<compile_context>
chip_gen: v7x
topology: tpu7x:2x2x1
jax: 0.10.0
libtpu: 0.0.40
codegen_flags: <defaults>
</compile_context>

<pallas_src>
import functools

import jax
import jax.numpy as jnp
from jax import lax
from jax.experimental import pallas as pl
from jax.experimental.pallas import tpu as pltpu


def _make_kernel(tap_offsets, mo, outp):
    """Build the fused 2-conv kernel. All arguments are static Python values."""
    ntap = len(tap_offsets)

    def kernel(x_ref, w_ref, b_ref, o_ref):
        # x_ref: (1, CB, L)            bf16 zero-padded, flattened input block
        # w_ref: (NCK, NTAP*OUTP, CB)  bf16 tap-stacked weights (fully VMEM-resident)
        # b_ref: (OUTP, 1)             f32 summed bias of the two convolutions
        # o_ref: (1, OUTP, MO)         f32 output, accumulated across channel blocks
        ck = pl.program_id(1)

        # One large MXU matmul per channel block: (NTAP*OUTP, CB) @ (CB, L) -> f32.
        y = jnp.dot(w_ref[ck], x_ref[0], preferred_element_type=jnp.float32)

        # Apply the 18 static tap shifts on the SMALL result and sum (cheap VPU work).
        off0 = tap_offsets[0]
        acc = y[0:outp, off0:off0 + mo]
        for t in range(1, ntap):
            off = tap_offsets[t]
            acc = acc + y[t * outp:(t + 1) * outp, off:off + mo]

        @pl.when(ck == 0)
        def _init():  # first channel block: initialize output with bias folded in
            o_ref[...] = (acc + b_ref[...])[None]

        @pl.when(ck > 0)
        def _accumulate():  # remaining channel blocks: accumulate in resident block
            o_ref[...] = o_ref[...] + acc[None]

    return kernel


@functools.partial(jax.jit, static_argnames=("dilations", "paddings", "cb"))
def classifier_module_forward(x, weights, biases, *, dilations, paddings, cb=1024):
    """Forward pass of Classifier_Module.

    x:       (N, C, H, W) float32
    weights: tuple of (num_classes, C, 3, 3) conv weights (one per branch)
    biases:  tuple of (num_classes,) conv biases
    dilations, paddings: static int tuples (one per branch)

    Faithful to the PyTorch forward: the `return` sits inside the loop, so only
    branches 0 and 1 contribute: out = conv0(x) + conv1(x).
    """
    assert len(weights) >= 2 and len(biases) >= 2, "module forward needs >= 2 branches"
    n, c, h, w = x.shape
    out_dim = weights[0].shape[0]

    d0, d1 = int(dilations[0]), int(dilations[1])
    p0, p1 = int(paddings[0]), int(paddings[1])
    # Same-size convolutions (padding == dilation), as used by DeepLabV2.
    # TODO(synk): general padding != dilation changes the output size; not supported.
    assert p0 == d0 and p1 == d1, "only padding == dilation branches are supported"

    dils = (d0, d1)
    dmax = max(dils)

    # ---- static geometry ---------------------------------------------------
    wp = w + 2 * dmax            # wide width: columns stay wide so taps are uniform
    pt = dmax + 1                # top/bottom row pad: keeps every tap offset in-bounds
    lh = h + 2 * pt
    l_flat = lh * wp             # flat input length (lane axis of the matmul)
    mo = h * wp                  # flat output length: only the h VALID rows
    base = pt * wp
    tap_offsets = []
    for dj in dils:              # conv 0, then conv 1
        for a in (-1, 0, 1):     # kernel row
            for b in (-1, 0, 1): # kernel col
                tap_offsets.append(base + a * dj * wp + b * dj)
    ntap = len(tap_offsets)      # 18

    # ---- pad channels / classes to tile-friendly multiples ------------------
    if c <= cb:
        cb_eff = -(-c // 8) * 8              # single channel block (sublane multiple)
    else:
        cb_eff = -(-cb // 128) * 128         # multi-block: lane-aligned channel tiles
    cp = -(-c // cb_eff) * cb_eff            # padded channel count
    n_ck = cp // cb_eff
    outp = -(-out_dim // 8) * 8              # padded class count

    # One pad covers: channel padding + spatial halo.  bf16, then flatten spatial.
    x_pad = jnp.pad(x.astype(jnp.bfloat16),
                    ((0, 0), (0, cp - c), (pt, pt), (dmax, dmax)))
    x_flat = x_pad.reshape(n, cp, l_flat)

    # Tap-stacked weights: rows [t*outp:(t+1)*outp] hold tap t's (OUTP, C) matrix,
    # ordered exactly like tap_offsets; pre-split by channel block and cast to bf16.
    wk = jnp.stack([weights[0], weights[1]], axis=0)                    # (2,O,C,3,3)
    wk = jnp.transpose(wk, (0, 3, 4, 1, 2)).reshape(ntap, out_dim, c)   # (18,O,C)
    wk = jnp.pad(wk, ((0, 0), (0, outp - out_dim), (0, cp - c)))        # (18,OUTP,CP)
    wk = wk.reshape(ntap * outp, n_ck, cb_eff)
    wk = jnp.transpose(wk, (1, 0, 2)).astype(jnp.bfloat16)              # (NCK,432,CB)

    # Both convolutions add their bias once each -> fold into a single f32 vector.
    b2 = jnp.pad((biases[0] + biases[1]).astype(jnp.float32),
                 (0, outp - out_dim)).reshape(outp, 1)

    kernel = _make_kernel(tuple(tap_offsets), mo, outp)

    flops = 2 * n * (ntap * outp) * cp * l_flat
    bytes_accessed = (2 * n * cp * l_flat          # x, bf16, read once
                      + 2 * ntap * outp * cp       # weights, bf16, resident (once)
                      + 4 * n * outp * mo          # f32 output writeback
                      + 4 * outp)                  # bias

    out_wide = pl.pallas_call(
        kernel,
        out_shape=jax.ShapeDtypeStruct((n, outp, mo), jnp.float32),
        grid_spec=pltpu.PrefetchScalarGridSpec(
            num_scalar_prefetch=0,
            grid=(n, n_ck),                              # channel reduction last
            in_specs=[
                pl.BlockSpec((1, cb_eff, l_flat), lambda b, k: (b, k, 0)),
                # Full weight resident in VMEM: constant block index -> DMA'd once.
                pl.BlockSpec((n_ck, ntap * outp, cb_eff), lambda b, k: (0, 0, 0)),
                pl.BlockSpec((outp, 1), lambda b, k: (0, 0)),
            ],
            out_specs=pl.BlockSpec((1, outp, mo), lambda b, k: (b, 0, 0)),
        ),
        compiler_params=pltpu.CompilerParams(
            dimension_semantics=("parallel", "arbitrary"),
            vmem_limit_bytes=32 * 1024 * 1024),
        cost_estimate=pl.CostEstimate(
            flops=flops, transcendentals=0, bytes_accessed=bytes_accessed),
    )(x_flat, wk, b2)

    # Drop the class padding and the wide columns (rows are already valid-only).
    out = out_wide.reshape(n, outp, h, wp)[:, :out_dim, :, dmax:dmax + w]
    return out


if __name__ == "__main__":
    # Small-but-faithful shapes: the module hardcodes 2048 input channels and
    # DeepLabV2-VOC uses num_classes=21.  Small spatial map, small dilations.
    N, C, H, W = 2, 2048, 16, 16
    NUM_CLASSES = 21
    dilation_series = (2, 4, 6, 8)
    padding_series = (2, 4, 6, 8)

    key = jax.random.PRNGKey(0)
    keys = jax.random.split(key, 1 + 2 * len(dilation_series))
    x = jax.random.normal(keys[0], (N, C, H, W), dtype=jnp.float32)

    weights, biases = [], []
    bias_bound = 1.0 / (C * 9) ** 0.5            # default Conv2d bias init
    for i in range(len(dilation_series)):
        kw_, kb_ = keys[1 + 2 * i], keys[2 + 2 * i]
        # Module init: m.weight.data.normal_(0, 0.01); bias keeps default init.
        weights.append(0.01 * jax.random.normal(
            kw_, (NUM_CLASSES, C, 3, 3), dtype=jnp.float32))
        biases.append(jax.random.uniform(
            kb_, (NUM_CLASSES,), minval=-bias_bound, maxval=bias_bound,
            dtype=jnp.float32))

    out = classifier_module_forward(
        x, tuple(weights), tuple(biases),
        dilations=dilation_series, paddings=padding_series)
    out = jax.block_until_ready(out)

    # Reference: exact PyTorch forward semantics (early return -> conv0 + conv1),
    # computed with the SAME bf16 input/weight quantization and f32 accumulation
    # so the check isolates the kernel's indexing / reduction correctness.
    def conv_ref(xx, wgt, bia, dil, pad):
        y = lax.conv_general_dilated(
            xx.astype(jnp.bfloat16), wgt.astype(jnp.bfloat16),
            window_strides=(1, 1),
            padding=((pad, pad), (pad, pad)),
            rhs_dilation=(dil, dil),
            dimension_numbers=("NCHW", "OIHW", "NCHW"),
            preferred_element_type=jnp.float32)
        return y + bia[None, :, None, None]

    ref = (conv_ref(x, weights[0], biases[0], dilation_series[0], padding_series[0])
           + conv_ref(x, weights[1], biases[1], dilation_series[1], padding_series[1]))

    assert out.shape == (N, NUM_CLASSES, H, W), out.shape
    max_err = float(jnp.max(jnp.abs(out - ref)))
    assert jnp.allclose(out, ref, atol=1e-2, rtol=1e-2), f"max abs err {max_err}"

    print("KERNEL_OK")
</pallas_src>

<mosaic_0001>
module attributes {stable_mosaic.version = 11 : i64} {
  func.func @kernel(%arg0: i32, %arg1: i32, %arg2: memref<1x1024x624xbf16, #tpu.memory_space<vmem>>, %arg3: memref<2x432x1024xbf16, #tpu.memory_space<vmem>>, %arg4: memref<24x1xf32, #tpu.memory_space<vmem>>, %arg5: memref<1x24x384xf32, #tpu.memory_space<vmem>>) attributes {dimension_semantics = [#tpu.dimension_semantics<parallel>, #tpu.dimension_semantics<arbitrary>], iteration_bounds = array<i64: 2, 2>, scalar_prefetch = 0 : i64, scratch_operands = 0 : i64, tpu.core_type = #tpu.core_type<tc>, window_params = [{transform_indices = @transform_0, window_bounds = array<i64: 1, 1024, 624>}, {pipeline_mode = #tpu.pipeline_mode<synchronous>, transform_indices = @transform_1, window_bounds = array<i64: 2, 432, 1024>}, {pipeline_mode = #tpu.pipeline_mode<synchronous>, transform_indices = @transform_2, window_bounds = array<i64: 24, 1>}, {transform_indices = @transform_3, window_bounds = array<i64: 1, 24, 384>}]} {
    %0 = arith.index_cast %arg1 : i32 to index
    %c0 = arith.constant 0 : index
    %c0_0 = arith.constant 0 : index
    %1 = vector.load %arg3[%0, %c0, %c0_0] : memref<2x432x1024xbf16, #tpu.memory_space<vmem>>, vector<1x432x1024xbf16>
    %2 = vector.shape_cast %1 : vector<1x432x1024xbf16> to vector<432x1024xbf16>
    %c0_1 = arith.constant 0 : index
    %c0_2 = arith.constant 0 : index
    %c0_3 = arith.constant 0 : index
    %3 = vector.load %arg2[%c0_1, %c0_2, %c0_3] : memref<1x1024x624xbf16, #tpu.memory_space<vmem>>, vector<1x1024x624xbf16>
    %4 = vector.shape_cast %3 : vector<1x1024x624xbf16> to vector<1024x624xbf16>
    %cst = arith.constant dense<0.000000e+00> : vector<432x624xf32>
    %5 = tpu.matmul %2, %4, %cst {dimension_numbers = #tpu.dot_dimension_numbers<[1], [0], [0], [1], [0, 0, 1, 1], [], []>} : vector<432x1024xbf16>, vector<1024x624xbf16>, vector<432x624xf32> -> vector<432x624xf32>
    %6 = vector.extract_strided_slice %5 {offsets = [0, 70], sizes = [24, 384], strides = [1, 1]} : vector<432x624xf32> to vector<24x384xf32>
    %7 = vector.extract_strided_slice %5 {offsets = [24, 72], sizes = [24, 384], strides = [1, 1]} : vector<432x624xf32> to vector<24x384xf32>
    %8 = arith.addf %6, %7 : vector<24x384xf32>
    %9 = vector.extract_strided_slice %5 {offsets = [48, 74], sizes = [24, 384], strides = [1, 1]} : vector<432x624xf32> to vector<24x384xf32>
    %10 = arith.addf %8, %9 : vector<24x384xf32>
    %11 = vector.extract_strided_slice %5 {offsets = [72, 118], sizes = [24, 384], strides = [1, 1]} : vector<432x624xf32> to vector<24x384xf32>
    %12 = arith.addf %10, %11 : vector<24x384xf32>
    %13 = vector.extract_strided_slice %5 {offsets = [96, 120], sizes = [24, 384], strides = [1, 1]} : vector<432x624xf32> to vector<24x384xf32>
    %14 = arith.addf %12, %13 : vector<24x384xf32>
    %15 = vector.extract_strided_slice %5 {offsets = [120, 122], sizes = [24, 384], strides = [1, 1]} : vector<432x624xf32> to vector<24x384xf32>
    %16 = arith.addf %14, %15 : vector<24x384xf32>
    %17 = vector.extract_strided_slice %5 {offsets = [144, 166], sizes = [24, 384], strides = [1, 1]} : vector<432x624xf32> to vector<24x384xf32>
    %18 = arith.addf %16, %17 : vector<24x384xf32>
    %19 = vector.extract_strided_slice %5 {offsets = [168, 168], sizes = [24, 384], strides = [1, 1]} : vector<432x624xf32> to vector<24x384xf32>
    %20 = arith.addf %18, %19 : vector<24x384xf32>
    %21 = vector.extract_strided_slice %5 {offsets = [192, 170], sizes = [24, 384], strides = [1, 1]} : vector<432x624xf32> to vector<24x384xf32>
    %22 = arith.addf %20, %21 : vector<24x384xf32>
    %23 = vector.extract_strided_slice %5 {offsets = [216, 20], sizes = [24, 384], strides = [1, 1]} : vector<432x624xf32> to vector<24x384xf32>
    %24 = arith.addf %22, %23 : vector<24x384xf32>
    %25 = vector.extract_strided_slice %5 {offsets = [240, 24], sizes = [24, 384], strides = [1, 1]} : vector<432x624xf32> to vector<24x384xf32>
    %26 = arith.addf %24, %25 : vector<24x384xf32>
    %27 = vector.extract_strided_slice %5 {offsets = [264, 28], sizes = [24, 384], strides = [1, 1]} : vector<432x624xf32> to vector<24x384xf32>
    %28 = arith.addf %26, %27 : vector<24x384xf32>
    %29 = vector.extract_strided_slice %5 {offsets = [288, 116], sizes = [24, 384], strides = [1, 1]} : vector<432x624xf32> to vector<24x384xf32>
    %30 = arith.addf %28, %29 : vector<24x384xf32>
    %31 = vector.extract_strided_slice %5 {offsets = [312, 120], sizes = [24, 384], strides = [1, 1]} : vector<432x624xf32> to vector<24x384xf32>
    %32 = arith.addf %30, %31 : vector<24x384xf32>
    %33 = vector.extract_strided_slice %5 {offsets = [336, 124], sizes = [24, 384], strides = [1, 1]} : vector<432x624xf32> to vector<24x384xf32>
    %34 = arith.addf %32, %33 : vector<24x384xf32>
    %35 = vector.extract_strided_slice %5 {offsets = [360, 212], sizes = [24, 384], strides = [1, 1]} : vector<432x624xf32> to vector<24x384xf32>
    %36 = arith.addf %34, %35 : vector<24x384xf32>
    %37 = vector.extract_strided_slice %5 {offsets = [384, 216], sizes = [24, 384], strides = [1, 1]} : vector<432x624xf32> to vector<24x384xf32>
    %38 = arith.addf %36, %37 : vector<24x384xf32>
    %39 = vector.extract_strided_slice %5 {offsets = [408, 220], sizes = [24, 384], strides = [1, 1]} : vector<432x624xf32> to vector<24x384xf32>
    %40 = arith.addf %38, %39 : vector<24x384xf32>
    %c0_i32 = arith.constant 0 : i32
    %41 = arith.cmpi eq, %arg1, %c0_i32 : i32
    %42 = arith.extui %41 : i1 to i32
    %c0_i32_4 = arith.constant 0 : i32
    %43 = arith.cmpi ne, %42, %c0_i32_4 : i32
    scf.if %43 {
      %c0_7 = arith.constant 0 : index
      %c0_8 = arith.constant 0 : index
      %47 = vector.load %arg4[%c0_7, %c0_8] : memref<24x1xf32, #tpu.memory_space<vmem>>, vector<24x1xf32>
      %48 = vector.broadcast %47 : vector<24x1xf32> to vector<24x384xf32>
      %49 = arith.addf %40, %48 : vector<24x384xf32>
      %50 = vector.shape_cast %49 : vector<24x384xf32> to vector<1x24x384xf32>
      %c0_9 = arith.constant 0 : index
      %c0_10 = arith.constant 0 : index
      %c0_11 = arith.constant 0 : index
      %51 = vector.load %arg5[%c0_9, %c0_10, %c0_11] : memref<1x24x384xf32, #tpu.memory_space<vmem>>, vector<1x24x384xf32>
      tpu.vector_store %arg5[%c0_9, %c0_10, %c0_11], %50 {strides = array<i32>} : memref<1x24x384xf32, #tpu.memory_space<vmem>>, vector<1x24x384xf32>,
    } else {
    }
    %c0_i32_5 = arith.constant 0 : i32
    %44 = arith.cmpi sgt, %arg1, %c0_i32_5 : i32
    %45 = arith.extui %44 : i1 to i32
    %c0_i32_6 = arith.constant 0 : i32
    %46 = arith.cmpi ne, %45, %c0_i32_6 : i32
    scf.if %46 {
      %c0_7 = arith.constant 0 : index
      %c0_8 = arith.constant 0 : index
      %c0_9 = arith.constant 0 : index
      %47 = vector.load %arg5[%c0_7, %c0_8, %c0_9] : memref<1x24x384xf32, #tpu.memory_space<vmem>>, vector<1x24x384xf32>
      %48 = vector.shape_cast %40 : vector<24x384xf32> to vector<1x24x384xf32>
      %49 = arith.addf %47, %48 : vector<1x24x384xf32>
      %c0_10 = arith.constant 0 : index
      %c0_11 = arith.constant 0 : index
      %c0_12 = arith.constant 0 : index
      %50 = vector.load %arg5[%c0_10, %c0_11, %c0_12] : memref<1x24x384xf32, #tpu.memory_space<vmem>>, vector<1x24x384xf32>
      tpu.vector_store %arg5[%c0_10, %c0_11, %c0_12], %49 {strides = array<i32>} : memref<1x24x384xf32, #tpu.memory_space<vmem>>, vector<1x24x384xf32>,
    } else {
    }
    return
  }
  func.func @transform_0(%arg0: i32, %arg1: i32) -> (i32, i32, i32) {
    %c0_i32 = arith.constant 0 : i32
    %c0_i32_0 = arith.constant 0 : i32
    return %arg0, %arg1, %c0_i32 : i32, i32, i32
  }
  func.func @transform_1(%arg0: i32, %arg1: i32) -> (i32, i32, i32) {
    %c0_i32 = arith.constant 0 : i32
    %c0_i32_0 = arith.constant 0 : i32
    %c0_i32_1 = arith.constant 0 : i32
    %c0_i32_2 = arith.constant 0 : i32
    return %c0_i32, %c0_i32_0, %c0_i32_1 : i32, i32, i32
  }
  func.func @transform_2(%arg0: i32, %arg1: i32) -> (i32, i32) {
    %c0_i32 = arith.constant 0 : i32
    %c0_i32_0 = arith.constant 0 : i32
    %c0_i32_1 = arith.constant 0 : i32
    return %c0_i32, %c0_i32_0 : i32, i32
  }
  func.func @transform_3(%arg0: i32, %arg1: i32) -> (i32, i32, i32) {
    %c0_i32 = arith.constant 0 : i32
    %c0_i32_0 = arith.constant 0 : i32
    %c0_i32_1 = arith.constant 0 : i32
    return %arg0, %c0_i32, %c0_i32_0 : i32, i32, i32
  }
}

</mosaic_0001>

<bundles_post_ra>
// kernel: classifier_module_forward.1
= control target key start
LH: loop header
LB: loop body
LE: loop exit
PB: predicated region body
PF: predicated region fallthrough
CT: control target
= control target key end

     0   :  { %s10097_s12 = smov 0   ;;  %s10099_s13 = smov 0   ;;  %s12992_s0 = inlined_call_operand.vmem [shape: bf16[2,2048,624], index: 0, kind: input, shape index: {}]   ;;  %s12993_s1 = inlined_call_operand.vmem [shape: bf16[2,432,1024], index: 1, kind: input, shape index: {}]   ;;  %s12994_s2 = inlined_call_operand.vmem [shape: f32[24,1], index: 2, kind: input, shape index: {}]   ;;  %s12995_s3 = inlined_call_operand.vmem [shape: f32[2,24,384], index: 3, kind: output, shape index: {}]  }
   0x1   :  { %s10101_s14 = smov 0   ;;  %s10103_s15 = smov 0  }
   0x2   :  { %s10105_s16 = smov 0  }
   0x3 LB: > { %s22_s17 = sadd.s32 1, %s10047_s14  ;;  %s25_s18 = sadd.s32 1, %s10051_s15  ;;  %s10055_s16 = sphi %s10105_s16, %s13_s16   ;;  %s10051_s15 = sphi %s10103_s15, %s13852_s15   ;;  %s10047_s14 = sphi %s10101_s14, %s13851_s14   ;;  %s10043_s13 = sphi %s10099_s13, %s13850_s13   ;;  %s10039_s12 = sphi %s10097_s12, %s13849_s12  }
   0x4   : > { %p23_p0 = scmp.ge.s32.totalorder %s22_s17, 2  ;;  %p8208_p1 = scmp.ge.s32.totalorder %s10055_s16, 1 }
   0x5   : > { %p157_p2 = scmp.lt.s32.totalorder %s10055_s16, 5 }
   0x6   : > { %s13854_s17 = smov (%p23_p0, %s22_s17), 0  ;;  %s13856_s18 = smov (!%p23_p0, %s25_s18), %s10051_s15 }
   0x7   : > { %p158_p3 = pnand %p8208_p1, %p157_p2  ;;  %p27_p4 = scmp.ge.s32.totalorder %s13856_s18, 2 }
   0x9   : > { %s13858_s18 = smov (%p27_p4, %s13856_s18), 0  ;;  %161 = sbr.rel (%p158_p3) target bundleno = 2177 (0x881), region = 32 }
  0x10   : > { %s8209_s19 = sshll.u32 %s10039_s12, 7  ;;  %p187_p5 = scmp.lt.s32.totalorder %s10043_s13, 1  ;;  %vm6790_vm0 = vcmask 1031168   ;;  %vm6860_vm1 = vcmask 1014784   ;;  %vm6930_vm2 = vcmask 654336   ;;  %vm7000_vm3 = vcmask 637952  }
  0x11   : > { %p189_p6 = scmp.lt.s32.totalorder %s8209_s19, 255  ;;  %s8753_s20 = smul.u32 1728, %s10039_s12  ;;  %vm7070_vm4 = vcmask 621568   ;;  %vm7140_vm5 = vcmask 261120   ;;  %vm7210_vm6 = vcmask 244736   ;;  %vm7280_vm7 = vcmask 228352  }
  0x12   : > { %s13860_s13 = smov (!%p187_p5, %s10043_s13), 1  ;;  %s10058_s8 = smov 126   ;;  %vm7350_vm8 = vcmask 408576   ;;  %vm7420_vm9 = vcmask 375808   ;;  %vm7490_vm10 = vcmask 343040   ;;  %vm7560_vm11 = vcmask 670720  }
  0x13   : > { %s13862_s19 = smov (!%p189_p6, %s8209_s19), 255  ;;  %s9505_s21 = smul.u32 1280, %s13860_s13  ;;  %vm7699_vm12 = vcmask 605184   ;;  %vm7769_vm13 = vcmask 932864   ;;  %vm7839_vm14 = vcmask 900096   ;;  %vm7909_vm15 = vcmask 867328  }
  0x14   : > { %s10134_s24 = scalar_lea.vmem %s12993_s1, %s8753_s20  ;;  %s9504_s25 = smul.u32 5, %s13862_s19 }
  0x15   : > { %v206_v0 = vld [vmem:[%s10134_s24] sm:$0xff]  ;;  %v208_v2 = vld [vmem:[%s10134_s24 + $0x10] sm:$0xff]  ;;  %s9506_s26 = smul.u32 72, %s13860_s13  ;;  %s10059_s9 = smov 124  }
  0x16   : > { %v210_v1 = vld [vmem:[%s10134_s24 + $0x20] sm:$0xff]  ;;  %v212_v4 = vld [vmem:[%s10134_s24 + $0x30] sm:$0xff]  ;;  %s193_s27 = sadd.s32 %s9505_s21, %s9504_s25  ;;  %s10060_s10 = smov 80  }
  0x17   : > { %v10139_v3 = vcombine.high %v206_v0, %v210_v1  ;;  %v10142_v5 = vcombine.low %v206_v0, %v210_v1  ;;  %v10144_v6 = vcombine.high %v208_v2, %v212_v4  ;;  %v10146_v7 = vcombine.low %v208_v2, %v212_v4  ;;  %s8210_s28 = sshll.u32 %s193_s27, 2  ;;  %s10151_s4 = scalar_lea.vmem %s12995_s3, %s9506_s26 }
  0x18   : > { %s10157_s7 = scalar_lea.vmem %s12992_s0, %s8210_s28  ;;  %s10061_s11 = smov 78  }
  0x19   : > { %13368 = vst [vmem:[#allocation2_spill] sm:$0xff] %v10144_v6  ;;  %13369 = vst [vmem:[#allocation3_spill] sm:$0xff] %v10146_v7  ;;  %3582 = vmatprep.mubr.bf16.mxu1 %v10139_v3  ;;  %4152 = vmatprep.mubr.bf16.mxu0 %v10144_v6  ;;  %v9567_v8 = vld [vmem:[%s10157_s7 + $0x4] ss:$20 sps:$4 sm:$0xff]   ;;  %v9571_v10 = vld [vmem:[%s10157_s7] ss:$20 sps:$4 sm:$0xff]  }
  0x1a   : > { %v9569_v9 = vld [vmem:[%s10157_s7 + $0x504] ss:$20 sps:$4 sm:$0xff]   ;;  %3550 = vmatprep.subr.bf16.mxu1 %v9567_v8  ;;  %v9572_v11 = vld [vmem:[%s10157_s7 + $0x500] ss:$20 sps:$4 sm:$0xff]   ;;  %v9577_v14 = vld [vmem:[%s10157_s7 + $0x28] ss:$20 sps:$4 sm:$0xff]  }
  0x1b   : > { %4120 = vmatprep.subr.bf16.mxu0 %v9569_v9  ;;  %v9573_v12 = vld [vmem:[%s10157_s7 + $0x2c] ss:$20 sps:$4 sm:$0xff]   ;;  %3551 = vmatpush1.bf16.msra.mxu1 %v9571_v10  ;;  %v9578_v15 = vld [vmem:[%s10157_s7 + $0x528] ss:$20 sps:$4 sm:$0xff]   ;;  %v9583_v18 = vld [vmem:[%s10157_s7 + $0x50] ss:$20 sps:$4 sm:$0xff]  }
  0x1c   : > { %4121 = vmatpush1.bf16.msra.mxu0 %v9572_v11  ;;  %v9575_v13 = vld [vmem:[%s10157_s7 + $0x52c] ss:$20 sps:$4 sm:$0xff]   ;;  %3552 = vmatprep.subr.bf16.mxu1 %v9573_v12  ;;  %v9579_v16 = vld [vmem:[%s10157_s7 + $0x54] ss:$20 sps:$4 sm:$0xff]   ;;  %v9584_v19 = vld [vmem:[%s10157_s7 + $0x550] ss:$20 sps:$4 sm:$0xff]  }
  0x1d   : > { %4122 = vmatprep.subr.bf16.mxu0 %v9575_v13  ;;  %v9581_v17 = vld [vmem:[%s10157_s7 + $0x554] ss:$20 sps:$4 sm:$0xff]   ;;  %v9585_v20 = vld [vmem:[%s10157_s7 + $0x7c] ss:$20 sps:$4 sm:$0xff]   ;;  %v9589_v22 = vld [vmem:[%s10157_s7 + $0x78] ss:$20 sps:$4 sm:$0xff]  }
  0x1e   : > { %v9587_v21 = vld [vmem:[%s10157_s7 + $0x57c] ss:$20 sps:$4 sm:$0xff]   ;;  %v9590_v23 = vld [vmem:[%s10157_s7 + $0x578] ss:$20 sps:$4 sm:$0xff]   ;;  %v9595_v26 = vld [vmem:[%s10157_s7 + $0xa0] ss:$20 sps:$4 sm:$0xff]  }
  0x1f   : > { %3553 = vmatpush1.bf16.msra.mxu1 %v9577_v14  ;;  %v9591_v24 = vld [vmem:[%s10157_s7 + $0xa4] ss:$20 sps:$4 sm:$0xff]   ;;  %v9596_v27 = vld [vmem:[%s10157_s7 + $0x5a0] ss:$20 sps:$4 sm:$0xff]   ;;  %v9601_v30 = vld [vmem:[%s10157_s7 + $0xc8] ss:$20 sps:$4 sm:$0xff]  }
  0x20   : > { %4123 = vmatpush1.bf16.msra.mxu0 %v9578_v15  ;;  %3554 = vmatprep.subr.bf16.mxu1 %v9579_v16  ;;  %v9593_v25 = vld [vmem:[%s10157_s7 + $0x5a4] ss:$20 sps:$4 sm:$0xff]   ;;  %v9597_v28 = vld [vmem:[%s10157_s7 + $0xcc] ss:$20 sps:$4 sm:$0xff]   ;;  %v9602_v31 = vld [vmem:[%s10157_s7 + $0x5c8] ss:$20 sps:$4 sm:$0xff]  }
  0x21   : > { %4124 = vmatprep.subr.bf16.mxu0 %v9581_v17  ;;  %v9599_v29 = vld [vmem:[%s10157_s7 + $0x5cc] ss:$20 sps:$4 sm:$0xff]   ;;  %v9603_v32 = vld [vmem:[%s10157_s7 + $0xf4] ss:$20 sps:$4 sm:$0xff]   ;;  %v9607_v34 = vld [vmem:[%s10157_s7 + $0xf0] ss:$20 sps:$4 sm:$0xff]  }
  0x22   : > { %v9605_v33 = vld [vmem:[%s10157_s7 + $0x5f4] ss:$20 sps:$4 sm:$0xff]   ;;  %v9608_v35 = vld [vmem:[%s10157_s7 + $0x5f0] ss:$20 sps:$4 sm:$0xff]   ;;  %v9613_v38 = vld [vmem:[%s10157_s7 + $0x118] ss:$20 sps:$4 sm:$0xff]  }
  0x23   : > { %3555 = vmatpush1.bf16.msra.mxu1 %v9583_v18  ;;  %v9609_v36 = vld [vmem:[%s10157_s7 + $0x11c] ss:$20 sps:$4 sm:$0xff]   ;;  %v9614_v39 = vld [vmem:[%s10157_s7 + $0x618] ss:$20 sps:$4 sm:$0xff]   ;;  %v9619_v42 = vld [vmem:[%s10157_s7 + $0x140] ss:$20 sps:$4 sm:$0xff]  }
  0x24   : > { %4125 = vmatpush1.bf16.msra.mxu0 %v9584_v19  ;;  %3556 = vmatprep.subr.bf16.mxu1 %v9585_v20  ;;  %v9611_v37 = vld [vmem:[%s10157_s7 + $0x61c] ss:$20 sps:$4 sm:$0xff]   ;;  %v9615_v40 = vld [vmem:[%s10157_s7 + $0x144] ss:$20 sps:$4 sm:$0xff]   ;;  %v9620_v43 = vld [vmem:[%s10157_s7 + $0x640] ss:$20 sps:$4 sm:$0xff]  }
  0x25   : > { %4126 = vmatprep.subr.bf16.mxu0 %v9587_v21  ;;  %v9617_v41 = vld [vmem:[%s10157_s7 + $0x644] ss:$20 sps:$4 sm:$0xff]   ;;  %v9621_v44 = vld [vmem:[%s10157_s7 + $0x16c] ss:$20 sps:$4 sm:$0xff]   ;;  %v9625_v46 = vld [vmem:[%s10157_s7 + $0x168] ss:$20 sps:$4 sm:$0xff]  }
  0x26   : > { %v9623_v45 = vld [vmem:[%s10157_s7 + $0x66c] ss:$20 sps:$4 sm:$0xff]   ;;  %v9626_v47 = vld [vmem:[%s10157_s7 + $0x668] ss:$20 sps:$4 sm:$0xff]   ;;  %v9631_v50 = vld [vmem:[%s10157_s7 + $0x190] ss:$20 sps:$4 sm:$0xff]  }
  0x27   : > { %3557 = vmatpush1.bf16.msra.mxu1 %v9589_v22  ;;  %v9627_v48 = vld [vmem:[%s10157_s7 + $0x194] ss:$20 sps:$4 sm:$0xff]   ;;  %v9632_v51 = vld [vmem:[%s10157_s7 + $0x690] ss:$20 sps:$4 sm:$0xff]   ;;  %v9637_v54 = vld [vmem:[%s10157_s7 + $0x1b8] ss:$20 sps:$4 sm:$0xff]  }
  0x28   : > { %4127 = vmatpush1.bf16.msra.mxu0 %v9590_v23  ;;  %3558 = vmatprep.subr.bf16.mxu1 %v9591_v24  ;;  %v9629_v49 = vld [vmem:[%s10157_s7 + $0x694] ss:$20 sps:$4 sm:$0xff]   ;;  %v9633_v52 = vld [vmem:[%s10157_s7 + $0x1bc] ss:$20 sps:$4 sm:$0xff]   ;;  %v9638_v55 = vld [vmem:[%s10157_s7 + $0x6b8] ss:$20 sps:$4 sm:$0xff]  }
  0x29   : > { %4128 = vmatprep.subr.bf16.mxu0 %v9593_v25  ;;  %v9635_v53 = vld [vmem:[%s10157_s7 + $0x6bc] ss:$20 sps:$4 sm:$0xff]   ;;  %v9639_v56 = vld [vmem:[%s10157_s7 + $0x1e4] ss:$20 sps:$4 sm:$0xff]   ;;  %v9643_v58 = vld [vmem:[%s10157_s7 + $0x1e0] ss:$20 sps:$4 sm:$0xff]  }
  0x2a   : > { %v9641_v57 = vld [vmem:[%s10157_s7 + $0x6e4] ss:$20 sps:$4 sm:$0xff]   ;;  %v9644_v59 = vld [vmem:[%s10157_s7 + $0x6e0] ss:$20 sps:$4 sm:$0xff]   ;;  %v9649_v62 = vld [vmem:[%s10157_s7 + $0x208] ss:$20 sps:$4 sm:$0xff]  }
  0x2b   : > { %3559 = vmatpush1.bf16.msra.mxu1 %v9595_v26  ;;  %v9645_v60 = vld [vmem:[%s10157_s7 + $0x20c] ss:$20 sps:$4 sm:$0xff]   ;;  %v9650_v63 = vld [vmem:[%s10157_s7 + $0x708] ss:$20 sps:$4 sm:$0xff]   ;;  %v9655_v2 = vld [vmem:[%s10157_s7 + $0x230] ss:$20 sps:$4 sm:$0xff]  }
  0x2c   : > { %4129 = vmatpush1.bf16.msra.mxu0 %v9596_v27  ;;  %3560 = vmatprep.subr.bf16.mxu1 %v9597_v28  ;;  %v9647_v61 = vld [vmem:[%s10157_s7 + $0x70c] ss:$20 sps:$4 sm:$0xff]   ;;  %v9651_v0 = vld [vmem:[%s10157_s7 + $0x234] ss:$20 sps:$4 sm:$0xff]   ;;  %v9656_v4 = vld [vmem:[%s10157_s7 + $0x730] ss:$20 sps:$4 sm:$0xff]  }
  0x2d   : > { %4130 = vmatprep.subr.bf16.mxu0 %v9599_v29  ;;  %v9653_v1 = vld [vmem:[%s10157_s7 + $0x734] ss:$20 sps:$4 sm:$0xff]   ;;  %v9657_v8 = vld [vmem:[%s10157_s7 + $0x25c] ss:$20 sps:$4 sm:$0xff]   ;;  %v9661_v10 = vld [vmem:[%s10157_s7 + $0x258] ss:$20 sps:$4 sm:$0xff]  }
  0x2e   : > { %v9659_v9 = vld [vmem:[%s10157_s7 + $0x75c] ss:$20 sps:$4 sm:$0xff]   ;;  %v214_v11 = vld [vmem:[%s10134_s24 + $0x40] sm:$0xff]  ;;  %v9662_v12 = vld [vmem:[%s10157_s7 + $0x758] ss:$20 sps:$4 sm:$0xff]   ;;  %s10062_s13 = smov 76  }
  0x2f   : > { %3561 = vmatpush1.bf16.msra.mxu1 %v9601_v30  ;;  %v9665_v13 = vld [vmem:[%s10157_s7 + $0x284] ss:$20 sps:$4 sm:$0xff]   ;;  %v216_v16 = vld [vmem:[%s10134_s24 + $0x50] sm:$0xff]  ;;  %v9671_v22 = vld [vmem:[%s10157_s7 + $0x2ac] ss:$20 sps:$4 sm:$0xff]   ;;  %s10063_s19 = smov 32  }
  0x30   : > { %4131 = vmatpush1.bf16.msra.mxu0 %v9602_v31  ;;  %3562 = vmatprep.subr.bf16.mxu1 %v9603_v32  ;;  %v9668_v14 = vld [vmem:[%s10157_s7 + $0x784] ss:$20 sps:$4 sm:$0xff]   ;;  %v220_v17 = vld [vmem:[%s10134_s24 + $0x70] sm:$0xff]  ;;  %v9674_v23 = vld [vmem:[%s10157_s7 + $0x7ac] ss:$20 sps:$4 sm:$0xff]   ;;  %s10064_s20 = smov 30  }
  0x31   : > { %4132 = vmatprep.subr.bf16.mxu0 %v9605_v33  ;;  %v218_v15 = vld [vmem:[%s10134_s24 + $0x60] sm:$0xff]  ;;  %v10234_v21 = vcombine.high %v216_v16, %v220_v17  ;;  %v224_v26 = vld [vmem:[%s10134_s24 + $0x90] sm:$0xff]  ;;  %v9669_v27 = vld [vmem:[%s10157_s7 + $0x2a8] ss:$20 sps:$4 sm:$0xff]   ;;  %v10252_v33 = vcombine.low %v216_v16, %v220_v17  ;;  %s10065_s21 = smov 28   ;;  %s10066_s22 = smov 50  }
  0x32   : > { %v9663_v18 = vld [vmem:[%s10157_s7 + $0x280] ss:$20 sps:$4 sm:$0xff]   ;;  %v10231_v19 = vcombine.high %v214_v11, %v218_v15  ;;  %v9672_v29 = vld [vmem:[%s10157_s7 + $0x7a8] ss:$20 sps:$4 sm:$0xff]   ;;  %v10250_v32 = vcombine.low %v214_v11, %v218_v15  ;;  %v9705_v16 = vld [vmem:[%s10157_s7 + $0x398] ss:$20 sps:$4 sm:$0xff]  }
  0x33   : > { %3563 = vmatpush1.bf16.msra.mxu1 %v9607_v34  ;;  %v9666_v20 = vld [vmem:[%s10157_s7 + $0x780] ss:$20 sps:$4 sm:$0xff]   ;;  %13370 = vst [vmem:[#allocation4_spill] sm:$0xff] %v10234_v21  ;;  %13371 = vst [vmem:[#allocation5_spill] sm:$0xff] %v10252_v33  ;;  %v9710_v11 = vld [vmem:[%s10157_s7 + $0x89c] ss:$20 sps:$4 sm:$0xff]  }
  0x34   : > { %4133 = vmatpush1.bf16.msra.mxu0 %v9608_v35  ;;  %3564 = vmatprep.subr.bf16.mxu1 %v9609_v36  ;;  %v222_v24 = vld [vmem:[%s10134_s24 + $0x80] sm:$0xff]  ;;  %v228_v28 = vld [vmem:[%s10134_s24 + $0xb0] sm:$0xff]  ;;  %v9708_v17 = vld [vmem:[%s10157_s7 + $0x898] ss:$20 sps:$4 sm:$0xff]   ;;  %s10067_s23 = smov 46   ;;  %s10069_s25 = smov 82  }
  0x35   : > { %4134 = vmatprep.subr.bf16.mxu0 %v9611_v37  ;;  %v226_v25 = vld [vmem:[%s10134_s24 + $0xa0] sm:$0xff]  ;;  %v9677_v30 = vld [vmem:[%s10157_s7 + $0x2d4] ss:$20 sps:$4 sm:$0xff]   ;;  %v10256_v35 = vcombine.high %v224_v26, %v228_v28  ;;  %s10070_s26 = smov 74   ;;  %s10071_s27 = smov 114  }
  0x36   : > { %v9680_v31 = vld [vmem:[%s10157_s7 + $0x7d4] ss:$20 sps:$4 sm:$0xff]   ;;  %v10254_v34 = vcombine.high %v222_v24, %v226_v25  ;;  %v9675_v36 = vld [vmem:[%s10157_s7 + $0x2d0] ss:$20 sps:$4 sm:$0xff]   ;;  %s10072_s28 = smov 110   ;;  %s10073_s29 = smov 106  }
  0x37   : > { %3565 = vmatpush1.bf16.msra.mxu1 %v9613_v38  ;;  %13372 = vst [vmem:[#allocation6_spill] sm:$0xff] %v10256_v35  ;;  %v9678_v37 = vld [vmem:[%s10157_s7 + $0x7d0] ss:$20 sps:$4 sm:$0xff]   ;;  %p8749_p7 = scmp.ne.s32.totalorder %s10039_s12, 0 }
  0x38   : > { %4135 = vmatpush1.bf16.msra.mxu0 %v9614_v39  ;;  %3566 = vmatprep.subr.bf16.mxu1 %v9615_v40  ;;  %v9683_v38 = vld [vmem:[%s10157_s7 + $0x2fc] ss:$20 sps:$4 sm:$0xff]   ;;  %v230_v40 = vld [vmem:[%s10134_s24 + $0xc0] sm:$0xff] }
  0x39   : > { %4136 = vmatprep.subr.bf16.mxu0 %v9617_v41  ;;  %v9686_v39 = vld [vmem:[%s10157_s7 + $0x7fc] ss:$20 sps:$4 sm:$0xff]   ;;  %v234_v41 = vld [vmem:[%s10134_s24 + $0xe0] sm:$0xff] }
  0x3a   : > { %v252_v15 = vld [vmem:[%s10134_s24 + $0x170] sm:$0xff] }
  0x3b   : > { %3567 = vmatpush1.bf16.msra.mxu1 %v9619_v42  ;;  %v232_v42 = vld [vmem:[%s10134_s24 + $0xd0] sm:$0xff] }
  0x3c   : > { %4137 = vmatpush1.bf16.msra.mxu0 %v9620_v43  ;;  %3568 = vmatprep.subr.bf16.mxu1 %v9621_v44  ;;  %v236_v43 = vld [vmem:[%s10134_s24 + $0xf0] sm:$0xff]  ;;  %v9681_v44 = vld [vmem:[%s10157_s7 + $0x2f8] ss:$20 sps:$4 sm:$0xff]  }
  0x3d   : > { %4138 = vmatprep.subr.bf16.mxu0 %v9623_v45  ;;  %v9684_v45 = vld [vmem:[%s10157_s7 + $0x7f8] ss:$20 sps:$4 sm:$0xff]  }
  0x3f   : > { %3569 = vmatpush1.bf16.msra.mxu1 %v9625_v46  ;;  %v9689_v46 = vld [vmem:[%s10157_s7 + $0x324] ss:$20 sps:$4 sm:$0xff]  }
  0x40   : > { %4139 = vmatpush1.bf16.msra.mxu0 %v9626_v47  ;;  %3570 = vmatprep.subr.bf16.mxu1 %v9627_v48  ;;  %v9692_v47 = vld [vmem:[%s10157_s7 + $0x824] ss:$20 sps:$4 sm:$0xff]   ;;  %v10274_v48 = vcombine.low %v222_v24, %v226_v25 }
  0x41   : > { %4140 = vmatprep.subr.bf16.mxu0 %v9629_v49  ;;  %v10276_v49 = vcombine.low %v224_v26, %v228_v28  ;;  %v9711_v26 = vld [vmem:[%s10157_s7 + $0x3c0] ss:$20 sps:$4 sm:$0xff]  }
  0x42   : > { %v9719_v28 = vld [vmem:[%s10157_s7 + $0x3ec] ss:$20 sps:$4 sm:$0xff]  }
  0x43   : > { %3571 = vmatpush1.bf16.msra.mxu1 %v9631_v50  ;;  %13373 = vst [vmem:[#allocation7_spill] sm:$0xff] %v10276_v49  ;;  %v10278_v50 = vcombine.high %v230_v40, %v234_v41 }
  0x44   : > { %4141 = vmatpush1.bf16.msra.mxu0 %v9632_v51  ;;  %3572 = vmatprep.subr.bf16.mxu1 %v9633_v52  ;;  %v10280_v51 = vcombine.high %v232_v42, %v236_v43  ;;  %v9687_v52 = vld [vmem:[%s10157_s7 + $0x320] ss:$20 sps:$4 sm:$0xff]  }
  0x45   : > { %4142 = vmatprep.subr.bf16.mxu0 %v9635_v53  ;;  %v9690_v53 = vld [vmem:[%s10157_s7 + $0x820] ss:$20 sps:$4 sm:$0xff]  }
  0x46   : > { %13374 = vst [vmem:[#allocation8_spill] sm:$0xff] %v10280_v51 }
  0x47   : > { %3573 = vmatpush1.bf16.msra.mxu1 %v9637_v54  ;;  %v9695_v54 = vld [vmem:[%s10157_s7 + $0x34c] ss:$20 sps:$4 sm:$0xff]  }
  0x48   : > { %4143 = vmatpush1.bf16.msra.mxu0 %v9638_v55  ;;  %3574 = vmatprep.subr.bf16.mxu1 %v9639_v56  ;;  %v9698_v55 = vld [vmem:[%s10157_s7 + $0x84c] ss:$20 sps:$4 sm:$0xff]  }
  0x49   : > { %4144 = vmatprep.subr.bf16.mxu0 %v9641_v57  ;;  %v238_v56 = vld [vmem:[%s10134_s24 + $0x100] sm:$0xff] }
  0x4a   : > { %v242_v57 = vld [vmem:[%s10134_s24 + $0x120] sm:$0xff] }
  0x4b   : > { %3575 = vmatpush1.bf16.msra.mxu1 %v9643_v58  ;;  %v240_v58 = vld [vmem:[%s10134_s24 + $0x110] sm:$0xff] }
  0x4c   : > { %4145 = vmatpush1.bf16.msra.mxu0 %v9644_v59  ;;  %3576 = vmatprep.subr.bf16.mxu1 %v9645_v60  ;;  %v244_v59 = vld [vmem:[%s10134_s24 + $0x130] sm:$0xff]  ;;  %v9693_v60 = vld [vmem:[%s10157_s7 + $0x348] ss:$20 sps:$4 sm:$0xff]  }
  0x4d   : > { %4146 = vmatprep.subr.bf16.mxu0 %v9647_v61  ;;  %v9696_v61 = vld [vmem:[%s10157_s7 + $0x848] ss:$20 sps:$4 sm:$0xff]  }
  0x4f   : > { %3577 = vmatpush1.bf16.msra.mxu1 %v9649_v62  ;;  %v9701_v62 = vld [vmem:[%s10157_s7 + $0x374] ss:$20 sps:$4 sm:$0xff]  }
  0x50   : > { %4147 = vmatpush1.bf16.msra.mxu0 %v9650_v63  ;;  %3578 = vmatprep.subr.bf16.mxu1 %v9651_v0  ;;  %v9704_v63 = vld [vmem:[%s10157_s7 + $0x874] ss:$20 sps:$4 sm:$0xff]   ;;  %v10298_v0 = vcombine.low %v230_v40, %v234_v41 }
  0x51   : > { %4148 = vmatprep.subr.bf16.mxu0 %v9653_v1  ;;  %v10300_v1 = vcombine.low %v232_v42, %v236_v43  ;;  %v9725_v40 = vld [vmem:[%s10157_s7 + $0x414] ss:$20 sps:$4 sm:$0xff]  }
  0x52   : > { %v9728_v41 = vld [vmem:[%s10157_s7 + $0x914] ss:$20 sps:$4 sm:$0xff]  }
  0x53   : > { %3579 = vmatpush1.bf16.msra.mxu1 %v9655_v2  ;;  %13375 = vst [vmem:[#allocation9_spill] sm:$0xff] %v10300_v1  ;;  %v10302_v2 = vcombine.high %v238_v56, %v242_v57 }
  0x54   : > { %4149 = vmatpush1.bf16.msra.mxu0 %v9656_v4  ;;  %3580 = vmatprep.subr.bf16.mxu1 %v9657_v8  ;;  %v10304_v4 = vcombine.high %v240_v58, %v244_v59  ;;  %v9699_v8 = vld [vmem:[%s10157_s7 + $0x370] ss:$20 sps:$4 sm:$0xff]  }
  0x55   : > { %4150 = vmatprep.subr.bf16.mxu0 %v9659_v9  ;;  %v9702_v9 = vld [vmem:[%s10157_s7 + $0x870] ss:$20 sps:$4 sm:$0xff]  }
  0x56   : > { %13376 = vst [vmem:[#allocation10_spill] sm:$0xff] %v10304_v4 }
  0x57   : > { %3581 = vmatpush1.bf16.msra.mxu1 %v9661_v10  ;;  %v9707_v10 = vld [vmem:[%s10157_s7 + $0x39c] ss:$20 sps:$4 sm:$0xff]  }
  0x58   : > { %4151 = vmatpush1.bf16.msra.mxu0 %v9662_v12  ;;  %3835 = vmatprep.subr.bf16.mxu1 %v9665_v13  ;;  %v246_v12 = vld [vmem:[%s10134_s24 + $0x140] sm:$0xff] }
  0x59   : > { %4405 = vmatprep.subr.bf16.mxu0 %v9668_v14  ;;  %v250_v13 = vld [vmem:[%s10134_s24 + $0x160] sm:$0xff]  ;;  %v248_v14 = vld [vmem:[%s10134_s24 + $0x150] sm:$0xff] }
  0x5a   : > { %3583 = vmatmul.mubr.bf16.vlgmr.msra.gmra.mrb[0].mxu1 %v10142_v5  ;;  %v10326_v24 = vcombine.high %v246_v12, %v250_v13  ;;  %v10328_v25 = vcombine.high %v248_v14, %v252_v15  ;;  %v10346_v42 = vcombine.low %v246_v12, %v250_v13  ;;  %v10348_v43 = vcombine.low %v248_v14, %v252_v15  ;;  %v270_v12 = vld [vmem:[%s10134_s24 + $0x200] sm:$0xff]  ;;  %v272_v15 = vld [vmem:[%s10134_s24 + $0x210] sm:$0xff] }
  0x5b   : > { %4153 = vmatmul.mubr.bf16.vlgmr.msra.gmra.mrb[0].mxu0 %v10146_v7  ;;  %3836 = vmatpush1.bf16.msra.mxu1 %v9663_v18  ;;  %v9713_v18 = vld [vmem:[%s10157_s7 + $0x3c4] ss:$20 sps:$4 sm:$0xff]   ;;  %v9743_v14 = vld [vmem:[%s10157_s7 + $0x48c] ss:$20 sps:$4 sm:$0xff]  }
  0x5c   : > { %3592 = vmatprep.mubr.bf16.mxu1 %v10231_v19  ;;  %4162 = vmatprep.mubr.bf16.mxu0 %v10234_v21  ;;  %13378 = vst [vmem:[#allocation12_spill] sm:$0xff] %v10328_v25  ;;  %13379 = vst [vmem:[#allocation13_spill] sm:$0xff] %v10348_v43  ;;  %v274_v13 = vld [vmem:[%s10134_s24 + $0x220] sm:$0xff] }
  0x5d   : > { %4406 = vmatpush1.bf16.msra.mxu0 %v9666_v20  ;;  %3837 = vmatprep.subr.bf16.mxu1 %v9671_v22  ;;  %v9716_v20 = vld [vmem:[%s10157_s7 + $0x8c4] ss:$20 sps:$4 sm:$0xff]   ;;  %v10322_v22 = vcombine.low %v238_v56, %v242_v57  ;;  %v264_v56 = vld [vmem:[%s10134_s24 + $0x1d0] sm:$0xff] }
  0x5e   : > { %4407 = vmatprep.subr.bf16.mxu0 %v9674_v23  ;;  %v10324_v23 = vcombine.low %v240_v58, %v244_v59  ;;  %v268_v57 = vld [vmem:[%s10134_s24 + $0x1f0] sm:$0xff]  ;;  %v9729_v58 = vld [vmem:[%s10157_s7 + $0x438] ss:$20 sps:$4 sm:$0xff]  }
  0x5f   : > { %3838 = vmatpush1.bf16.msra.mxu1 %v9669_v27  ;;  %v9714_v27 = vld [vmem:[%s10157_s7 + $0x8c0] ss:$20 sps:$4 sm:$0xff]   ;;  %v9732_v59 = vld [vmem:[%s10157_s7 + $0x938] ss:$20 sps:$4 sm:$0xff]  }
  0x60   : > { %3839 = vmatprep.subr.bf16.mxu1 %v9677_v30  ;;  %13377 = vst [vmem:[#allocation11_spill] sm:$0xff] %v10324_v23  ;;  %v254_v30 = vld [vmem:[%s10134_s24 + $0x180] sm:$0xff] }
  0x61   : > { %4408 = vmatpush1.bf16.msra.mxu0 %v9672_v29  ;;  %v9722_v29 = vld [vmem:[%s10157_s7 + $0x8ec] ss:$20 sps:$4 sm:$0xff]  }
  0x62   : > { %4409 = vmatprep.subr.bf16.mxu0 %v9680_v31  ;;  %3593 = vmatmul.mubr.bf16.gmra.mrb[4].mxu1 %v10250_v32  ;;  %v258_v31 = vld [vmem:[%s10134_s24 + $0x1a0] sm:$0xff] }
  0x63   : > { %4163 = vmatmul.mubr.bf16.gmra.mrb[4].mxu0 %v10252_v33  ;;  %3602 = vmatprep.mubr.bf16.mxu1 %v10254_v34 }
  0x64   : > { %4172 = vmatprep.mubr.bf16.mxu0 %v10256_v35  ;;  %3840 = vmatpush1.bf16.msra.mxu1 %v9675_v36  ;;  %v256_v36 = vld [vmem:[%s10134_s24 + $0x190] sm:$0xff] }
  0x65   : > { %4410 = vmatpush1.bf16.msra.mxu0 %v9678_v37  ;;  %3841 = vmatprep.subr.bf16.mxu1 %v9683_v38  ;;  %v260_v37 = vld [vmem:[%s10134_s24 + $0x1b0] sm:$0xff]  ;;  %v9717_v38 = vld [vmem:[%s10157_s7 + $0x3e8] ss:$20 sps:$4 sm:$0xff]  }
  0x66   : > { %4411 = vmatprep.subr.bf16.mxu0 %v9686_v39  ;;  %v9720_v39 = vld [vmem:[%s10157_s7 + $0x8e8] ss:$20 sps:$4 sm:$0xff]  }
  0x68   : > { %3842 = vmatpush1.bf16.msra.mxu1 %v9681_v44  ;;  %v9723_v44 = vld [vmem:[%s10157_s7 + $0x410] ss:$20 sps:$4 sm:$0xff]  }
  0x69   : > { %4412 = vmatpush1.bf16.msra.mxu0 %v9684_v45  ;;  %3843 = vmatprep.subr.bf16.mxu1 %v9689_v46  ;;  %v9726_v45 = vld [vmem:[%s10157_s7 + $0x910] ss:$20 sps:$4 sm:$0xff]   ;;  %v10352_v46 = vcombine.high %v254_v30, %v258_v31 }
  0x6a   : > { %4413 = vmatprep.subr.bf16.mxu0 %v9692_v47  ;;  %3603 = vmatmul.mubr.bf16.gmra.mrb[8].mxu1 %v10274_v48  ;;  %v10354_v47 = vcombine.high %v256_v36, %v260_v37 }
  0x6b   : > { %4173 = vmatmul.mubr.bf16.gmra.mrb[8].mxu0 %v10276_v49  ;;  %3612 = vmatprep.mubr.bf16.mxu1 %v10278_v50 }
  0x6c   : > { %4182 = vmatprep.mubr.bf16.mxu0 %v10280_v51  ;;  %3844 = vmatpush1.bf16.msra.mxu1 %v9687_v52  ;;  %13380 = vst [vmem:[#allocation14_spill] sm:$0xff] %v10354_v47  ;;  %v9731_v52 = vld [vmem:[%s10157_s7 + $0x43c] ss:$20 sps:$4 sm:$0xff]  }
  0x6d   : > { %4414 = vmatpush1.bf16.msra.mxu0 %v9690_v53  ;;  %3845 = vmatprep.subr.bf16.mxu1 %v9695_v54  ;;  %v9734_v53 = vld [vmem:[%s10157_s7 + $0x93c] ss:$20 sps:$4 sm:$0xff]   ;;  %v262_v54 = vld [vmem:[%s10134_s24 + $0x1c0] sm:$0xff] }
  0x6e   : > { %4415 = vmatprep.subr.bf16.mxu0 %v9698_v55  ;;  %v266_v55 = vld [vmem:[%s10134_s24 + $0x1e0] sm:$0xff] }
  0x70   : > { %3846 = vmatpush1.bf16.msra.mxu1 %v9693_v60  ;;  %v9737_v60 = vld [vmem:[%s10157_s7 + $0x464] ss:$20 sps:$4 sm:$0xff]  }
  0x71   : > { %4416 = vmatpush1.bf16.msra.mxu0 %v9696_v61  ;;  %3847 = vmatprep.subr.bf16.mxu1 %v9701_v62  ;;  %v9740_v61 = vld [vmem:[%s10157_s7 + $0x964] ss:$20 sps:$4 sm:$0xff]   ;;  %v10370_v62 = vcombine.low %v254_v30, %v258_v31 }
  0x72   : > { %4417 = vmatprep.subr.bf16.mxu0 %v9704_v63  ;;  %3613 = vmatmul.mubr.bf16.gmra.mrb[12].mxu1 %v10298_v0  ;;  %v10372_v63 = vcombine.low %v256_v36, %v260_v37  ;;  %v278_v30 = vld [vmem:[%s10134_s24 + $0x240] sm:$0xff]  ;;  %v9749_v36 = vld [vmem:[%s10157_s7 + $0x4b4] ss:$20 sps:$4 sm:$0xff]  }
  0x73   : > { %4183 = vmatmul.mubr.bf16.gmra.mrb[12].mxu0 %v10300_v1  ;;  %3622 = vmatprep.mubr.bf16.mxu1 %v10302_v2  ;;  %v9747_v31 = vld [vmem:[%s10157_s7 + $0x4b0] ss:$20 sps:$4 sm:$0xff]  }
  0x74   : > { %4192 = vmatprep.mubr.bf16.mxu0 %v10304_v4  ;;  %3848 = vmatpush1.bf16.msra.mxu1 %v9699_v8  ;;  %13381 = vst [vmem:[#allocation15_spill] sm:$0xff] %v10372_v63  ;;  %v9735_v8 = vld [vmem:[%s10157_s7 + $0x460] ss:$20 sps:$4 sm:$0xff]  }
  0x75   : > { %4418 = vmatpush1.bf16.msra.mxu0 %v9702_v9  ;;  %3849 = vmatprep.subr.bf16.mxu1 %v9707_v10  ;;  %v9738_v9 = vld [vmem:[%s10157_s7 + $0x960] ss:$20 sps:$4 sm:$0xff]   ;;  %v10376_v10 = vcombine.high %v262_v54, %v266_v55 }
  0x76   : > { %4419 = vmatprep.subr.bf16.mxu0 %v9710_v11  ;;  %v10378_v11 = vcombine.high %v264_v56, %v268_v57  ;;  %v282_v37 = vld [vmem:[%s10134_s24 + $0x260] sm:$0xff] }
  0x78   : > { %3850 = vmatpush1.bf16.msra.mxu1 %v9705_v16  ;;  %13382 = vst [vmem:[#allocation16_spill] sm:$0xff] %v10378_v11  ;;  %v276_v16 = vld [vmem:[%s10134_s24 + $0x230] sm:$0xff] }
  0x79   : > { %4420 = vmatpush1.bf16.msra.mxu0 %v9708_v17  ;;  %3851 = vmatprep.subr.bf16.mxu1 %v9713_v18  ;;  %v9746_v17 = vld [vmem:[%s10157_s7 + $0x98c] ss:$20 sps:$4 sm:$0xff]   ;;  %v9741_v18 = vld [vmem:[%s10157_s7 + $0x488] ss:$20 sps:$4 sm:$0xff]  }
  0x7a   : > { %4421 = vmatprep.subr.bf16.mxu0 %v9716_v20  ;;  %3623 = vmatmul.mubr.bf16.gmra.mrb[16].mxu1 %v10322_v22  ;;  %v9744_v20 = vld [vmem:[%s10157_s7 + $0x988] ss:$20 sps:$4 sm:$0xff]  }
  0x7b   : > { %4193 = vmatmul.mubr.bf16.gmra.mrb[16].mxu0 %v10324_v23  ;;  %3632 = vmatprep.mubr.bf16.mxu1 %v10326_v24 }
  0x7c   : > { %4202 = vmatprep.mubr.bf16.mxu0 %v10328_v25  ;;  %3852 = vmatpush1.bf16.msra.mxu1 %v9711_v26  ;;  %v10392_v26 = vcombine.low %v262_v54, %v266_v55  ;;  %v9752_v54 = vld [vmem:[%s10157_s7 + $0x9b4] ss:$20 sps:$4 sm:$0xff]   ;;  %v290_v55 = vld [vmem:[%s10134_s24 + $0x2a0] sm:$0xff] }
  0x7d   : > { %4422 = vmatpush1.bf16.msra.mxu0 %v9714_v27  ;;  %3853 = vmatprep.subr.bf16.mxu1 %v9719_v28  ;;  %v10394_v27 = vcombine.low %v264_v56, %v268_v57  ;;  %v10396_v28 = vcombine.high %v270_v12, %v274_v13  ;;  %v288_v56 = vld [vmem:[%s10134_s24 + $0x290] sm:$0xff] }
  0x7e   : > { %4423 = vmatprep.subr.bf16.mxu0 %v9722_v29  ;;  %v10398_v29 = vcombine.high %v272_v15, %v276_v16  ;;  %v292_v57 = vld [vmem:[%s10134_s24 + $0x2b0] sm:$0xff] }
  0x7f   : > { %13383 = vst [vmem:[#allocation17_spill] sm:$0xff] %v10394_v27 }
  0x80   : > { %3854 = vmatpush1.bf16.msra.mxu1 %v9717_v38  ;;  %13384 = vst [vmem:[#allocation18_spill] sm:$0xff] %v10398_v29  ;;  %v280_v38 = vld [vmem:[%s10134_s24 + $0x250] sm:$0xff] }
  0x81   : > { %4424 = vmatpush1.bf16.msra.mxu0 %v9720_v39  ;;  %3855 = vmatprep.subr.bf16.mxu1 %v9725_v40  ;;  %v284_v39 = vld [vmem:[%s10134_s24 + $0x270] sm:$0xff]  ;;  %v10410_v40 = vcombine.low %v270_v12, %v274_v13  ;;  %v298_v13 = vld [vmem:[%s10134_s24 + $0x2e0] sm:$0xff] }
  0x82   : > { %4425 = vmatprep.subr.bf16.mxu0 %v9728_v41  ;;  %3633 = vmatmul.mubr.bf16.gmra.mrb[20].mxu1 %v10346_v42  ;;  %v10412_v41 = vcombine.low %v272_v15, %v276_v16  ;;  %v9755_v12 = vld [vmem:[%s10157_s7 + $0x4dc] ss:$20 sps:$4 sm:$0xff]  }
  0x83   : > { %4203 = vmatmul.mubr.bf16.gmra.mrb[20].mxu0 %v10348_v43  ;;  %3642 = vmatprep.mubr.bf16.mxu1 %v10352_v46  ;;  %v300_v15 = vld [vmem:[%s10134_s24 + $0x2f0] sm:$0xff] }
  0x84   : > { %4212 = vmatprep.mubr.bf16.mxu0 %v10354_v47  ;;  %3856 = vmatpush1.bf16.msra.mxu1 %v9723_v44  ;;  %13385 = vst [vmem:[#allocation19_spill] sm:$0xff] %v10412_v41  ;;  %v10414_v44 = vcombine.high %v278_v30, %v282_v37 }
  0x85   : > { %4426 = vmatpush1.bf16.msra.mxu0 %v9726_v45  ;;  %3857 = vmatprep.subr.bf16.mxu1 %v9731_v52  ;;  %v10416_v45 = vcombine.high %v280_v38, %v284_v39  ;;  %v286_v52 = vld [vmem:[%s10134_s24 + $0x280] sm:$0xff] }
  0x86   : > { %4427 = vmatprep.subr.bf16.mxu0 %v9734_v53  ;;  %v9750_v53 = vld [vmem:[%s10157_s7 + $0x9b0] ss:$20 sps:$4 sm:$0xff]   ;;  %v10446_v16 = vcombine.low %v286_v52, %v290_v55 }
  0x87   : > { %13386 = vst [vmem:[#allocation20_spill] sm:$0xff] %v10416_v45 }
  0x88   : > { %3858 = vmatpush1.bf16.msra.mxu1 %v9729_v58  ;;  %v10428_v58 = vcombine.low %v278_v30, %v282_v37  ;;  %v302_v30 = vld [vmem:[%s10134_s24 + $0x300] sm:$0xff] }
  0x89   : > { %4428 = vmatpush1.bf16.msra.mxu0 %v9732_v59  ;;  %3859 = vmatprep.subr.bf16.mxu1 %v9737_v60  ;;  %v10430_v59 = vcombine.low %v280_v38, %v284_v39  ;;  %v10432_v60 = vcombine.high %v286_v52, %v290_v55  ;;  %v306_v37 = vld [vmem:[%s10134_s24 + $0x320] sm:$0xff]  ;;  %v304_v38 = vld [vmem:[%s10134_s24 + $0x310] sm:$0xff] }
  0x8a   : > { %4429 = vmatprep.subr.bf16.mxu0 %v9740_v61  ;;  %3643 = vmatmul.mubr.bf16.gmra.mrb[24].mxu1 %v10370_v62  ;;  %v10434_v61 = vcombine.high %v288_v56, %v292_v57  ;;  %v308_v39 = vld [vmem:[%s10134_s24 + $0x330] sm:$0xff] }
  0x8b   : > { %4213 = vmatmul.mubr.bf16.gmra.mrb[24].mxu0 %v10372_v63  ;;  %3652 = vmatprep.mubr.bf16.mxu1 %v10376_v10  ;;  %13387 = vst [vmem:[#allocation21_spill] sm:$0xff] %v10430_v59  ;;  %v10470_v55 = vcombine.high %v304_v38, %v308_v39 }
  0x8c   : > { %4222 = vmatprep.mubr.bf16.mxu0 %v10378_v11  ;;  %3860 = vmatpush1.bf16.msra.mxu1 %v9735_v8  ;;  %13388 = vst [vmem:[#allocation22_spill] sm:$0xff] %v10434_v61  ;;  %v294_v8 = vld [vmem:[%s10134_s24 + $0x2c0] sm:$0xff] }
  0x8d   : > { %4430 = vmatpush1.bf16.msra.mxu0 %v9738_v9  ;;  %3861 = vmatprep.subr.bf16.mxu1 %v9743_v14  ;;  %v9753_v9 = vld [vmem:[%s10157_s7 + $0x4d8] ss:$20 sps:$4 sm:$0xff]   ;;  %v296_v14 = vld [vmem:[%s10134_s24 + $0x2d0] sm:$0xff]  ;;  %v10464_v52 = vcombine.low %v294_v8, %v298_v13  ;;  %13392 = vst [vmem:[#allocation26_spill] sm:$0xff] %v10470_v55 }
  0x8e   : > { %4431 = vmatprep.subr.bf16.mxu0 %v9746_v17  ;;  %v10448_v17 = vcombine.low %v288_v56, %v292_v57  ;;  %v9761_v56 = vld [vmem:[%s10157_s7 + $0xc] ss:$20 sps:$4 sm:$0xff]  }
  0x8f   : > { %v310_v57 = vld [vmem:[%s10134_s24 + $0x340] sm:$0xff] }
  0x90   : > { %3862 = vmatpush1.bf16.msra.mxu1 %v9741_v18  ;;  %13389 = vst [vmem:[#allocation23_spill] sm:$0xff] %v10448_v17  ;;  %v10450_v18 = vcombine.high %v294_v8, %v298_v13  ;;  %v314_v8 = vld [vmem:[%s10134_s24 + $0x360] sm:$0xff]  ;;  %v12998_v13 = vmov 0  }
  0x91   : > { %4432 = vmatpush1.bf16.msra.mxu0 %v9744_v20  ;;  %3863 = vmatprep.subr.bf16.mxu1 %v9749_v36  ;;  %v10452_v20 = vcombine.high %v296_v14, %v300_v15  ;;  %v9758_v36 = vld [vmem:[%s10157_s7 + $0x9dc] ss:$20 sps:$4 sm:$0xff]  }
  0x92   : > { %3653 = vmatmul.mubr.bf16.gmra.mrb[28].mxu1 %v10392_v26  ;;  %4433 = vmatprep.subr.bf16.mxu0 %v9752_v54  ;;  %v10468_v54 = vcombine.high %v302_v30, %v306_v37 }
  0x93   : > { %4223 = vmatmul.mubr.bf16.gmra.mrb[28].mxu0 %v10394_v27  ;;  %3662 = vmatprep.mubr.bf16.mxu1 %v10396_v28  ;;  %13390 = vst [vmem:[#allocation24_spill] sm:$0xff] %v10452_v20 }
  0x94   : > { %4232 = vmatprep.mubr.bf16.mxu0 %v10398_v29  ;;  %3864 = vmatpush1.bf16.msra.mxu1 %v9747_v31  ;;  %v9756_v31 = vld [vmem:[%s10157_s7 + $0x9d8] ss:$20 sps:$4 sm:$0xff]  }
  0x95   : > { %4434 = vmatpush1.bf16.msra.mxu0 %v9750_v53  ;;  %3865 = vmatprep.subr.bf16.mxu1 %v9755_v12  ;;  %v10466_v53 = vcombine.low %v296_v14, %v300_v15  ;;  %v316_v12 = vld [vmem:[%s10134_s24 + $0x370] sm:$0xff]  ;;  %v10482_v14 = vcombine.low %v302_v30, %v306_v37  ;;  %v10484_v15 = vcombine.low %v304_v38, %v308_v39  ;;  %v322_v30 = vld [vmem:[%s10134_s24 + $0x3a0] sm:$0xff] }
  0x96   : > { %4435 = vmatprep.subr.bf16.mxu0 %v9758_v36  ;;  %v320_v37 = vld [vmem:[%s10134_s24 + $0x390] sm:$0xff]  ;;  %v10498_v39 = vcombine.low %v310_v57, %v314_v8 }
  0x97   : > { %13391 = vst [vmem:[#allocation25_spill] sm:$0xff] %v10466_v53  ;;  %13393 = vst [vmem:[#allocation27_spill] sm:$0xff] %v10484_v15  ;;  %v324_v38 = vld [vmem:[%s10134_s24 + $0x3b0] sm:$0xff] }
  0x98   : > { %3866 = vmatpush1.bf16.msra.mxu1 %v9753_v9  ;;  %v312_v9 = vld [vmem:[%s10134_s24 + $0x350] sm:$0xff] }
  0x99   : > { %4436 = vmatpush1.bf16.msra.mxu0 %v9756_v31  ;;  %4690 = vmatprep.subr.bf16.mxu1 %v9761_v56  ;;  %v10486_v31 = vcombine.high %v310_v57, %v314_v8  ;;  %v10488_v36 = vcombine.high %v312_v9, %v316_v12  ;;  %v10500_v56 = vcombine.low %v312_v9, %v316_v12  ;;  %v328_v57 = vld [vmem:[%s10134_s24 + $0x3d0] sm:$0xff] }
  0x9a   : > { %3663 = vmatmul.mubr.bf16.gmra.mrb[32].mxu1 %v10410_v40  ;;  %5902 = vmatprep.subr.bf16.mxu0 %v12998_v13  ;;  %v332_v8 = vld [vmem:[%s10134_s24 + $0x3f0] sm:$0xff]  ;;  %v10516_v12 = vcombine.low %v320_v37, %v324_v38 }
  0x9b   : > { %4233 = vmatmul.mubr.bf16.gmra.mrb[32].mxu0 %v10412_v41  ;;  %3672 = vmatprep.mubr.bf16.mxu1 %v10414_v44  ;;  %13394 = vst [vmem:[#allocation28_spill] sm:$0xff] %v10488_v36  ;;  %13395 = vst [vmem:[#allocation29_spill] sm:$0xff] %v10500_v56 }
  0x9c   : > { %4242 = vmatprep.mubr.bf16.mxu0 %v10416_v45  ;;  %13397 = vst [vmem:[#allocation31_spill] sm:$0xff] %v10516_v12 }
  0xa2   : > { %3673 = vmatmul.mubr.bf16.gmra.mrb[36].mxu1 %v10428_v58 }
  0xa3   : > { %4243 = vmatmul.mubr.bf16.gmra.mrb[36].mxu0 %v10430_v59  ;;  %3680 = vmatprep.mubr.bf16.mxu1 %v10432_v60 }
  0xa4   : > { %4250 = vmatprep.mubr.bf16.mxu0 %v10434_v61 }
  0xaa   : > { %3681 = vmatmul.mubr.bf16.gmra.mrb[40].mxu1 %v10446_v16 }
  0xab   : > { %4251 = vmatmul.mubr.bf16.gmra.mrb[40].mxu0 %v10448_v17  ;;  %3688 = vmatprep.mubr.bf16.mxu1 %v10450_v18  ;;  %v10520_v17 = vcombine.high %v328_v57, %v332_v8 }
  0xac   : > { %4258 = vmatprep.mubr.bf16.mxu0 %v10452_v20 }
  0xad   : > { %13398 = vst [vmem:[#allocation32_spill] sm:$0xff] %v10520_v17 }
  0xb2   : > { %3689 = vmatmul.mubr.bf16.gmra.mrb[44].mxu1 %v10464_v52 }
  0xb3   : > { %4259 = vmatmul.mubr.bf16.gmra.mrb[44].mxu0 %v10466_v53  ;;  %3696 = vmatprep.mubr.bf16.mxu1 %v10468_v54  ;;  %v10504_v53 = vcombine.high %v320_v37, %v324_v38  ;;  %v340_v37 = vld [vmem:[%s10134_s24 + $0x430] sm:$0xff] }
  0xb4   : > { %4266 = vmatprep.mubr.bf16.mxu0 %v10470_v55  ;;  %v318_v55 = vld [vmem:[%s10134_s24 + $0x380] sm:$0xff] }
  0xb5   : > { %v10502_v13 = vcombine.high %v318_v55, %v322_v30  ;;  %13396 = vst [vmem:[#allocation30_spill] sm:$0xff] %v10504_v53  ;;  %v10514_v9 = vcombine.low %v318_v55, %v322_v30  ;;  %v338_v55 = vld [vmem:[%s10134_s24 + $0x420] sm:$0xff]  ;;  %v336_v30 = vld [vmem:[%s10134_s24 + $0x410] sm:$0xff] }
  0xb6   : > { %v10536_v59 = vcombine.high %v336_v30, %v340_v37 }
  0xb8   : > { %13400 = vst [vmem:[#allocation34_spill] sm:$0xff] %v10536_v59 }
  0xba   : > { %3697 = vmatmul.mubr.bf16.gmra.mrb[48].mxu1 %v10482_v14 }
  0xbb   : > { %4267 = vmatmul.mubr.bf16.gmra.mrb[48].mxu0 %v10484_v15  ;;  %3704 = vmatprep.mubr.bf16.mxu1 %v10486_v31  ;;  %v326_v15 = vld [vmem:[%s10134_s24 + $0x3c0] sm:$0xff] }
  0xbc   : > { %4274 = vmatprep.mubr.bf16.mxu0 %v10488_v36  ;;  %v330_v36 = vld [vmem:[%s10134_s24 + $0x3e0] sm:$0xff] }
  0xbd   : > { %v10518_v20 = vcombine.high %v326_v15, %v330_v36  ;;  %v10530_v38 = vcombine.low %v326_v15, %v330_v36  ;;  %v344_v15 = vld [vmem:[%s10134_s24 + $0x450] sm:$0xff] }
  0xbe   : > { %v348_v36 = vld [vmem:[%s10134_s24 + $0x470] sm:$0xff] }
  0xbf   : > { %v10552_v41 = vcombine.high %v344_v15, %v348_v36 }
  0xc1   : > { %13402 = vst [vmem:[#allocation36_spill] sm:$0xff] %v10552_v41 }
  0xc2   : > { %3705 = vmatmul.mubr.bf16.gmra.mrb[52].mxu1 %v10498_v39 }
  0xc3   : > { %4275 = vmatmul.mubr.bf16.gmra.mrb[52].mxu0 %v10500_v56  ;;  %3713 = vmatprep.mubr.bf16.mxu1 %v10502_v13  ;;  %v334_v56 = vld [vmem:[%s10134_s24 + $0x400] sm:$0xff] }
  0xc4   : > { %4283 = vmatprep.mubr.bf16.mxu0 %v10504_v53  ;;  %v10532_v53 = vcombine.low %v328_v57, %v332_v8  ;;  %v10534_v61 = vcombine.high %v334_v56, %v338_v55  ;;  %v10546_v57 = vcombine.low %v334_v56, %v338_v55  ;;  %v10548_v8 = vcombine.low %v336_v30, %v340_v37  ;;  %v354_v56 = vld [vmem:[%s10134_s24 + $0x4a0] sm:$0xff]  ;;  %v352_v55 = vld [vmem:[%s10134_s24 + $0x490] sm:$0xff] }
  0xc5   : > { %v356_v30 = vld [vmem:[%s10134_s24 + $0x4b0] sm:$0xff] }
  0xc6   : > { %13399 = vst [vmem:[#allocation33_spill] sm:$0xff] %v10532_v53  ;;  %13401 = vst [vmem:[#allocation35_spill] sm:$0xff] %v10548_v8  ;;  %v10568_v27 = vcombine.high %v352_v55, %v356_v30 }
  0xc8   : > { %13404 = vst [vmem:[#allocation38_spill] sm:$0xff] %v10568_v27 }
  0xca   : > { %3714 = vmatmul.mubr.bf16.gmra.mrb[56].mxu1 %v10514_v9 }
  0xcb   : > { %4284 = vmatmul.mubr.bf16.gmra.mrb[56].mxu0 %v10516_v12  ;;  %3723 = vmatprep.mubr.bf16.mxu1 %v10518_v20  ;;  %v342_v12 = vld [vmem:[%s10134_s24 + $0x440] sm:$0xff] }
  0xcc   : > { %4293 = vmatprep.mubr.bf16.mxu0 %v10520_v17  ;;  %v346_v17 = vld [vmem:[%s10134_s24 + $0x460] sm:$0xff] }
  0xcd   : > { %v10550_v45 = vcombine.high %v342_v12, %v346_v17  ;;  %v10562_v37 = vcombine.low %v342_v12, %v346_v17  ;;  %v358_v17 = vld [vmem:[%s10134_s24 + $0x4c0] sm:$0xff] }
  0xce   : > { %v362_v12 = vld [vmem:[%s10134_s24 + $0x4e0] sm:$0xff] }
  0xcf   : > { %v10582_v11 = vcombine.high %v358_v17, %v362_v12 }
  0xd2   : > { %3724 = vmatmul.mubr.bf16.gmra.mrb[60].mxu1 %v10530_v38 }
  0xd3   : > { %4294 = vmatmul.mubr.bf16.gmra.mrb[60].mxu0 %v10532_v53  ;;  %3733 = vmatprep.mubr.bf16.mxu1 %v10534_v61  ;;  %v350_v53 = vld [vmem:[%s10134_s24 + $0x480] sm:$0xff] }
  0xd4   : > { %4303 = vmatprep.mubr.bf16.mxu0 %v10536_v59  ;;  %v10564_v59 = vcombine.low %v344_v15, %v348_v36  ;;  %v10566_v29 = vcombine.high %v350_v53, %v354_v56  ;;  %v360_v15 = vld [vmem:[%s10134_s24 + $0x4d0] sm:$0xff] }
  0xd5   : > { %v364_v36 = vld [vmem:[%s10134_s24 + $0x4f0] sm:$0xff] }
  0xd6   : > { %13403 = vst [vmem:[#allocation37_spill] sm:$0xff] %v10564_v59  ;;  %v10584_v63 = vcombine.high %v360_v15, %v364_v36 }
  0xd8   : > { %13406 = vst [vmem:[#allocation40_spill] sm:$0xff] %v10584_v63 }
  0xda   : > { %3734 = vmatmul.mubr.bf16.gmra.mrb[64].mxu1 %v10546_v57 }
  0xdb   : > { %4304 = vmatmul.mubr.bf16.gmra.mrb[64].mxu0 %v10548_v8  ;;  %3743 = vmatprep.mubr.bf16.mxu1 %v10550_v45  ;;  %v10580_v8 = vcombine.low %v352_v55, %v356_v30  ;;  %v10594_v55 = vcombine.low %v358_v17, %v362_v12  ;;  %v10596_v30 = vcombine.low %v360_v15, %v364_v36  ;;  %v374_v17 = vld [vmem:[%s10134_s24 + $0x540] sm:$0xff]  ;;  %v376_v15 = vld [vmem:[%s10134_s24 + $0x550] sm:$0xff] }
  0xdc   : > { %4313 = vmatprep.mubr.bf16.mxu0 %v10552_v41  ;;  %v10578_v41 = vcombine.low %v350_v53, %v354_v56  ;;  %v368_v53 = vld [vmem:[%s10134_s24 + $0x510] sm:$0xff]  ;;  %v378_v12 = vld [vmem:[%s10134_s24 + $0x560] sm:$0xff] }
  0xdd   : > { %13405 = vst [vmem:[#allocation39_spill] sm:$0xff] %v10580_v8  ;;  %v372_v56 = vld [vmem:[%s10134_s24 + $0x530] sm:$0xff]  ;;  %13407 = vst [vmem:[#allocation41_spill] sm:$0xff] %v10596_v30  ;;  %v10614_v25 = vcombine.high %v374_v17, %v378_v12 }
  0xde   : > { %v10600_v43 = vcombine.high %v368_v53, %v372_v56  ;;  %v380_v36 = vld [vmem:[%s10134_s24 + $0x570] sm:$0xff] }
  0xdf   : > { %v10616_v23 = vcombine.high %v376_v15, %v380_v36 }
  0xe0   : > { %13408 = vst [vmem:[#allocation42_spill] sm:$0xff] %v10600_v43 }
  0xe1   : > { %13410 = vst [vmem:[#allocation44_spill] sm:$0xff] %v10616_v23 }
  0xe2   : > { %3744 = vmatmul.mubr.bf16.gmra.mrb[68].mxu1 %v10562_v37 }
  0xe3   : > { %4314 = vmatmul.mubr.bf16.gmra.mrb[68].mxu0 %v10564_v59  ;;  %3753 = vmatprep.mubr.bf16.mxu1 %v10566_v29  ;;  %v370_v59 = vld [vmem:[%s10134_s24 + $0x520] sm:$0xff] }
  0xe4   : > { %4323 = vmatprep.mubr.bf16.mxu0 %v10568_v27  ;;  %v366_v27 = vld [vmem:[%s10134_s24 + $0x500] sm:$0xff] }
  0xe5   : > { %v10598_v47 = vcombine.high %v366_v27, %v370_v59 }
  0xea   : > { %3754 = vmatmul.mubr.bf16.gmra.mrb[72].mxu1 %v10578_v41 }
  0xeb   : > { %4324 = vmatmul.mubr.bf16.gmra.mrb[72].mxu0 %v10580_v8  ;;  %3763 = vmatprep.mubr.bf16.mxu1 %v10582_v11  ;;  %v10612_v8 = vcombine.low %v368_v53, %v372_v56  ;;  %v384_v53 = vld [vmem:[%s10134_s24 + $0x590] sm:$0xff] }
  0xec   : > { %4333 = vmatprep.mubr.bf16.mxu0 %v10584_v63  ;;  %v10610_v63 = vcombine.low %v366_v27, %v370_v59  ;;  %v382_v27 = vld [vmem:[%s10134_s24 + $0x580] sm:$0xff]  ;;  %v388_v56 = vld [vmem:[%s10134_s24 + $0x5b0] sm:$0xff] }
  0xed   : > { %13409 = vst [vmem:[#allocation43_spill] sm:$0xff] %v10612_v8  ;;  %v386_v59 = vld [vmem:[%s10134_s24 + $0x5a0] sm:$0xff]  ;;  %v10632_v1 = vcombine.high %v384_v53, %v388_v56 }
  0xee   : > { %v10630_v4 = vcombine.high %v382_v27, %v386_v59 }
  0xef   : > { %13412 = vst [vmem:[#allocation46_spill] sm:$0xff] %v10632_v1 }
  0xf2   : > { %3764 = vmatmul.mubr.bf16.gmra.mrb[76].mxu1 %v10594_v55 }
  0xf3   : > { %4334 = vmatmul.mubr.bf16.gmra.mrb[76].mxu0 %v10596_v30  ;;  %3773 = vmatprep.mubr.bf16.mxu1 %v10598_v47  ;;  %v10628_v30 = vcombine.low %v376_v15, %v380_v36  ;;  %v392_v15 = vld [vmem:[%s10134_s24 + $0x5d0] sm:$0xff] }
  0xf4   : > { %4343 = vmatprep.mubr.bf16.mxu0 %v10600_v43  ;;  %v10626_v43 = vcombine.low %v374_v17, %v378_v12  ;;  %v390_v17 = vld [vmem:[%s10134_s24 + $0x5c0] sm:$0xff]  ;;  %v396_v36 = vld [vmem:[%s10134_s24 + $0x5f0] sm:$0xff] }
  0xf5   : > { %13411 = vst [vmem:[#allocation45_spill] sm:$0xff] %v10628_v30  ;;  %v394_v12 = vld [vmem:[%s10134_s24 + $0x5e0] sm:$0xff]  ;;  %v10648_v49 = vcombine.high %v392_v15, %v396_v36 }
  0xf6   : > { %v10646_v51 = vcombine.high %v390_v17, %v394_v12 }
  0xf7   : > { %13416 = vst [vmem:[#allocation50_spill] sm:$0xff] %v10648_v49 }
  0xf8   : > { %13415 = vst [vmem:[#allocation49_spill] sm:$0xff] %v10646_v51 }
  0xfa   : > { %3774 = vmatmul.mubr.bf16.gmra.mrb[80].mxu1 %v10610_v63 }
  0xfb   : > { %4344 = vmatmul.mubr.bf16.gmra.mrb[80].mxu0 %v10612_v8  ;;  %3783 = vmatprep.mubr.bf16.mxu1 %v10614_v25  ;;  %v10644_v8 = vcombine.low %v384_v53, %v388_v56  ;;  %v400_v53 = vld [vmem:[%s10134_s24 + $0x610] sm:$0xff] }
  0xfc   : > { %4353 = vmatprep.mubr.bf16.mxu0 %v10616_v23  ;;  %v10642_v23 = vcombine.low %v382_v27, %v386_v59  ;;  %v398_v27 = vld [vmem:[%s10134_s24 + $0x600] sm:$0xff]  ;;  %v404_v56 = vld [vmem:[%s10134_s24 + $0x630] sm:$0xff] }
  0xfd   : > { %13414 = vst [vmem:[#allocation48_spill] sm:$0xff] %v10644_v8  ;;  %v402_v59 = vld [vmem:[%s10134_s24 + $0x620] sm:$0xff]  ;;  %v10664_v33 = vcombine.high %v400_v53, %v404_v56 }
  0xfe   : > { %13413 = vst [vmem:[#allocation47_spill] sm:$0xff] %v10642_v23  ;;  %v10662_v35 = vcombine.high %v398_v27, %v402_v59 }
  0xff   : > { %13420 = vst [vmem:[#allocation54_spill] sm:$0xff] %v10664_v33 }
 0x100   : > { %13419 = vst [vmem:[#allocation53_spill] sm:$0xff] %v10662_v35 }
 0x102   : > { %3784 = vmatmul.mubr.bf16.gmra.mrb[84].mxu1 %v10626_v43 }
 0x103   : > { %4354 = vmatmul.mubr.bf16.gmra.mrb[84].mxu0 %v10628_v30  ;;  %3793 = vmatprep.mubr.bf16.mxu1 %v10630_v4  ;;  %v10660_v30 = vcombine.low %v392_v15, %v396_v36  ;;  %v408_v15 = vld [vmem:[%s10134_s24 + $0x650] sm:$0xff] }
 0x104   : > { %4363 = vmatprep.mubr.bf16.mxu0 %v10632_v1  ;;  %v10658_v1 = vcombine.low %v390_v17, %v394_v12  ;;  %v406_v17 = vld [vmem:[%s10134_s24 + $0x640] sm:$0xff]  ;;  %v412_v36 = vld [vmem:[%s10134_s24 + $0x670] sm:$0xff] }
 0x105   : > { %13418 = vst [vmem:[#allocation52_spill] sm:$0xff] %v10660_v30  ;;  %v410_v12 = vld [vmem:[%s10134_s24 + $0x660] sm:$0xff]  ;;  %v10680_v7 = vcombine.high %v408_v15, %v412_v36 }
 0x106   : > { %13417 = vst [vmem:[#allocation51_spill] sm:$0xff] %v10658_v1  ;;  %v10678_v21 = vcombine.high %v406_v17, %v410_v12 }
 0x107   : > { %13424 = vst [vmem:[#allocation58_spill] sm:$0xff] %v10680_v7 }
 0x108   : > { %13423 = vst [vmem:[#allocation57_spill] sm:$0xff] %v10678_v21 }
 0x10a   : > { %3794 = vmatmul.mubr.bf16.gmra.mrb[88].mxu1 %v10642_v23 }
 0x10b   : > { %4364 = vmatmul.mubr.bf16.gmra.mrb[88].mxu0 %v10644_v8  ;;  %3802 = vmatprep.mubr.bf16.mxu1 %v10646_v51  ;;  %v10676_v8 = vcombine.low %v400_v53, %v404_v56  ;;  %v416_v53 = vld [vmem:[%s10134_s24 + $0x690] sm:$0xff] }
 0x10c   : > { %4372 = vmatprep.mubr.bf16.mxu0 %v10648_v49  ;;  %v10674_v49 = vcombine.low %v398_v27, %v402_v59  ;;  %v414_v27 = vld [vmem:[%s10134_s24 + $0x680] sm:$0xff]  ;;  %v420_v56 = vld [vmem:[%s10134_s24 + $0x6b0] sm:$0xff] }
 0x10d   : > { %13422 = vst [vmem:[#allocation56_spill] sm:$0xff] %v10676_v8  ;;  %v418_v59 = vld [vmem:[%s10134_s24 + $0x6a0] sm:$0xff]  ;;  %v9769_v51 = vld [vmem:[%s10157_s7 + $0x5c] ss:$20 sps:$4 sm:$0xff]  }
 0x10e   : > { %13421 = vst [vmem:[#allocation55_spill] sm:$0xff] %v10674_v49  ;;  %v10694_v6 = vcombine.high %v414_v27, %v418_v59 }
 0x110   : > { %13427 = vst [vmem:[#allocation61_spill] sm:$0xff] %v10694_v6 }
 0x112   : > { %3803 = vmatmul.mubr.bf16.gmra.mrb[92].mxu1 %v10658_v1  ;;  %v9766_v1 = vld [vmem:[%s10157_s7 + $0x38] ss:$20 sps:$4 sm:$0xff]  }
 0x113   : > { %4373 = vmatmul.mubr.bf16.gmra.mrb[92].mxu0 %v10660_v30  ;;  %3810 = vmatprep.mubr.bf16.mxu1 %v10662_v35  ;;  %v10692_v30 = vcombine.low %v408_v15, %v412_v36  ;;  %v209_v15 = vld [vmem:[%s10134_s24 + $0x18] sm:$0xff]  ;;  %v9763_v35 = vld [vmem:[%s10157_s7 + $0x30] ss:$20 sps:$4 sm:$0xff]  }
 0x114   : > { %4380 = vmatprep.mubr.bf16.mxu0 %v10664_v33  ;;  %v10690_v33 = vcombine.low %v406_v17, %v410_v12  ;;  %v207_v17 = vld [vmem:[%s10134_s24 + $0x8] sm:$0xff]  ;;  %v213_v36 = vld [vmem:[%s10134_s24 + $0x38] sm:$0xff] }
 0x115   : > { %13426 = vst [vmem:[#allocation60_spill] sm:$0xff] %v10692_v30  ;;  %v211_v12 = vld [vmem:[%s10134_s24 + $0x28] sm:$0xff] }
 0x116   : > { %13425 = vst [vmem:[#allocation59_spill] sm:$0xff] %v10690_v33 }
 0x11a   : > { %3811 = vmatmul.mubr.bf16.gmra.mrb[96].mxu1 %v10674_v49  ;;  %v10696_v49 = vcombine.high %v416_v53, %v420_v56 }
 0x11b   : > { %4381 = vmatmul.mubr.bf16.gmra.mrb[96].mxu0 %v10676_v8  ;;  %3818 = vmatprep.mubr.bf16.mxu1 %v10678_v21  ;;  %v10708_v8 = vcombine.low %v416_v53, %v420_v56  ;;  %v221_v53 = vld [vmem:[%s10134_s24 + $0x78] sm:$0xff]  ;;  %v10722_v56 = vcombine.low %v207_v17, %v211_v12  ;;  %v9765_v21 = vld [vmem:[%s10157_s7 + $0x34] ss:$20 sps:$4 sm:$0xff]  }
 0x11c   : > { %4388 = vmatprep.mubr.bf16.mxu0 %v10680_v7  ;;  %13428 = vst [vmem:[#allocation62_spill] sm:$0xff] %v10696_v49  ;;  %v10706_v7 = vcombine.low %v414_v27, %v418_v59  ;;  %v219_v27 = vld [vmem:[%s10134_s24 + $0x68] sm:$0xff]  ;;  %v217_v59 = vld [vmem:[%s10134_s24 + $0x58] sm:$0xff] }
 0x11d   : > { %13430 = vst [vmem:[#allocation64_spill] sm:$0xff] %v10708_v8  ;;  %13433 = vst [vmem:[#allocation67_spill] sm:$0xff] %v10722_v56 }
 0x11e   : > { %13429 = vst [vmem:[#allocation63_spill] sm:$0xff] %v10706_v7 }
 0x122   : > { %3819 = vmatmul.mubr.bf16.gmra.mrb[100].mxu1 %v10690_v33  ;;  %v10710_v33 = vcombine.high %v207_v17, %v211_v12  ;;  %v223_v17 = vld [vmem:[%s10134_s24 + $0x88] sm:$0xff] }
 0x123   : > { %4389 = vmatmul.mubr.bf16.gmra.mrb[100].mxu0 %v10692_v30  ;;  %3826 = vmatprep.mubr.bf16.mxu1 %v10694_v6  ;;  %v10712_v30 = vcombine.high %v209_v15, %v213_v36  ;;  %v10724_v6 = vcombine.low %v209_v15, %v213_v36  ;;  %v227_v12 = vld [vmem:[%s10134_s24 + $0xa8] sm:$0xff]  ;;  %v225_v15 = vld [vmem:[%s10134_s24 + $0x98] sm:$0xff] }
 0x124   : > { %4396 = vmatprep.mubr.bf16.mxu0 %v10696_v49  ;;  %13431 = vst [vmem:[#allocation65_spill] sm:$0xff] %v10710_v33  ;;  %v215_v49 = vld [vmem:[%s10134_s24 + $0x48] sm:$0xff]  ;;  %v229_v36 = vld [vmem:[%s10134_s24 + $0xb8] sm:$0xff] }
 0x125   : > { %13432 = vst [vmem:[#allocation66_spill] sm:$0xff] %v10712_v30  ;;  %13434 = vst [vmem:[#allocation68_spill] sm:$0xff] %v10724_v6  ;;  %v10751_v23 = vcombine.high %v225_v15, %v229_v36 }
 0x127   : > { %13441 = vst [vmem:[#allocation74_spill] sm:$0xff] %v10751_v23 }
 0x12a   : > { %3827 = vmatmul.mubr.bf16.gmra.mrb[104].mxu1 %v10706_v7  ;;  %v9759_v7 = vld [vmem:[%s10157_s7 + $0x8] ss:$20 sps:$4 sm:$0xff]  }
 0x12b   : > { %4397 = vmatmul.mubr.bf16.gmra.mrb[104].mxu0 %v10708_v8  ;;  %3867 = vmatprep.mubr.bf16.mxu1 %v10710_v33  ;;  %v10727_v8 = vcombine.high %v215_v49, %v219_v27  ;;  %v10729_v33 = vcombine.high %v217_v59, %v221_v53 }
 0x12c   : > { %4437 = vmatprep.mubr.bf16.mxu0 %v10712_v30  ;;  %v9762_v30 = vld [vmem:[%s10157_s7 + $0x10] ss:$20 sps:$4 sm:$0xff]  }
 0x12d   : > { %13435 = vst [vmem:[#allocation69_spill] sm:$0xff] %v10727_v8  ;;  %13436 = vst [vmem:[#allocation70_spill] sm:$0xff] %v10729_v33 }
 0x132   : > { %3868 = vmatmul.mubr.bf16.vlgmr.msra.gmra.mrb[0].mxu1 %v10722_v56  ;;  %v13437_v56 = vmov 0  }
 0x133   : > { %4438 = vmatmul.mubr.bf16.vlgmr.msra.gmra.mrb[0].mxu0 %v10724_v6  ;;  %4691 = vmatpush1.bf16.msra.mxu1 %v9759_v7  ;;  %v10745_v6 = vcombine.low %v215_v49, %v219_v27  ;;  %v10747_v7 = vcombine.low %v217_v59, %v221_v53  ;;  %v9773_v49 = vld [vmem:[%s10157_s7 + $0x84] ss:$20 sps:$4 sm:$0xff]   ;;  %v231_v27 = vld [vmem:[%s10134_s24 + $0xc8] sm:$0xff] }
 0x134   : > { %3877 = vmatprep.mubr.bf16.mxu1 %v10727_v8  ;;  %4447 = vmatprep.mubr.bf16.mxu0 %v10729_v33  ;;  %v10749_v8 = vcombine.high %v223_v17, %v227_v12  ;;  %v237_v59 = vld [vmem:[%s10134_s24 + $0xf8] sm:$0xff]  ;;  %v9777_v33 = vld [vmem:[%s10157_s7 + $0xac] ss:$20 sps:$4 sm:$0xff]  }
 0x135   : > { %5903 = vmatpush1.bf16.msra.mxu0 %v9762_v30  ;;  %4692 = vmatprep.subr.bf16.mxu1 %v9765_v21  ;;  %13438 = vst [vmem:[#allocation71_spill] sm:$0xff] %v10745_v6  ;;  %13439 = vst [vmem:[#allocation72_spill] sm:$0xff] %v10747_v7  ;;  %v9767_v30 = vld [vmem:[%s10157_s7 + $0x58] ss:$20 sps:$4 sm:$0xff]   ;;  %v9770_v21 = vld [vmem:[%s10157_s7 + $0x60] ss:$20 sps:$4 sm:$0xff]  }
 0x136   : > { %5904 = vmatprep.subr.bf16.mxu0 %v13437_v56  ;;  %13440 = vst [vmem:[#allocation73_spill] sm:$0xff] %v10749_v8  ;;  %v9774_v53 = vld [vmem:[%s10157_s7 + $0x88] ss:$20 sps:$4 sm:$0xff]  }
 0x137   : > { %4693 = vmatpush1.bf16.msra.mxu1 %v9763_v35  ;;  %v235_v35 = vld [vmem:[%s10134_s24 + $0xe8] sm:$0xff] }
 0x138   : > { %4694 = vmatprep.subr.bf16.mxu1 %v9769_v51  ;;  %v9771_v51 = vld [vmem:[%s10157_s7 + $0x80] ss:$20 sps:$4 sm:$0xff]  }
 0x139   : > { %5905 = vmatpush1.bf16.msra.mxu0 %v9766_v1  ;;  %v233_v1 = vld [vmem:[%s10134_s24 + $0xd8] sm:$0xff] }
 0x13a   : > { %5906 = vmatprep.subr.bf16.mxu0 %v13437_v56  ;;  %3878 = vmatmul.mubr.bf16.gmra.mrb[4].mxu1 %v10745_v6  ;;  %v10775_v6 = vcombine.high %v233_v1, %v237_v59 }
 0x13b   : > { %4448 = vmatmul.mubr.bf16.gmra.mrb[4].mxu0 %v10747_v7  ;;  %3887 = vmatprep.mubr.bf16.mxu1 %v10749_v8  ;;  %v10769_v7 = vcombine.low %v223_v17, %v227_v12  ;;  %v10773_v8 = vcombine.high %v231_v27, %v235_v35  ;;  %v9781_v17 = vld [vmem:[%s10157_s7 + $0xd4] ss:$20 sps:$4 sm:$0xff]  }
 0x13c   : > { %4457 = vmatprep.mubr.bf16.mxu0 %v10751_v23  ;;  %4695 = vmatpush1.bf16.msra.mxu1 %v9767_v30  ;;  %v10771_v23 = vcombine.low %v225_v15, %v229_v36  ;;  %13445 = vst [vmem:[#allocation78_spill] sm:$0xff] %v10775_v6  ;;  %v9775_v30 = vld [vmem:[%s10157_s7 + $0xa8] ss:$20 sps:$4 sm:$0xff]  }
 0x13d   : > { %5907 = vmatpush1.bf16.msra.mxu0 %v9770_v21  ;;  %4696 = vmatprep.subr.bf16.mxu1 %v9773_v49  ;;  %13442 = vst [vmem:[#allocation75_spill] sm:$0xff] %v10769_v7  ;;  %13444 = vst [vmem:[#allocation77_spill] sm:$0xff] %v10773_v8  ;;  %v9778_v21 = vld [vmem:[%s10157_s7 + $0xb0] ss:$20 sps:$4 sm:$0xff]   ;;  %v239_v12 = vld [vmem:[%s10134_s24 + $0x108] sm:$0xff] }
 0x13e   : > { %5908 = vmatprep.subr.bf16.mxu0 %v13437_v56  ;;  %13443 = vst [vmem:[#allocation76_spill] sm:$0xff] %v10771_v23  ;;  %v243_v15 = vld [vmem:[%s10134_s24 + $0x128] sm:$0xff]  ;;  %v241_v36 = vld [vmem:[%s10134_s24 + $0x118] sm:$0xff] }
 0x13f   : > { %v245_v49 = vld [vmem:[%s10134_s24 + $0x138] sm:$0xff] }
 0x140   : > { %4697 = vmatpush1.bf16.msra.mxu1 %v9771_v51  ;;  %v9782_v51 = vld [vmem:[%s10157_s7 + $0xd8] ss:$20 sps:$4 sm:$0xff]  }
 0x141   : > { %5909 = vmatpush1.bf16.msra.mxu0 %v9774_v53  ;;  %4698 = vmatprep.subr.bf16.mxu1 %v9777_v33  ;;  %v9779_v33 = vld [vmem:[%s10157_s7 + $0xd0] ss:$20 sps:$4 sm:$0xff]  }
 0x142   : > { %5910 = vmatprep.subr.bf16.mxu0 %v13437_v56  ;;  %3888 = vmatmul.mubr.bf16.gmra.mrb[8].mxu1 %v10769_v7  ;;  %v9785_v53 = vld [vmem:[%s10157_s7 + $0xfc] ss:$20 sps:$4 sm:$0xff]   ;;  %v10799_v7 = vcombine.high %v241_v36, %v245_v49 }
 0x143   : > { %4458 = vmatmul.mubr.bf16.gmra.mrb[8].mxu0 %v10771_v23  ;;  %3897 = vmatprep.mubr.bf16.mxu1 %v10773_v8  ;;  %v10793_v23 = vcombine.low %v231_v27, %v235_v35  ;;  %v10797_v8 = vcombine.high %v239_v12, %v243_v15  ;;  %v9789_v27 = vld [vmem:[%s10157_s7 + $0x124] ss:$20 sps:$4 sm:$0xff]   ;;  %v247_v35 = vld [vmem:[%s10134_s24 + $0x148] sm:$0xff] }
 0x144   : > { %4467 = vmatprep.mubr.bf16.mxu0 %v10775_v6  ;;  %4699 = vmatpush1.bf16.msra.mxu1 %v9775_v30  ;;  %v10795_v6 = vcombine.low %v233_v1, %v237_v59  ;;  %13449 = vst [vmem:[#allocation82_spill] sm:$0xff] %v10799_v7  ;;  %v9783_v30 = vld [vmem:[%s10157_s7 + $0xf8] ss:$20 sps:$4 sm:$0xff]  }
 0x145   : > { %5911 = vmatpush1.bf16.msra.mxu0 %v9778_v21  ;;  %4700 = vmatprep.subr.bf16.mxu1 %v9781_v17  ;;  %13446 = vst [vmem:[#allocation79_spill] sm:$0xff] %v10793_v23  ;;  %13448 = vst [vmem:[#allocation81_spill] sm:$0xff] %v10797_v8  ;;  %v9786_v21 = vld [vmem:[%s10157_s7 + $0x100] ss:$20 sps:$4 sm:$0xff]   ;;  %v251_v1 = vld [vmem:[%s10134_s24 + $0x168] sm:$0xff] }
 0x146   : > { %5912 = vmatprep.subr.bf16.mxu0 %v13437_v56  ;;  %13447 = vst [vmem:[#allocation80_spill] sm:$0xff] %v10795_v6  ;;  %v249_v59 = vld [vmem:[%s10134_s24 + $0x158] sm:$0xff] }
 0x147   : > { %v253_v17 = vld [vmem:[%s10134_s24 + $0x178] sm:$0xff] }
 0x148   : > { %4701 = vmatpush1.bf16.msra.mxu1 %v9779_v33  ;;  %v9787_v33 = vld [vmem:[%s10157_s7 + $0x120] ss:$20 sps:$4 sm:$0xff]  }
 0x149   : > { %5913 = vmatpush1.bf16.msra.mxu0 %v9782_v51  ;;  %4702 = vmatprep.subr.bf16.mxu1 %v9785_v53  ;;  %v9790_v51 = vld [vmem:[%s10157_s7 + $0x128] ss:$20 sps:$4 sm:$0xff]   ;;  %v9793_v53 = vld [vmem:[%s10157_s7 + $0x14c] ss:$20 sps:$4 sm:$0xff]  }
 0x14a   : > { %5914 = vmatprep.subr.bf16.mxu0 %v13437_v56  ;;  %3898 = vmatmul.mubr.bf16.gmra.mrb[12].mxu1 %v10793_v23  ;;  %v10823_v23 = vcombine.high %v249_v59, %v253_v17 }
 0x14b   : > { %4468 = vmatmul.mubr.bf16.gmra.mrb[12].mxu0 %v10795_v6  ;;  %3907 = vmatprep.mubr.bf16.mxu1 %v10797_v8  ;;  %v10817_v6 = vcombine.low %v239_v12, %v243_v15  ;;  %v10821_v8 = vcombine.high %v247_v35, %v251_v1  ;;  %v9797_v12 = vld [vmem:[%s10157_s7 + $0x174] ss:$20 sps:$4 sm:$0xff]  }
 0x14c   : > { %4477 = vmatprep.mubr.bf16.mxu0 %v10799_v7  ;;  %4703 = vmatpush1.bf16.msra.mxu1 %v9783_v30  ;;  %v10819_v7 = vcombine.low %v241_v36, %v245_v49  ;;  %13453 = vst [vmem:[#allocation86_spill] sm:$0xff] %v10823_v23  ;;  %v9791_v30 = vld [vmem:[%s10157_s7 + $0x148] ss:$20 sps:$4 sm:$0xff]  }
 0x14d   : > { %5915 = vmatpush1.bf16.msra.mxu0 %v9786_v21  ;;  %4704 = vmatprep.subr.bf16.mxu1 %v9789_v27  ;;  %13450 = vst [vmem:[#allocation83_spill] sm:$0xff] %v10817_v6  ;;  %13452 = vst [vmem:[#allocation85_spill] sm:$0xff] %v10821_v8  ;;  %v9794_v21 = vld [vmem:[%s10157_s7 + $0x150] ss:$20 sps:$4 sm:$0xff]   ;;  %v255_v15 = vld [vmem:[%s10134_s24 + $0x188] sm:$0xff] }
 0x14e   : > { %5916 = vmatprep.subr.bf16.mxu0 %v13437_v56  ;;  %13451 = vst [vmem:[#allocation84_spill] sm:$0xff] %v10819_v7  ;;  %v259_v36 = vld [vmem:[%s10134_s24 + $0x1a8] sm:$0xff]  ;;  %v257_v49 = vld [vmem:[%s10134_s24 + $0x198] sm:$0xff] }
 0x14f   : > { %v261_v27 = vld [vmem:[%s10134_s24 + $0x1b8] sm:$0xff] }
 0x150   : > { %4705 = vmatpush1.bf16.msra.mxu1 %v9787_v33  ;;  %v9795_v33 = vld [vmem:[%s10157_s7 + $0x170] ss:$20 sps:$4 sm:$0xff]  }
 0x151   : > { %5917 = vmatpush1.bf16.msra.mxu0 %v9790_v51  ;;  %4706 = vmatprep.subr.bf16.mxu1 %v9793_v53  ;;  %v9798_v51 = vld [vmem:[%s10157_s7 + $0x178] ss:$20 sps:$4 sm:$0xff]   ;;  %v9801_v53 = vld [vmem:[%s10157_s7 + $0x19c] ss:$20 sps:$4 sm:$0xff]  }
 0x152   : > { %5918 = vmatprep.subr.bf16.mxu0 %v13437_v56  ;;  %3908 = vmatmul.mubr.bf16.gmra.mrb[16].mxu1 %v10817_v6  ;;  %v10847_v6 = vcombine.high %v257_v49, %v261_v27 }
 0x153   : > { %4478 = vmatmul.mubr.bf16.gmra.mrb[16].mxu0 %v10819_v7  ;;  %3917 = vmatprep.mubr.bf16.mxu1 %v10821_v8  ;;  %v10841_v7 = vcombine.low %v247_v35, %v251_v1  ;;  %v10845_v8 = vcombine.high %v255_v15, %v259_v36  ;;  %v9805_v35 = vld [vmem:[%s10157_s7 + $0x1c4] ss:$20 sps:$4 sm:$0xff]   ;;  %v263_v1 = vld [vmem:[%s10134_s24 + $0x1c8] sm:$0xff] }
 0x154   : > { %4487 = vmatprep.mubr.bf16.mxu0 %v10823_v23  ;;  %4707 = vmatpush1.bf16.msra.mxu1 %v9791_v30  ;;  %v10843_v23 = vcombine.low %v249_v59, %v253_v17  ;;  %13457 = vst [vmem:[#allocation90_spill] sm:$0xff] %v10847_v6  ;;  %v9799_v30 = vld [vmem:[%s10157_s7 + $0x198] ss:$20 sps:$4 sm:$0xff]  }
 0x155   : > { %5919 = vmatpush1.bf16.msra.mxu0 %v9794_v21  ;;  %4708 = vmatprep.subr.bf16.mxu1 %v9797_v12  ;;  %13454 = vst [vmem:[#allocation87_spill] sm:$0xff] %v10841_v7  ;;  %13456 = vst [vmem:[#allocation89_spill] sm:$0xff] %v10845_v8  ;;  %v9802_v21 = vld [vmem:[%s10157_s7 + $0x1a0] ss:$20 sps:$4 sm:$0xff]   ;;  %v267_v59 = vld [vmem:[%s10134_s24 + $0x1e8] sm:$0xff] }
 0x156   : > { %5920 = vmatprep.subr.bf16.mxu0 %v13437_v56  ;;  %13455 = vst [vmem:[#allocation88_spill] sm:$0xff] %v10843_v23  ;;  %v265_v17 = vld [vmem:[%s10134_s24 + $0x1d8] sm:$0xff] }
 0x157   : > { %v269_v12 = vld [vmem:[%s10134_s24 + $0x1f8] sm:$0xff] }
 0x158   : > { %4709 = vmatpush1.bf16.msra.mxu1 %v9795_v33  ;;  %v9803_v33 = vld [vmem:[%s10157_s7 + $0x1c0] ss:$20 sps:$4 sm:$0xff]  }
 0x159   : > { %5921 = vmatpush1.bf16.msra.mxu0 %v9798_v51  ;;  %4710 = vmatprep.subr.bf16.mxu1 %v9801_v53  ;;  %v9806_v51 = vld [vmem:[%s10157_s7 + $0x1c8] ss:$20 sps:$4 sm:$0xff]   ;;  %v9809_v53 = vld [vmem:[%s10157_s7 + $0x1ec] ss:$20 sps:$4 sm:$0xff]  }
 0x15a   : > { %5922 = vmatprep.subr.bf16.mxu0 %v13437_v56  ;;  %3918 = vmatmul.mubr.bf16.gmra.mrb[20].mxu1 %v10841_v7  ;;  %v10871_v7 = vcombine.high %v265_v17, %v269_v12 }
 0x15b   : > { %4488 = vmatmul.mubr.bf16.gmra.mrb[20].mxu0 %v10843_v23  ;;  %3927 = vmatprep.mubr.bf16.mxu1 %v10845_v8  ;;  %v10865_v23 = vcombine.low %v255_v15, %v259_v36  ;;  %v10869_v8 = vcombine.high %v263_v1, %v267_v59  ;;  %v9813_v15 = vld [vmem:[%s10157_s7 + $0x214] ss:$20 sps:$4 sm:$0xff]  }
 0x15c   : > { %4497 = vmatprep.mubr.bf16.mxu0 %v10847_v6  ;;  %4711 = vmatpush1.bf16.msra.mxu1 %v9799_v30  ;;  %v10867_v6 = vcombine.low %v257_v49, %v261_v27  ;;  %13460 = vst [vmem:[#allocation93_spill] sm:$0xff] %v10871_v7  ;;  %v9807_v30 = vld [vmem:[%s10157_s7 + $0x1e8] ss:$20 sps:$4 sm:$0xff]  }
 0x15d   : > { %5923 = vmatpush1.bf16.msra.mxu0 %v9802_v21  ;;  %4712 = vmatprep.subr.bf16.mxu1 %v9805_v35  ;;  %13459 = vst [vmem:[#allocation92_spill] sm:$0xff] %v10869_v8  ;;  %v9810_v21 = vld [vmem:[%s10157_s7 + $0x1f0] ss:$20 sps:$4 sm:$0xff]   ;;  %v271_v36 = vld [vmem:[%s10134_s24 + $0x208] sm:$0xff]  ;;  %v273_v27 = vld [vmem:[%s10134_s24 + $0x218] sm:$0xff] }
 0x15e   : > { %5924 = vmatprep.subr.bf16.mxu0 %v13437_v56  ;;  %13458 = vst [vmem:[#allocation91_spill] sm:$0xff] %v10867_v6  ;;  %v275_v49 = vld [vmem:[%s10134_s24 + $0x228] sm:$0xff]  ;;  %v277_v35 = vld [vmem:[%s10134_s24 + $0x238] sm:$0xff] }
 0x160   : > { %4713 = vmatpush1.bf16.msra.mxu1 %v9803_v33  ;;  %v9811_v33 = vld [vmem:[%s10157_s7 + $0x210] ss:$20 sps:$4 sm:$0xff]  }
 0x161   : > { %5925 = vmatpush1.bf16.msra.mxu0 %v9806_v51  ;;  %4714 = vmatprep.subr.bf16.mxu1 %v9809_v53  ;;  %v9814_v51 = vld [vmem:[%s10157_s7 + $0x218] ss:$20 sps:$4 sm:$0xff]   ;;  %v10888_v53 = vcombine.low %v263_v1, %v267_v59 }
 0x162   : > { %5926 = vmatprep.subr.bf16.mxu0 %v13437_v56  ;;  %3928 = vmatmul.mubr.bf16.gmra.mrb[24].mxu1 %v10865_v23  ;;  %v279_v1 = vld [vmem:[%s10134_s24 + $0x248] sm:$0xff] }
 0x163   : > { %4498 = vmatmul.mubr.bf16.gmra.mrb[24].mxu0 %v10867_v6  ;;  %3937 = vmatprep.mubr.bf16.mxu1 %v10869_v8  ;;  %v10892_v6 = vcombine.high %v271_v36, %v275_v49  ;;  %v10894_v8 = vcombine.high %v273_v27, %v277_v35  ;;  %v283_v59 = vld [vmem:[%s10134_s24 + $0x268] sm:$0xff] }
 0x164   : > { %4507 = vmatprep.mubr.bf16.mxu0 %v10871_v7  ;;  %4715 = vmatpush1.bf16.msra.mxu1 %v9807_v30  ;;  %v10890_v7 = vcombine.low %v265_v17, %v269_v12  ;;  %v9815_v30 = vld [vmem:[%s10157_s7 + $0x238] ss:$20 sps:$4 sm:$0xff]  }
 0x165   : > { %5927 = vmatpush1.bf16.msra.mxu0 %v9810_v21  ;;  %4716 = vmatprep.subr.bf16.mxu1 %v9813_v15  ;;  %13462 = vst [vmem:[#allocation95_spill] sm:$0xff] %v10892_v6  ;;  %13463 = vst [vmem:[#allocation96_spill] sm:$0xff] %v10894_v8  ;;  %v9817_v21 = vld [vmem:[%s10157_s7 + $0x23c] ss:$20 sps:$4 sm:$0xff]   ;;  %v10907_v15 = vcombine.low %v271_v36, %v275_v49  ;;  %v291_v36 = vld [vmem:[%s10134_s24 + $0x2a8] sm:$0xff] }
 0x166   : > { %5928 = vmatprep.subr.bf16.mxu0 %v13437_v56  ;;  %13461 = vst [vmem:[#allocation94_spill] sm:$0xff] %v10890_v7  ;;  %v281_v17 = vld [vmem:[%s10134_s24 + $0x258] sm:$0xff] }
 0x167   : > { %v285_v12 = vld [vmem:[%s10134_s24 + $0x278] sm:$0xff]  ;;  %13464 = vst [vmem:[#allocation97_spill] sm:$0xff] %v10907_v15 }
 0x168   : > { %4717 = vmatpush1.bf16.msra.mxu1 %v9811_v33  ;;  %v10909_v33 = vcombine.low %v273_v27, %v277_v35  ;;  %v289_v49 = vld [vmem:[%s10134_s24 + $0x298] sm:$0xff]  ;;  %v10925_v35 = vcombine.low %v279_v1, %v283_v59 }
 0x169   : > { %5929 = vmatpush1.bf16.msra.mxu0 %v9814_v51  ;;  %4718 = vmatprep.subr.bf16.mxu1 %v9817_v21  ;;  %v10911_v51 = vcombine.high %v279_v1, %v283_v59  ;;  %v293_v27 = vld [vmem:[%s10134_s24 + $0x2b8] sm:$0xff]  ;;  %v10927_v21 = vcombine.low %v281_v17, %v285_v12  ;;  %v299_v1 = vld [vmem:[%s10134_s24 + $0x2e8] sm:$0xff] }
 0x16a   : > { %5930 = vmatprep.subr.bf16.mxu0 %v13437_v56  ;;  %3938 = vmatmul.mubr.bf16.gmra.mrb[28].mxu1 %v10888_v53  ;;  %13465 = vst [vmem:[#allocation98_spill] sm:$0xff] %v10909_v33  ;;  %13468 = vst [vmem:[#allocation101_spill] sm:$0xff] %v10925_v35  ;;  %v297_v59 = vld [vmem:[%s10134_s24 + $0x2d8] sm:$0xff] }
 0x16b   : > { %4508 = vmatmul.mubr.bf16.gmra.mrb[28].mxu0 %v10890_v7  ;;  %3947 = vmatprep.mubr.bf16.mxu1 %v10892_v6  ;;  %13466 = vst [vmem:[#allocation99_spill] sm:$0xff] %v10911_v51  ;;  %v10913_v7 = vcombine.high %v281_v17, %v285_v12  ;;  %13469 = vst [vmem:[#allocation102_spill] sm:$0xff] %v10927_v21  ;;  %v301_v17 = vld [vmem:[%s10134_s24 + $0x2f8] sm:$0xff] }
 0x16c   : > { %4517 = vmatprep.mubr.bf16.mxu0 %v10894_v8  ;;  %4719 = vmatpush1.bf16.msra.mxu1 %v9815_v30  ;;  %v9818_v8 = vld [vmem:[%s10157_s7 + $0x240] ss:$20 sps:$4 sm:$0xff]   ;;  %v287_v30 = vld [vmem:[%s10134_s24 + $0x288] sm:$0xff]  ;;  %v10949_v6 = vcombine.high %v297_v59, %v301_v17 }
 0x16d   : > { %13467 = vst [vmem:[#allocation100_spill] sm:$0xff] %v10913_v7  ;;  %5931 = vmatpush1.bf16.msra.mxu0 %v9818_v8  ;;  %v295_v8 = vld [vmem:[%s10134_s24 + $0x2c8] sm:$0xff]  ;;  %v10943_v12 = vcombine.low %v287_v30, %v291_v36 }
 0x16e   : > { %5932 = vmatprep.subr.bf16.mxu0 %v13437_v56  ;;  %13475 = vst [vmem:[#allocation108_spill] sm:$0xff] %v10949_v6 }
 0x16f   : > { %13472 = vst [vmem:[#allocation105_spill] sm:$0xff] %v10943_v12 }
 0x172   : > { %3948 = vmatmul.mubr.bf16.gmra.mrb[32].mxu1 %v10907_v15  ;;  %v9821_v15 = vld [vmem:[%s10157_s7 + $0x264] ss:$20 sps:$4 sm:$0xff]  }
 0x173   : > { %4518 = vmatmul.mubr.bf16.gmra.mrb[32].mxu0 %v10909_v33  ;;  %3957 = vmatprep.mubr.bf16.mxu1 %v10911_v51  ;;  %v10929_v33 = vcombine.high %v287_v30, %v291_v36  ;;  %v10931_v51 = vcombine.high %v289_v49, %v293_v27  ;;  %v305_v30 = vld [vmem:[%s10134_s24 + $0x318] sm:$0xff] }
 0x174   : > { %4527 = vmatprep.mubr.bf16.mxu0 %v10913_v7  ;;  %v9819_v7 = vld [vmem:[%s10157_s7 + $0x260] ss:$20 sps:$4 sm:$0xff]   ;;  %4720 = vmatprep.subr.bf16.mxu1 %v9821_v15  ;;  %v307_v15 = vld [vmem:[%s10134_s24 + $0x328] sm:$0xff]  ;;  %v309_v36 = vld [vmem:[%s10134_s24 + $0x338] sm:$0xff] }
 0x175   : > { %13470 = vst [vmem:[#allocation103_spill] sm:$0xff] %v10929_v33  ;;  %13471 = vst [vmem:[#allocation104_spill] sm:$0xff] %v10931_v51  ;;  %4721 = vmatpush1.bf16.msra.mxu1 %v9819_v7  ;;  %v303_v7 = vld [vmem:[%s10134_s24 + $0x308] sm:$0xff] }
 0x17a   : > { %3958 = vmatmul.mubr.bf16.gmra.mrb[36].mxu1 %v10925_v35  ;;  %v10947_v35 = vcombine.high %v295_v8, %v299_v1 }
 0x17b   : > { %4528 = vmatmul.mubr.bf16.gmra.mrb[36].mxu0 %v10927_v21  ;;  %3965 = vmatprep.mubr.bf16.mxu1 %v10929_v33  ;;  %v10945_v21 = vcombine.low %v289_v49, %v293_v27  ;;  %v10961_v49 = vcombine.low %v295_v8, %v299_v1  ;;  %v10963_v27 = vcombine.low %v297_v59, %v301_v17  ;;  %v315_v8 = vld [vmem:[%s10134_s24 + $0x368] sm:$0xff]  ;;  %v313_v1 = vld [vmem:[%s10134_s24 + $0x358] sm:$0xff] }
 0x17c   : > { %4535 = vmatprep.mubr.bf16.mxu0 %v10931_v51  ;;  %13474 = vst [vmem:[#allocation107_spill] sm:$0xff] %v10947_v35  ;;  %v9822_v51 = vld [vmem:[%s10157_s7 + $0x268] ss:$20 sps:$4 sm:$0xff]   ;;  %v10978_v17 = vcombine.low %v303_v7, %v307_v15 }
 0x17d   : > { %13473 = vst [vmem:[#allocation106_spill] sm:$0xff] %v10945_v21  ;;  %5933 = vmatpush1.bf16.msra.mxu0 %v9822_v51  ;;  %13476 = vst [vmem:[#allocation109_spill] sm:$0xff] %v10961_v49  ;;  %v311_v51 = vld [vmem:[%s10134_s24 + $0x348] sm:$0xff]  ;;  %v317_v59 = vld [vmem:[%s10134_s24 + $0x378] sm:$0xff] }
 0x17e   : > { %6115 = vmatprep.subr.bf16.mxu0 %v13437_v56  ;;  %13477 = vst [vmem:[#allocation110_spill] sm:$0xff] %v10963_v27  ;;  %13480 = vst [vmem:[#allocation113_spill] sm:$0xff] %v10978_v17  ;;  %v421_v33 = vld [vmem:[%s10134_s24 + $0x6b8] sm:$0xff] }
 0x182   : > { %3966 = vmatmul.mubr.bf16.gmra.mrb[40].mxu1 %v10943_v12  ;;  %v10980_v12 = vcombine.low %v305_v30, %v309_v36 }
 0x183   : > { %4536 = vmatmul.mubr.bf16.gmra.mrb[40].mxu0 %v10945_v21  ;;  %3973 = vmatprep.mubr.bf16.mxu1 %v10947_v35  ;;  %v10965_v21 = vcombine.high %v303_v7, %v307_v15  ;;  %v10967_v35 = vcombine.high %v305_v30, %v309_v36  ;;  %v323_v7 = vld [vmem:[%s10134_s24 + $0x3a8] sm:$0xff]  ;;  %v321_v15 = vld [vmem:[%s10134_s24 + $0x398] sm:$0xff]  ;;  %v10994_v36 = vcombine.low %v311_v51, %v315_v8 }
 0x184   : > { %4543 = vmatprep.mubr.bf16.mxu0 %v10949_v6  ;;  %v9825_v6 = vld [vmem:[%s10157_s7 + $0x28c] ss:$20 sps:$4 sm:$0xff]   ;;  %13481 = vst [vmem:[#allocation114_spill] sm:$0xff] %v10980_v12  ;;  %v325_v30 = vld [vmem:[%s10134_s24 + $0x3b8] sm:$0xff] }
 0x185   : > { %13478 = vst [vmem:[#allocation111_spill] sm:$0xff] %v10965_v21  ;;  %13479 = vst [vmem:[#allocation112_spill] sm:$0xff] %v10967_v35  ;;  %4993 = vmatprep.subr.bf16.mxu1 %v9825_v6  ;;  %v319_v6 = vld [vmem:[%s10134_s24 + $0x388] sm:$0xff] }
 0x186   : > { %13484 = vst [vmem:[#allocation117_spill] sm:$0xff] %v10994_v36 }
 0x18a   : > { %3974 = vmatmul.mubr.bf16.gmra.mrb[44].mxu1 %v10961_v49  ;;  %v10982_v49 = vcombine.high %v311_v51, %v315_v8  ;;  %v327_v51 = vld [vmem:[%s10134_s24 + $0x3c8] sm:$0xff] }
 0x18b   : > { %4544 = vmatmul.mubr.bf16.gmra.mrb[44].mxu0 %v10963_v27  ;;  %3981 = vmatprep.mubr.bf16.mxu1 %v10965_v21  ;;  %v10984_v27 = vcombine.high %v313_v1, %v317_v59  ;;  %v10998_v21 = vcombine.high %v319_v6, %v323_v7  ;;  %v331_v8 = vld [vmem:[%s10134_s24 + $0x3e8] sm:$0xff] }
 0x18c   : > { %4551 = vmatprep.mubr.bf16.mxu0 %v10967_v35  ;;  %13482 = vst [vmem:[#allocation115_spill] sm:$0xff] %v10982_v49  ;;  %v10996_v35 = vcombine.low %v313_v1, %v317_v59  ;;  %v329_v1 = vld [vmem:[%s10134_s24 + $0x3d8] sm:$0xff] }
 0x18d   : > { %13483 = vst [vmem:[#allocation116_spill] sm:$0xff] %v10984_v27  ;;  %13486 = vst [vmem:[#allocation119_spill] sm:$0xff] %v10998_v21  ;;  %v333_v59 = vld [vmem:[%s10134_s24 + $0x3f8] sm:$0xff] }
 0x18e   : > { %13485 = vst [vmem:[#allocation118_spill] sm:$0xff] %v10996_v35 }
 0x192   : > { %3982 = vmatmul.mubr.bf16.gmra.mrb[48].mxu1 %v10978_v17  ;;  %v11000_v17 = vcombine.high %v321_v15, %v325_v30 }
 0x193   : > { %4552 = vmatmul.mubr.bf16.gmra.mrb[48].mxu0 %v10980_v12  ;;  %3989 = vmatprep.mubr.bf16.mxu1 %v10982_v49  ;;  %v11012_v12 = vcombine.low %v321_v15, %v325_v30  ;;  %v11014_v49 = vcombine.high %v327_v51, %v331_v8  ;;  %v337_v15 = vld [vmem:[%s10134_s24 + $0x418] sm:$0xff] }
 0x194   : > { %4559 = vmatprep.mubr.bf16.mxu0 %v10984_v27  ;;  %13487 = vst [vmem:[#allocation120_spill] sm:$0xff] %v11000_v17  ;;  %v11010_v27 = vcombine.low %v319_v6, %v323_v7  ;;  %v335_v6 = vld [vmem:[%s10134_s24 + $0x408] sm:$0xff]  ;;  %v341_v30 = vld [vmem:[%s10134_s24 + $0x438] sm:$0xff] }
 0x195   : > { %13489 = vst [vmem:[#allocation122_spill] sm:$0xff] %v11012_v12  ;;  %13490 = vst [vmem:[#allocation123_spill] sm:$0xff] %v11014_v49  ;;  %v339_v7 = vld [vmem:[%s10134_s24 + $0x428] sm:$0xff] }
 0x196   : > { %13488 = vst [vmem:[#allocation121_spill] sm:$0xff] %v11010_v27 }
 0x19a   : > { %3990 = vmatmul.mubr.bf16.gmra.mrb[52].mxu1 %v10994_v36  ;;  %v11016_v36 = vcombine.high %v329_v1, %v333_v59 }
 0x19b   : > { %4560 = vmatmul.mubr.bf16.gmra.mrb[52].mxu0 %v10996_v35  ;;  %3998 = vmatprep.mubr.bf16.mxu1 %v10998_v21  ;;  %v11028_v35 = vcombine.low %v329_v1, %v333_v59  ;;  %v11030_v21 = vcombine.high %v335_v6, %v339_v7  ;;  %v345_v1 = vld [vmem:[%s10134_s24 + $0x458] sm:$0xff] }
 0x19c   : > { %4568 = vmatprep.mubr.bf16.mxu0 %v11000_v17  ;;  %13491 = vst [vmem:[#allocation124_spill] sm:$0xff] %v11016_v36  ;;  %v11026_v17 = vcombine.low %v327_v51, %v331_v8  ;;  %v343_v51 = vld [vmem:[%s10134_s24 + $0x448] sm:$0xff]  ;;  %v349_v59 = vld [vmem:[%s10134_s24 + $0x478] sm:$0xff] }
 0x19d   : > { %13493 = vst [vmem:[#allocation126_spill] sm:$0xff] %v11028_v35  ;;  %13494 = vst [vmem:[#allocation127_spill] sm:$0xff] %v11030_v21  ;;  %v347_v8 = vld [vmem:[%s10134_s24 + $0x468] sm:$0xff] }
 0x19e   : > { %13492 = vst [vmem:[#allocation125_spill] sm:$0xff] %v11026_v17 }
 0x1a2   : > { %3999 = vmatmul.mubr.bf16.gmra.mrb[56].mxu1 %v11010_v27  ;;  %v11032_v27 = vcombine.high %v337_v15, %v341_v30 }
 0x1a3   : > { %4569 = vmatmul.mubr.bf16.gmra.mrb[56].mxu0 %v11012_v12  ;;  %4008 = vmatprep.mubr.bf16.mxu1 %v11014_v49  ;;  %v11044_v12 = vcombine.low %v337_v15, %v341_v30  ;;  %v11046_v49 = vcombine.high %v343_v51, %v347_v8  ;;  %v353_v15 = vld [vmem:[%s10134_s24 + $0x498] sm:$0xff] }
 0x1a4   : > { %4578 = vmatprep.mubr.bf16.mxu0 %v11016_v36  ;;  %13495 = vst [vmem:[#allocation128_spill] sm:$0xff] %v11032_v27  ;;  %v11042_v36 = vcombine.low %v335_v6, %v339_v7  ;;  %v351_v6 = vld [vmem:[%s10134_s24 + $0x488] sm:$0xff]  ;;  %v357_v30 = vld [vmem:[%s10134_s24 + $0x4b8] sm:$0xff] }
 0x1a5   : > { %13497 = vst [vmem:[#allocation130_spill] sm:$0xff] %v11044_v12  ;;  %13498 = vst [vmem:[#allocation131_spill] sm:$0xff] %v11046_v49  ;;  %v355_v7 = vld [vmem:[%s10134_s24 + $0x4a8] sm:$0xff] }
 0x1a6   : > { %13496 = vst [vmem:[#allocation129_spill] sm:$0xff] %v11042_v36 }
 0x1aa   : > { %4009 = vmatmul.mubr.bf16.gmra.mrb[60].mxu1 %v11026_v17  ;;  %v11048_v17 = vcombine.high %v345_v1, %v349_v59 }
 0x1ab   : > { %4579 = vmatmul.mubr.bf16.gmra.mrb[60].mxu0 %v11028_v35  ;;  %4018 = vmatprep.mubr.bf16.mxu1 %v11030_v21  ;;  %v11060_v35 = vcombine.low %v345_v1, %v349_v59  ;;  %v11062_v21 = vcombine.high %v351_v6, %v355_v7  ;;  %v361_v1 = vld [vmem:[%s10134_s24 + $0x4d8] sm:$0xff] }
 0x1ac   : > { %4588 = vmatprep.mubr.bf16.mxu0 %v11032_v27  ;;  %13499 = vst [vmem:[#allocation132_spill] sm:$0xff] %v11048_v17  ;;  %v11058_v27 = vcombine.low %v343_v51, %v347_v8  ;;  %v359_v51 = vld [vmem:[%s10134_s24 + $0x4c8] sm:$0xff]  ;;  %v365_v59 = vld [vmem:[%s10134_s24 + $0x4f8] sm:$0xff] }
 0x1ad   : > { %13501 = vst [vmem:[#allocation134_spill] sm:$0xff] %v11060_v35  ;;  %13502 = vst [vmem:[#allocation135_spill] sm:$0xff] %v11062_v21  ;;  %v363_v8 = vld [vmem:[%s10134_s24 + $0x4e8] sm:$0xff] }
 0x1ae   : > { %13500 = vst [vmem:[#allocation133_spill] sm:$0xff] %v11058_v27 }
 0x1b2   : > { %4019 = vmatmul.mubr.bf16.gmra.mrb[64].mxu1 %v11042_v36  ;;  %v11064_v36 = vcombine.high %v353_v15, %v357_v30 }
 0x1b3   : > { %4589 = vmatmul.mubr.bf16.gmra.mrb[64].mxu0 %v11044_v12  ;;  %4028 = vmatprep.mubr.bf16.mxu1 %v11046_v49  ;;  %v11076_v12 = vcombine.low %v353_v15, %v357_v30  ;;  %v11078_v49 = vcombine.high %v359_v51, %v363_v8  ;;  %v369_v15 = vld [vmem:[%s10134_s24 + $0x518] sm:$0xff] }
 0x1b4   : > { %4598 = vmatprep.mubr.bf16.mxu0 %v11048_v17  ;;  %13503 = vst [vmem:[#allocation136_spill] sm:$0xff] %v11064_v36  ;;  %v11074_v17 = vcombine.low %v351_v6, %v355_v7  ;;  %v367_v6 = vld [vmem:[%s10134_s24 + $0x508] sm:$0xff]  ;;  %v373_v30 = vld [vmem:[%s10134_s24 + $0x538] sm:$0xff] }
 0x1b5   : > { %13505 = vst [vmem:[#allocation138_spill] sm:$0xff] %v11076_v12  ;;  %13506 = vst [vmem:[#allocation139_spill] sm:$0xff] %v11078_v49  ;;  %v371_v7 = vld [vmem:[%s10134_s24 + $0x528] sm:$0xff] }
 0x1b6   : > { %13504 = vst [vmem:[#allocation137_spill] sm:$0xff] %v11074_v17 }
 0x1ba   : > { %4029 = vmatmul.mubr.bf16.gmra.mrb[68].mxu1 %v11058_v27  ;;  %v11080_v27 = vcombine.high %v361_v1, %v365_v59 }
 0x1bb   : > { %4599 = vmatmul.mubr.bf16.gmra.mrb[68].mxu0 %v11060_v35  ;;  %4038 = vmatprep.mubr.bf16.mxu1 %v11062_v21  ;;  %v11092_v35 = vcombine.low %v361_v1, %v365_v59  ;;  %v11094_v21 = vcombine.high %v367_v6, %v371_v7  ;;  %v377_v1 = vld [vmem:[%s10134_s24 + $0x558] sm:$0xff] }
 0x1bc   : > { %4608 = vmatprep.mubr.bf16.mxu0 %v11064_v36  ;;  %13507 = vst [vmem:[#allocation140_spill] sm:$0xff] %v11080_v27  ;;  %v11090_v36 = vcombine.low %v359_v51, %v363_v8  ;;  %v375_v51 = vld [vmem:[%s10134_s24 + $0x548] sm:$0xff]  ;;  %v381_v59 = vld [vmem:[%s10134_s24 + $0x578] sm:$0xff] }
 0x1bd   : > { %13509 = vst [vmem:[#allocation142_spill] sm:$0xff] %v11092_v35  ;;  %13510 = vst [vmem:[#allocation143_spill] sm:$0xff] %v11094_v21  ;;  %v379_v8 = vld [vmem:[%s10134_s24 + $0x568] sm:$0xff] }
 0x1be   : > { %13508 = vst [vmem:[#allocation141_spill] sm:$0xff] %v11090_v36 }
 0x1c2   : > { %4039 = vmatmul.mubr.bf16.gmra.mrb[72].mxu1 %v11074_v17  ;;  %v11096_v17 = vcombine.high %v369_v15, %v373_v30 }
 0x1c3   : > { %4609 = vmatmul.mubr.bf16.gmra.mrb[72].mxu0 %v11076_v12  ;;  %4048 = vmatprep.mubr.bf16.mxu1 %v11078_v49  ;;  %v11108_v12 = vcombine.low %v369_v15, %v373_v30  ;;  %v11110_v49 = vcombine.high %v375_v51, %v379_v8  ;;  %v385_v15 = vld [vmem:[%s10134_s24 + $0x598] sm:$0xff] }
 0x1c4   : > { %4618 = vmatprep.mubr.bf16.mxu0 %v11080_v27  ;;  %13511 = vst [vmem:[#allocation144_spill] sm:$0xff] %v11096_v17  ;;  %v11106_v27 = vcombine.low %v367_v6, %v371_v7  ;;  %v383_v6 = vld [vmem:[%s10134_s24 + $0x588] sm:$0xff]  ;;  %v389_v30 = vld [vmem:[%s10134_s24 + $0x5b8] sm:$0xff] }
 0x1c5   : > { %13513 = vst [vmem:[#allocation146_spill] sm:$0xff] %v11108_v12  ;;  %13514 = vst [vmem:[#allocation147_spill] sm:$0xff] %v11110_v49  ;;  %v387_v7 = vld [vmem:[%s10134_s24 + $0x5a8] sm:$0xff] }
 0x1c6   : > { %13512 = vst [vmem:[#allocation145_spill] sm:$0xff] %v11106_v27 }
 0x1ca   : > { %4049 = vmatmul.mubr.bf16.gmra.mrb[76].mxu1 %v11090_v36  ;;  %v11112_v36 = vcombine.high %v377_v1, %v381_v59 }
 0x1cb   : > { %4619 = vmatmul.mubr.bf16.gmra.mrb[76].mxu0 %v11092_v35  ;;  %4058 = vmatprep.mubr.bf16.mxu1 %v11094_v21  ;;  %v11124_v35 = vcombine.low %v377_v1, %v381_v59  ;;  %v11126_v21 = vcombine.high %v383_v6, %v387_v7  ;;  %v393_v1 = vld [vmem:[%s10134_s24 + $0x5d8] sm:$0xff] }
 0x1cc   : > { %4628 = vmatprep.mubr.bf16.mxu0 %v11096_v17  ;;  %13515 = vst [vmem:[#allocation148_spill] sm:$0xff] %v11112_v36  ;;  %v11122_v17 = vcombine.low %v375_v51, %v379_v8  ;;  %v391_v51 = vld [vmem:[%s10134_s24 + $0x5c8] sm:$0xff]  ;;  %v397_v59 = vld [vmem:[%s10134_s24 + $0x5f8] sm:$0xff] }
 0x1cd   : > { %13517 = vst [vmem:[#allocation150_spill] sm:$0xff] %v11124_v35  ;;  %13518 = vst [vmem:[#allocation151_spill] sm:$0xff] %v11126_v21  ;;  %v395_v8 = vld [vmem:[%s10134_s24 + $0x5e8] sm:$0xff] }
 0x1ce   : > { %13516 = vst [vmem:[#allocation149_spill] sm:$0xff] %v11122_v17 }
 0x1d2   : > { %4059 = vmatmul.mubr.bf16.gmra.mrb[80].mxu1 %v11106_v27  ;;  %v11128_v27 = vcombine.high %v385_v15, %v389_v30 }
 0x1d3   : > { %4629 = vmatmul.mubr.bf16.gmra.mrb[80].mxu0 %v11108_v12  ;;  %4068 = vmatprep.mubr.bf16.mxu1 %v11110_v49  ;;  %v11140_v12 = vcombine.low %v385_v15, %v389_v30  ;;  %v11142_v49 = vcombine.high %v391_v51, %v395_v8  ;;  %v401_v15 = vld [vmem:[%s10134_s24 + $0x618] sm:$0xff] }
 0x1d4   : > { %4638 = vmatprep.mubr.bf16.mxu0 %v11112_v36  ;;  %13519 = vst [vmem:[#allocation152_spill] sm:$0xff] %v11128_v27  ;;  %v11138_v36 = vcombine.low %v383_v6, %v387_v7  ;;  %v399_v6 = vld [vmem:[%s10134_s24 + $0x608] sm:$0xff]  ;;  %v405_v30 = vld [vmem:[%s10134_s24 + $0x638] sm:$0xff] }
 0x1d5   : > { %13521 = vst [vmem:[#allocation154_spill] sm:$0xff] %v11140_v12  ;;  %13522 = vst [vmem:[#allocation155_spill] sm:$0xff] %v11142_v49  ;;  %v403_v7 = vld [vmem:[%s10134_s24 + $0x628] sm:$0xff] }
 0x1d6   : > { %13520 = vst [vmem:[#allocation153_spill] sm:$0xff] %v11138_v36 }
 0x1da   : > { %4069 = vmatmul.mubr.bf16.gmra.mrb[84].mxu1 %v11122_v17  ;;  %v11144_v17 = vcombine.high %v393_v1, %v397_v59 }
 0x1db   : > { %4639 = vmatmul.mubr.bf16.gmra.mrb[84].mxu0 %v11124_v35  ;;  %4078 = vmatprep.mubr.bf16.mxu1 %v11126_v21  ;;  %v11156_v35 = vcombine.low %v393_v1, %v397_v59  ;;  %v11158_v21 = vcombine.high %v399_v6, %v403_v7  ;;  %v409_v1 = vld [vmem:[%s10134_s24 + $0x658] sm:$0xff] }
 0x1dc   : > { %4648 = vmatprep.mubr.bf16.mxu0 %v11128_v27  ;;  %13523 = vst [vmem:[#allocation156_spill] sm:$0xff] %v11144_v17  ;;  %v11154_v27 = vcombine.low %v391_v51, %v395_v8  ;;  %v407_v51 = vld [vmem:[%s10134_s24 + $0x648] sm:$0xff]  ;;  %v413_v59 = vld [vmem:[%s10134_s24 + $0x678] sm:$0xff] }
 0x1dd   : > { %13525 = vst [vmem:[#allocation158_spill] sm:$0xff] %v11156_v35  ;;  %13526 = vst [vmem:[#allocation159_spill] sm:$0xff] %v11158_v21  ;;  %v411_v8 = vld [vmem:[%s10134_s24 + $0x668] sm:$0xff] }
 0x1de   : > { %13524 = vst [vmem:[#allocation157_spill] sm:$0xff] %v11154_v27 }
 0x1e2   : > { %4079 = vmatmul.mubr.bf16.gmra.mrb[88].mxu1 %v11138_v36  ;;  %v11160_v36 = vcombine.high %v401_v15, %v405_v30 }
 0x1e3   : > { %4649 = vmatmul.mubr.bf16.gmra.mrb[88].mxu0 %v11140_v12  ;;  %4087 = vmatprep.mubr.bf16.mxu1 %v11142_v49  ;;  %v11172_v12 = vcombine.low %v401_v15, %v405_v30  ;;  %v11174_v49 = vcombine.high %v407_v51, %v411_v8 }
 0x1e4   : > { %4657 = vmatprep.mubr.bf16.mxu0 %v11144_v17  ;;  %13527 = vst [vmem:[#allocation160_spill] sm:$0xff] %v11160_v36  ;;  %v11170_v17 = vcombine.low %v399_v6, %v403_v7  ;;  %v11186_v6 = vcombine.low %v407_v51, %v411_v8  ;;  %v11188_v7 = vcombine.low %v409_v1, %v413_v59 }
 0x1e5   : > { %13528 = vst [vmem:[#allocation161_spill] sm:$0xff] %v11172_v12 }
 0x1e6   : > { %13530 = vst [vmem:[#allocation163_spill] sm:$0xff] %v11186_v6  ;;  %13531 = vst [vmem:[#allocation164_spill] sm:$0xff] %v11188_v7 }
 0x1ea   : > { %4088 = vmatmul.mubr.bf16.gmra.mrb[92].mxu1 %v11154_v27  ;;  %v11176_v27 = vcombine.high %v409_v1, %v413_v59 }
 0x1eb   : > { %4658 = vmatmul.mubr.bf16.gmra.mrb[92].mxu0 %v11156_v35  ;;  %4095 = vmatprep.mubr.bf16.mxu1 %v11158_v21  ;;  %v419_v35 = vld [vmem:[%s10134_s24 + $0x6a8] sm:$0xff]  ;;  %v417_v21 = vld [vmem:[%s10134_s24 + $0x698] sm:$0xff] }
 0x1ec   : > { %4665 = vmatprep.mubr.bf16.mxu0 %v11160_v36  ;;  %13529 = vst [vmem:[#allocation162_spill] sm:$0xff] %v11176_v27  ;;  %v415_v36 = vld [vmem:[%s10134_s24 + $0x688] sm:$0xff]  ;;  %v11192_v30 = vcombine.high %v417_v21, %v421_v33  ;;  %s10068_s24 = smov 42  }
 0x1ed   : > { %v11190_v15 = vcombine.high %v415_v36, %v419_v35 }
 0x1ee   : > { %13533 = vst [vmem:[#allocation166_spill] sm:$0xff] %v11192_v30 }
 0x1ef   : > { %13532 = vst [vmem:[#allocation165_spill] sm:$0xff] %v11190_v15 }
 0x1f2   : > { %4096 = vmatmul.mubr.bf16.gmra.mrb[96].mxu1 %v11170_v17 }
 0x1f3   : > { %4666 = vmatmul.mubr.bf16.gmra.mrb[96].mxu0 %v11172_v12  ;;  %4103 = vmatprep.mubr.bf16.mxu1 %v11174_v49  ;;  %v11200_v12 = vcombine.low %v417_v21, %v421_v33 }
 0x1f4   : > { %4673 = vmatprep.mubr.bf16.mxu0 %v11176_v27  ;;  %v11198_v27 = vcombine.low %v415_v36, %v419_v35 }
 0x1f5   : > { %13535 = vst [vmem:[#allocation168_spill] sm:$0xff] %v11200_v12 }
 0x1f6   : > { %13534 = vst [vmem:[#allocation167_spill] sm:$0xff] %v11198_v27 }
 0x1fa   : > { %4104 = vmatmul.mubr.bf16.gmra.mrb[100].mxu1 %v11186_v6  ;;  %v9829_v6 = vld [vmem:[%s10157_s7 + $0x2b4] ss:$20 sps:$4 sm:$0xff]  }
 0x1fb   : > { %4674 = vmatmul.mubr.bf16.gmra.mrb[100].mxu0 %v11188_v7  ;;  %4111 = vmatprep.mubr.bf16.mxu1 %v11190_v15  ;;  %v9826_v15 = vld [vmem:[%s10157_s7 + $0x290] ss:$20 sps:$4 sm:$0xff]  }
 0x1fc   : > { %4681 = vmatprep.mubr.bf16.mxu0 %v11192_v30  ;;  %v9823_v30 = vld [vmem:[%s10157_s7 + $0x288] ss:$20 sps:$4 sm:$0xff]  }
 0x202   : > { %4112 = vmatmul.mubr.bf16.gmra.mrb[104].mxu1 %v11198_v27 }
 0x203   : > { %4682 = vmatmul.mubr.bf16.gmra.mrb[104].mxu0 %v11200_v12  ;;  %4722 = vmatprep.mubr.bf16.mxu1 %v10139_v3 }
 0x204   : > { %5934 = vmatprep.mubr.bf16.mxu0 %v10139_v3 }
 0x205   : > { %v3869_v51 = vpop.f32.mrb[0].mxu1 }
 0x206   : > { %v4439_v8 = vpop.f32.mrb[0].mxu0  ;;  %v3871_v59 = vpop.f32.mrb[1].mxu1 }
 0x207   : > { %v11206_v1 = vadd.f32 %v4439_v8, %v3869_v51  ;;  %v4441_v35 = vpop.f32.mrb[1].mxu0  ;;  %v3873_v33 = vpop.f32.mrb[2].mxu1  ;;  %v9827_v51 = vld [vmem:[%s10157_s7 + $0x2b0] ss:$20 sps:$4 sm:$0xff]   ;;  %v9830_v8 = vld [vmem:[%s10157_s7 + $0x2b8] ss:$20 sps:$4 sm:$0xff]  }
 0x208   : > { %v11208_v36 = vadd.f32 %v4441_v35, %v3871_v59  ;;  %v4443_v21 = vpop.f32.mrb[2].mxu0  ;;  %v3875_v7 = vpop.f32.mrb[3].mxu1  ;;  %v9833_v59 = vld [vmem:[%s10157_s7 + $0x2dc] ss:$20 sps:$4 sm:$0xff]  }
 0x209   : > { %13536 = vst [vmem:[#allocation169_spill] sm:$0xff] %v11206_v1  ;;  %v11211_v12 = vadd.f32 %v4443_v21, %v3873_v33  ;;  %v4445_v27 = vpop.f32.mrb[3].mxu0 }
 0x20a   : > { %v11214_v3 = vadd.f32 %v4445_v27, %v3875_v7  ;;  %4723 = vmatmul.mubr.bf16.vlgmr.msra.gmra.mrb[108].mxu1 %v10142_v5 }
 0x20b   : > { %13537 = vst [vmem:[#allocation170_spill] sm:$0xff] %v11211_v12  ;;  %5935 = vmatmul.mubr.bf16.vlgmr.msra.gmra.mrb[108].mxu0 %v10142_v5  ;;  %4994 = vmatpush1.bf16.msra.mxu1 %v9823_v30 }
 0x20c   : > { %13538 = vst [vmem:[#allocation171_spill] sm:$0xff] %v11214_v3  ;;  %4732 = vmatprep.mubr.bf16.mxu1 %v10231_v19  ;;  %5940 = vmatprep.mubr.bf16.mxu0 %v10231_v19  ;;  %v9831_v3 = vld [vmem:[%s10157_s7 + $0x2d8] ss:$20 sps:$4 sm:$0xff]  }
 0x20d   : > { %6116 = vmatpush1.bf16.msra.mxu0 %v9826_v15  ;;  %v3879_v35 = vpop.f32.mrb[4].mxu1  ;;  %4995 = vmatprep.subr.bf16.mxu1 %v9829_v6 }
 0x20e   : > { %v4449_v33 = vpop.f32.mrb[4].mxu0  ;;  %6117 = vmatprep.subr.bf16.mxu0 %v13437_v56  ;;  %v3881_v5 = vpop.f32.mrb[5].mxu1 }
 0x20f   : > { %v11225_v27 = vadd.f32 %v4449_v33, %v3879_v35  ;;  %v4451_v7 = vpop.f32.mrb[5].mxu0  ;;  %v3883_v21 = vpop.f32.mrb[6].mxu1  ;;  %4996 = vmatpush1.bf16.msra.mxu1 %v9827_v51  ;;  %v9834_v35 = vld [vmem:[%s10157_s7 + $0x2e0] ss:$20 sps:$4 sm:$0xff]   ;;  %v9837_v33 = vld [vmem:[%s10157_s7 + $0x304] ss:$20 sps:$4 sm:$0xff]  }
 0x210   : > { %v11227_v30 = vadd.f32 %v4451_v7, %v3881_v5  ;;  %v4453_v12 = vpop.f32.mrb[6].mxu0  ;;  %v3885_v19 = vpop.f32.mrb[7].mxu1  ;;  %4997 = vmatprep.subr.bf16.mxu1 %v9833_v59  ;;  %v9838_v59 = vld [vmem:[%s10157_s7 + $0x308] ss:$20 sps:$4 sm:$0xff]  }
 0x211   : > { %13539 = vst [vmem:[#allocation172_spill] sm:$0xff] %v11225_v27  ;;  %v4455_v15 = vpop.f32.mrb[7].mxu0  ;;  %v8760_v1 = vadd.f32 %v4453_v12, %v3883_v21  ;;  %6118 = vmatpush1.bf16.msra.mxu0 %v9830_v8  ;;  %v9835_v12 = vld [vmem:[%s10157_s7 + $0x300] ss:$20 sps:$4 sm:$0xff]  }
 0x212   : > { %v8761_v6 = vadd.f32 %v4455_v15, %v3885_v19  ;;  %6119 = vmatprep.subr.bf16.mxu0 %v13437_v56  ;;  %4733 = vmatmul.mubr.bf16.gmra.mrb[112].mxu1 %v10250_v32 }
 0x213   : > { %5941 = vmatmul.mubr.bf16.gmra.mrb[112].mxu0 %v10250_v32  ;;  %6766 = vrot.lane.b32.xlu0 %v8760_v1, %s10058_s8 }
 0x214   : > { %4742 = vmatprep.mubr.bf16.mxu1 %v10254_v34  ;;  %5946 = vmatprep.mubr.bf16.mxu0 %v10254_v34 }
 0x215   : > { %4998 = vmatpush1.bf16.msra.mxu1 %v9831_v3  ;;  %v3889_v51 = vpop.f32.mrb[8].mxu1  ;;  %6120 = vmatpush1.bf16.msra.mxu0 %v9834_v35  ;;  %v9841_v35 = vld [vmem:[%s10157_s7 + $0x32c] ss:$20 sps:$4 sm:$0xff]  }
 0x216   : > { %v4459_v8 = vpop.f32.mrb[8].mxu0  ;;  %4999 = vmatprep.subr.bf16.mxu1 %v9837_v33  ;;  %v3891_v21 = vpop.f32.mrb[9].mxu1  ;;  %6121 = vmatprep.subr.bf16.mxu0 %v13437_v56 }
 0x217   : > { %v8762_v5 = vadd.f32 %v4459_v8, %v3889_v51  ;;  %v4461_v7 = vpop.f32.mrb[9].mxu0  ;;  %6768 = vrot.lane.b32.xlu0 %v8761_v6, %s10058_s8  ;;  %v3893_v1 = vpop.f32.mrb[10].mxu1  ;;  %v9839_v51 = vld [vmem:[%s10157_s7 + $0x328] ss:$20 sps:$4 sm:$0xff]   ;;  %v9842_v8 = vld [vmem:[%s10157_s7 + $0x330] ss:$20 sps:$4 sm:$0xff]  }
 0x218   : > { %v8763_v32 = vadd.f32 %v4461_v7, %v3891_v21  ;;  %v4463_v34 = vpop.f32.mrb[10].mxu0  ;;  %v3895_v19 = vpop.f32.mrb[11].mxu1  ;;  %v9845_v6 = vld [vmem:[%s10157_s7 + $0x354] ss:$20 sps:$4 sm:$0xff]  }
 0x219   : > { %v8764_v3 = vadd.f32 %v4463_v34, %v3893_v1  ;;  %v4465_v15 = vpop.f32.mrb[11].mxu0  ;;  %5000 = vmatpush1.bf16.msra.mxu1 %v9835_v12  ;;  %6122 = vmatpush1.bf16.msra.mxu0 %v9838_v59  ;;  %v9843_v59 = vld [vmem:[%s10157_s7 + $0x350] ss:$20 sps:$4 sm:$0xff]  }
 0x21a   : > { %v8765_v33 = vadd.f32 %v4465_v15, %v3895_v19  ;;  %6776 = vrot.lane.b32.xlu1 %v8763_v32, %s10058_s8  ;;  %4743 = vmatmul.mubr.bf16.gmra.mrb[116].mxu1 %v10274_v48 }
 0x21b   : > { %5947 = vmatmul.mubr.bf16.gmra.mrb[116].mxu0 %v10274_v48  ;;  %6774 = vrot.lane.b32.xlu0 %v8762_v5, %s10058_s8 }
 0x21c   : > { %4752 = vmatprep.mubr.bf16.mxu1 %v10278_v50  ;;  %5952 = vmatprep.mubr.bf16.mxu0 %v10278_v50 }
 0x21d   : > { %5001 = vmatprep.subr.bf16.mxu1 %v9841_v35  ;;  %v3899_v7 = vpop.f32.mrb[12].mxu1  ;;  %6123 = vmatprep.subr.bf16.mxu0 %v13437_v56  ;;  %v9846_v35 = vld [vmem:[%s10157_s7 + $0x358] ss:$20 sps:$4 sm:$0xff]  }
 0x21e   : > { %v4469_v12 = vpop.f32.mrb[12].mxu0  ;;  %6784 = vrot.lane.b32.xlu1 %v8765_v33, %s10058_s8  ;;  %5002 = vmatpush1.bf16.msra.mxu1 %v9839_v51  ;;  %v3901_v1 = vpop.f32.mrb[13].mxu1  ;;  %v9849_v51 = vld [vmem:[%s10157_s7 + $0x37c] ss:$20 sps:$4 sm:$0xff]  }
 0x21f   : > { %v8766_v21 = vadd.f32 %v4469_v12, %v3899_v7  ;;  %v4471_v32 = vpop.f32.mrb[13].mxu0  ;;  %5003 = vmatprep.subr.bf16.mxu1 %v9845_v6  ;;  %6782 = vrot.lane.b32.xlu0 %v8764_v3, %s10058_s8  ;;  %v3903_v50 = vpop.f32.mrb[14].mxu1  ;;  %v9847_v3 = vld [vmem:[%s10157_s7 + $0x378] ss:$20 sps:$4 sm:$0xff]  }
 0x220   : > { %v8767_v48 = vadd.f32 %v4471_v32, %v3901_v1  ;;  %v4473_v5 = vpop.f32.mrb[14].mxu0  ;;  %6124 = vmatpush1.bf16.msra.mxu0 %v9842_v8  ;;  %v3905_v19 = vpop.f32.mrb[15].mxu1  ;;  %v9853_v6 = vld [vmem:[%s10157_s7 + $0x3a4] ss:$20 sps:$4 sm:$0xff]   ;;  %v9850_v8 = vld [vmem:[%s10157_s7 + $0x380] ss:$20 sps:$4 sm:$0xff]  }
 0x221   : > { %v8768_v34 = vadd.f32 %v4473_v5, %v3903_v50  ;;  %v4475_v15 = vpop.f32.mrb[15].mxu0  ;;  %6125 = vmatprep.subr.bf16.mxu0 %v13437_v56 }
 0x222   : > { %v8769_v33 = vadd.f32 %v4475_v15, %v3905_v19  ;;  %6838 = vrot.lane.b32.xlu1 %v8767_v48, %s10059_s9  ;;  %5004 = vmatpush1.bf16.msra.mxu1 %v9843_v59  ;;  %v9851_v19 = vld [vmem:[%s10157_s7 + $0x3a0] ss:$20 sps:$4 sm:$0xff]  }
 0x223   : > { %4753 = vmatmul.mubr.bf16.gmra.mrb[120].mxu1 %v10298_v0  ;;  %5953 = vmatmul.mubr.bf16.gmra.mrb[120].mxu0 %v10298_v0 }
 0x224   : > { %6836 = vrot.lane.b32.xlu0 %v8766_v21, %s10059_s9  ;;  %4762 = vmatprep.mubr.bf16.mxu1 %v10302_v2 }
 0x225   : > { %5958 = vmatprep.mubr.bf16.mxu0 %v10302_v2  ;;  %6126 = vmatpush1.bf16.msra.mxu0 %v9846_v35  ;;  %v3909_v7 = vpop.f32.mrb[16].mxu1  ;;  %v9854_v35 = vld [vmem:[%s10157_s7 + $0x3a8] ss:$20 sps:$4 sm:$0xff]  }
 0x226   : > { %v4479_v12 = vpop.f32.mrb[16].mxu0  ;;  %6846 = vrot.lane.b32.xlu1 %v8769_v33, %s10059_s9  ;;  %5005 = vmatprep.subr.bf16.mxu1 %v9849_v51  ;;  %v3911_v1 = vpop.f32.mrb[17].mxu1  ;;  %v9855_v33 = vld [vmem:[%s10157_s7 + $0x3c8] ss:$20 sps:$4 sm:$0xff]  }
 0x227   : > { %v8770_v59 = vadd.f32 %v4479_v12, %v3909_v7  ;;  %v4481_v32 = vpop.f32.mrb[17].mxu0  ;;  %5006 = vmatpush1.bf16.msra.mxu1 %v9847_v3  ;;  %6127 = vmatprep.subr.bf16.mxu0 %v13437_v56  ;;  %v3913_v2 = vpop.f32.mrb[18].mxu1 }
 0x228   : > { %6844 = vrot.lane.b32.xlu0 %v8768_v34, %s10059_s9  ;;  %v8771_v0 = vadd.f32 %v4481_v32, %v3911_v1  ;;  %v4483_v21 = vpop.f32.mrb[18].mxu0  ;;  %5007 = vmatprep.subr.bf16.mxu1 %v9853_v6  ;;  %v3915_v50 = vpop.f32.mrb[19].mxu1  ;;  %v9857_v34 = vld [vmem:[%s10157_s7 + $0x3cc] ss:$20 sps:$4 sm:$0xff]   ;;  %v9858_v6 = vld [vmem:[%s10157_s7 + $0x3d0] ss:$20 sps:$4 sm:$0xff]  }
 0x229   : > { %v8772_v48 = vadd.f32 %v4483_v21, %v3913_v2  ;;  %v4485_v5 = vpop.f32.mrb[19].mxu0  ;;  %6128 = vmatpush1.bf16.msra.mxu0 %v9850_v8  ;;  %v9861_v2 = vld [vmem:[%s10157_s7 + $0x3f4] ss:$20 sps:$4 sm:$0xff]  }
 0x22a   : > { %v8773_v15 = vadd.f32 %v4485_v5, %v3915_v50  ;;  %6854 = vrot.lane.b32.xlu1 %v8771_v0, %s10059_s9  ;;  %6129 = vmatprep.subr.bf16.mxu0 %v13437_v56  ;;  %v9859_v50 = vld [vmem:[%s10157_s7 + $0x3f0] ss:$20 sps:$4 sm:$0xff]   ;;  %v9862_v5 = vld [vmem:[%s10157_s7 + $0x3f8] ss:$20 sps:$4 sm:$0xff]  }
 0x22b   : > { %4763 = vmatmul.mubr.bf16.gmra.mrb[124].mxu1 %v10322_v22  ;;  %5959 = vmatmul.mubr.bf16.gmra.mrb[124].mxu0 %v10322_v22 }
 0x22c   : > { %6852 = vrot.lane.b32.xlu0 %v8770_v59, %s10059_s9  ;;  %4772 = vmatprep.mubr.bf16.mxu1 %v10326_v24 }
 0x22d   : > { %5964 = vmatprep.mubr.bf16.mxu0 %v10326_v24  ;;  %5008 = vmatpush1.bf16.msra.mxu1 %v9851_v19  ;;  %v3919_v3 = vpop.f32.mrb[20].mxu1 }
 0x22e   : > { %v4489_v51 = vpop.f32.mrb[20].mxu0  ;;  %6908 = vrot.lane.b32.xlu1 %v8773_v15, %s10060_s10  ;;  %6130 = vmatpush1.bf16.msra.mxu0 %v9854_v35  ;;  %v3921_v22 = vpop.f32.mrb[21].mxu1  ;;  %v9863_v35 = vld [vmem:[%s10157_s7 + $0x418] ss:$20 sps:$4 sm:$0xff]  }
 0x22f   : > { %v8774_v8 = vadd.f32 %v4489_v51, %v3919_v3  ;;  %v4491_v12 = vpop.f32.mrb[21].mxu0  ;;  %5009 = vmatprep.subr.bf16.mxu1 %v9857_v34  ;;  %6131 = vmatprep.subr.bf16.mxu0 %v13437_v56  ;;  %v3923_v7 = vpop.f32.mrb[22].mxu1 }
 0x230   : > { %6906 = vrot.lane.b32.xlu0 %v8772_v48, %s10060_s10  ;;  %v8775_v24 = vadd.f32 %v4491_v12, %v3921_v22  ;;  %v4493_v59 = vpop.f32.mrb[22].mxu0  ;;  %v3925_v1 = vpop.f32.mrb[23].mxu1  ;;  %v9865_v48 = vld [vmem:[%s10157_s7 + $0x41c] ss:$20 sps:$4 sm:$0xff]   ;;  %v9866_v22 = vld [vmem:[%s10157_s7 + $0x420] ss:$20 sps:$4 sm:$0xff]  }
 0x231   : > { %v8776_v32 = vadd.f32 %v4493_v59, %v3923_v7  ;;  %v4495_v0 = vpop.f32.mrb[23].mxu0  ;;  %5010 = vmatpush1.bf16.msra.mxu1 %v9855_v33  ;;  %v9869_v7 = vld [vmem:[%s10157_s7 + $0x444] ss:$20 sps:$4 sm:$0xff]   ;;  %v9867_v59 = vld [vmem:[%s10157_s7 + $0x440] ss:$20 sps:$4 sm:$0xff]  }
 0x232   : > { %v8777_v21 = vadd.f32 %v4495_v0, %v3925_v1  ;;  %6916 = vrot.lane.b32.xlu1 %v8775_v24, %s10060_s10  ;;  %6132 = vmatpush1.bf16.msra.mxu0 %v9858_v6  ;;  %v9870_v1 = vld [vmem:[%s10157_s7 + $0x448] ss:$20 sps:$4 sm:$0xff]  }
 0x233   : > { %4773 = vmatmul.mubr.bf16.gmra.mrb[128].mxu1 %v10346_v42  ;;  %5965 = vmatmul.mubr.bf16.gmra.mrb[128].mxu0 %v10346_v42 }
 0x234   : > { %6914 = vrot.lane.b32.xlu0 %v8774_v8, %s10060_s10  ;;  %4782 = vmatprep.mubr.bf16.mxu1 %v10352_v46 }
 0x235   : > { %5970 = vmatprep.mubr.bf16.mxu0 %v10352_v46  ;;  %5011 = vmatprep.subr.bf16.mxu1 %v9861_v2  ;;  %v3929_v15 = vpop.f32.mrb[24].mxu1 }
 0x236   : > { %v4499_v19 = vpop.f32.mrb[24].mxu0  ;;  %6924 = vrot.lane.b32.xlu1 %v8777_v21, %s10060_s10  ;;  %5012 = vmatpush1.bf16.msra.mxu1 %v9859_v50  ;;  %v3931_v51 = vpop.f32.mrb[25].mxu1 }
 0x237   : > { %v8778_v34 = vadd.f32 %v4499_v19, %v3929_v15  ;;  %v4501_v33 = vpop.f32.mrb[25].mxu0  ;;  %6133 = vmatprep.subr.bf16.mxu0 %v13437_v56  ;;  %5013 = vmatprep.subr.bf16.mxu1 %v9865_v48  ;;  %v3933_v46 = vpop.f32.mrb[26].mxu1 }
 0x238   : > { %6922 = vrot.lane.b32.xlu0 %v8776_v32, %s10060_s10  ;;  %v8779_v42 = vadd.f32 %v4501_v33, %v3931_v51  ;;  %v4503_v3 = vpop.f32.mrb[26].mxu0  ;;  %6134 = vmatpush1.bf16.msra.mxu0 %v9862_v5  ;;  %v3935_v8 = vpop.f32.mrb[27].mxu1  ;;  %v9873_v32 = vld [vmem:[%s10157_s7 + $0x46c] ss:$20 sps:$4 sm:$0xff]   ;;  %v9874_v51 = vld [vmem:[%s10157_s7 + $0x470] ss:$20 sps:$4 sm:$0xff]  }
 0x239   : > { %v8780_v6 = vadd.f32 %v4503_v3, %v3933_v46  ;;  %v4505_v12 = vpop.f32.mrb[27].mxu0  ;;  %6135 = vmatprep.subr.bf16.mxu0 %v13437_v56  ;;  %v9875_v46 = vld [vmem:[%s10157_s7 + $0x490] ss:$20 sps:$4 sm:$0xff]  }
 0x23a   : > { %v8781_v24 = vadd.f32 %v4505_v12, %v3935_v8  ;;  %6978 = vrot.lane.b32.xlu1 %v8779_v42, %s10061_s11  ;;  %5014 = vmatpush1.bf16.msra.mxu1 %v9863_v35  ;;  %v9877_v42 = vld [vmem:[%s10157_s7 + $0x494] ss:$20 sps:$4 sm:$0xff]   ;;  %v9878_v8 = vld [vmem:[%s10157_s7 + $0x498] ss:$20 sps:$4 sm:$0xff]  }
 0x23b   : > { %4783 = vmatmul.mubr.bf16.gmra.mrb[132].mxu1 %v10370_v62  ;;  %5971 = vmatmul.mubr.bf16.gmra.mrb[132].mxu0 %v10370_v62 }
 0x23c   : > { %6976 = vrot.lane.b32.xlu0 %v8778_v34, %s10061_s11  ;;  %4792 = vmatprep.mubr.bf16.mxu1 %v10376_v10  ;;  %v9871_v34 = vld [vmem:[%s10157_s7 + $0x468] ss:$20 sps:$4 sm:$0xff]  }
 0x23d   : > { %5976 = vmatprep.mubr.bf16.mxu0 %v10376_v10  ;;  %6136 = vmatpush1.bf16.msra.mxu0 %v9866_v22  ;;  %v3939_v2 = vpop.f32.mrb[28].mxu1 }
 0x23e   : > { %v4509_v0 = vpop.f32.mrb[28].mxu0  ;;  %6986 = vrot.lane.b32.xlu1 %v8781_v24, %s10061_s11  ;;  %5015 = vmatprep.subr.bf16.mxu1 %v9869_v7  ;;  %v3941_v48 = vpop.f32.mrb[29].mxu1 }
 0x23f   : > { %v8782_v21 = vadd.f32 %v4509_v0, %v3939_v2  ;;  %v4511_v50 = vpop.f32.mrb[29].mxu0  ;;  %5016 = vmatpush1.bf16.msra.mxu1 %v9867_v59  ;;  %6137 = vmatprep.subr.bf16.mxu0 %v13437_v56  ;;  %v3943_v10 = vpop.f32.mrb[30].mxu1  ;;  %v9881_v0 = vld [vmem:[%s10157_s7 + $0x4bc] ss:$20 sps:$4 sm:$0xff]  }
 0x240   : > { %6984 = vrot.lane.b32.xlu0 %v8780_v6, %s10061_s11  ;;  %v8783_v62 = vadd.f32 %v4511_v50, %v3941_v48  ;;  %v4513_v5 = vpop.f32.mrb[30].mxu0  ;;  %5017 = vmatprep.subr.bf16.mxu1 %v9873_v32  ;;  %v3945_v15 = vpop.f32.mrb[31].mxu1 }
 0x241   : > { %v8784_v19 = vadd.f32 %v4513_v5, %v3943_v10  ;;  %v4515_v35 = vpop.f32.mrb[31].mxu0  ;;  %6138 = vmatpush1.bf16.msra.mxu0 %v9870_v1 }
 0x242   : > { %v8785_v33 = vadd.f32 %v4515_v35, %v3945_v15  ;;  %6994 = vrot.lane.b32.xlu1 %v8783_v62, %s10061_s11  ;;  %6139 = vmatprep.subr.bf16.mxu0 %v13437_v56  ;;  %v9882_v15 = vld [vmem:[%s10157_s7 + $0x4c0] ss:$20 sps:$4 sm:$0xff]  }
 0x243   : > { %4793 = vmatmul.mubr.bf16.gmra.mrb[136].mxu1 %v10392_v26  ;;  %5977 = vmatmul.mubr.bf16.gmra.mrb[136].mxu0 %v10392_v26 }
 0x244   : > { %6992 = vrot.lane.b32.xlu0 %v8782_v21, %s10061_s11  ;;  %4802 = vmatprep.mubr.bf16.mxu1 %v10396_v28  ;;  %v9879_v21 = vld [vmem:[%s10157_s7 + $0x4b8] ss:$20 sps:$4 sm:$0xff]  }
 0x245   : > { %5982 = vmatprep.mubr.bf16.mxu0 %v10396_v28  ;;  %5018 = vmatpush1.bf16.msra.mxu1 %v9871_v34  ;;  %v3949_v6 = vpop.f32.mrb[32].mxu1 }
 0x246   : > { %v4519_v3 = vpop.f32.mrb[32].mxu0  ;;  %7048 = vrot.lane.b32.xlu1 %v8785_v33, %s10062_s13  ;;  %6140 = vmatpush1.bf16.msra.mxu0 %v9874_v51  ;;  %v3951_v26 = vpop.f32.mrb[33].mxu1 }
 0x247   : > { %v8786_v12 = vadd.f32 %v4519_v3, %v3949_v6  ;;  %v4521_v22 = vpop.f32.mrb[33].mxu0  ;;  %5019 = vmatprep.subr.bf16.mxu1 %v9877_v42  ;;  %6141 = vmatprep.subr.bf16.mxu0 %v13437_v56  ;;  %v3953_v24 = vpop.f32.mrb[34].mxu1  ;;  %v9883_v3 = vld [vmem:[%s10157_s7 + $0x4e0] ss:$20 sps:$4 sm:$0xff]   ;;  %v9885_v6 = vld [vmem:[%s10157_s7 + $0x4e4] ss:$20 sps:$4 sm:$0xff]  }
 0x248   : > { %7046 = vrot.lane.b32.xlu0 %v8784_v19, %s10062_s13  ;;  %v8787_v28 = vadd.f32 %v4521_v22, %v3951_v26  ;;  %v4523_v7 = vpop.f32.mrb[34].mxu0  ;;  %v3955_v32 = vpop.f32.mrb[35].mxu1 }
 0x249   : > { %v8788_v59 = vadd.f32 %v4523_v7, %v3953_v24  ;;  %v4525_v1 = vpop.f32.mrb[35].mxu0  ;;  %5020 = vmatpush1.bf16.msra.mxu1 %v9875_v46 }
 0x24a   : > { %v8789_v2 = vadd.f32 %v4525_v1, %v3955_v32  ;;  %7056 = vrot.lane.b32.xlu1 %v8787_v28, %s10062_s13  ;;  %6142 = vmatpush1.bf16.msra.mxu0 %v9878_v8 }
 0x24b   : > { %4803 = vmatmul.mubr.bf16.gmra.mrb[140].mxu1 %v10410_v40  ;;  %5983 = vmatmul.mubr.bf16.gmra.mrb[140].mxu0 %v10410_v40 }
 0x24c   : > { %7054 = vrot.lane.b32.xlu0 %v8786_v12, %s10062_s13  ;;  %4812 = vmatprep.mubr.bf16.mxu1 %v10414_v44 }
 0x24d   : > { %5988 = vmatprep.mubr.bf16.mxu0 %v10414_v44  ;;  %5021 = vmatprep.subr.bf16.mxu1 %v9881_v0  ;;  %v3959_v48 = vpop.f32.mrb[36].mxu1 }
 0x24e   : > { %v4529_v50 = vpop.f32.mrb[36].mxu0  ;;  %7064 = vrot.lane.b32.xlu1 %v8789_v2, %s10062_s13  ;;  %5022 = vmatpush1.bf16.msra.mxu1 %v9879_v21  ;;  %v3960_v10 = vpop.f32.mrb[37].mxu1 }
 0x24f   : > { %v4530_v62 = vpop.f32.mrb[37].mxu0  ;;  %6143 = vmatprep.subr.bf16.mxu0 %v13437_v56  ;;  %v3962_v5 = vpop.f32.mrb[38].mxu1  ;;  %5023 = vmatprep.subr.bf16.mxu1 %v9885_v6 }
 0x250   : > { %7062 = vrot.lane.b32.xlu0 %v8788_v59, %s10062_s13  ;;  %v8790_v40 = vadd.f32 %v4530_v62, %v3960_v10  ;;  %v4532_v19 = vpop.f32.mrb[38].mxu0  ;;  %v3963_v35 = vpop.f32.mrb[39].mxu1  ;;  %6144 = vmatpush1.bf16.msra.mxu0 %v9882_v15 }
 0x251   : > { %v4533_v44 = vpop.f32.mrb[39].mxu0  ;;  %6145 = vmatprep.subr.bf16.mxu0 %v13437_v56 }
 0x252   : > { %v8791_v34 = vadd.f32 %v4533_v44, %v3963_v35  ;;  %5024 = vmatpush1.bf16.msra.mxu1 %v9883_v3 }
 0x253   : > { %4813 = vmatmul.mubr.bf16.gmra.mrb[144].mxu1 %v10428_v58  ;;  %5989 = vmatmul.mubr.bf16.gmra.mrb[144].mxu0 %v10428_v58 }
 0x254   : > { %7116 = vrot.lane.b32.xlu0 %v8790_v40, %s10063_s19  ;;  %4822 = vmatprep.mubr.bf16.mxu1 %v10432_v60 }
 0x255   : > { %5996 = vmatprep.mubr.bf16.mxu0 %v10432_v60  ;;  %v3967_v33 = vpop.f32.mrb[40].mxu1  ;;  %v9886_v60 = vld [vmem:[%s10157_s7 + $0x4e8] ss:$20 sps:$4 sm:$0xff]  }
 0x256   : > { %v4537_v51 = vpop.f32.mrb[40].mxu0  ;;  %v3968_v46 = vpop.f32.mrb[41].mxu1  ;;  %6146 = vmatpush1.bf16.msra.mxu0 %v9886_v60 }
 0x257   : > { %v4538_v42 = vpop.f32.mrb[41].mxu0  ;;  %v3970_v58 = vpop.f32.mrb[42].mxu1  ;;  %6328 = vmatprep.subr.bf16.mxu0 %v13437_v56 }
 0x258   : > { %7124 = vrot.lane.b32.xlu0 %v8791_v34, %s10063_s19  ;;  %v8792_v8 = vadd.f32 %v4538_v42, %v3968_v46  ;;  %v4540_v12 = vpop.f32.mrb[42].mxu0  ;;  %v3971_v22 = vpop.f32.mrb[43].mxu1 }
 0x259   : > { %v4541_v26 = vpop.f32.mrb[43].mxu0 }
 0x25a   : > { %v8793_v28 = vadd.f32 %v4541_v26, %v3971_v22 }
 0x25b   : > { %4823 = vmatmul.mubr.bf16.gmra.mrb[148].mxu1 %v10446_v16  ;;  %5997 = vmatmul.mubr.bf16.gmra.mrb[148].mxu0 %v10446_v16 }
 0x25c   : > { %7132 = vrot.lane.b32.xlu0 %v8792_v8, %s10063_s19  ;;  %4832 = vmatprep.mubr.bf16.mxu1 %v10450_v18 }
 0x25d   : > { %6004 = vmatprep.mubr.bf16.mxu0 %v10450_v18  ;;  %v3975_v24 = vpop.f32.mrb[44].mxu1  ;;  %v9889_v18 = vld [vmem:[%s10157_s7 + $0x50c] ss:$20 sps:$4 sm:$0xff]  }
 0x25e   : > { %v4545_v7 = vpop.f32.mrb[44].mxu0  ;;  %v3976_v32 = vpop.f32.mrb[45].mxu1  ;;  %5296 = vmatprep.subr.bf16.mxu1 %v9889_v18 }
 0x25f   : > { %v4546_v59 = vpop.f32.mrb[45].mxu0  ;;  %v3978_v16 = vpop.f32.mrb[46].mxu1 }
 0x260   : > { %7186 = vrot.lane.b32.xlu0 %v8793_v28, %s10064_s20  ;;  %v8794_v1 = vadd.f32 %v4546_v59, %v3976_v32  ;;  %v4548_v0 = vpop.f32.mrb[46].mxu0  ;;  %v3979_v2 = vpop.f32.mrb[47].mxu1 }
 0x261   : > { %v4549_v21 = vpop.f32.mrb[47].mxu0 }
 0x262   : > { %v8795_v50 = vadd.f32 %v4549_v21, %v3979_v2 }
 0x263   : > { %4833 = vmatmul.mubr.bf16.gmra.mrb[152].mxu1 %v10464_v52  ;;  %6005 = vmatmul.mubr.bf16.gmra.mrb[152].mxu0 %v10464_v52 }
 0x264   : > { %7194 = vrot.lane.b32.xlu0 %v8794_v1, %s10064_s20  ;;  %4842 = vmatprep.mubr.bf16.mxu1 %v10468_v54 }
 0x265   : > { %6012 = vmatprep.mubr.bf16.mxu0 %v10468_v54  ;;  %v3983_v48 = vpop.f32.mrb[48].mxu1 }
 0x266   : > { %v4553_v62 = vpop.f32.mrb[48].mxu0  ;;  %v3984_v40 = vpop.f32.mrb[49].mxu1 }
 0x267   : > { %v4554_v10 = vpop.f32.mrb[49].mxu0  ;;  %v3986_v19 = vpop.f32.mrb[50].mxu1 }
 0x268   : > { %7202 = vrot.lane.b32.xlu0 %v8795_v50, %s10064_s20  ;;  %v8796_v5 = vadd.f32 %v4554_v10, %v3984_v40  ;;  %v4556_v15 = vpop.f32.mrb[50].mxu0  ;;  %v3987_v35 = vpop.f32.mrb[51].mxu1 }
 0x269   : > { %v4557_v44 = vpop.f32.mrb[51].mxu0 }
 0x26a   : > { %v8797_v52 = vadd.f32 %v4557_v44, %v3987_v35 }
 0x26b   : > { %4843 = vmatmul.mubr.bf16.gmra.mrb[156].mxu1 %v10482_v14  ;;  %6013 = vmatmul.mubr.bf16.gmra.mrb[156].mxu0 %v10482_v14 }
 0x26c   : > { %7256 = vrot.lane.b32.xlu0 %v8796_v5, %s10065_s21  ;;  %4852 = vmatprep.mubr.bf16.mxu1 %v10486_v31 }
 0x26d   : > { %6020 = vmatprep.mubr.bf16.mxu0 %v10486_v31  ;;  %v3991_v54 = vpop.f32.mrb[52].mxu1 }
 0x26e   : > { %v4561_v34 = vpop.f32.mrb[52].mxu0  ;;  %v3992_v51 = vpop.f32.mrb[53].mxu1 }
 0x26f   : > { %v4562_v33 = vpop.f32.mrb[53].mxu0  ;;  %v3994_v46 = vpop.f32.mrb[54].mxu1 }
 0x270   : > { %7264 = vrot.lane.b32.xlu0 %v8797_v52, %s10065_s21  ;;  %v8798_v42 = vadd.f32 %v4562_v33, %v3992_v51  ;;  %v4564_v3 = vpop.f32.mrb[54].mxu0  ;;  %v3996_v8 = vpop.f32.mrb[55].mxu1 }
 0x271   : > { %v8799_v6 = vadd.f32 %v4564_v3, %v3994_v46  ;;  %v4566_v58 = vpop.f32.mrb[55].mxu0 }
 0x272   : > { %v8800_v14 = vadd.f32 %v4566_v58, %v3996_v8 }
 0x273   : > { %4853 = vmatmul.mubr.bf16.gmra.mrb[160].mxu1 %v10498_v39  ;;  %6021 = vmatmul.mubr.bf16.gmra.mrb[160].mxu0 %v10498_v39 }
 0x274   : > { %7272 = vrot.lane.b32.xlu0 %v8798_v42, %s10065_s21  ;;  %7328 = vrot.lane.b32.xlu1 %v8800_v14, %s10066_s22 }
 0x275   : > { %4862 = vmatprep.mubr.bf16.mxu1 %v10502_v13  ;;  %6027 = vmatprep.mubr.bf16.mxu0 %v10502_v13  ;;  %v4000_v31 = vpop.f32.mrb[56].mxu1 }
 0x276   : > { %v4570_v12 = vpop.f32.mrb[56].mxu0  ;;  %v4002_v28 = vpop.f32.mrb[57].mxu1 }
 0x277   : > { %v8801_v22 = vadd.f32 %v4570_v12, %v4000_v31  ;;  %v4572_v26 = vpop.f32.mrb[57].mxu0  ;;  %v4004_v24 = vpop.f32.mrb[58].mxu1 }
 0x278   : > { %7326 = vrot.lane.b32.xlu0 %v8799_v6, %s10066_s22  ;;  %v8802_v60 = vadd.f32 %v4572_v26, %v4002_v28  ;;  %v4574_v7 = vpop.f32.mrb[58].mxu0  ;;  %v4006_v59 = vpop.f32.mrb[59].mxu1 }
 0x279   : > { %v8803_v39 = vadd.f32 %v4574_v7, %v4004_v24  ;;  %v4576_v32 = vpop.f32.mrb[59].mxu0 }
 0x27a   : > { %v8804_v1 = vadd.f32 %v4576_v32, %v4006_v59  ;;  %7336 = vrot.lane.b32.xlu1 %v8802_v60, %s10066_s22 }
 0x27b   : > { %4863 = vmatmul.mubr.bf16.gmra.mrb[164].mxu1 %v10514_v9  ;;  %6028 = vmatmul.mubr.bf16.gmra.mrb[164].mxu0 %v10514_v9 }
 0x27c   : > { %7334 = vrot.lane.b32.xlu0 %v8801_v22, %s10066_s22  ;;  %4872 = vmatprep.mubr.bf16.mxu1 %v10518_v20 }
 0x27d   : > { %6033 = vmatprep.mubr.bf16.mxu0 %v10518_v20  ;;  %v4010_v16 = vpop.f32.mrb[60].mxu1 }
 0x27e   : > { %v4580_v13 = vpop.f32.mrb[60].mxu0  ;;  %7344 = vrot.lane.b32.xlu1 %v8804_v1, %s10066_s22  ;;  %v4012_v21 = vpop.f32.mrb[61].mxu1 }
 0x27f   : > { %v8805_v0 = vadd.f32 %v4580_v13, %v4010_v16  ;;  %v4582_v2 = vpop.f32.mrb[61].mxu0  ;;  %v4014_v18 = vpop.f32.mrb[62].mxu1 }
 0x280   : > { %7342 = vrot.lane.b32.xlu0 %v8803_v39, %s10066_s22  ;;  %v8806_v50 = vadd.f32 %v4582_v2, %v4012_v21  ;;  %v4584_v48 = vpop.f32.mrb[62].mxu0  ;;  %v4016_v9 = vpop.f32.mrb[63].mxu1 }
 0x281   : > { %v8807_v62 = vadd.f32 %v4584_v48, %v4014_v18  ;;  %v4586_v10 = vpop.f32.mrb[63].mxu0 }
 0x282   : > { %v8808_v40 = vadd.f32 %v4586_v10, %v4016_v9  ;;  %7398 = vrot.lane.b32.xlu1 %v8806_v50, %s10067_s23 }
 0x283   : > { %4873 = vmatmul.mubr.bf16.gmra.mrb[168].mxu1 %v10530_v38  ;;  %6034 = vmatmul.mubr.bf16.gmra.mrb[168].mxu0 %v10530_v38 }
 0x284   : > { %7396 = vrot.lane.b32.xlu0 %v8805_v0, %s10067_s23  ;;  %4882 = vmatprep.mubr.bf16.mxu1 %v10534_v61 }
 0x285   : > { %6039 = vmatprep.mubr.bf16.mxu0 %v10534_v61  ;;  %v4020_v5 = vpop.f32.mrb[64].mxu1 }
 0x286   : > { %v4590_v20 = vpop.f32.mrb[64].mxu0  ;;  %7406 = vrot.lane.b32.xlu1 %v8808_v40, %s10067_s23  ;;  %v4022_v35 = vpop.f32.mrb[65].mxu1 }
 0x287   : > { %v4592_v19 = vpop.f32.mrb[65].mxu0  ;;  %v8809_v15 = vadd.f32 %v4590_v20, %v4020_v5  ;;  %v4024_v54 = vpop.f32.mrb[66].mxu1 }
 0x288   : > { %7404 = vrot.lane.b32.xlu0 %v8807_v62, %s10067_s23  ;;  %v4594_v44 = vpop.f32.mrb[66].mxu0  ;;  %v8810_v52 = vadd.f32 %v4592_v19, %v4022_v35  ;;  %v4026_v33 = vpop.f32.mrb[67].mxu1 }
 0x289   : > { %v4596_v34 = vpop.f32.mrb[67].mxu0  ;;  %v8811_v38 = vadd.f32 %v4594_v44, %v4024_v54 }
 0x28a   : > { %v8812_v51 = vadd.f32 %v4596_v34, %v4026_v33  ;;  %7414 = vrot.lane.b32.xlu1 %v8810_v52, %s10067_s23 }
 0x28b   : > { %4883 = vmatmul.mubr.bf16.gmra.mrb[172].mxu1 %v10546_v57  ;;  %6040 = vmatmul.mubr.bf16.gmra.mrb[172].mxu0 %v10546_v57 }
 0x28c   : > { %7412 = vrot.lane.b32.xlu0 %v8809_v15, %s10067_s23  ;;  %4892 = vmatprep.mubr.bf16.mxu1 %v10550_v45 }
 0x28d   : > { %6045 = vmatprep.mubr.bf16.mxu0 %v10550_v45  ;;  %v4030_v42 = vpop.f32.mrb[68].mxu1 }
 0x28e   : > { %v4600_v61 = vpop.f32.mrb[68].mxu0  ;;  %7468 = vrot.lane.b32.xlu1 %v8812_v51, %s10068_s24  ;;  %v4032_v6 = vpop.f32.mrb[69].mxu1 }
 0x28f   : > { %v4602_v46 = vpop.f32.mrb[69].mxu0  ;;  %v8813_v3 = vadd.f32 %v4600_v61, %v4030_v42  ;;  %v4034_v14 = vpop.f32.mrb[70].mxu1 }
 0x290   : > { %7466 = vrot.lane.b32.xlu0 %v8811_v38, %s10068_s24  ;;  %v4604_v8 = vpop.f32.mrb[70].mxu0  ;;  %v8814_v58 = vadd.f32 %v4602_v46, %v4032_v6  ;;  %v4036_v12 = vpop.f32.mrb[71].mxu1 }
 0x291   : > { %v8815_v57 = vadd.f32 %v4604_v8, %v4034_v14  ;;  %v4606_v31 = vpop.f32.mrb[71].mxu0 }
 0x292   : > { %7476 = vrot.lane.b32.xlu1 %v8814_v58, %s10068_s24  ;;  %v8816_v45 = vadd.f32 %v4606_v31, %v4036_v12 }
 0x293   : > { %4893 = vmatmul.mubr.bf16.gmra.mrb[176].mxu1 %v10562_v37  ;;  %6046 = vmatmul.mubr.bf16.gmra.mrb[176].mxu0 %v10562_v37 }
 0x294   : > { %7474 = vrot.lane.b32.xlu0 %v8813_v3, %s10068_s24  ;;  %4902 = vmatprep.mubr.bf16.mxu1 %v10566_v29 }
 0x295   : > { %6051 = vmatprep.mubr.bf16.mxu0 %v10566_v29  ;;  %v4040_v26 = vpop.f32.mrb[72].mxu1 }
 0x296   : > { %v4610_v22 = vpop.f32.mrb[72].mxu0  ;;  %7484 = vrot.lane.b32.xlu1 %v8816_v45, %s10068_s24  ;;  %v4042_v24 = vpop.f32.mrb[73].mxu1 }
 0x297   : > { %v4612_v28 = vpop.f32.mrb[73].mxu0  ;;  %v8817_v60 = vadd.f32 %v4610_v22, %v4040_v26  ;;  %v4044_v59 = vpop.f32.mrb[74].mxu1 }
 0x298   : > { %7482 = vrot.lane.b32.xlu0 %v8815_v57, %s10068_s24  ;;  %v4614_v7 = vpop.f32.mrb[74].mxu0  ;;  %v8818_v39 = vadd.f32 %v4612_v28, %v4042_v24  ;;  %v4046_v1 = vpop.f32.mrb[75].mxu1 }
 0x299   : > { %v8819_v32 = vadd.f32 %v4614_v7, %v4044_v59  ;;  %v4616_v37 = vpop.f32.mrb[75].mxu0 }
 0x29a   : > { %7538 = vrot.lane.b32.xlu1 %v8818_v39, %s10069_s25  ;;  %v8820_v29 = vadd.f32 %v4616_v37, %v4046_v1 }
 0x29b   : > { %4903 = vmatmul.mubr.bf16.gmra.mrb[180].mxu1 %v10578_v41  ;;  %6052 = vmatmul.mubr.bf16.gmra.mrb[180].mxu0 %v10578_v41 }
 0x29c   : > { %7536 = vrot.lane.b32.xlu0 %v8817_v60, %s10069_s25  ;;  %4912 = vmatprep.mubr.bf16.mxu1 %v10582_v11  ;;  %v13540_v60 = vld [vmem:[#allocation47_spill] sm:$0xff] }
 0x29d   : > { %6057 = vmatprep.mubr.bf16.mxu0 %v10582_v11  ;;  %v4050_v16 = vpop.f32.mrb[76].mxu1 }
 0x29e   : > { %v4620_v13 = vpop.f32.mrb[76].mxu0  ;;  %7546 = vrot.lane.b32.xlu1 %v8820_v29, %s10069_s25  ;;  %v4052_v21 = vpop.f32.mrb[77].mxu1 }
 0x29f   : > { %v4622_v0 = vpop.f32.mrb[77].mxu0  ;;  %v8821_v2 = vadd.f32 %v4620_v13, %v4050_v16  ;;  %v4054_v48 = vpop.f32.mrb[78].mxu1 }
 0x2a0   : > { %7544 = vrot.lane.b32.xlu0 %v8819_v32, %s10069_s25  ;;  %v4624_v50 = vpop.f32.mrb[78].mxu0  ;;  %v8822_v18 = vadd.f32 %v4622_v0, %v4052_v21  ;;  %v4056_v9 = vpop.f32.mrb[79].mxu1  ;;  %v13542_v0 = vld [vmem:[#allocation51_spill] sm:$0xff]  ;;  %v13543_v21 = vld [vmem:[#allocation53_spill] sm:$0xff] }
 0x2a1   : > { %v8823_v62 = vadd.f32 %v4624_v50, %v4054_v48  ;;  %v4626_v41 = vpop.f32.mrb[79].mxu0 }
 0x2a2   : > { %7554 = vrot.lane.b32.xlu1 %v8822_v18, %s10069_s25  ;;  %v8824_v11 = vadd.f32 %v4626_v41, %v4056_v9 }
 0x2a3   : > { %4913 = vmatmul.mubr.bf16.gmra.mrb[184].mxu1 %v10594_v55  ;;  %6058 = vmatmul.mubr.bf16.gmra.mrb[184].mxu0 %v10594_v55 }
 0x2a4   : > { %7552 = vrot.lane.b32.xlu0 %v8821_v2, %s10069_s25  ;;  %4922 = vmatprep.mubr.bf16.mxu1 %v10598_v47 }
 0x2a5   : > { %6063 = vmatprep.mubr.bf16.mxu0 %v10598_v47  ;;  %v4060_v40 = vpop.f32.mrb[80].mxu1 }
 0x2a6   : > { %v4630_v10 = vpop.f32.mrb[80].mxu0  ;;  %7608 = vrot.lane.b32.xlu1 %v8824_v11, %s10061_s11  ;;  %v4062_v19 = vpop.f32.mrb[81].mxu1 }
 0x2a7   : > { %v4632_v20 = vpop.f32.mrb[81].mxu0  ;;  %v8825_v5 = vadd.f32 %v4630_v10, %v4060_v40  ;;  %v4064_v44 = vpop.f32.mrb[82].mxu1 }
 0x2a8   : > { %7606 = vrot.lane.b32.xlu0 %v8823_v62, %s10061_s11  ;;  %v4634_v15 = vpop.f32.mrb[82].mxu0  ;;  %v8826_v35 = vadd.f32 %v4632_v20, %v4062_v19  ;;  %v4066_v54 = vpop.f32.mrb[83].mxu1  ;;  %v13545_v19 = vld [vmem:[#allocation57_spill] sm:$0xff] }
 0x2a9   : > { %v8827_v52 = vadd.f32 %v4634_v15, %v4064_v44  ;;  %v4636_v55 = vpop.f32.mrb[83].mxu0 }
 0x2aa   : > { %7616 = vrot.lane.b32.xlu1 %v8826_v35, %s10061_s11  ;;  %v8828_v47 = vadd.f32 %v4636_v55, %v4066_v54 }
 0x2ab   : > { %4923 = vmatmul.mubr.bf16.gmra.mrb[188].mxu1 %v10610_v63  ;;  %6064 = vmatmul.mubr.bf16.gmra.mrb[188].mxu0 %v10610_v63 }
 0x2ac   : > { %7614 = vrot.lane.b32.xlu0 %v8825_v5, %s10061_s11  ;;  %4932 = vmatprep.mubr.bf16.mxu1 %v10614_v25  ;;  %v13544_v5 = vld [vmem:[#allocation55_spill] sm:$0xff] }
 0x2ad   : > { %6069 = vmatprep.mubr.bf16.mxu0 %v10614_v25  ;;  %v4070_v38 = vpop.f32.mrb[84].mxu1 }
 0x2ae   : > { %v4640_v34 = vpop.f32.mrb[84].mxu0  ;;  %7624 = vrot.lane.b32.xlu1 %v8828_v47, %s10061_s11  ;;  %v4072_v61 = vpop.f32.mrb[85].mxu1 }
 0x2af   : > { %v4642_v33 = vpop.f32.mrb[85].mxu0  ;;  %v8829_v51 = vadd.f32 %v4640_v34, %v4070_v38  ;;  %v4074_v3 = vpop.f32.mrb[86].mxu1 }
 0x2b0   : > { %7622 = vrot.lane.b32.xlu0 %v8827_v52, %s10061_s11  ;;  %v4644_v42 = vpop.f32.mrb[86].mxu0  ;;  %v8830_v46 = vadd.f32 %v4642_v33, %v4072_v61  ;;  %v4076_v8 = vpop.f32.mrb[87].mxu1 }
 0x2b1   : > { %v8831_v6 = vadd.f32 %v4644_v42, %v4074_v3  ;;  %v4646_v63 = vpop.f32.mrb[87].mxu0  ;;  %v11463_v61 = vpop.permute.xlu0 %6766  ;;  %v13548_v42 = vld [vmem:[#allocation61_spill] sm:$0xff] }
 0x2b2   : > { %7677 = vrot.lane.b32.xlu1 %v8830_v46, %s10070_s26  ;;  %v8832_v25 = vadd.f32 %v4646_v63, %v4076_v8  ;;  %13547 = vst [vmem:[#allocation47_spill] sm:$0xff] %v11463_v61 }
 0x2b3   : > { %4933 = vmatmul.mubr.bf16.gmra.mrb[192].mxu1 %v10626_v43  ;;  %6070 = vmatmul.mubr.bf16.gmra.mrb[192].mxu0 %v10626_v43 }
 0x2b4   : > { %7675 = vrot.lane.b32.xlu0 %v8829_v51, %s10070_s26  ;;  %4942 = vmatprep.mubr.bf16.mxu1 %v10630_v4  ;;  %v13546_v51 = vld [vmem:[#allocation59_spill] sm:$0xff] }
 0x2b5   : > { %6075 = vmatprep.mubr.bf16.mxu0 %v10630_v4  ;;  %v4080_v14 = vpop.f32.mrb[88].mxu1  ;;  %v13541_v4 = vld [vmem:[#allocation49_spill] sm:$0xff] }
 0x2b6   : > { %v4650_v58 = vpop.f32.mrb[88].mxu0  ;;  %7685 = vrot.lane.b32.xlu1 %v8832_v25, %s10070_s26  ;;  %v4082_v12 = vpop.f32.mrb[89].mxu1 }
 0x2b7   : > { %v4652_v57 = vpop.f32.mrb[89].mxu0  ;;  %v8833_v31 = vadd.f32 %v4650_v58, %v4080_v14  ;;  %v4084_v26 = vpop.f32.mrb[90].mxu1 }
 0x2b8   : > { %7683 = vrot.lane.b32.xlu0 %v8831_v6, %s10070_s26  ;;  %v4654_v45 = vpop.f32.mrb[90].mxu0  ;;  %v8834_v22 = vadd.f32 %v4652_v57, %v4082_v12  ;;  %v4085_v43 = vpop.f32.mrb[91].mxu1 }
 0x2b9   : > { %v4655_v28 = vpop.f32.mrb[91].mxu0  ;;  %v11470_v57 = vpop.permute.xlu0 %6768  ;;  %v13550_v45 = vld [vmem:[#allocation63_spill] sm:$0xff] }
 0x2ba   : > { %7693 = vrot.lane.b32.xlu1 %v8834_v22, %s10070_s26  ;;  %v8835_v24 = vadd.f32 %v4655_v28, %v4085_v43  ;;  %13549 = vst [vmem:[#allocation49_spill] sm:$0xff] %v11470_v57  ;;  %v13551_v22 = vld [vmem:[#allocation65_spill] sm:$0xff] }
 0x2bb   : > { %4943 = vmatmul.mubr.bf16.gmra.mrb[196].mxu1 %v13540_v60  ;;  %6076 = vmatmul.mubr.bf16.gmra.mrb[196].mxu0 %v13540_v60  ;;  %v9887_v60 = vld [vmem:[%s10157_s7 + $0x508] ss:$20 sps:$4 sm:$0xff]  }
 0x2bc   : > { %7691 = vrot.lane.b32.xlu0 %v8833_v31, %s10070_s26  ;;  %4952 = vmatprep.mubr.bf16.mxu1 %v13541_v4 }
 0x2bd   : > { %6082 = vmatprep.mubr.bf16.mxu0 %v13541_v4  ;;  %v4089_v7 = vpop.f32.mrb[92].mxu1  ;;  %v11477_v43 = vpop.permute.xlu0 %6774 }
 0x2be   : > { %v4659_v39 = vpop.f32.mrb[92].mxu0  ;;  %v4090_v59 = vpop.f32.mrb[93].mxu1  ;;  %13552 = vst [vmem:[#allocation51_spill] sm:$0xff] %v11477_v43  ;;  %v9890_v7 = vld [vmem:[%s10157_s7 + $0x510] ss:$20 sps:$4 sm:$0xff]  }
 0x2bf   : > { %v4660_v32 = vpop.f32.mrb[93].mxu0  ;;  %v4092_v37 = vpop.f32.mrb[94].mxu1  ;;  %v9893_v39 = vld [vmem:[%s10157_s7 + $0x534] ss:$20 sps:$4 sm:$0xff]  }
 0x2c0   : > { %7745 = vrot.lane.b32.xlu0 %v8835_v24, %s10071_s27  ;;  %v8836_v1 = vadd.f32 %v4660_v32, %v4090_v59  ;;  %v4662_v29 = vpop.f32.mrb[94].mxu0  ;;  %v4093_v16 = vpop.f32.mrb[95].mxu1  ;;  %v13553_v59 = vld [vmem:[#allocation67_spill] sm:$0xff]  ;;  %v9891_v32 = vld [vmem:[%s10157_s7 + $0x530] ss:$20 sps:$4 sm:$0xff]   ;;  %v13554_v37 = vld [vmem:[#allocation69_spill] sm:$0xff] }
 0x2c1   : > { %v4663_v13 = vpop.f32.mrb[95].mxu0  ;;  %v9894_v29 = vld [vmem:[%s10157_s7 + $0x538] ss:$20 sps:$4 sm:$0xff]  }
 0x2c2   : > { %v8837_v2 = vadd.f32 %v4663_v13, %v4093_v16 }
 0x2c3   : > { %4953 = vmatmul.mubr.bf16.gmra.mrb[200].mxu1 %v13542_v0  ;;  %6083 = vmatmul.mubr.bf16.gmra.mrb[200].mxu0 %v13542_v0 }
 0x2c4   : > { %7753 = vrot.lane.b32.xlu0 %v8836_v1, %s10071_s27  ;;  %4962 = vmatprep.mubr.bf16.mxu1 %v13543_v21  ;;  %v9897_v1 = vld [vmem:[%s10157_s7 + $0x55c] ss:$20 sps:$4 sm:$0xff]  }
 0x2c5   : > { %6090 = vmatprep.mubr.bf16.mxu0 %v13543_v21  ;;  %v4097_v50 = vpop.f32.mrb[96].mxu1 }
 0x2c6   : > { %v4667_v18 = vpop.f32.mrb[96].mxu0  ;;  %v4098_v48 = vpop.f32.mrb[97].mxu1  ;;  %v9898_v50 = vld [vmem:[%s10157_s7 + $0x560] ss:$20 sps:$4 sm:$0xff]  }
 0x2c7   : > { %v4668_v62 = vpop.f32.mrb[97].mxu0  ;;  %v4100_v41 = vpop.f32.mrb[98].mxu1  ;;  %v9901_v18 = vld [vmem:[%s10157_s7 + $0x584] ss:$20 sps:$4 sm:$0xff]  }
 0x2c8   : > { %7761 = vrot.lane.b32.xlu0 %v8837_v2, %s10071_s27  ;;  %v8838_v9 = vadd.f32 %v4668_v62, %v4098_v48  ;;  %v4670_v11 = vpop.f32.mrb[98].mxu0  ;;  %v4101_v10 = vpop.f32.mrb[99].mxu1  ;;  %v9895_v2 = vld [vmem:[%s10157_s7 + $0x558] ss:$20 sps:$4 sm:$0xff]   ;;  %v9899_v41 = vld [vmem:[%s10157_s7 + $0x580] ss:$20 sps:$4 sm:$0xff]  }
 0x2c9   : > { %v4671_v40 = vpop.f32.mrb[99].mxu0  ;;  %v13555_v48 = vld [vmem:[#allocation71_spill] sm:$0xff]  ;;  %v13556_v62 = vld [vmem:[#allocation73_spill] sm:$0xff] }
 0x2ca   : > { %v8839_v20 = vadd.f32 %v4671_v40, %v4101_v10  ;;  %v9902_v11 = vld [vmem:[%s10157_s7 + $0x588] ss:$20 sps:$4 sm:$0xff]   ;;  %v9905_v10 = vld [vmem:[%s10157_s7 + $0x5ac] ss:$20 sps:$4 sm:$0xff]  }
 0x2cb   : > { %4963 = vmatmul.mubr.bf16.gmra.mrb[204].mxu1 %v13544_v5  ;;  %6091 = vmatmul.mubr.bf16.gmra.mrb[204].mxu0 %v13544_v5 }
 0x2cc   : > { %7815 = vrot.lane.b32.xlu0 %v8838_v9, %s10072_s28  ;;  %4972 = vmatprep.mubr.bf16.mxu1 %v13545_v19 }
 0x2cd   : > { %6098 = vmatprep.mubr.bf16.mxu0 %v13545_v19  ;;  %v4105_v15 = vpop.f32.mrb[100].mxu1  ;;  %v9903_v19 = vld [vmem:[%s10157_s7 + $0x5a8] ss:$20 sps:$4 sm:$0xff]  }
 0x2ce   : > { %v4675_v35 = vpop.f32.mrb[100].mxu0  ;;  %v4106_v44 = vpop.f32.mrb[101].mxu1  ;;  %v9906_v15 = vld [vmem:[%s10157_s7 + $0x5b0] ss:$20 sps:$4 sm:$0xff]  }
 0x2cf   : > { %v4676_v52 = vpop.f32.mrb[101].mxu0  ;;  %v4108_v55 = vpop.f32.mrb[102].mxu1  ;;  %v9909_v35 = vld [vmem:[%s10157_s7 + $0x5d4] ss:$20 sps:$4 sm:$0xff]  }
 0x2d0   : > { %7823 = vrot.lane.b32.xlu0 %v8839_v20, %s10072_s28  ;;  %v8840_v54 = vadd.f32 %v4676_v52, %v4106_v44  ;;  %v4678_v47 = vpop.f32.mrb[102].mxu0  ;;  %v4109_v34 = vpop.f32.mrb[103].mxu1  ;;  %v13557_v44 = vld [vmem:[#allocation75_spill] sm:$0xff]  ;;  %v13558_v52 = vld [vmem:[#allocation77_spill] sm:$0xff]  ;;  %v9907_v55 = vld [vmem:[%s10157_s7 + $0x5d0] ss:$20 sps:$4 sm:$0xff]  }
 0x2d1   : > { %v4679_v38 = vpop.f32.mrb[103].mxu0  ;;  %v9910_v47 = vld [vmem:[%s10157_s7 + $0x5d8] ss:$20 sps:$4 sm:$0xff]  }
 0x2d2   : > { %v8841_v33 = vadd.f32 %v4679_v38, %v4109_v34  ;;  %v9913_v34 = vld [vmem:[%s10157_s7 + $0x5fc] ss:$20 sps:$4 sm:$0xff]  }
 0x2d3   : > { %4973 = vmatmul.mubr.bf16.gmra.mrb[208].mxu1 %v13546_v51  ;;  %6099 = vmatmul.mubr.bf16.gmra.mrb[208].mxu0 %v13546_v51 }
 0x2d4   : > { %7831 = vrot.lane.b32.xlu0 %v8840_v54, %s10072_s28  ;;  %4982 = vmatprep.mubr.bf16.mxu1 %v13548_v42 }
 0x2d5   : > { %6106 = vmatprep.mubr.bf16.mxu0 %v13548_v42  ;;  %v4113_v46 = vpop.f32.mrb[104].mxu1  ;;  %v9911_v42 = vld [vmem:[%s10157_s7 + $0x5f8] ss:$20 sps:$4 sm:$0xff]  }
 0x2d6   : > { %v4683_v3 = vpop.f32.mrb[104].mxu0  ;;  %v4114_v6 = vpop.f32.mrb[105].mxu1  ;;  %v9914_v46 = vld [vmem:[%s10157_s7 + $0x600] ss:$20 sps:$4 sm:$0xff]  }
 0x2d7   : > { %v4684_v63 = vpop.f32.mrb[105].mxu0  ;;  %v4116_v8 = vpop.f32.mrb[106].mxu1  ;;  %v9917_v3 = vld [vmem:[%s10157_s7 + $0x624] ss:$20 sps:$4 sm:$0xff]  }
 0x2d8   : > { %7885 = vrot.lane.b32.xlu0 %v8841_v33, %s10073_s29  ;;  %v8842_v25 = vadd.f32 %v4684_v63, %v4114_v6  ;;  %v4686_v58 = vpop.f32.mrb[106].mxu0  ;;  %v4117_v14 = vpop.f32.mrb[107].mxu1  ;;  %v13559_v6 = vld [vmem:[#allocation79_spill] sm:$0xff]  ;;  %v13560_v63 = vld [vmem:[#allocation81_spill] sm:$0xff]  ;;  %v9915_v8 = vld [vmem:[%s10157_s7 + $0x620] ss:$20 sps:$4 sm:$0xff]  }
 0x2d9   : > { %v4687_v31 = vpop.f32.mrb[107].mxu0  ;;  %v9918_v58 = vld [vmem:[%s10157_s7 + $0x628] ss:$20 sps:$4 sm:$0xff]  }
 0x2da   : > { %v8843_v12 = vadd.f32 %v4687_v31, %v4117_v14  ;;  %v9921_v14 = vld [vmem:[%s10157_s7 + $0x64c] ss:$20 sps:$4 sm:$0xff]  }
 0x2db   : > { %4983 = vmatmul.mubr.bf16.gmra.mrb[212].mxu1 %v13550_v45  ;;  %6107 = vmatmul.mubr.bf16.gmra.mrb[212].mxu0 %v13550_v45 }
 0x2dc   : > { %7893 = vrot.lane.b32.xlu0 %v8842_v25, %s10073_s29  ;;  %5025 = vmatprep.mubr.bf16.mxu1 %v13551_v22 }
 0x2dd   : > { %6147 = vmatprep.mubr.bf16.mxu0 %v13551_v22  ;;  %v9919_v22 = vld [vmem:[%s10157_s7 + $0x648] ss:$20 sps:$4 sm:$0xff]  }
 0x2de   : > { %v5936_v26 = vpop.f32.mrb[108].mxu0 }
 0x2df   : > { %v5937_v28 = vpop.f32.mrb[109].mxu0  ;;  %v9922_v26 = vld [vmem:[%s10157_s7 + $0x650] ss:$20 sps:$4 sm:$0xff]  }
 0x2e0   : > { %7901 = vrot.lane.b32.xlu0 %v8843_v12, %s10073_s29  ;;  %v5938_v24 = vpop.f32.mrb[110].mxu0  ;;  %v9925_v28 = vld [vmem:[%s10157_s7 + $0x674] ss:$20 sps:$4 sm:$0xff]  }
 0x2e1   : > { %v5939_v4 = vpop.f32.mrb[111].mxu0  ;;  %v13562_v24 = vld [vmem:[#allocation85_spill] sm:$0xff] }
 0x2e2   : > { %v9923_v4 = vld [vmem:[%s10157_s7 + $0x670] ss:$20 sps:$4 sm:$0xff]  }
 0x2e3   : > { %5026 = vmatmul.mubr.bf16.vlgmr.msra.gmra.mrb[108].mxu1 %v13553_v59  ;;  %6148 = vmatmul.mubr.bf16.vlgmr.msra.gmra.mrb[216].mxu0 %v13553_v59  ;;  %v9929_v59 = vld [vmem:[%s10157_s7 + $0x69c] ss:$20 sps:$4 sm:$0xff]  }
 0x2e4   : > { %5297 = vmatpush1.bf16.msra.mxu1 %v9887_v60  ;;  %5035 = vmatprep.mubr.bf16.mxu1 %v13554_v37  ;;  %v13561_v60 = vld [vmem:[#allocation83_spill] sm:$0xff] }
 0x2e5   : > { %6153 = vmatprep.mubr.bf16.mxu0 %v13554_v37  ;;  %6329 = vmatpush1.bf16.msra.mxu0 %v9890_v7 }
 0x2e6   : > { %5298 = vmatprep.subr.bf16.mxu1 %v9893_v39  ;;  %v5942_v13 = vpop.f32.mrb[112].mxu0  ;;  %6330 = vmatprep.subr.bf16.mxu0 %v13437_v56  ;;  %v9926_v39 = vld [vmem:[%s10157_s7 + $0x678] ss:$20 sps:$4 sm:$0xff]  }
 0x2e7   : > { %v5943_v16 = vpop.f32.mrb[113].mxu0  ;;  %v9930_v13 = vld [vmem:[%s10157_s7 + $0x6a0] ss:$20 sps:$4 sm:$0xff]  }
 0x2e8   : > { %5299 = vmatpush1.bf16.msra.mxu1 %v9891_v32  ;;  %v5944_v0 = vpop.f32.mrb[114].mxu0  ;;  %v9933_v16 = vld [vmem:[%s10157_s7 + $0x6c4] ss:$20 sps:$4 sm:$0xff]  }
 0x2e9   : > { %5300 = vmatprep.subr.bf16.mxu1 %v9897_v1  ;;  %v5945_v21 = vpop.f32.mrb[115].mxu0  ;;  %6331 = vmatpush1.bf16.msra.mxu0 %v9894_v29  ;;  %v9927_v29 = vld [vmem:[%s10157_s7 + $0x698] ss:$20 sps:$4 sm:$0xff]  }
 0x2ea   : > { %6332 = vmatprep.subr.bf16.mxu0 %v13437_v56  ;;  %v13563_v0 = vld [vmem:[#allocation87_spill] sm:$0xff]  ;;  %v9931_v21 = vld [vmem:[%s10157_s7 + $0x6c0] ss:$20 sps:$4 sm:$0xff]  }
 0x2eb   : > { %5036 = vmatmul.mubr.bf16.gmra.mrb[112].mxu1 %v13555_v48  ;;  %6154 = vmatmul.mubr.bf16.gmra.mrb[220].mxu0 %v13555_v48  ;;  %v9937_v48 = vld [vmem:[%s10157_s7 + $0x6ec] ss:$20 sps:$4 sm:$0xff]  }
 0x2ec   : > { %5045 = vmatprep.mubr.bf16.mxu1 %v13556_v62  ;;  %6159 = vmatprep.mubr.bf16.mxu0 %v13556_v62 }
 0x2ed   : > { %5301 = vmatpush1.bf16.msra.mxu1 %v9895_v2  ;;  %6333 = vmatpush1.bf16.msra.mxu0 %v9898_v50  ;;  %v13564_v2 = vld [vmem:[#allocation89_spill] sm:$0xff] }
 0x2ee   : > { %v5948_v9 = vpop.f32.mrb[116].mxu0  ;;  %5302 = vmatprep.subr.bf16.mxu1 %v9901_v18  ;;  %6334 = vmatprep.subr.bf16.mxu0 %v13437_v56  ;;  %v9934_v18 = vld [vmem:[%s10157_s7 + $0x6c8] ss:$20 sps:$4 sm:$0xff]  }
 0x2ef   : > { %v5949_v40 = vpop.f32.mrb[117].mxu0 }
 0x2f0   : > { %v5950_v20 = vpop.f32.mrb[118].mxu0  ;;  %v9941_v40 = vld [vmem:[%s10157_s7 + $0x714] ss:$20 sps:$4 sm:$0xff]  }
 0x2f1   : > { %v5951_v5 = vpop.f32.mrb[119].mxu0  ;;  %5303 = vmatpush1.bf16.msra.mxu1 %v9899_v41  ;;  %6335 = vmatpush1.bf16.msra.mxu0 %v9902_v11  ;;  %v9935_v11 = vld [vmem:[%s10157_s7 + $0x6e8] ss:$20 sps:$4 sm:$0xff]   ;;  %v13565_v20 = vld [vmem:[#allocation92_spill] sm:$0xff] }
 0x2f2   : > { %5304 = vmatprep.subr.bf16.mxu1 %v9905_v10  ;;  %6336 = vmatprep.subr.bf16.mxu0 %v13437_v56  ;;  %v9938_v10 = vld [vmem:[%s10157_s7 + $0x6f0] ss:$20 sps:$4 sm:$0xff]  }
 0x2f3   : > { %5046 = vmatmul.mubr.bf16.gmra.mrb[116].mxu1 %v13557_v44  ;;  %6160 = vmatmul.mubr.bf16.gmra.mrb[224].mxu0 %v13557_v44  ;;  %v9939_v5 = vld [vmem:[%s10157_s7 + $0x710] ss:$20 sps:$4 sm:$0xff]  }
 0x2f4   : > { %5055 = vmatprep.mubr.bf16.mxu1 %v13558_v52  ;;  %6165 = vmatprep.mubr.bf16.mxu0 %v13558_v52 }
 0x2f5   : > { %5305 = vmatpush1.bf16.msra.mxu1 %v9903_v19  ;;  %6337 = vmatpush1.bf16.msra.mxu0 %v9906_v15  ;;  %v9942_v15 = vld [vmem:[%s10157_s7 + $0x718] ss:$20 sps:$4 sm:$0xff]  }
 0x2f6   : > { %v5954_v54 = vpop.f32.mrb[120].mxu0  ;;  %5306 = vmatprep.subr.bf16.mxu1 %v9909_v35  ;;  %6338 = vmatprep.subr.bf16.mxu0 %v13437_v56 }
 0x2f7   : > { %v5955_v38 = vpop.f32.mrb[121].mxu0  ;;  %v9945_v54 = vld [vmem:[%s10157_s7 + $0x73c] ss:$20 sps:$4 sm:$0xff]  }
 0x2f8   : > { %v5956_v33 = vpop.f32.mrb[122].mxu0 }
 0x2f9   : > { %v5957_v51 = vpop.f32.mrb[123].mxu0  ;;  %5307 = vmatpush1.bf16.msra.mxu1 %v9907_v55  ;;  %6339 = vmatpush1.bf16.msra.mxu0 %v9910_v47  ;;  %v9943_v55 = vld [vmem:[%s10157_s7 + $0x738] ss:$20 sps:$4 sm:$0xff]  }
 0x2fa   : > { %5308 = vmatprep.subr.bf16.mxu1 %v9913_v34  ;;  %6340 = vmatprep.subr.bf16.mxu0 %v13437_v56  ;;  %v13567_v51 = vld [vmem:[#allocation97_spill] sm:$0xff] }
 0x2fb   : > { %5056 = vmatmul.mubr.bf16.gmra.mrb[120].mxu1 %v13559_v6  ;;  %6166 = vmatmul.mubr.bf16.gmra.mrb[228].mxu0 %v13559_v6  ;;  %v9947_v6 = vld [vmem:[%s10157_s7 + $0x760] ss:$20 sps:$4 sm:$0xff]  }
 0x2fc   : > { %5065 = vmatprep.mubr.bf16.mxu1 %v13560_v63  ;;  %6171 = vmatprep.mubr.bf16.mxu0 %v13560_v63  ;;  %v9949_v63 = vld [vmem:[%s10157_s7 + $0x764] ss:$20 sps:$4 sm:$0xff]  }
 0x2fd   : > { %5309 = vmatpush1.bf16.msra.mxu1 %v9911_v42  ;;  %6341 = vmatpush1.bf16.msra.mxu0 %v9914_v46  ;;  %v13568_v42 = vld [vmem:[#allocation99_spill] sm:$0xff]  ;;  %v13569_v46 = vld [vmem:[#allocation101_spill] sm:$0xff] }
 0x2fe   : > { %v5960_v25 = vpop.f32.mrb[124].mxu0  ;;  %5310 = vmatprep.subr.bf16.mxu1 %v9917_v3  ;;  %6342 = vmatprep.subr.bf16.mxu0 %v13437_v56  ;;  %v13570_v3 = vld [vmem:[#allocation103_spill] sm:$0xff] }
 0x2ff   : > { %v5961_v31 = vpop.f32.mrb[125].mxu0  ;;  %v13572_v25 = vld [vmem:[#allocation107_spill] sm:$0xff] }
 0x300   : > { %v5962_v12 = vpop.f32.mrb[126].mxu0  ;;  %v9953_v31 = vld [vmem:[%s10157_s7 + $0x78c] ss:$20 sps:$4 sm:$0xff]  }
 0x301   : > { %v5963_v45 = vpop.f32.mrb[127].mxu0  ;;  %5311 = vmatpush1.bf16.msra.mxu1 %v9915_v8  ;;  %6343 = vmatpush1.bf16.msra.mxu0 %v9918_v58  ;;  %v13571_v8 = vld [vmem:[#allocation105_spill] sm:$0xff]  ;;  %v13574_v12 = vld [vmem:[#allocation111_spill] sm:$0xff] }
 0x302   : > { %5312 = vmatprep.subr.bf16.mxu1 %v9921_v14  ;;  %6344 = vmatprep.subr.bf16.mxu0 %v13437_v56  ;;  %v9950_v58 = vld [vmem:[%s10157_s7 + $0x768] ss:$20 sps:$4 sm:$0xff]  }
 0x303   : > { %5066 = vmatmul.mubr.bf16.gmra.mrb[124].mxu1 %v13561_v60  ;;  %6172 = vmatmul.mubr.bf16.gmra.mrb[232].mxu0 %v13561_v60  ;;  %v13573_v14 = vld [vmem:[#allocation109_spill] sm:$0xff] }
 0x304   : > { %5075 = vmatprep.mubr.bf16.mxu1 %v13562_v24  ;;  %6177 = vmatprep.mubr.bf16.mxu0 %v13562_v24  ;;  %v13575_v45 = vld [vmem:[#allocation113_spill] sm:$0xff] }
 0x305   : > { %5313 = vmatpush1.bf16.msra.mxu1 %v9919_v22  ;;  %6345 = vmatpush1.bf16.msra.mxu0 %v9922_v26  ;;  %v13576_v22 = vld [vmem:[#allocation115_spill] sm:$0xff]  ;;  %v13577_v26 = vld [vmem:[#allocation117_spill] sm:$0xff] }
 0x306   : > { %v5966_v7 = vpop.f32.mrb[128].mxu0  ;;  %5314 = vmatprep.subr.bf16.mxu1 %v9925_v28  ;;  %6346 = vmatprep.subr.bf16.mxu0 %v13437_v56  ;;  %v13578_v28 = vld [vmem:[#allocation119_spill] sm:$0xff] }
 0x307   : > { %v5967_v32 = vpop.f32.mrb[129].mxu0 }
 0x308   : > { %v5968_v37 = vpop.f32.mrb[130].mxu0 }
 0x309   : > { %v5969_v1 = vpop.f32.mrb[131].mxu0  ;;  %5315 = vmatpush1.bf16.msra.mxu1 %v9923_v4  ;;  %6347 = vmatpush1.bf16.msra.mxu0 %v9926_v39  ;;  %v13579_v39 = vld [vmem:[#allocation121_spill] sm:$0xff] }
 0x30a   : > { %5316 = vmatprep.subr.bf16.mxu1 %v9929_v59  ;;  %6348 = vmatprep.subr.bf16.mxu0 %v13437_v56  ;;  %v13580_v59 = vld [vmem:[#allocation123_spill] sm:$0xff] }
 0x30b   : > { %5076 = vmatmul.mubr.bf16.gmra.mrb[128].mxu1 %v13563_v0  ;;  %6178 = vmatmul.mubr.bf16.gmra.mrb[236].mxu0 %v13563_v0 }
 0x30c   : > { %5085 = vmatprep.mubr.bf16.mxu1 %v13564_v2  ;;  %6183 = vmatprep.mubr.bf16.mxu0 %v13564_v2 }
 0x30d   : > { %5317 = vmatpush1.bf16.msra.mxu1 %v9927_v29  ;;  %6349 = vmatpush1.bf16.msra.mxu0 %v9930_v13  ;;  %v13581_v13 = vld [vmem:[#allocation125_spill] sm:$0xff] }
 0x30e   : > { %v5972_v50 = vpop.f32.mrb[132].mxu0  ;;  %5318 = vmatprep.subr.bf16.mxu1 %v9933_v16  ;;  %6350 = vmatprep.subr.bf16.mxu0 %v13437_v56  ;;  %v13582_v16 = vld [vmem:[#allocation127_spill] sm:$0xff] }
 0x30f   : > { %v5973_v62 = vpop.f32.mrb[133].mxu0 }
 0x310   : > { %v5974_v41 = vpop.f32.mrb[134].mxu0 }
 0x311   : > { %v5975_v9 = vpop.f32.mrb[135].mxu0  ;;  %5319 = vmatpush1.bf16.msra.mxu1 %v9931_v21  ;;  %6351 = vmatpush1.bf16.msra.mxu0 %v9934_v18  ;;  %v13583_v18 = vld [vmem:[#allocation129_spill] sm:$0xff] }
 0x312   : > { %5320 = vmatprep.subr.bf16.mxu1 %v9937_v48  ;;  %6352 = vmatprep.subr.bf16.mxu0 %v13437_v56  ;;  %v13584_v48 = vld [vmem:[#allocation131_spill] sm:$0xff] }
 0x313   : > { %5086 = vmatmul.mubr.bf16.gmra.mrb[132].mxu1 %v10865_v23  ;;  %6184 = vmatmul.mubr.bf16.gmra.mrb[240].mxu0 %v10865_v23  ;;  %v13566_v23 = vld [vmem:[#allocation95_spill] sm:$0xff] }
 0x314   : > { %5095 = vmatprep.mubr.bf16.mxu1 %v13565_v20  ;;  %6189 = vmatprep.mubr.bf16.mxu0 %v13565_v20 }
 0x315   : > { %5321 = vmatpush1.bf16.msra.mxu1 %v9935_v11  ;;  %6353 = vmatpush1.bf16.msra.mxu0 %v9938_v10  ;;  %v13585_v10 = vld [vmem:[#allocation133_spill] sm:$0xff] }
 0x316   : > { %v5978_v19 = vpop.f32.mrb[136].mxu0  ;;  %5322 = vmatprep.subr.bf16.mxu1 %v9941_v40  ;;  %6354 = vmatprep.subr.bf16.mxu0 %v13437_v56  ;;  %v13586_v40 = vld [vmem:[#allocation135_spill] sm:$0xff] }
 0x317   : > { %v5979_v35 = vpop.f32.mrb[137].mxu0 }
 0x318   : > { %v5980_v44 = vpop.f32.mrb[138].mxu0  ;;  %v13587_v35 = vld [vmem:[#allocation137_spill] sm:$0xff] }
 0x319   : > { %v5981_v52 = vpop.f32.mrb[139].mxu0  ;;  %5323 = vmatpush1.bf16.msra.mxu1 %v9939_v5  ;;  %6355 = vmatpush1.bf16.msra.mxu0 %v9942_v15  ;;  %v13588_v44 = vld [vmem:[#allocation139_spill] sm:$0xff] }
 0x31a   : > { %6356 = vmatprep.subr.bf16.mxu0 %v13437_v56  ;;  %5324 = vmatprep.subr.bf16.mxu1 %v9945_v54 }
 0x31b   : > { %5096 = vmatmul.mubr.bf16.gmra.mrb[136].mxu1 %v10888_v53  ;;  %6190 = vmatmul.mubr.bf16.gmra.mrb[244].mxu0 %v10888_v53  ;;  %v9946_v53 = vld [vmem:[%s10157_s7 + $0x740] ss:$20 sps:$4 sm:$0xff]  }
 0x31c   : > { %5105 = vmatprep.mubr.bf16.mxu1 %v13566_v23  ;;  %6195 = vmatprep.mubr.bf16.mxu0 %v13566_v23 }
 0x31d   : > { %5325 = vmatpush1.bf16.msra.mxu1 %v9943_v55  ;;  %6357 = vmatpush1.bf16.msra.mxu0 %v9946_v53  ;;  %v13591_v53 = vld [vmem:[#allocation145_spill] sm:$0xff] }
 0x31e   : > { %v5984_v47 = vpop.f32.mrb[140].mxu0  ;;  %6358 = vmatprep.subr.bf16.mxu0 %v13437_v56  ;;  %5326 = vmatprep.subr.bf16.mxu1 %v9949_v63 }
 0x31f   : > { %v5985_v34 = vpop.f32.mrb[141].mxu0  ;;  %v13589_v47 = vld [vmem:[#allocation141_spill] sm:$0xff] }
 0x320   : > { %v5986_v38 = vpop.f32.mrb[142].mxu0  ;;  %v13590_v34 = vld [vmem:[#allocation143_spill] sm:$0xff] }
 0x321   : > { %v5987_v33 = vpop.f32.mrb[143].mxu0  ;;  %5327 = vmatpush1.bf16.msra.mxu1 %v9947_v6  ;;  %6359 = vmatpush1.bf16.msra.mxu0 %v9950_v58  ;;  %v13594_v58 = vld [vmem:[#allocation151_spill] sm:$0xff] }
 0x322   : > { %6541 = vmatprep.subr.bf16.mxu0 %v13437_v56  ;;  %5599 = vmatprep.subr.bf16.mxu1 %v9953_v31  ;;  %v13596_v31 = vld [vmem:[#allocation155_spill] sm:$0xff] }
 0x323   : > { %5106 = vmatmul.mubr.bf16.gmra.mrb[140].mxu1 %v13567_v51  ;;  %6196 = vmatmul.mubr.bf16.gmra.mrb[248].mxu0 %v13567_v51 }
 0x324   : > { %5115 = vmatprep.mubr.bf16.mxu1 %v13568_v42  ;;  %6201 = vmatprep.mubr.bf16.mxu0 %v13568_v42 }
 0x32b   : > { %5116 = vmatmul.mubr.bf16.gmra.mrb[144].mxu1 %v13569_v46  ;;  %6202 = vmatmul.mubr.bf16.gmra.mrb[144].mxu0 %v13569_v46  ;;  %v13592_v46 = vld [vmem:[#allocation147_spill] sm:$0xff] }
 0x32c   : > { %5125 = vmatprep.mubr.bf16.mxu1 %v13570_v3  ;;  %6209 = vmatprep.mubr.bf16.mxu0 %v13570_v3 }
 0x333   : > { %5126 = vmatmul.mubr.bf16.gmra.mrb[148].mxu1 %v13571_v8  ;;  %6210 = vmatmul.mubr.bf16.gmra.mrb[148].mxu0 %v13571_v8 }
 0x334   : > { %5135 = vmatprep.mubr.bf16.mxu1 %v13572_v25  ;;  %6217 = vmatprep.mubr.bf16.mxu0 %v13572_v25  ;;  %v13593_v25 = vld [vmem:[#allocation149_spill] sm:$0xff] }
 0x33b   : > { %5136 = vmatmul.mubr.bf16.gmra.mrb[152].mxu1 %v13573_v14  ;;  %6218 = vmatmul.mubr.bf16.gmra.mrb[152].mxu0 %v13573_v14  ;;  %v13595_v14 = vld [vmem:[#allocation153_spill] sm:$0xff] }
 0x33c   : > { %5145 = vmatprep.mubr.bf16.mxu1 %v13574_v12  ;;  %6225 = vmatprep.mubr.bf16.mxu0 %v13574_v12  ;;  %v13597_v12 = vld [vmem:[#allocation157_spill] sm:$0xff] }
 0x343   : > { %5146 = vmatmul.mubr.bf16.gmra.mrb[156].mxu1 %v13575_v45  ;;  %6226 = vmatmul.mubr.bf16.gmra.mrb[156].mxu0 %v13575_v45  ;;  %v13598_v45 = vld [vmem:[#allocation159_spill] sm:$0xff] }
 0x344   : > { %5155 = vmatprep.mubr.bf16.mxu1 %v13576_v22  ;;  %6233 = vmatprep.mubr.bf16.mxu0 %v13576_v22  ;;  %v13599_v22 = vld [vmem:[#allocation163_spill] sm:$0xff] }
 0x34b   : > { %5156 = vmatmul.mubr.bf16.gmra.mrb[160].mxu1 %v13577_v26  ;;  %6234 = vmatmul.mubr.bf16.gmra.mrb[160].mxu0 %v13577_v26  ;;  %v13600_v26 = vld [vmem:[#allocation165_spill] sm:$0xff] }
 0x34c   : > { %5165 = vmatprep.mubr.bf16.mxu1 %v13578_v28  ;;  %6240 = vmatprep.mubr.bf16.mxu0 %v13578_v28  ;;  %v13601_v28 = vld [vmem:[#allocation167_spill] sm:$0xff] }
 0x34e   : > { %v6029_v60 = vpop.f32.mrb[164].mxu0 }
 0x34f   : > { %v6030_v24 = vpop.f32.mrb[165].mxu0 }
 0x350   : > { %v6031_v4 = vpop.f32.mrb[166].mxu0 }
 0x351   : > { %v6032_v7 = vpop.f32.mrb[167].mxu0 }
 0x353   : > { %5166 = vmatmul.mubr.bf16.gmra.mrb[164].mxu1 %v13579_v39  ;;  %6241 = vmatmul.mubr.bf16.gmra.mrb[252].mxu0 %v13579_v39  ;;  %v9954_v39 = vld [vmem:[%s10157_s7 + $0x790] ss:$20 sps:$4 sm:$0xff]  }
 0x354   : > { %5175 = vmatprep.mubr.bf16.mxu1 %v13580_v59  ;;  %6246 = vmatprep.mubr.bf16.mxu0 %v13580_v59  ;;  %v9957_v59 = vld [vmem:[%s10157_s7 + $0x7b4] ss:$20 sps:$4 sm:$0xff]  }
 0x356   : > { %v6035_v32 = vpop.f32.mrb[168].mxu0 }
 0x357   : > { %v6036_v37 = vpop.f32.mrb[169].mxu0  ;;  %v13603_v32 = vld [vmem:[#allocation3_spill] sm:$0xff] }
 0x358   : > { %v6037_v1 = vpop.f32.mrb[170].mxu0  ;;  %v9955_v37 = vld [vmem:[%s10157_s7 + $0x7b0] ss:$20 sps:$4 sm:$0xff]  }
 0x359   : > { %v6038_v29 = vpop.f32.mrb[171].mxu0  ;;  %v13604_v1 = vld [vmem:[#allocation4_spill] sm:$0xff] }
 0x35a   : > { %v9961_v29 = vld [vmem:[%s10157_s7 + $0x7dc] ss:$20 sps:$4 sm:$0xff]  }
 0x35b   : > { %5176 = vmatmul.mubr.bf16.gmra.mrb[168].mxu1 %v13581_v13  ;;  %6247 = vmatmul.mubr.bf16.gmra.mrb[0].mxu0 %v13581_v13  ;;  %v9958_v13 = vld [vmem:[%s10157_s7 + $0x7b8] ss:$20 sps:$4 sm:$0xff]  }
 0x35c   : > { %5185 = vmatprep.mubr.bf16.mxu1 %v13582_v16  ;;  %6252 = vmatprep.mubr.bf16.mxu0 %v13582_v16 }
 0x35e   : > { %v6041_v0 = vpop.f32.mrb[172].mxu0 }
 0x35f   : > { %v6042_v2 = vpop.f32.mrb[173].mxu0 }
 0x360   : > { %v6043_v21 = vpop.f32.mrb[174].mxu0 }
 0x361   : > { %v6044_v50 = vpop.f32.mrb[175].mxu0  ;;  %v9959_v21 = vld [vmem:[%s10157_s7 + $0x7d8] ss:$20 sps:$4 sm:$0xff]  }
 0x363   : > { %5186 = vmatmul.mubr.bf16.gmra.mrb[172].mxu1 %v13583_v18  ;;  %6253 = vmatmul.mubr.bf16.gmra.mrb[4].mxu0 %v13583_v18  ;;  %v9962_v18 = vld [vmem:[%s10157_s7 + $0x7e0] ss:$20 sps:$4 sm:$0xff]  }
 0x364   : > { %5195 = vmatprep.mubr.bf16.mxu1 %v13584_v48  ;;  %6258 = vmatprep.mubr.bf16.mxu0 %v13584_v48  ;;  %v9965_v48 = vld [vmem:[%s10157_s7 + $0x804] ss:$20 sps:$4 sm:$0xff]  }
 0x366   : > { %v6047_v62 = vpop.f32.mrb[176].mxu0 }
 0x367   : > { %v6048_v41 = vpop.f32.mrb[177].mxu0  ;;  %v13605_v62 = vld [vmem:[#allocation5_spill] sm:$0xff] }
 0x368   : > { %v6049_v9 = vpop.f32.mrb[178].mxu0  ;;  %v13606_v41 = vld [vmem:[#allocation6_spill] sm:$0xff] }
 0x369   : > { %v6050_v11 = vpop.f32.mrb[179].mxu0  ;;  %v9963_v9 = vld [vmem:[%s10157_s7 + $0x800] ss:$20 sps:$4 sm:$0xff]  }
 0x36a   : > { %v9966_v11 = vld [vmem:[%s10157_s7 + $0x808] ss:$20 sps:$4 sm:$0xff]  }
 0x36b   : > { %5196 = vmatmul.mubr.bf16.gmra.mrb[176].mxu1 %v13585_v10  ;;  %6259 = vmatmul.mubr.bf16.gmra.mrb[8].mxu0 %v13585_v10  ;;  %v9969_v10 = vld [vmem:[%s10157_s7 + $0x82c] ss:$20 sps:$4 sm:$0xff]  }
 0x36c   : > { %5205 = vmatprep.mubr.bf16.mxu1 %v13586_v40  ;;  %6264 = vmatprep.mubr.bf16.mxu0 %v13586_v40 }
 0x36e   : > { %v6053_v20 = vpop.f32.mrb[180].mxu0 }
 0x36f   : > { %v6054_v5 = vpop.f32.mrb[181].mxu0 }
 0x370   : > { %v6055_v19 = vpop.f32.mrb[182].mxu0 }
 0x371   : > { %v6056_v15 = vpop.f32.mrb[183].mxu0  ;;  %v9967_v19 = vld [vmem:[%s10157_s7 + $0x828] ss:$20 sps:$4 sm:$0xff]  }
 0x373   : > { %5206 = vmatmul.mubr.bf16.gmra.mrb[180].mxu1 %v13587_v35  ;;  %6265 = vmatmul.mubr.bf16.gmra.mrb[12].mxu0 %v13587_v35  ;;  %v9970_v35 = vld [vmem:[%s10157_s7 + $0x830] ss:$20 sps:$4 sm:$0xff]  }
 0x374   : > { %5215 = vmatprep.mubr.bf16.mxu1 %v13588_v44  ;;  %6270 = vmatprep.mubr.bf16.mxu0 %v13588_v44  ;;  %v9973_v44 = vld [vmem:[%s10157_s7 + $0x854] ss:$20 sps:$4 sm:$0xff]  }
 0x376   : > { %v6059_v52 = vpop.f32.mrb[184].mxu0 }
 0x377   : > { %v6060_v23 = vpop.f32.mrb[185].mxu0  ;;  %v13607_v52 = vld [vmem:[#allocation7_spill] sm:$0xff] }
 0x378   : > { %v6061_v55 = vpop.f32.mrb[186].mxu0  ;;  %v13608_v23 = vld [vmem:[#allocation8_spill] sm:$0xff] }
 0x379   : > { %v6062_v54 = vpop.f32.mrb[187].mxu0  ;;  %v9971_v55 = vld [vmem:[%s10157_s7 + $0x850] ss:$20 sps:$4 sm:$0xff]  }
 0x37a   : > { %v9974_v54 = vld [vmem:[%s10157_s7 + $0x858] ss:$20 sps:$4 sm:$0xff]  }
 0x37b   : > { %5216 = vmatmul.mubr.bf16.gmra.mrb[184].mxu1 %v13589_v47  ;;  %6271 = vmatmul.mubr.bf16.gmra.mrb[16].mxu0 %v13589_v47  ;;  %v9977_v47 = vld [vmem:[%s10157_s7 + $0x87c] ss:$20 sps:$4 sm:$0xff]  }
 0x37c   : > { %5225 = vmatprep.mubr.bf16.mxu1 %v13590_v34  ;;  %6276 = vmatprep.mubr.bf16.mxu0 %v13590_v34 }
 0x37e   : > { %v6065_v38 = vpop.f32.mrb[188].mxu0 }
 0x37f   : > { %v6066_v33 = vpop.f32.mrb[189].mxu0 }
 0x380   : > { %v6067_v51 = vpop.f32.mrb[190].mxu0 }
 0x381   : > { %v6068_v42 = vpop.f32.mrb[191].mxu0  ;;  %v9975_v51 = vld [vmem:[%s10157_s7 + $0x878] ss:$20 sps:$4 sm:$0xff]  }
 0x383   : > { %5226 = vmatmul.mubr.bf16.gmra.mrb[188].mxu1 %v13591_v53  ;;  %6277 = vmatmul.mubr.bf16.gmra.mrb[20].mxu0 %v13591_v53  ;;  %v9978_v53 = vld [vmem:[%s10157_s7 + $0x880] ss:$20 sps:$4 sm:$0xff]  }
 0x384   : > { %5235 = vmatprep.mubr.bf16.mxu1 %v13592_v46  ;;  %6282 = vmatprep.mubr.bf16.mxu0 %v13592_v46  ;;  %v9981_v46 = vld [vmem:[%s10157_s7 + $0x8a4] ss:$20 sps:$4 sm:$0xff]  }
 0x386   : > { %v6071_v3 = vpop.f32.mrb[192].mxu0 }
 0x387   : > { %v6072_v6 = vpop.f32.mrb[193].mxu0  ;;  %v13609_v3 = vld [vmem:[#allocation9_spill] sm:$0xff] }
 0x388   : > { %v6073_v63 = vpop.f32.mrb[194].mxu0  ;;  %v13610_v6 = vld [vmem:[#allocation10_spill] sm:$0xff] }
 0x389   : > { %v6074_v8 = vpop.f32.mrb[195].mxu0  ;;  %v9979_v63 = vld [vmem:[%s10157_s7 + $0x8a0] ss:$20 sps:$4 sm:$0xff]  }
 0x38a   : > { %v9982_v8 = vld [vmem:[%s10157_s7 + $0x8a8] ss:$20 sps:$4 sm:$0xff]  }
 0x38b   : > { %5236 = vmatmul.mubr.bf16.gmra.mrb[192].mxu1 %v13593_v25  ;;  %6283 = vmatmul.mubr.bf16.gmra.mrb[24].mxu0 %v13593_v25  ;;  %v9985_v25 = vld [vmem:[%s10157_s7 + $0x8cc] ss:$20 sps:$4 sm:$0xff]  }
 0x38c   : > { %5245 = vmatprep.mubr.bf16.mxu1 %v13594_v58  ;;  %6288 = vmatprep.mubr.bf16.mxu0 %v13594_v58 }
 0x393   : > { %5246 = vmatmul.mubr.bf16.gmra.mrb[196].mxu1 %v13595_v14  ;;  %6289 = vmatmul.mubr.bf16.gmra.mrb[196].mxu0 %v13595_v14 }
 0x394   : > { %5255 = vmatprep.mubr.bf16.mxu1 %v13596_v31  ;;  %6295 = vmatprep.mubr.bf16.mxu0 %v13596_v31 }
 0x39b   : > { %5256 = vmatmul.mubr.bf16.gmra.mrb[200].mxu1 %v13597_v12  ;;  %6296 = vmatmul.mubr.bf16.gmra.mrb[200].mxu0 %v13597_v12  ;;  %v9983_v12 = vld [vmem:[%s10157_s7 + $0x8c8] ss:$20 sps:$4 sm:$0xff]  }
 0x39c   : > { %5265 = vmatprep.mubr.bf16.mxu1 %v13598_v45  ;;  %6303 = vmatprep.mubr.bf16.mxu0 %v13598_v45 }
 0x3a3   : > { %5266 = vmatmul.mubr.bf16.gmra.mrb[204].mxu1 %v11170_v17  ;;  %6304 = vmatmul.mubr.bf16.gmra.mrb[204].mxu0 %v11170_v17  ;;  %v13602_v17 = vld [vmem:[#allocation2_spill] sm:$0xff] }
 0x3a4   : > { %5275 = vmatprep.mubr.bf16.mxu1 %v11174_v49  ;;  %6311 = vmatprep.mubr.bf16.mxu0 %v11174_v49  ;;  %v9951_v49 = vld [vmem:[%s10157_s7 + $0x788] ss:$20 sps:$4 sm:$0xff]  }
 0x3ab   : > { %5276 = vmatmul.mubr.bf16.gmra.mrb[208].mxu1 %v13599_v22  ;;  %6312 = vmatmul.mubr.bf16.gmra.mrb[208].mxu0 %v13599_v22  ;;  %v9986_v22 = vld [vmem:[%s10157_s7 + $0x8d0] ss:$20 sps:$4 sm:$0xff]  }
 0x3ac   : > { %5285 = vmatprep.mubr.bf16.mxu1 %v13600_v26  ;;  %6319 = vmatprep.mubr.bf16.mxu0 %v13600_v26  ;;  %v9989_v26 = vld [vmem:[%s10157_s7 + $0x8f4] ss:$20 sps:$4 sm:$0xff]  }
 0x3b3   : > { %5286 = vmatmul.mubr.bf16.gmra.mrb[212].mxu1 %v13601_v28  ;;  %6320 = vmatmul.mubr.bf16.gmra.mrb[212].mxu0 %v13601_v28  ;;  %v13611_v28 = vld [vmem:[#allocation11_spill] sm:$0xff] }
 0x3b4   : > { %5328 = vmatprep.mubr.bf16.mxu1 %v13602_v17  ;;  %6360 = vmatprep.mubr.bf16.mxu0 %v13602_v17  ;;  %v13612_v17 = vld [vmem:[#allocation12_spill] sm:$0xff] }
 0x3b6   : > { %v6149_v60 = vpop.f32.mrb[216].mxu0 }
 0x3b7   : > { %v6150_v24 = vpop.f32.mrb[217].mxu0  ;;  %v9987_v60 = vld [vmem:[%s10157_s7 + $0x8f0] ss:$20 sps:$4 sm:$0xff]  }
 0x3b8   : > { %v6151_v4 = vpop.f32.mrb[218].mxu0  ;;  %v9993_v24 = vld [vmem:[%s10157_s7 + $0x91c] ss:$20 sps:$4 sm:$0xff]  }
 0x3b9   : > { %v6152_v7 = vpop.f32.mrb[219].mxu0 }
 0x3bb   : > { %5329 = vmatmul.mubr.bf16.vlgmr.msra.gmra.mrb[108].mxu1 %v13603_v32  ;;  %6361 = vmatmul.mubr.bf16.vlgmr.msra.gmra.mrb[28].mxu0 %v13603_v32 }
 0x3bc   : > { %5600 = vmatpush1.bf16.msra.mxu1 %v9951_v49  ;;  %5338 = vmatprep.mubr.bf16.mxu1 %v13604_v1  ;;  %v9990_v49 = vld [vmem:[%s10157_s7 + $0x8f8] ss:$20 sps:$4 sm:$0xff]  }
 0x3bd   : > { %6366 = vmatprep.mubr.bf16.mxu0 %v13604_v1  ;;  %6542 = vmatpush1.bf16.msra.mxu0 %v9954_v39  ;;  %v9997_v1 = vld [vmem:[%s10157_s7 + $0x944] ss:$20 sps:$4 sm:$0xff]  }
 0x3be   : > { %5601 = vmatprep.subr.bf16.mxu1 %v9957_v59  ;;  %v6155_v16 = vpop.f32.mrb[220].mxu0  ;;  %6543 = vmatprep.subr.bf16.mxu0 %v13437_v56  ;;  %v9991_v59 = vld [vmem:[%s10157_s7 + $0x918] ss:$20 sps:$4 sm:$0xff]  }
 0x3bf   : > { %v6156_v0 = vpop.f32.mrb[221].mxu0  ;;  %v9995_v16 = vld [vmem:[%s10157_s7 + $0x940] ss:$20 sps:$4 sm:$0xff]  }
 0x3c0   : > { %5602 = vmatpush1.bf16.msra.mxu1 %v9955_v37  ;;  %v6157_v2 = vpop.f32.mrb[222].mxu0  ;;  %v9994_v37 = vld [vmem:[%s10157_s7 + $0x920] ss:$20 sps:$4 sm:$0xff]   ;;  %v9998_v0 = vld [vmem:[%s10157_s7 + $0x948] ss:$20 sps:$4 sm:$0xff]  }
 0x3c1   : > { %5603 = vmatprep.subr.bf16.mxu1 %v9961_v29  ;;  %v6158_v50 = vpop.f32.mrb[223].mxu0  ;;  %6544 = vmatpush1.bf16.msra.mxu0 %v9958_v13  ;;  %v13613_v29 = vld [vmem:[#allocation13_spill] sm:$0xff]  ;;  %v13614_v13 = vld [vmem:[#allocation14_spill] sm:$0xff] }
 0x3c2   : > { %6545 = vmatprep.subr.bf16.mxu0 %v13437_v56  ;;  %v10001_v2 = vld [vmem:[%s10157_s7 + $0x96c] ss:$20 sps:$4 sm:$0xff]  }
 0x3c3   : > { %5339 = vmatmul.mubr.bf16.gmra.mrb[112].mxu1 %v13605_v62  ;;  %6367 = vmatmul.mubr.bf16.gmra.mrb[32].mxu0 %v13605_v62 }
 0x3c4   : > { %5348 = vmatprep.mubr.bf16.mxu1 %v13606_v41  ;;  %6372 = vmatprep.mubr.bf16.mxu0 %v13606_v41  ;;  %v10002_v41 = vld [vmem:[%s10157_s7 + $0x970] ss:$20 sps:$4 sm:$0xff]  }
 0x3c5   : > { %5604 = vmatpush1.bf16.msra.mxu1 %v9959_v21  ;;  %6546 = vmatpush1.bf16.msra.mxu0 %v9962_v18 }
 0x3c6   : > { %5605 = vmatprep.subr.bf16.mxu1 %v9965_v48  ;;  %v6161_v40 = vpop.f32.mrb[224].mxu0  ;;  %6547 = vmatprep.subr.bf16.mxu0 %v13437_v56  ;;  %v9999_v48 = vld [vmem:[%s10157_s7 + $0x968] ss:$20 sps:$4 sm:$0xff]  }
 0x3c7   : > { %v6162_v20 = vpop.f32.mrb[225].mxu0  ;;  %v10003_v40 = vld [vmem:[%s10157_s7 + $0x990] ss:$20 sps:$4 sm:$0xff]  }
 0x3c8   : > { %v6163_v5 = vpop.f32.mrb[226].mxu0  ;;  %v10006_v20 = vld [vmem:[%s10157_s7 + $0x998] ss:$20 sps:$4 sm:$0xff]  }
 0x3c9   : > { %5606 = vmatpush1.bf16.msra.mxu1 %v9963_v9  ;;  %v6164_v15 = vpop.f32.mrb[227].mxu0  ;;  %6548 = vmatpush1.bf16.msra.mxu0 %v9966_v11  ;;  %v13615_v9 = vld [vmem:[#allocation15_spill] sm:$0xff] }
 0x3ca   : > { %5607 = vmatprep.subr.bf16.mxu1 %v9969_v10  ;;  %6549 = vmatprep.subr.bf16.mxu0 %v13437_v56  ;;  %v10005_v11 = vld [vmem:[%s10157_s7 + $0x994] ss:$20 sps:$4 sm:$0xff]  }
 0x3cb   : > { %5349 = vmatmul.mubr.bf16.gmra.mrb[116].mxu1 %v13607_v52  ;;  %6373 = vmatmul.mubr.bf16.gmra.mrb[36].mxu0 %v13607_v52  ;;  %v13616_v10 = vld [vmem:[#allocation16_spill] sm:$0xff]  ;;  %v13618_v52 = vld [vmem:[#allocation18_spill] sm:$0xff] }
 0x3cc   : > { %5358 = vmatprep.mubr.bf16.mxu1 %v13608_v23  ;;  %6378 = vmatprep.mubr.bf16.mxu0 %v13608_v23  ;;  %v10007_v23 = vld [vmem:[%s10157_s7 + $0x9b8] ss:$20 sps:$4 sm:$0xff]  }
 0x3cd   : > { %5608 = vmatpush1.bf16.msra.mxu1 %v9967_v19  ;;  %6550 = vmatpush1.bf16.msra.mxu0 %v9970_v35 }
 0x3ce   : > { %5609 = vmatprep.subr.bf16.mxu1 %v9973_v44  ;;  %v6167_v34 = vpop.f32.mrb[228].mxu0  ;;  %6551 = vmatprep.subr.bf16.mxu0 %v13437_v56  ;;  %v13617_v44 = vld [vmem:[#allocation17_spill] sm:$0xff] }
 0x3cf   : > { %v6168_v38 = vpop.f32.mrb[229].mxu0 }
 0x3d0   : > { %v6169_v33 = vpop.f32.mrb[230].mxu0 }
 0x3d1   : > { %5610 = vmatpush1.bf16.msra.mxu1 %v9971_v55  ;;  %v6170_v42 = vpop.f32.mrb[231].mxu0  ;;  %6552 = vmatpush1.bf16.msra.mxu0 %v9974_v54  ;;  %v10009_v55 = vld [vmem:[%s10157_s7 + $0x9bc] ss:$20 sps:$4 sm:$0xff]   ;;  %v13619_v33 = vld [vmem:[#allocation19_spill] sm:$0xff] }
 0x3d2   : > { %5611 = vmatprep.subr.bf16.mxu1 %v9977_v47  ;;  %6553 = vmatprep.subr.bf16.mxu0 %v13437_v56  ;;  %v10010_v42 = vld [vmem:[%s10157_s7 + $0x9c0] ss:$20 sps:$4 sm:$0xff]  }
 0x3d3   : > { %5359 = vmatmul.mubr.bf16.gmra.mrb[120].mxu1 %v13609_v3  ;;  %6379 = vmatmul.mubr.bf16.gmra.mrb[40].mxu0 %v13609_v3  ;;  %v10011_v3 = vld [vmem:[%s10157_s7 + $0x9e0] ss:$20 sps:$4 sm:$0xff]  }
 0x3d4   : > { %5368 = vmatprep.mubr.bf16.mxu1 %v13610_v6  ;;  %6384 = vmatprep.mubr.bf16.mxu0 %v13610_v6  ;;  %v10013_v6 = vld [vmem:[%s10157_s7 + $0x9e4] ss:$20 sps:$4 sm:$0xff]  }
 0x3d5   : > { %5612 = vmatpush1.bf16.msra.mxu1 %v9975_v51  ;;  %6554 = vmatpush1.bf16.msra.mxu0 %v9978_v53  ;;  %v13620_v51 = vld [vmem:[#allocation20_spill] sm:$0xff]  ;;  %v13621_v53 = vld [vmem:[#allocation21_spill] sm:$0xff] }
 0x3d6   : > { %5613 = vmatprep.subr.bf16.mxu1 %v9981_v46  ;;  %v6173_v58 = vpop.f32.mrb[232].mxu0  ;;  %6555 = vmatprep.subr.bf16.mxu0 %v13437_v56  ;;  %v13622_v46 = vld [vmem:[#allocation22_spill] sm:$0xff] }
 0x3d7   : > { %v6174_v14 = vpop.f32.mrb[233].mxu0  ;;  %v13626_v58 = vld [vmem:[#allocation26_spill] sm:$0xff] }
 0x3d8   : > { %v6175_v31 = vpop.f32.mrb[234].mxu0  ;;  %v13627_v14 = vld [vmem:[#allocation27_spill] sm:$0xff] }
 0x3d9   : > { %5614 = vmatpush1.bf16.msra.mxu1 %v9979_v63  ;;  %v6176_v45 = vpop.f32.mrb[235].mxu0  ;;  %6556 = vmatpush1.bf16.msra.mxu0 %v9982_v8  ;;  %v13623_v63 = vld [vmem:[#allocation23_spill] sm:$0xff]  ;;  %v13624_v8 = vld [vmem:[#allocation24_spill] sm:$0xff] }
 0x3da   : > { %5615 = vmatprep.subr.bf16.mxu1 %v9985_v25  ;;  %6557 = vmatprep.subr.bf16.mxu0 %v13437_v56  ;;  %v10014_v25 = vld [vmem:[%s10157_s7 + $0x9e8] ss:$20 sps:$4 sm:$0xff]   ;;  %v13628_v31 = vld [vmem:[#allocation28_spill] sm:$0xff]  ;;  %v13630_v45 = vld [vmem:[#allocation30_spill] sm:$0xff] }
 0x3db   : > { %5369 = vmatmul.mubr.bf16.gmra.mrb[124].mxu1 %v13611_v28  ;;  %6385 = vmatmul.mubr.bf16.gmra.mrb[44].mxu0 %v13611_v28 }
 0x3dc   : > { %5378 = vmatprep.mubr.bf16.mxu1 %v13612_v17  ;;  %6390 = vmatprep.mubr.bf16.mxu0 %v13612_v17 }
 0x3dd   : > { %5616 = vmatpush1.bf16.msra.mxu1 %v9983_v12  ;;  %6558 = vmatpush1.bf16.msra.mxu0 %v9986_v22  ;;  %v13629_v12 = vld [vmem:[#allocation29_spill] sm:$0xff] }
 0x3de   : > { %5617 = vmatprep.subr.bf16.mxu1 %v9989_v26  ;;  %v6179_v4 = vpop.f32.mrb[236].mxu0  ;;  %6559 = vmatprep.subr.bf16.mxu0 %v13437_v56 }
 0x3df   : > { %v6180_v7 = vpop.f32.mrb[237].mxu0 }
 0x3e0   : > { %v6181_v39 = vpop.f32.mrb[238].mxu0 }
 0x3e1   : > { %5618 = vmatpush1.bf16.msra.mxu1 %v9987_v60  ;;  %v6182_v32 = vpop.f32.mrb[239].mxu0  ;;  %6560 = vmatpush1.bf16.msra.mxu0 %v9990_v49  ;;  %v13631_v60 = vld [vmem:[#allocation31_spill] sm:$0xff]  ;;  %v13632_v49 = vld [vmem:[#allocation32_spill] sm:$0xff] }
 0x3e2   : > { %5619 = vmatprep.subr.bf16.mxu1 %v9993_v24  ;;  %6561 = vmatprep.subr.bf16.mxu0 %v13437_v56  ;;  %v13634_v32 = vld [vmem:[#allocation34_spill] sm:$0xff] }
 0x3e3   : > { %5379 = vmatmul.mubr.bf16.gmra.mrb[128].mxu1 %v13613_v29  ;;  %6391 = vmatmul.mubr.bf16.gmra.mrb[48].mxu0 %v13613_v29 }
 0x3e4   : > { %5388 = vmatprep.mubr.bf16.mxu1 %v13614_v13  ;;  %6396 = vmatprep.mubr.bf16.mxu0 %v13614_v13 }
 0x3e5   : > { %5620 = vmatpush1.bf16.msra.mxu1 %v9991_v59  ;;  %6562 = vmatpush1.bf16.msra.mxu0 %v9994_v37  ;;  %v13633_v59 = vld [vmem:[#allocation33_spill] sm:$0xff] }
 0x3e6   : > { %5621 = vmatprep.subr.bf16.mxu1 %v9997_v1  ;;  %v6185_v21 = vpop.f32.mrb[240].mxu0  ;;  %6563 = vmatprep.subr.bf16.mxu0 %v13437_v56 }
 0x3e7   : > { %v6186_v50 = vpop.f32.mrb[241].mxu0 }
 0x3e8   : > { %v6187_v18 = vpop.f32.mrb[242].mxu0 }
 0x3e9   : > { %5622 = vmatpush1.bf16.msra.mxu1 %v9995_v16  ;;  %v6188_v62 = vpop.f32.mrb[243].mxu0  ;;  %6564 = vmatpush1.bf16.msra.mxu0 %v9998_v0  ;;  %v13635_v16 = vld [vmem:[#allocation35_spill] sm:$0xff]  ;;  %v13636_v0 = vld [vmem:[#allocation36_spill] sm:$0xff] }
 0x3ea   : > { %5623 = vmatprep.subr.bf16.mxu1 %v10001_v2  ;;  %6565 = vmatprep.subr.bf16.mxu0 %v13437_v56  ;;  %v13638_v62 = vld [vmem:[#allocation38_spill] sm:$0xff] }
 0x3eb   : > { %5389 = vmatmul.mubr.bf16.gmra.mrb[132].mxu1 %v13615_v9  ;;  %6397 = vmatmul.mubr.bf16.gmra.mrb[52].mxu0 %v13615_v9 }
 0x3ec   : > { %5398 = vmatprep.mubr.bf16.mxu1 %v13616_v10  ;;  %6402 = vmatprep.mubr.bf16.mxu0 %v13616_v10 }
 0x3ed   : > { %5624 = vmatpush1.bf16.msra.mxu1 %v9999_v48  ;;  %6566 = vmatpush1.bf16.msra.mxu0 %v10002_v41  ;;  %v13637_v48 = vld [vmem:[#allocation37_spill] sm:$0xff] }
 0x3ee   : > { %5625 = vmatprep.subr.bf16.mxu1 %v10005_v11  ;;  %v6191_v5 = vpop.f32.mrb[244].mxu0  ;;  %6567 = vmatprep.subr.bf16.mxu0 %v13437_v56 }
 0x3ef   : > { %v6192_v19 = vpop.f32.mrb[245].mxu0 }
 0x3f0   : > { %v6193_v15 = vpop.f32.mrb[246].mxu0 }
 0x3f1   : > { %5626 = vmatpush1.bf16.msra.mxu1 %v10003_v40  ;;  %v6194_v35 = vpop.f32.mrb[247].mxu0  ;;  %6568 = vmatpush1.bf16.msra.mxu0 %v10006_v20  ;;  %v13639_v40 = vld [vmem:[#allocation39_spill] sm:$0xff]  ;;  %v13640_v20 = vld [vmem:[#allocation40_spill] sm:$0xff] }
 0x3f2   : > { %6569 = vmatprep.subr.bf16.mxu0 %v13437_v56  ;;  %5627 = vmatprep.subr.bf16.mxu1 %v10009_v55 }
 0x3f3   : > { %5399 = vmatmul.mubr.bf16.gmra.mrb[136].mxu1 %v13617_v44  ;;  %6403 = vmatmul.mubr.bf16.gmra.mrb[56].mxu0 %v13617_v44  ;;  %v13641_v44 = vld [vmem:[#allocation41_spill] sm:$0xff] }
 0x3f4   : > { %5408 = vmatprep.mubr.bf16.mxu1 %v13618_v52  ;;  %6408 = vmatprep.mubr.bf16.mxu0 %v13618_v52  ;;  %v13642_v52 = vld [vmem:[#allocation42_spill] sm:$0xff] }
 0x3f5   : > { %5628 = vmatpush1.bf16.msra.mxu1 %v10007_v23  ;;  %6570 = vmatpush1.bf16.msra.mxu0 %v10010_v42 }
 0x3f6   : > { %v6197_v54 = vpop.f32.mrb[248].mxu0  ;;  %6571 = vmatprep.subr.bf16.mxu0 %v13437_v56  ;;  %5629 = vmatprep.subr.bf16.mxu1 %v10013_v6  ;;  %v13625_v56 = vld [vmem:[#allocation25_spill] sm:$0xff]  ;;  %v13647_v6 = vld [vmem:[#allocation48_spill] sm:$0xff] }
 0x3f7   : > { %v6198_v47 = vpop.f32.mrb[249].mxu0 }
 0x3f8   : > { %v6199_v34 = vpop.f32.mrb[250].mxu0 }
 0x3f9   : > { %v6200_v38 = vpop.f32.mrb[251].mxu0  ;;  %5630 = vmatpush1.bf16.msra.mxu1 %v10011_v3  ;;  %6572 = vmatpush1.bf16.msra.mxu0 %v10014_v25  ;;  %v13643_v34 = vld [vmem:[#allocation43_spill] sm:$0xff]  ;;  %v13646_v3 = vld [vmem:[#allocation46_spill] sm:$0xff] }
 0x3fa   : > { %v13644_v38 = vld [vmem:[#allocation44_spill] sm:$0xff]  ;;  %v13650_v25 = vld [vmem:[#allocation54_spill] sm:$0xff] }
 0x3fb   : > { %5409 = vmatmul.mubr.bf16.gmra.mrb[140].mxu1 %v13619_v33  ;;  %6409 = vmatmul.mubr.bf16.gmra.mrb[60].mxu0 %v13619_v33 }
 0x3fc   : > { %5418 = vmatprep.mubr.bf16.mxu1 %v13620_v51  ;;  %6414 = vmatprep.mubr.bf16.mxu0 %v13620_v51 }
 0x403   : > { %5419 = vmatmul.mubr.bf16.gmra.mrb[144].mxu1 %v13621_v53  ;;  %6415 = vmatmul.mubr.bf16.gmra.mrb[144].mxu0 %v13621_v53 }
 0x404   : > { %5428 = vmatprep.mubr.bf16.mxu1 %v13622_v46  ;;  %6422 = vmatprep.mubr.bf16.mxu0 %v13622_v46  ;;  %v13645_v46 = vld [vmem:[#allocation45_spill] sm:$0xff] }
 0x40b   : > { %5429 = vmatmul.mubr.bf16.gmra.mrb[148].mxu1 %v13623_v63  ;;  %6423 = vmatmul.mubr.bf16.gmra.mrb[148].mxu0 %v13623_v63  ;;  %v13648_v63 = vld [vmem:[#allocation50_spill] sm:$0xff] }
 0x40c   : > { %5438 = vmatprep.mubr.bf16.mxu1 %v13624_v8  ;;  %6430 = vmatprep.mubr.bf16.mxu0 %v13624_v8  ;;  %v13649_v8 = vld [vmem:[#allocation52_spill] sm:$0xff] }
 0x413   : > { %5439 = vmatmul.mubr.bf16.gmra.mrb[152].mxu1 %v13625_v56  ;;  %6431 = vmatmul.mubr.bf16.gmra.mrb[152].mxu0 %v13625_v56  ;;  %v13651_v56 = vld [vmem:[#allocation56_spill] sm:$0xff] }
 0x414   : > { %5448 = vmatprep.mubr.bf16.mxu1 %v13626_v58  ;;  %6438 = vmatprep.mubr.bf16.mxu0 %v13626_v58  ;;  %v13652_v58 = vld [vmem:[#allocation58_spill] sm:$0xff] }
 0x41b   : > { %5449 = vmatmul.mubr.bf16.gmra.mrb[156].mxu1 %v13627_v14  ;;  %6439 = vmatmul.mubr.bf16.gmra.mrb[156].mxu0 %v13627_v14  ;;  %v13653_v14 = vld [vmem:[#allocation60_spill] sm:$0xff] }
 0x41c   : > { %5458 = vmatprep.mubr.bf16.mxu1 %v13628_v31  ;;  %6446 = vmatprep.mubr.bf16.mxu0 %v13628_v31  ;;  %v13654_v31 = vld [vmem:[#allocation62_spill] sm:$0xff] }
 0x423   : > { %5459 = vmatmul.mubr.bf16.gmra.mrb[160].mxu1 %v13629_v12  ;;  %6447 = vmatmul.mubr.bf16.gmra.mrb[160].mxu0 %v13629_v12  ;;  %v13655_v12 = vld [vmem:[#allocation64_spill] sm:$0xff] }
 0x424   : > { %5468 = vmatprep.mubr.bf16.mxu1 %v13630_v45  ;;  %6453 = vmatprep.mubr.bf16.mxu0 %v13630_v45  ;;  %v13656_v45 = vld [vmem:[#allocation66_spill] sm:$0xff] }
 0x426   : > { %v6242_v22 = vpop.f32.mrb[252].mxu0 }
 0x427   : > { %v6243_v26 = vpop.f32.mrb[253].mxu0 }
 0x428   : > { %v6244_v28 = vpop.f32.mrb[254].mxu0 }
 0x429   : > { %v6245_v17 = vpop.f32.mrb[255].mxu0 }
 0x42b   : > { %5469 = vmatmul.mubr.bf16.gmra.mrb[164].mxu1 %v13631_v60  ;;  %6454 = vmatmul.mubr.bf16.gmra.mrb[64].mxu0 %v13631_v60  ;;  %v13657_v60 = vld [vmem:[#allocation68_spill] sm:$0xff] }
 0x42c   : > { %5478 = vmatprep.mubr.bf16.mxu1 %v13632_v49  ;;  %6459 = vmatprep.mubr.bf16.mxu0 %v13632_v49  ;;  %v13658_v49 = vld [vmem:[#allocation70_spill] sm:$0xff] }
 0x42e   : > { %v6248_v24 = vpop.f32.mrb[0].mxu0 }
 0x42f   : > { %v6249_v4 = vpop.f32.mrb[1].mxu0 }
 0x430   : > { %v6250_v7 = vpop.f32.mrb[2].mxu0 }
 0x431   : > { %v6251_v39 = vpop.f32.mrb[3].mxu0 }
 0x433   : > { %5479 = vmatmul.mubr.bf16.gmra.mrb[168].mxu1 %v13633_v59  ;;  %6460 = vmatmul.mubr.bf16.gmra.mrb[68].mxu0 %v13633_v59  ;;  %v13659_v59 = vld [vmem:[#allocation72_spill] sm:$0xff] }
 0x434   : > { %5488 = vmatprep.mubr.bf16.mxu1 %v13634_v32  ;;  %6465 = vmatprep.mubr.bf16.mxu0 %v13634_v32  ;;  %v13660_v32 = vld [vmem:[#allocation74_spill] sm:$0xff] }
 0x436   : > { %v6254_v37 = vpop.f32.mrb[4].mxu0 }
 0x437   : > { %v6255_v1 = vpop.f32.mrb[5].mxu0 }
 0x438   : > { %v6256_v29 = vpop.f32.mrb[6].mxu0 }
 0x439   : > { %v6257_v13 = vpop.f32.mrb[7].mxu0 }
 0x43b   : > { %5489 = vmatmul.mubr.bf16.gmra.mrb[172].mxu1 %v13635_v16  ;;  %6466 = vmatmul.mubr.bf16.gmra.mrb[72].mxu0 %v13635_v16  ;;  %v13661_v16 = vld [vmem:[#allocation76_spill] sm:$0xff] }
 0x43c   : > { %5498 = vmatprep.mubr.bf16.mxu1 %v13636_v0  ;;  %6471 = vmatprep.mubr.bf16.mxu0 %v13636_v0  ;;  %v13662_v0 = vld [vmem:[#allocation78_spill] sm:$0xff] }
 0x43e   : > { %v6260_v2 = vpop.f32.mrb[8].mxu0 }
 0x43f   : > { %v6261_v21 = vpop.f32.mrb[9].mxu0  ;;  %v11834_v2 = vpop.permute.xlu0 %6782 }
 0x440   : > { %v6262_v50 = vpop.f32.mrb[10].mxu0  ;;  %13663 = vst [vmem:[#allocation53_spill] sm:$0xff] %v11834_v2 }
 0x441   : > { %v6263_v18 = vpop.f32.mrb[11].mxu0 }
 0x443   : > { %5499 = vmatmul.mubr.bf16.gmra.mrb[176].mxu1 %v13637_v48  ;;  %6472 = vmatmul.mubr.bf16.gmra.mrb[76].mxu0 %v13637_v48 }
 0x444   : > { %5508 = vmatprep.mubr.bf16.mxu1 %v13638_v62  ;;  %6477 = vmatprep.mubr.bf16.mxu0 %v13638_v62  ;;  %v13664_v62 = vld [vmem:[#allocation80_spill] sm:$0xff] }
 0x446   : > { %v6266_v41 = vpop.f32.mrb[12].mxu0 }
 0x447   : > { %v6267_v9 = vpop.f32.mrb[13].mxu0  ;;  %v11837_v41 = vpop.permute.xlu0 %6836 }
 0x448   : > { %v6268_v11 = vpop.f32.mrb[14].mxu0  ;;  %13665 = vst [vmem:[#allocation55_spill] sm:$0xff] %v11837_v41  ;;  %v13666_v9 = vld [vmem:[#allocation82_spill] sm:$0xff] }
 0x449   : > { %v6269_v10 = vpop.f32.mrb[15].mxu0 }
 0x44b   : > { %5509 = vmatmul.mubr.bf16.gmra.mrb[180].mxu1 %v13639_v40  ;;  %6478 = vmatmul.mubr.bf16.gmra.mrb[80].mxu0 %v13639_v40 }
 0x44c   : > { %5518 = vmatprep.mubr.bf16.mxu1 %v13640_v20  ;;  %6483 = vmatprep.mubr.bf16.mxu0 %v13640_v20  ;;  %v11842_v20 = vpop.permute.xlu0 %6844 }
 0x44d   : > { %13667 = vst [vmem:[#allocation57_spill] sm:$0xff] %v11842_v20 }
 0x44e   : > { %v6272_v5 = vpop.f32.mrb[16].mxu0 }
 0x44f   : > { %v6273_v19 = vpop.f32.mrb[17].mxu0 }
 0x450   : > { %v6274_v15 = vpop.f32.mrb[18].mxu0  ;;  %v13668_v19 = vld [vmem:[#allocation84_spill] sm:$0xff] }
 0x451   : > { %v6275_v35 = vpop.f32.mrb[19].mxu0  ;;  %v13669_v15 = vld [vmem:[#allocation86_spill] sm:$0xff] }
 0x453   : > { %5519 = vmatmul.mubr.bf16.gmra.mrb[184].mxu1 %v13641_v44  ;;  %6484 = vmatmul.mubr.bf16.gmra.mrb[84].mxu0 %v13641_v44  ;;  %v11848_v44 = vpop.permute.xlu0 %6852 }
 0x454   : > { %5528 = vmatprep.mubr.bf16.mxu1 %v13642_v52  ;;  %6489 = vmatprep.mubr.bf16.mxu0 %v13642_v52  ;;  %13670 = vst [vmem:[#allocation59_spill] sm:$0xff] %v11848_v44 }
 0x456   : > { %v6278_v23 = vpop.f32.mrb[20].mxu0 }
 0x457   : > { %v6279_v55 = vpop.f32.mrb[21].mxu0 }
 0x458   : > { %v6280_v54 = vpop.f32.mrb[22].mxu0 }
 0x459   : > { %v6281_v47 = vpop.f32.mrb[23].mxu0  ;;  %v13671_v54 = vld [vmem:[#allocation88_spill] sm:$0xff] }
 0x45a   : > { %v13672_v47 = vld [vmem:[#allocation90_spill] sm:$0xff] }
 0x45b   : > { %5529 = vmatmul.mubr.bf16.gmra.mrb[188].mxu1 %v13643_v34  ;;  %6490 = vmatmul.mubr.bf16.gmra.mrb[88].mxu0 %v13643_v34  ;;  %v11854_v34 = vpop.permute.xlu0 %6906 }
 0x45c   : > { %5538 = vmatprep.mubr.bf16.mxu1 %v13644_v38  ;;  %6495 = vmatprep.mubr.bf16.mxu0 %v13644_v38  ;;  %13673 = vst [vmem:[#allocation61_spill] sm:$0xff] %v11854_v34 }
 0x45e   : > { %v6284_v33 = vpop.f32.mrb[24].mxu0 }
 0x45f   : > { %v6285_v51 = vpop.f32.mrb[25].mxu0 }
 0x460   : > { %v6286_v42 = vpop.f32.mrb[26].mxu0 }
 0x461   : > { %v6287_v53 = vpop.f32.mrb[27].mxu0 }
 0x462   : > { %v13674_v53 = vld [vmem:[#allocation91_spill] sm:$0xff] }
 0x463   : > { %5539 = vmatmul.mubr.bf16.gmra.mrb[192].mxu1 %v13645_v46  ;;  %6496 = vmatmul.mubr.bf16.gmra.mrb[92].mxu0 %v13645_v46  ;;  %v11857_v46 = vpop.permute.xlu0 %6914 }
 0x464   : > { %5548 = vmatprep.mubr.bf16.mxu1 %v13646_v3  ;;  %6501 = vmatprep.mubr.bf16.mxu0 %v13646_v3  ;;  %13675 = vst [vmem:[#allocation63_spill] sm:$0xff] %v11857_v46  ;;  %v13676_v3 = vld [vmem:[#allocation93_spill] sm:$0xff] }
 0x46b   : > { %5549 = vmatmul.mubr.bf16.gmra.mrb[196].mxu1 %v13647_v6  ;;  %6502 = vmatmul.mubr.bf16.gmra.mrb[196].mxu0 %v13647_v6 }
 0x46c   : > { %5558 = vmatprep.mubr.bf16.mxu1 %v13648_v63  ;;  %6508 = vmatprep.mubr.bf16.mxu0 %v13648_v63 }
 0x473   : > { %5559 = vmatmul.mubr.bf16.gmra.mrb[200].mxu1 %v13649_v8  ;;  %6509 = vmatmul.mubr.bf16.gmra.mrb[200].mxu0 %v13649_v8 }
 0x474   : > { %5568 = vmatprep.mubr.bf16.mxu1 %v13650_v25  ;;  %6516 = vmatprep.mubr.bf16.mxu0 %v13650_v25  ;;  %v11862_v25 = vpop.permute.xlu0 %6922 }
 0x475   : > { %13677 = vst [vmem:[#allocation65_spill] sm:$0xff] %v11862_v25 }
 0x47b   : > { %5569 = vmatmul.mubr.bf16.gmra.mrb[204].mxu1 %v13651_v56  ;;  %6517 = vmatmul.mubr.bf16.gmra.mrb[204].mxu0 %v13651_v56 }
 0x47c   : > { %5578 = vmatprep.mubr.bf16.mxu1 %v13652_v58  ;;  %6524 = vmatprep.mubr.bf16.mxu0 %v13652_v58  ;;  %v13678_v58 = vld [vmem:[#allocation94_spill] sm:$0xff] }
 0x483   : > { %5579 = vmatmul.mubr.bf16.gmra.mrb[208].mxu1 %v13653_v14  ;;  %6525 = vmatmul.mubr.bf16.gmra.mrb[208].mxu0 %v13653_v14  ;;  %v13679_v14 = vld [vmem:[#allocation96_spill] sm:$0xff] }
 0x484   : > { %5588 = vmatprep.mubr.bf16.mxu1 %v13654_v31  ;;  %6532 = vmatprep.mubr.bf16.mxu0 %v13654_v31 }
 0x48b   : > { %5589 = vmatmul.mubr.bf16.gmra.mrb[212].mxu1 %v13655_v12  ;;  %6533 = vmatmul.mubr.bf16.gmra.mrb[212].mxu0 %v13655_v12  ;;  %v11868_v12 = vpop.permute.xlu0 %6976 }
 0x48c   : > { %5631 = vmatprep.mubr.bf16.mxu1 %v13656_v45  ;;  %6573 = vmatprep.mubr.bf16.mxu0 %v13656_v45  ;;  %13680 = vst [vmem:[#allocation67_spill] sm:$0xff] %v11868_v12 }
 0x48e   : > { %v6362_v22 = vpop.f32.mrb[28].mxu0 }
 0x48f   : > { %v6363_v26 = vpop.f32.mrb[29].mxu0 }
 0x490   : > { %v6364_v28 = vpop.f32.mrb[30].mxu0 }
 0x491   : > { %v6365_v17 = vpop.f32.mrb[31].mxu0  ;;  %v13681_v28 = vld [vmem:[#allocation98_spill] sm:$0xff] }
 0x492   : > { %v13682_v17 = vld [vmem:[#allocation100_spill] sm:$0xff] }
 0x493   : > { %5632 = vmatmul.mubr.bf16.vlgmr.msra.gmra.mrb[108].mxu1 %v13657_v60  ;;  %6574 = vmatmul.mubr.bf16.vlgmr.msra.gmra.mrb[96].mxu0 %v13657_v60  ;;  %v11874_v60 = vpop.permute.xlu0 %6984 }
 0x494   : > { %5641 = vmatprep.mubr.bf16.mxu1 %v13658_v49  ;;  %6579 = vmatprep.mubr.bf16.mxu0 %v13658_v49  ;;  %13683 = vst [vmem:[#allocation69_spill] sm:$0xff] %v11874_v60  ;;  %v13684_v49 = vld [vmem:[#allocation102_spill] sm:$0xff] }
 0x496   : > { %v6368_v24 = vpop.f32.mrb[32].mxu0 }
 0x497   : > { %v6369_v4 = vpop.f32.mrb[33].mxu0  ;;  %v11877_v24 = vpop.permute.xlu0 %6992 }
 0x498   : > { %v6370_v7 = vpop.f32.mrb[34].mxu0  ;;  %13685 = vst [vmem:[#allocation71_spill] sm:$0xff] %v11877_v24  ;;  %v13686_v4 = vld [vmem:[#allocation104_spill] sm:$0xff] }
 0x499   : > { %v6371_v39 = vpop.f32.mrb[35].mxu0 }
 0x49a   : > { %v13688_v39 = vld [vmem:[#allocation106_spill] sm:$0xff] }
 0x49b   : > { %5642 = vmatmul.mubr.bf16.gmra.mrb[112].mxu1 %v13659_v59  ;;  %6580 = vmatmul.mubr.bf16.gmra.mrb[100].mxu0 %v13659_v59  ;;  %v11882_v7 = vpop.permute.xlu0 %7046  ;;  %v13689_v59 = vld [vmem:[#allocation108_spill] sm:$0xff] }
 0x49c   : > { %5651 = vmatprep.mubr.bf16.mxu1 %v13660_v32  ;;  %6585 = vmatprep.mubr.bf16.mxu0 %v13660_v32  ;;  %13687 = vst [vmem:[#allocation73_spill] sm:$0xff] %v11882_v7 }
 0x49e   : > { %v6374_v37 = vpop.f32.mrb[36].mxu0 }
 0x49f   : > { %v6375_v1 = vpop.f32.mrb[37].mxu0  ;;  %v11888_v32 = vpop.permute.xlu0 %7054  ;;  %v13691_v37 = vld [vmem:[#allocation110_spill] sm:$0xff] }
 0x4a0   : > { %v6376_v29 = vpop.f32.mrb[38].mxu0  ;;  %13690 = vst [vmem:[#allocation75_spill] sm:$0xff] %v11888_v32  ;;  %v13692_v1 = vld [vmem:[#allocation112_spill] sm:$0xff] }
 0x4a1   : > { %v6377_v13 = vpop.f32.mrb[39].mxu0 }
 0x4a2   : > { %v13694_v13 = vld [vmem:[#allocation114_spill] sm:$0xff] }
 0x4a3   : > { %5652 = vmatmul.mubr.bf16.gmra.mrb[116].mxu1 %v13661_v16  ;;  %6586 = vmatmul.mubr.bf16.gmra.mrb[104].mxu0 %v13661_v16  ;;  %v11894_v29 = vpop.permute.xlu0 %7062 }
 0x4a4   : > { %5661 = vmatprep.mubr.bf16.mxu1 %v13662_v0  ;;  %6591 = vmatprep.mubr.bf16.mxu0 %v13662_v0  ;;  %13693 = vst [vmem:[#allocation77_spill] sm:$0xff] %v11894_v29  ;;  %v13695_v0 = vld [vmem:[#allocation116_spill] sm:$0xff] }
 0x4a6   : > { %v6380_v21 = vpop.f32.mrb[40].mxu0 }
 0x4a7   : > { %v6381_v50 = vpop.f32.mrb[41].mxu0  ;;  %v11897_v16 = vpop.permute.xlu0 %7116 }
 0x4a8   : > { %v6382_v18 = vpop.f32.mrb[42].mxu0  ;;  %v13696_v50 = vld [vmem:[#allocation118_spill] sm:$0xff] }
 0x4a9   : > { %v6383_v48 = vpop.f32.mrb[43].mxu0  ;;  %v13697_v18 = vld [vmem:[#allocation120_spill] sm:$0xff] }
 0x4ab   : > { %5662 = vmatmul.mubr.bf16.gmra.mrb[120].mxu1 %v13664_v62  ;;  %6592 = vmatmul.mubr.bf16.gmra.mrb[108].mxu0 %v13664_v62  ;;  %v11902_v21 = vpop.permute.xlu0 %7124 }
 0x4ac   : > { %5671 = vmatprep.mubr.bf16.mxu1 %v13666_v9  ;;  %6597 = vmatprep.mubr.bf16.mxu0 %v13666_v9 }
 0x4ae   : > { %v6386_v11 = vpop.f32.mrb[44].mxu0 }
 0x4af   : > { %v6387_v10 = vpop.f32.mrb[45].mxu0  ;;  %v11908_v62 = vpop.permute.xlu0 %7132 }
 0x4b0   : > { %v6388_v40 = vpop.f32.mrb[46].mxu0 }
 0x4b1   : > { %v6389_v5 = vpop.f32.mrb[47].mxu0  ;;  %v13698_v40 = vld [vmem:[#allocation122_spill] sm:$0xff] }
 0x4b2   : > { %v13699_v5 = vld [vmem:[#allocation124_spill] sm:$0xff] }
 0x4b3   : > { %5672 = vmatmul.mubr.bf16.gmra.mrb[124].mxu1 %v13668_v19  ;;  %6598 = vmatmul.mubr.bf16.gmra.mrb[112].mxu0 %v13668_v19  ;;  %v11914_v19 = vpop.permute.xlu0 %7186 }
 0x4b4   : > { %5681 = vmatprep.mubr.bf16.mxu1 %v13669_v15  ;;  %6603 = vmatprep.mubr.bf16.mxu0 %v13669_v15 }
 0x4b6   : > { %v6392_v35 = vpop.f32.mrb[48].mxu0 }
 0x4b7   : > { %v6393_v52 = vpop.f32.mrb[49].mxu0 }
 0x4b8   : > { %v6394_v23 = vpop.f32.mrb[50].mxu0  ;;  %v11916_v52 = vpop.permute.xlu1 %6776 }
 0x4b9   : > { %v6395_v55 = vpop.f32.mrb[51].mxu0  ;;  %13700 = vst [vmem:[#allocation79_spill] sm:$0xff] %v11916_v52 }
 0x4bb   : > { %5682 = vmatmul.mubr.bf16.gmra.mrb[128].mxu1 %v13671_v54  ;;  %6604 = vmatmul.mubr.bf16.gmra.mrb[116].mxu0 %v13671_v54  ;;  %v13701_v54 = vld [vmem:[#allocation126_spill] sm:$0xff] }
 0x4bc   : > { %5691 = vmatprep.mubr.bf16.mxu1 %v13672_v47  ;;  %6609 = vmatprep.mubr.bf16.mxu0 %v13672_v47  ;;  %v11919_v47 = vpop.permute.xlu0 %7194 }
 0x4be   : > { %v6398_v38 = vpop.f32.mrb[52].mxu0 }
 0x4bf   : > { %v6399_v33 = vpop.f32.mrb[53].mxu0  ;;  %v13702_v38 = vld [vmem:[#allocation128_spill] sm:$0xff] }
 0x4c0   : > { %v6400_v51 = vpop.f32.mrb[54].mxu0  ;;  %v11924_v33 = vpop.permute.xlu1 %6784 }
 0x4c1   : > { %v6401_v42 = vpop.f32.mrb[55].mxu0  ;;  %13703 = vst [vmem:[#allocation81_spill] sm:$0xff] %v11924_v33 }
 0x4c3   : > { %5692 = vmatmul.mubr.bf16.gmra.mrb[132].mxu1 %v13674_v53  ;;  %6610 = vmatmul.mubr.bf16.gmra.mrb[120].mxu0 %v13674_v53 }
 0x4c4   : > { %5701 = vmatprep.mubr.bf16.mxu1 %v13676_v3  ;;  %6615 = vmatprep.mubr.bf16.mxu0 %v13676_v3  ;;  %v11926_v3 = vpop.permute.xlu0 %7202 }
 0x4c6   : > { %v6404_v6 = vpop.f32.mrb[56].mxu0 }
 0x4c7   : > { %v6405_v63 = vpop.f32.mrb[57].mxu0 }
 0x4c8   : > { %v6406_v8 = vpop.f32.mrb[58].mxu0  ;;  %v13704_v63 = vld [vmem:[#allocation130_spill] sm:$0xff] }
 0x4c9   : > { %v6407_v56 = vpop.f32.mrb[59].mxu0  ;;  %v13705_v8 = vld [vmem:[#allocation132_spill] sm:$0xff] }
 0x4ca   : > { %v11931_v56 = vpop.permute.xlu1 %6838 }
 0x4cb   : > { %5702 = vmatmul.mubr.bf16.gmra.mrb[136].mxu1 %v13678_v58  ;;  %6616 = vmatmul.mubr.bf16.gmra.mrb[124].mxu0 %v13678_v58 }
 0x4cc   : > { %5711 = vmatprep.mubr.bf16.mxu1 %v13679_v14  ;;  %6621 = vmatprep.mubr.bf16.mxu0 %v13679_v14  ;;  %v11934_v14 = vpop.permute.xlu0 %7256 }
 0x4ce   : > { %v6410_v31 = vpop.f32.mrb[60].mxu0 }
 0x4cf   : > { %v6411_v45 = vpop.f32.mrb[61].mxu0 }
 0x4d0   : > { %v6412_v22 = vpop.f32.mrb[62].mxu0 }
 0x4d1   : > { %v6413_v26 = vpop.f32.mrb[63].mxu0 }
 0x4d2   : > { %v11936_v26 = vpop.permute.xlu1 %6846 }
 0x4d3   : > { %5712 = vmatmul.mubr.bf16.gmra.mrb[140].mxu1 %v13681_v28  ;;  %6622 = vmatmul.mubr.bf16.gmra.mrb[128].mxu0 %v13681_v28  ;;  %13706 = vst [vmem:[#allocation83_spill] sm:$0xff] %v11936_v26  ;;  %v13707_v28 = vld [vmem:[#allocation134_spill] sm:$0xff] }
 0x4d4   : > { %5721 = vmatprep.mubr.bf16.mxu1 %v13682_v17  ;;  %6627 = vmatprep.mubr.bf16.mxu0 %v13682_v17  ;;  %v13708_v17 = vld [vmem:[#allocation136_spill] sm:$0xff] }
 0x4db   : > { %5722 = vmatmul.mubr.bf16.gmra.mrb[144].mxu1 %v13684_v49  ;;  %6628 = vmatmul.mubr.bf16.gmra.mrb[144].mxu0 %v13684_v49  ;;  %v11942_v49 = vpop.permute.xlu0 %7264 }
 0x4dc   : > { %5731 = vmatprep.mubr.bf16.mxu1 %v13686_v4  ;;  %6635 = vmatprep.mubr.bf16.mxu0 %v13686_v4 }
 0x4e3   : > { %5732 = vmatmul.mubr.bf16.gmra.mrb[148].mxu1 %v13688_v39  ;;  %6636 = vmatmul.mubr.bf16.gmra.mrb[148].mxu0 %v13688_v39 }
 0x4e4   : > { %5741 = vmatprep.mubr.bf16.mxu1 %v13689_v59  ;;  %6643 = vmatprep.mubr.bf16.mxu0 %v13689_v59  ;;  %v11944_v59 = vpop.permute.xlu1 %6854 }
 0x4e5   : > { %13709 = vst [vmem:[#allocation85_spill] sm:$0xff] %v11944_v59 }
 0x4eb   : > { %5742 = vmatmul.mubr.bf16.gmra.mrb[152].mxu1 %v13691_v37  ;;  %6644 = vmatmul.mubr.bf16.gmra.mrb[152].mxu0 %v13691_v37 }
 0x4ec   : > { %5751 = vmatprep.mubr.bf16.mxu1 %v13692_v1  ;;  %6651 = vmatprep.mubr.bf16.mxu0 %v13692_v1 }
 0x4f3   : > { %5752 = vmatmul.mubr.bf16.gmra.mrb[156].mxu1 %v13694_v13  ;;  %6652 = vmatmul.mubr.bf16.gmra.mrb[156].mxu0 %v13694_v13  ;;  %v13710_v13 = vld [vmem:[#allocation138_spill] sm:$0xff] }
 0x4f4   : > { %5761 = vmatprep.mubr.bf16.mxu1 %v13695_v0  ;;  %6659 = vmatprep.mubr.bf16.mxu0 %v13695_v0  ;;  %v11947_v0 = vpop.permute.xlu0 %7272 }
 0x4f5   : > { %13711 = vst [vmem:[#allocation87_spill] sm:$0xff] %v11947_v0 }
 0x4fb   : > { %5762 = vmatmul.mubr.bf16.gmra.mrb[160].mxu1 %v13696_v50  ;;  %6660 = vmatmul.mubr.bf16.gmra.mrb[160].mxu0 %v13696_v50  ;;  %v13712_v50 = vld [vmem:[#allocation140_spill] sm:$0xff] }
 0x4fc   : > { %5771 = vmatprep.mubr.bf16.mxu1 %v13697_v18  ;;  %6666 = vmatprep.mubr.bf16.mxu0 %v13697_v18  ;;  %v11952_v18 = vpop.permute.xlu1 %6908 }
 0x4fd   : > { %13713 = vst [vmem:[#allocation89_spill] sm:$0xff] %v11952_v18 }
 0x4fe   : > { %v6455_v48 = vpop.f32.mrb[64].mxu0 }
 0x4ff   : > { %v6456_v9 = vpop.f32.mrb[65].mxu0 }
 0x500   : > { %v6457_v11 = vpop.f32.mrb[66].mxu0 }
 0x501   : > { %v6458_v10 = vpop.f32.mrb[67].mxu0 }
 0x502   : > { %v11954_v10 = vpop.permute.xlu0 %7326 }
 0x503   : > { %5772 = vmatmul.mubr.bf16.gmra.mrb[164].mxu1 %v13698_v40  ;;  %6667 = vmatmul.mubr.bf16.gmra.mrb[132].mxu0 %v13698_v40  ;;  %13714 = vst [vmem:[#allocation92_spill] sm:$0xff] %v11954_v10 }
 0x504   : > { %5781 = vmatprep.mubr.bf16.mxu1 %v13699_v5  ;;  %6672 = vmatprep.mubr.bf16.mxu0 %v13699_v5  ;;  %v13715_v5 = vld [vmem:[#allocation142_spill] sm:$0xff] }
 0x506   : > { %v6461_v15 = vpop.f32.mrb[68].mxu0 }
 0x507   : > { %v6462_v35 = vpop.f32.mrb[69].mxu0  ;;  %v13716_v15 = vld [vmem:[#allocation144_spill] sm:$0xff] }
 0x508   : > { %v6463_v23 = vpop.f32.mrb[70].mxu0  ;;  %v11959_v35 = vpop.permute.xlu1 %6916 }
 0x509   : > { %v6464_v55 = vpop.f32.mrb[71].mxu0  ;;  %13717 = vst [vmem:[#allocation95_spill] sm:$0xff] %v11959_v35 }
 0x50a   : > { %v11962_v55 = vpop.permute.xlu0 %7334 }
 0x50b   : > { %5782 = vmatmul.mubr.bf16.gmra.mrb[168].mxu1 %v13701_v54  ;;  %6673 = vmatmul.mubr.bf16.gmra.mrb[136].mxu0 %v13701_v54  ;;  %13718 = vst [vmem:[#allocation97_spill] sm:$0xff] %v11962_v55 }
 0x50c   : > { %5791 = vmatprep.mubr.bf16.mxu1 %v13702_v38  ;;  %6678 = vmatprep.mubr.bf16.mxu0 %v13702_v38 }
 0x50e   : > { %v6467_v51 = vpop.f32.mrb[72].mxu0 }
 0x50f   : > { %v6468_v42 = vpop.f32.mrb[73].mxu0 }
 0x510   : > { %v6469_v53 = vpop.f32.mrb[74].mxu0  ;;  %v11964_v42 = vpop.permute.xlu1 %6924 }
 0x511   : > { %v6470_v6 = vpop.f32.mrb[75].mxu0  ;;  %13719 = vst [vmem:[#allocation99_spill] sm:$0xff] %v11964_v42  ;;  %v13720_v53 = vld [vmem:[#allocation146_spill] sm:$0xff] }
 0x512   : > { %v13721_v6 = vld [vmem:[#allocation148_spill] sm:$0xff] }
 0x513   : > { %5792 = vmatmul.mubr.bf16.gmra.mrb[172].mxu1 %v13704_v63  ;;  %6679 = vmatmul.mubr.bf16.gmra.mrb[140].mxu0 %v13704_v63  ;;  %v11970_v63 = vpop.permute.xlu0 %7342 }
 0x514   : > { %5801 = vmatprep.mubr.bf16.mxu1 %v13705_v8  ;;  %6684 = vmatprep.mubr.bf16.mxu0 %v13705_v8  ;;  %13722 = vst [vmem:[#allocation101_spill] sm:$0xff] %v11970_v63 }
 0x516   : > { %v6473_v58 = vpop.f32.mrb[76].mxu0 }
 0x517   : > { %v6474_v31 = vpop.f32.mrb[77].mxu0 }
 0x518   : > { %v6475_v45 = vpop.f32.mrb[78].mxu0  ;;  %v11972_v31 = vpop.permute.xlu1 %6978 }
 0x519   : > { %v6476_v22 = vpop.f32.mrb[79].mxu0  ;;  %13723 = vst [vmem:[#allocation103_spill] sm:$0xff] %v11972_v31 }
 0x51b   : > { %5802 = vmatmul.mubr.bf16.gmra.mrb[176].mxu1 %v13707_v28  ;;  %6685 = vmatmul.mubr.bf16.gmra.mrb[164].mxu0 %v13707_v28  ;;  %v13724_v28 = vld [vmem:[#allocation150_spill] sm:$0xff] }
 0x51c   : > { %5811 = vmatprep.mubr.bf16.mxu1 %v13708_v17  ;;  %6690 = vmatprep.mubr.bf16.mxu0 %v13708_v17  ;;  %v11975_v17 = vpop.permute.xlu0 %7396 }
 0x51d   : > { %13725 = vst [vmem:[#allocation105_spill] sm:$0xff] %v11975_v17 }
 0x51e   : > { %v6479_v4 = vpop.f32.mrb[80].mxu0 }
 0x51f   : > { %v6480_v39 = vpop.f32.mrb[81].mxu0  ;;  %v13726_v4 = vld [vmem:[#allocation152_spill] sm:$0xff] }
 0x520   : > { %v6481_v37 = vpop.f32.mrb[82].mxu0  ;;  %v11980_v39 = vpop.permute.xlu1 %6986 }
 0x521   : > { %v6482_v1 = vpop.f32.mrb[83].mxu0  ;;  %13727 = vst [vmem:[#allocation107_spill] sm:$0xff] %v11980_v39  ;;  %v11982_v37 = vpop.permute.xlu0 %7404 }
 0x522   : > { %13728 = vst [vmem:[#allocation109_spill] sm:$0xff] %v11982_v37  ;;  %v13729_v1 = vld [vmem:[#allocation154_spill] sm:$0xff] }
 0x523   : > { %5812 = vmatmul.mubr.bf16.gmra.mrb[180].mxu1 %v13710_v13  ;;  %6691 = vmatmul.mubr.bf16.gmra.mrb[168].mxu0 %v13710_v13  ;;  %v13730_v13 = vld [vmem:[#allocation156_spill] sm:$0xff] }
 0x524   : > { %5821 = vmatprep.mubr.bf16.mxu1 %v13712_v50  ;;  %6696 = vmatprep.mubr.bf16.mxu0 %v13712_v50  ;;  %v11987_v50 = vpop.permute.xlu1 %6994 }
 0x525   : > { %13731 = vst [vmem:[#allocation111_spill] sm:$0xff] %v11987_v50 }
 0x526   : > { %v6485_v48 = vpop.f32.mrb[84].mxu0 }
 0x527   : > { %v6486_v9 = vpop.f32.mrb[85].mxu0  ;;  %v11990_v48 = vpop.permute.xlu0 %7412 }
 0x528   : > { %v6487_v11 = vpop.f32.mrb[86].mxu0  ;;  %13732 = vst [vmem:[#allocation113_spill] sm:$0xff] %v11990_v48  ;;  %v11992_v9 = vpop.permute.xlu1 %7048 }
 0x529   : > { %v6488_v40 = vpop.f32.mrb[87].mxu0  ;;  %13733 = vst [vmem:[#allocation115_spill] sm:$0xff] %v11992_v9  ;;  %v13734_v11 = vld [vmem:[#allocation158_spill] sm:$0xff] }
 0x52a   : > { %v13735_v40 = vld [vmem:[#allocation160_spill] sm:$0xff] }
 0x52b   : > { %5822 = vmatmul.mubr.bf16.gmra.mrb[184].mxu1 %v13715_v5  ;;  %6697 = vmatmul.mubr.bf16.gmra.mrb[172].mxu0 %v13715_v5  ;;  %v11998_v5 = vpop.permute.xlu0 %7466 }
 0x52c   : > { %5831 = vmatprep.mubr.bf16.mxu1 %v13716_v15  ;;  %6702 = vmatprep.mubr.bf16.mxu0 %v13716_v15  ;;  %13736 = vst [vmem:[#allocation117_spill] sm:$0xff] %v11998_v5  ;;  %v12000_v15 = vpop.permute.xlu1 %7056 }
 0x52d   : > { %13737 = vst [vmem:[#allocation119_spill] sm:$0xff] %v12000_v15 }
 0x52e   : > { %v6491_v23 = vpop.f32.mrb[88].mxu0 }
 0x52f   : > { %v6492_v54 = vpop.f32.mrb[89].mxu0  ;;  %v13738_v23 = vld [vmem:[#allocation161_spill] sm:$0xff] }
 0x530   : > { %v6493_v38 = vpop.f32.mrb[90].mxu0  ;;  %v12003_v54 = vpop.permute.xlu0 %7474 }
 0x531   : > { %v6494_v51 = vpop.f32.mrb[91].mxu0  ;;  %13739 = vst [vmem:[#allocation121_spill] sm:$0xff] %v12003_v54  ;;  %v13740_v38 = vld [vmem:[#allocation162_spill] sm:$0xff] }
 0x532   : > { %v12008_v51 = vpop.permute.xlu1 %7064 }
 0x533   : > { %5832 = vmatmul.mubr.bf16.gmra.mrb[188].mxu1 %v13720_v53  ;;  %6703 = vmatmul.mubr.bf16.gmra.mrb[176].mxu0 %v13720_v53  ;;  %13741 = vst [vmem:[#allocation123_spill] sm:$0xff] %v12008_v51 }
 0x534   : > { %5841 = vmatprep.mubr.bf16.mxu1 %v13721_v6  ;;  %6708 = vmatprep.mubr.bf16.mxu0 %v13721_v6  ;;  %v12010_v53 = vpop.permute.xlu0 %7482 }
 0x535   : > { %13742 = vst [vmem:[#allocation125_spill] sm:$0xff] %v12010_v53 }
 0x536   : > { %v6497_v8 = vpop.f32.mrb[92].mxu0  ;;  %v12012_v6 = vpop.permute.xlu1 %7328 }
 0x537   : > { %v6498_v58 = vpop.f32.mrb[93].mxu0  ;;  %v13743_v8 = vld [vmem:[#allocation164_spill] sm:$0xff] }
 0x538   : > { %v6499_v45 = vpop.f32.mrb[94].mxu0  ;;  %v13744_v58 = vld [vmem:[#allocation166_spill] sm:$0xff] }
 0x539   : > { %v6500_v22 = vpop.f32.mrb[95].mxu0 }
 0x53a   : > { %v12018_v45 = vpop.permute.xlu1 %7336  ;;  %v12020_v22 = vpop.permute.xlu0 %7536 }
 0x53b   : > { %5842 = vmatmul.mubr.bf16.gmra.mrb[192].mxu1 %v13724_v28  ;;  %6709 = vmatmul.mubr.bf16.gmra.mrb[180].mxu0 %v13724_v28  ;;  %13745 = vst [vmem:[#allocation127_spill] sm:$0xff] %v12020_v22  ;;  %v13746_v28 = vld [vmem:[#allocation168_spill] sm:$0xff] }
 0x53c   : > { %5851 = vmatprep.mubr.bf16.mxu1 %v13726_v4  ;;  %6714 = vmatprep.mubr.bf16.mxu0 %v13726_v4 }
 0x53e   : > { %v12024_v4 = vpop.permute.xlu1 %7344 }
 0x53f   : > { %13747 = vst [vmem:[#allocation129_spill] sm:$0xff] %v12024_v4 }
 0x542   : > { %v12036_v54 = vpop.permute.xlu1 %7398 }
 0x543   : > { %5852 = vmatmul.mubr.bf16.gmra.mrb[196].mxu1 %v13729_v1  ;;  %6715 = vmatmul.mubr.bf16.gmra.mrb[196].mxu0 %v13729_v1  ;;  %v12026_v1 = vpop.permute.xlu0 %7544 }
 0x544   : > { %5861 = vmatprep.mubr.bf16.mxu1 %v13730_v13  ;;  %6721 = vmatprep.mubr.bf16.mxu0 %v13730_v13  ;;  %13748 = vst [vmem:[#allocation131_spill] sm:$0xff] %v12026_v1 }
 0x546   : > { %v12045_v32 = vpop.permute.xlu1 %7406 }
 0x547   : > { %v12038_v48 = vpop.permute.xlu0 %7552 }
 0x548   : > { %13749 = vst [vmem:[#allocation133_spill] sm:$0xff] %v12038_v48 }
 0x54b   : > { %5862 = vmatmul.mubr.bf16.gmra.mrb[200].mxu1 %v13734_v11  ;;  %6722 = vmatmul.mubr.bf16.gmra.mrb[200].mxu0 %v13734_v11 }
 0x54c   : > { %5871 = vmatprep.mubr.bf16.mxu1 %v13735_v40  ;;  %6729 = vmatprep.mubr.bf16.mxu0 %v13735_v40 }
 0x553   : > { %5872 = vmatmul.mubr.bf16.gmra.mrb[204].mxu1 %v13738_v23  ;;  %6730 = vmatmul.mubr.bf16.gmra.mrb[204].mxu0 %v13738_v23 }
 0x554   : > { %5881 = vmatprep.mubr.bf16.mxu1 %v13740_v38  ;;  %6737 = vmatprep.mubr.bf16.mxu0 %v13740_v38 }
 0x55b   : > { %5882 = vmatmul.mubr.bf16.gmra.mrb[208].mxu1 %v13743_v8  ;;  %6738 = vmatmul.mubr.bf16.gmra.mrb[208].mxu0 %v13743_v8 }
 0x55c   : > { %5891 = vmatprep.mubr.bf16.mxu1 %v13744_v58  ;;  %6745 = vmatprep.mubr.bf16.mxu0 %v13744_v58 }
 0x563   : > { %5892 = vmatmul.mubr.bf16.gmra.mrb[212].mxu1 %v13746_v28  ;;  %6746 = vmatmul.mubr.bf16.gmra.mrb[212].mxu0 %v13746_v28 }
 0x566   : > { %v12028_v13 = vpop.f32.mrb[108].mxu1  ;;  %v6575_v40 = vpop.f32.mrb[96].mxu0 }
 0x567   : > { %v12030_v11 = vpop.f32.mrb[109].mxu1  ;;  %v6576_v38 = vpop.f32.mrb[97].mxu0 }
 0x568   : > { %v12032_v23 = vpop.f32.mrb[110].mxu1  ;;  %v6577_v58 = vpop.f32.mrb[98].mxu0 }
 0x569   : > { %v12034_v8 = vpop.f32.mrb[111].mxu1  ;;  %v6578_v53 = vpop.f32.mrb[99].mxu0 }
 0x56a   : > { %v12048_v53 = vpop.permute.xlu0 %7606 }
 0x56b   : > { %13750 = vst [vmem:[#allocation135_spill] sm:$0xff] %v12048_v53 }
 0x56e   : > { %v12040_v28 = vpop.f32.mrb[112].mxu1  ;;  %v6581_v1 = vpop.f32.mrb[100].mxu0 }
 0x56f   : > { %v12042_v37 = vpop.f32.mrb[113].mxu1  ;;  %v6582_v55 = vpop.f32.mrb[101].mxu0 }
 0x570   : > { %v5647_v63 = vpop.f32.mrb[114].mxu1  ;;  %v6583_v29 = vpop.f32.mrb[102].mxu0 }
 0x571   : > { %6770 = vrot.lane.b32.xlu1 %v5647_v63, %s10058_s8  ;;  %v5649_v40 = vpop.f32.mrb[115].mxu1  ;;  %v6584_v38 = vpop.f32.mrb[103].mxu0 }
 0x572   : > { %v12053_v29 = vpop.permute.xlu1 %7414 }
 0x573   : > { %13751 = vst [vmem:[#allocation137_spill] sm:$0xff] %v12053_v29 }
 0x575   : > { %6772 = vrot.lane.b32.xlu1 %v5649_v40, %s10058_s8  ;;  %v12056_v40 = vpop.permute.xlu0 %7614 }
 0x576   : > { %v5653_v58 = vpop.f32.mrb[116].mxu1  ;;  %v6587_v24 = vpop.f32.mrb[104].mxu0  ;;  %13752 = vst [vmem:[#allocation139_spill] sm:$0xff] %v12056_v40 }
 0x577   : > { %v5655_v48 = vpop.f32.mrb[117].mxu1  ;;  %6778 = vrot.lane.b32.xlu0 %v5653_v58, %s10058_s8  ;;  %v6588_v1 = vpop.f32.mrb[105].mxu0 }
 0x578   : > { %v5657_v60 = vpop.f32.mrb[118].mxu1  ;;  %v6589_v63 = vpop.f32.mrb[106].mxu0 }
 0x579   : > { %6780 = vrot.lane.b32.xlu1 %v5655_v48, %s10058_s8  ;;  %v5659_v55 = vpop.f32.mrb[119].mxu1  ;;  %v6590_v25 = vpop.f32.mrb[107].mxu0 }
 0x57b   : > { %6786 = vrot.lane.b32.xlu0 %v5657_v60, %s10058_s8  ;;  %v12061_v60 = vpop.permute.xlu1 %7468 }
 0x57d   : > { %6788 = vrot.lane.b32.xlu1 %v5659_v55, %s10058_s8  ;;  %v12064_v55 = vpop.permute.xlu0 %7622 }
 0x57e   : > { %v5663_v38 = vpop.f32.mrb[120].mxu1  ;;  %v6593_v24 = vpop.f32.mrb[108].mxu0  ;;  %13753 = vst [vmem:[#allocation141_spill] sm:$0xff] %v12064_v55 }
 0x57f   : > { %v5665_v27 = vpop.f32.mrb[121].mxu1  ;;  %6840 = vrot.lane.b32.xlu0 %v5663_v38, %s10059_s9  ;;  %v6594_v1 = vpop.f32.mrb[109].mxu0 }
 0x580   : > { %v5667_v58 = vpop.f32.mrb[122].mxu1  ;;  %v6595_v63 = vpop.f32.mrb[110].mxu0 }
 0x581   : > { %6842 = vrot.lane.b32.xlu1 %v5665_v27, %s10059_s9  ;;  %v5669_v48 = vpop.f32.mrb[123].mxu1  ;;  %v6596_v25 = vpop.f32.mrb[111].mxu0 }
 0x583   : > { %6848 = vrot.lane.b32.xlu0 %v5667_v58, %s10059_s9  ;;  %v12069_v58 = vpop.permute.xlu1 %7476 }
 0x585   : > { %6850 = vrot.lane.b32.xlu1 %v5669_v48, %s10059_s9  ;;  %v12072_v48 = vpop.permute.xlu0 %7675 }
 0x586   : > { %v5673_v40 = vpop.f32.mrb[124].mxu1  ;;  %v6599_v38 = vpop.f32.mrb[112].mxu0  ;;  %13754 = vst [vmem:[#allocation143_spill] sm:$0xff] %v12072_v48 }
 0x587   : > { %v5675_v46 = vpop.f32.mrb[125].mxu1  ;;  %6856 = vrot.lane.b32.xlu0 %v5673_v40, %s10059_s9  ;;  %v6600_v1 = vpop.f32.mrb[113].mxu0 }
 0x588   : > { %v5677_v24 = vpop.f32.mrb[126].mxu1  ;;  %v6601_v63 = vpop.f32.mrb[114].mxu0 }
 0x589   : > { %6858 = vrot.lane.b32.xlu1 %v5675_v46, %s10059_s9  ;;  %v5679_v27 = vpop.f32.mrb[127].mxu1  ;;  %v6602_v25 = vpop.f32.mrb[115].mxu0 }
 0x58b   : > { %6910 = vrot.lane.b32.xlu0 %v5677_v24, %s10060_s10  ;;  %v12077_v24 = vpop.permute.xlu1 %7484 }
 0x58c   : > { %13755 = vst [vmem:[#allocation145_spill] sm:$0xff] %v12077_v24 }
 0x58d   : > { %6912 = vrot.lane.b32.xlu1 %v5679_v27, %s10060_s10  ;;  %v12080_v27 = vpop.permute.xlu0 %7683 }
 0x58e   : > { %v5683_v55 = vpop.f32.mrb[128].mxu1  ;;  %v6605_v40 = vpop.f32.mrb[116].mxu0  ;;  %13756 = vst [vmem:[#allocation147_spill] sm:$0xff] %v12080_v27 }
 0x58f   : > { %v5685_v44 = vpop.f32.mrb[129].mxu1  ;;  %6918 = vrot.lane.b32.xlu0 %v5683_v55, %s10060_s10  ;;  %v6606_v1 = vpop.f32.mrb[117].mxu0 }
 0x590   : > { %v5687_v38 = vpop.f32.mrb[130].mxu1  ;;  %v6607_v63 = vpop.f32.mrb[118].mxu0 }
 0x591   : > { %6920 = vrot.lane.b32.xlu1 %v5685_v44, %s10060_s10  ;;  %v5689_v46 = vpop.f32.mrb[131].mxu1  ;;  %v6608_v25 = vpop.f32.mrb[119].mxu0 }
 0x593   : > { %6926 = vrot.lane.b32.xlu0 %v5687_v38, %s10060_s10  ;;  %v12085_v38 = vpop.permute.xlu1 %7538 }
 0x594   : > { %13757 = vst [vmem:[#allocation149_spill] sm:$0xff] %v12085_v38 }
 0x595   : > { %6928 = vrot.lane.b32.xlu1 %v5689_v46, %s10060_s10  ;;  %v12088_v46 = vpop.permute.xlu0 %7691  ;;  %s10075_s10 = smov (!%p8749_p7), 58  }
 0x596   : > { %v5693_v20 = vpop.f32.mrb[132].mxu1  ;;  %v6611_v55 = vpop.f32.mrb[120].mxu0  ;;  %13758 = vst [vmem:[#allocation151_spill] sm:$0xff] %v12088_v46 }
 0x597   : > { %v5695_v2 = vpop.f32.mrb[133].mxu1  ;;  %6980 = vrot.lane.b32.xlu0 %v5693_v20, %s10061_s11  ;;  %v6612_v1 = vpop.f32.mrb[121].mxu0 }
 0x598   : > { %v5697_v40 = vpop.f32.mrb[134].mxu1  ;;  %v6613_v63 = vpop.f32.mrb[122].mxu0 }
 0x599   : > { %6982 = vrot.lane.b32.xlu1 %v5695_v2, %s10061_s11  ;;  %v5699_v44 = vpop.f32.mrb[135].mxu1  ;;  %v6614_v25 = vpop.f32.mrb[123].mxu0 }
 0x59b   : > { %6988 = vrot.lane.b32.xlu0 %v5697_v40, %s10061_s11  ;;  %v12093_v40 = vpop.permute.xlu1 %7546 }
 0x59c   : > { %13759 = vst [vmem:[#allocation153_spill] sm:$0xff] %v12093_v40 }
 0x59d   : > { %6990 = vrot.lane.b32.xlu1 %v5699_v44, %s10061_s11  ;;  %v12096_v44 = vpop.permute.xlu0 %7745 }
 0x59e   : > { %v5703_v27 = vpop.f32.mrb[136].mxu1  ;;  %v6617_v20 = vpop.f32.mrb[124].mxu0  ;;  %13760 = vst [vmem:[#allocation155_spill] sm:$0xff] %v12096_v44 }
 0x59f   : > { %v5705_v43 = vpop.f32.mrb[137].mxu1  ;;  %6996 = vrot.lane.b32.xlu0 %v5703_v27, %s10061_s11  ;;  %v6618_v1 = vpop.f32.mrb[125].mxu0 }
 0x5a0   : > { %v5707_v55 = vpop.f32.mrb[138].mxu1  ;;  %v6619_v63 = vpop.f32.mrb[126].mxu0 }
 0x5a1   : > { %6998 = vrot.lane.b32.xlu1 %v5705_v43, %s10061_s11  ;;  %v5709_v2 = vpop.f32.mrb[139].mxu1  ;;  %v6620_v25 = vpop.f32.mrb[127].mxu0 }
 0x5a3   : > { %7050 = vrot.lane.b32.xlu0 %v5707_v55, %s10062_s13  ;;  %v12101_v55 = vpop.permute.xlu1 %7554 }
 0x5a4   : > { %13761 = vst [vmem:[#allocation157_spill] sm:$0xff] %v12101_v55 }
 0x5a5   : > { %7052 = vrot.lane.b32.xlu1 %v5709_v2, %s10062_s13  ;;  %v12104_v2 = vpop.permute.xlu0 %7753 }
 0x5a6   : > { %v5713_v46 = vpop.f32.mrb[140].mxu1  ;;  %v6623_v27 = vpop.f32.mrb[128].mxu0  ;;  %13762 = vst [vmem:[#allocation159_spill] sm:$0xff] %v12104_v2 }
 0x5a7   : > { %v5715_v48 = vpop.f32.mrb[141].mxu1  ;;  %7058 = vrot.lane.b32.xlu0 %v5713_v46, %s10062_s13  ;;  %v6624_v1 = vpop.f32.mrb[129].mxu0 }
 0x5a8   : > { %v5717_v20 = vpop.f32.mrb[142].mxu1  ;;  %v6625_v63 = vpop.f32.mrb[130].mxu0 }
 0x5a9   : > { %7060 = vrot.lane.b32.xlu1 %v5715_v48, %s10062_s13  ;;  %v5719_v43 = vpop.f32.mrb[143].mxu1  ;;  %v6626_v25 = vpop.f32.mrb[131].mxu0 }
 0x5ab   : > { %7066 = vrot.lane.b32.xlu0 %v5717_v20, %s10062_s13  ;;  %v12109_v20 = vpop.permute.xlu1 %7608 }
 0x5ac   : > { %13763 = vst [vmem:[#allocation163_spill] sm:$0xff] %v12109_v20 }
 0x5ad   : > { %7068 = vrot.lane.b32.xlu1 %v5719_v43, %s10062_s13  ;;  %v12112_v43 = vpop.permute.xlu0 %7761 }
 0x5ae   : > { %v5723_v40 = vpop.f32.mrb[144].mxu1  ;;  %v6629_v44 = vpop.f32.mrb[144].mxu0  ;;  %13764 = vst [vmem:[#allocation165_spill] sm:$0xff] %v12112_v43 }
 0x5af   : > { %v5725_v53 = vpop.f32.mrb[145].mxu1  ;;  %v6631_v46 = vpop.f32.mrb[145].mxu0 }
 0x5b0   : > { %v5727_v27 = vpop.f32.mrb[146].mxu1  ;;  %7120 = vrot.lane.b32.xlu0 %v5725_v53, %s10063_s19  ;;  %v6632_v1 = vpop.f32.mrb[146].mxu0 }
 0x5b1   : > { %7118 = vrot.lane.b32.xlu1 %v5723_v40, %s10063_s19  ;;  %v5729_v48 = vpop.f32.mrb[147].mxu1  ;;  %v6634_v63 = vpop.f32.mrb[147].mxu0 }
 0x5b4   : > { %7128 = vrot.lane.b32.xlu0 %v5729_v48, %s10063_s19  ;;  %v12117_v48 = vpop.permute.xlu1 %7616 }
 0x5b5   : > { %7122 = vrot.lane.b32.xlu1 %v6629_v44, %s10063_s19  ;;  %13765 = vst [vmem:[#allocation167_spill] sm:$0xff] %v12117_v48  ;;  %v12120_v44 = vpop.permute.xlu0 %7815 }
 0x5b6   : > { %v5733_v25 = vpop.f32.mrb[148].mxu1  ;;  %v6637_v2 = vpop.f32.mrb[148].mxu0  ;;  %13766 = vst [vmem:[#allocation2_spill] sm:$0xff] %v12120_v44 }
 0x5b7   : > { %v5735_v55 = vpop.f32.mrb[149].mxu1  ;;  %v6639_v46 = vpop.f32.mrb[149].mxu0 }
 0x5b8   : > { %v5737_v22 = vpop.f32.mrb[150].mxu1  ;;  %7136 = vrot.lane.b32.xlu0 %v5735_v55, %s10063_s19  ;;  %v6640_v53 = vpop.f32.mrb[150].mxu0 }
 0x5b9   : > { %7126 = vrot.lane.b32.xlu1 %v5727_v27, %s10063_s19  ;;  %v5739_v40 = vpop.f32.mrb[151].mxu1  ;;  %v6642_v63 = vpop.f32.mrb[151].mxu0 }
 0x5bc   : > { %7190 = vrot.lane.b32.xlu0 %v5739_v40, %s10064_s20  ;;  %v12125_v40 = vpop.permute.xlu1 %7624 }
 0x5bd   : > { %7130 = vrot.lane.b32.xlu1 %v6632_v1, %s10063_s19  ;;  %13767 = vst [vmem:[#allocation3_spill] sm:$0xff] %v12125_v40  ;;  %v12128_v1 = vpop.permute.xlu0 %7823 }
 0x5be   : > { %v5743_v43 = vpop.f32.mrb[152].mxu1  ;;  %v6645_v20 = vpop.f32.mrb[152].mxu0  ;;  %13768 = vst [vmem:[#allocation4_spill] sm:$0xff] %v12128_v1 }
 0x5bf   : > { %v5745_v38 = vpop.f32.mrb[153].mxu1  ;;  %v6647_v46 = vpop.f32.mrb[153].mxu0 }
 0x5c0   : > { %v5747_v5 = vpop.f32.mrb[154].mxu1  ;;  %7198 = vrot.lane.b32.xlu0 %v5745_v38, %s10064_s20  ;;  %v6648_v55 = vpop.f32.mrb[154].mxu0 }
 0x5c1   : > { %7134 = vrot.lane.b32.xlu1 %v5733_v25, %s10063_s19  ;;  %v5749_v27 = vpop.f32.mrb[155].mxu1  ;;  %v6650_v63 = vpop.f32.mrb[155].mxu0 }
 0x5c4   : > { %7206 = vrot.lane.b32.xlu0 %v5749_v27, %s10064_s20  ;;  %v12135_v27 = vpop.permute.xlu1 %7677 }
 0x5c5   : > { %7138 = vrot.lane.b32.xlu1 %v6637_v2, %s10063_s19  ;;  %13769 = vst [vmem:[#allocation5_spill] sm:$0xff] %v12135_v27  ;;  %v12138_v2 = vpop.permute.xlu0 %7831 }
 0x5c6   : > { %v5753_v44 = vpop.f32.mrb[156].mxu1  ;;  %v6653_v48 = vpop.f32.mrb[156].mxu0  ;;  %13770 = vst [vmem:[#allocation6_spill] sm:$0xff] %v12138_v2 }
 0x5c7   : > { %v5755_v17 = vpop.f32.mrb[157].mxu1  ;;  %v6655_v46 = vpop.f32.mrb[157].mxu0 }
 0x5c8   : > { %v5757_v10 = vpop.f32.mrb[158].mxu1  ;;  %7260 = vrot.lane.b32.xlu0 %v5755_v17, %s10065_s21  ;;  %v12131_v38 = vpop.f32.mrb[158].mxu0 }
 0x5c9   : > { %7188 = vrot.lane.b32.xlu1 %v5737_v22, %s10064_s20  ;;  %v5759_v25 = vpop.f32.mrb[159].mxu1  ;;  %v6658_v63 = vpop.f32.mrb[159].mxu0 }
 0x5ca   : > { %v12152_v2 = vpop.permute.xlu0 %7885 }
 0x5cb   : > { %13772 = vst [vmem:[#allocation8_spill] sm:$0xff] %v12152_v2 }
 0x5cc   : > { %7268 = vrot.lane.b32.xlu0 %v5759_v25, %s10065_s21 }
 0x5cd   : > { %7192 = vrot.lane.b32.xlu1 %v6640_v53, %s10064_s20  ;;  %v12149_v53 = vpop.permute.xlu1 %7685 }
 0x5ce   : > { %v12140_v1 = vpop.f32.mrb[160].mxu1  ;;  %v12142_v46 = vpop.f32.mrb[160].mxu0  ;;  %13771 = vst [vmem:[#allocation7_spill] sm:$0xff] %v12149_v53 }
 0x5cf   : > { %v5765_v40 = vpop.f32.mrb[161].mxu1  ;;  %v6663_v17 = vpop.f32.mrb[161].mxu0 }
 0x5d0   : > { %v5767_v7 = vpop.f32.mrb[162].mxu1  ;;  %7276 = vrot.lane.b32.xlu0 %v5765_v40, %s10065_s21  ;;  %v6664_v22 = vpop.f32.mrb[162].mxu0 }
 0x5d1   : > { %7196 = vrot.lane.b32.xlu1 %v5743_v43, %s10064_s20  ;;  %v12146_v63 = vpop.f32.mrb[163].mxu1  ;;  %v6665_v25 = vpop.f32.mrb[163].mxu0 }
 0x5d2   : > { %v12161_v25 = vpop.permute.xlu1 %7693 }
 0x5d3   : > { %13773 = vst [vmem:[#allocation9_spill] sm:$0xff] %v12161_v25 }
 0x5d4   : > { %7330 = vrot.lane.b32.xlu0 %v5767_v7, %s10066_s22 }
 0x5d5   : > { %7200 = vrot.lane.b32.xlu1 %v6645_v20, %s10064_s20  ;;  %v12164_v20 = vpop.permute.xlu0 %7893 }
 0x5d6   : > { %v5773_v27 = vpop.f32.mrb[164].mxu1  ;;  %v6668_v17 = vpop.f32.mrb[132].mxu0  ;;  %13774 = vst [vmem:[#allocation10_spill] sm:$0xff] %v12164_v20 }
 0x5d7   : > { %v12154_v12 = vpop.f32.mrb[165].mxu1  ;;  %v6669_v40 = vpop.f32.mrb[133].mxu0 }
 0x5d8   : > { %v5777_v34 = vpop.f32.mrb[166].mxu1  ;;  %7338 = vrot.lane.b32.xlu0 %v5773_v27, %s10066_s22  ;;  %v6670_v22 = vpop.f32.mrb[134].mxu0 }
 0x5d9   : > { %7204 = vrot.lane.b32.xlu1 %v5747_v5, %s10064_s20  ;;  %v12158_v43 = vpop.f32.mrb[167].mxu1  ;;  %v6671_v7 = vpop.f32.mrb[135].mxu0 }
 0x5dc   : > { %7346 = vrot.lane.b32.xlu0 %v5777_v34, %s10066_s22 }
 0x5dd   : > { %7208 = vrot.lane.b32.xlu1 %v6648_v55, %s10064_s20  ;;  %v12173_v55 = vpop.permute.xlu0 %7901 }
 0x5de   : > { %v5783_v2 = vpop.f32.mrb[168].mxu1  ;;  %v6674_v53 = vpop.f32.mrb[136].mxu0  ;;  %13775 = vst [vmem:[#allocation11_spill] sm:$0xff] %v12173_v55 }
 0x5df   : > { %v12166_v17 = vpop.f32.mrb[169].mxu1  ;;  %v6675_v5 = vpop.f32.mrb[137].mxu0 }
 0x5e0   : > { %v5787_v27 = vpop.f32.mrb[170].mxu1  ;;  %7400 = vrot.lane.b32.xlu0 %v5783_v2, %s10067_s23  ;;  %v6676_v22 = vpop.f32.mrb[138].mxu0 }
 0x5e1   : > { %7258 = vrot.lane.b32.xlu1 %v5753_v44, %s10065_s21  ;;  %v12170_v40 = vpop.f32.mrb[171].mxu1  ;;  %v6677_v34 = vpop.f32.mrb[139].mxu0 }
 0x5e3   : > { %v6771_v7 = vpop.permute.xlu1 %6770 }
 0x5e4   : > { %7408 = vrot.lane.b32.xlu0 %v5787_v27, %s10067_s23 }
 0x5e5   : > { %7262 = vrot.lane.b32.xlu1 %v6653_v48, %s10065_s21 }
 0x5e6   : > { %v5793_v20 = vpop.f32.mrb[172].mxu1  ;;  %v6680_v44 = vpop.f32.mrb[140].mxu0 }
 0x5e7   : > { %v12176_v25 = vpop.permute.xlu1 %6772  ;;  %v12178_v53 = vpop.f32.mrb[173].mxu1 }
 0x5e8   : > { %v5797_v2 = vpop.f32.mrb[174].mxu1  ;;  %7416 = vrot.lane.b32.xlu0 %v5793_v20, %s10067_s23  ;;  %v6681_v34 = vpop.f32.mrb[141].mxu0  ;;  %v6792_v20 = vsel %vm6790_vm0, %v11470_v57, %v6771_v7 }
 0x5e9   : > { %7266 = vrot.lane.b32.xlu1 %v5757_v10, %s10065_s21  ;;  %v12182_v5 = vpop.f32.mrb[175].mxu1  ;;  %v6779_v22 = vpop.permute.xlu0 %6778 }
 0x5ea   : > { %v6682_v55 = vpop.f32.mrb[142].mxu0 }
 0x5eb   : > { %v12184_v27 = vpop.permute.xlu1 %6780  ;;  %v6683_v48 = vpop.f32.mrb[143].mxu0 }
 0x5ec   : > { %7470 = vrot.lane.b32.xlu0 %v5797_v2, %s10068_s24  ;;  %v6793_v2 = vsel %vm6790_vm0, %v6771_v7, %v12176_v25  ;;  %v6795_v7 = vsel %vm6790_vm0, %v11916_v52, %v6779_v22 }
 0x5ed   : > { %7270 = vrot.lane.b32.xlu1 %v12131_v38, %s10065_s21  ;;  %v6787_v41 = vpop.permute.xlu0 %6786 }
 0x5ee   : > { %v6798_v10 = vsel %vm6790_vm0, %v11924_v33, %v6787_v41  ;;  %v5803_v44 = vpop.f32.mrb[176].mxu1  ;;  %v6686_v61 = vpop.f32.mrb[164].mxu0  ;;  %v6813_v33 = vadd.f32 %v11208_v36, %v6792_v20 }
 0x5ef   : > { %v6821_v34 = vadd.f32 %v11227_v30, %v6798_v10  ;;  %v12194_v24 = vpop.permute.xlu1 %6788  ;;  %v12196_v55 = vpop.f32.mrb[177].mxu1  ;;  %v6814_v61 = vadd.f32 %v6793_v2, %v12028_v13 }
 0x5f0   : > { %v6799_v38 = vsel %vm6790_vm0, %v6787_v41, %v12194_v24  ;;  %v5807_v48 = vpop.f32.mrb[178].mxu1  ;;  %7478 = vrot.lane.b32.xlu0 %v5803_v44, %s10068_s24  ;;  %v6687_v29 = vpop.f32.mrb[165].mxu0 }
 0x5f1   : > { %v6822_v57 = vadd.f32 %v6799_v38, %v12040_v28  ;;  %7274 = vrot.lane.b32.xlu1 %v12140_v1, %s10065_s21  ;;  %v12207_v30 = vpop.f32.mrb[179].mxu1  ;;  %v6841_v10 = vpop.permute.xlu0 %6840  ;;  %v6796_v28 = vsel %vm6790_vm0, %v6779_v22, %v12184_v27  ;;  %v13776_v38 = vld [vmem:[#allocation171_spill] sm:$0xff] }
 0x5f2   : > { %v6862_v41 = vsel %vm6860_vm1, %v11931_v56, %v6841_v10  ;;  %v6688_v36 = vpop.f32.mrb[166].mxu0  ;;  %v6817_v52 = vadd.f32 %v13776_v38, %v6795_v7  ;;  %v6818_v2 = vadd.f32 %v6796_v28, %v12032_v23 }
 0x5f3   : > { %v6883_v44 = vadd.f32 %v6862_v41, %v6813_v33  ;;  %v12214_v4 = vpop.permute.xlu1 %6842  ;;  %v6689_v20 = vpop.f32.mrb[167].mxu0 }
 0x5f4   : > { %v6863_v1 = vsel %vm6860_vm1, %v6841_v10, %v12214_v4  ;;  %7486 = vrot.lane.b32.xlu0 %v5807_v48, %s10068_s24 }
 0x5f5   : > { %v6884_v0 = vadd.f32 %v6863_v1, %v6814_v61  ;;  %7278 = vrot.lane.b32.xlu1 %v12142_v46, %s10065_s21  ;;  %v6849_v13 = vpop.permute.xlu0 %6848 }
 0x5f6   : > { %v6865_v33 = vsel %vm6860_vm1, %v11936_v26, %v6849_v13  ;;  %v5813_v29 = vpop.f32.mrb[180].mxu1  ;;  %v6692_v61 = vpop.f32.mrb[168].mxu0 }
 0x5f7   : > { %v6887_v22 = vadd.f32 %v6865_v33, %v6817_v52  ;;  %v12227_v41 = vpop.permute.xlu1 %6850  ;;  %v12229_v10 = vpop.f32.mrb[181].mxu1 }
 0x5f8   : > { %v6866_v48 = vsel %vm6860_vm1, %v6849_v13, %v12227_v41  ;;  %v5817_v7 = vpop.f32.mrb[182].mxu1  ;;  %7540 = vrot.lane.b32.xlu0 %v5813_v29, %s10069_s25  ;;  %v6693_v23 = vpop.f32.mrb[169].mxu0 }
 0x5f9   : > { %v6888_v46 = vadd.f32 %v6866_v48, %v6818_v2  ;;  %7332 = vrot.lane.b32.xlu1 %v12146_v63, %s10066_s22  ;;  %v12236_v36 = vpop.f32.mrb[183].mxu1  ;;  %v6857_v1 = vpop.permute.xlu0 %6856 }
 0x5fa   : > { %v6868_v52 = vsel %vm6860_vm1, %v11944_v59, %v6857_v1  ;;  %v6694_v38 = vpop.f32.mrb[170].mxu0 }
 0x5fb   : > { %v6891_v28 = vadd.f32 %v6868_v52, %v6821_v34  ;;  %v12240_v20 = vpop.permute.xlu1 %6858  ;;  %v6695_v33 = vpop.f32.mrb[171].mxu0 }
 0x5fc   : > { %v6869_v13 = vsel %vm6860_vm1, %v6857_v1, %v12240_v20  ;;  %7548 = vrot.lane.b32.xlu0 %v5817_v7, %s10069_s25 }
 0x5fd   : > { %v6892_v29 = vadd.f32 %v6869_v13, %v6822_v57  ;;  %7340 = vrot.lane.b32.xlu1 %v12154_v12, %s10066_s22  ;;  %v6911_v63 = vpop.permute.xlu0 %6910 }
 0x5fe   : > { %v6932_v2 = vsel %vm6930_vm2, %v11952_v18, %v6911_v63  ;;  %v5823_v48 = vpop.f32.mrb[184].mxu1  ;;  %v6698_v57 = vpop.f32.mrb[172].mxu0 }
 0x5ff   : > { %v6953_v34 = vadd.f32 %v6932_v2, %v6883_v44  ;;  %v12249_v61 = vpop.permute.xlu1 %6912  ;;  %v12251_v52 = vpop.f32.mrb[185].mxu1 }
 0x600   : > { %v6933_v1 = vsel %vm6930_vm2, %v6911_v63, %v12249_v61  ;;  %v5827_v7 = vpop.f32.mrb[186].mxu1  ;;  %7556 = vrot.lane.b32.xlu0 %v5823_v48, %s10069_s25  ;;  %v6699_v13 = vpop.f32.mrb[173].mxu0 }
 0x601   : > { %v6954_v23 = vadd.f32 %v6933_v1, %v6884_v0  ;;  %7348 = vrot.lane.b32.xlu1 %v12158_v43, %s10066_s22  ;;  %v12258_v12 = vpop.f32.mrb[187].mxu1  ;;  %v6919_v38 = vpop.permute.xlu0 %6918 }
 0x602   : > { %v6935_v44 = vsel %vm6930_vm2, %v11959_v35, %v6919_v38  ;;  %v6700_v59 = vpop.f32.mrb[174].mxu0 }
 0x603   : > { %v6957_v33 = vadd.f32 %v6935_v44, %v6887_v22  ;;  %v12262_v2 = vpop.permute.xlu1 %6920  ;;  %v6701_v0 = vpop.f32.mrb[175].mxu0 }
 0x604   : > { %v6936_v63 = vsel %vm6930_vm2, %v6919_v38, %v12262_v2  ;;  %7610 = vrot.lane.b32.xlu0 %v5827_v7, %s10061_s11 }
 0x605   : > { %v6958_v48 = vadd.f32 %v6936_v63, %v6888_v46  ;;  %7402 = vrot.lane.b32.xlu1 %v12166_v17, %s10067_s23  ;;  %v6927_v43 = vpop.permute.xlu0 %6926 }
 0x606   : > { %v6938_v1 = vsel %vm6930_vm2, %v11964_v42, %v6927_v43  ;;  %v5833_v57 = vpop.f32.mrb[188].mxu1  ;;  %v6704_v46 = vpop.f32.mrb[176].mxu0 }
 0x607   : > { %v6961_v13 = vadd.f32 %v6938_v1, %v6891_v28  ;;  %v12271_v22 = vpop.permute.xlu1 %6928  ;;  %v12273_v44 = vpop.f32.mrb[189].mxu1 }
 0x608   : > { %v6939_v59 = vsel %vm6930_vm2, %v6927_v43, %v12271_v22  ;;  %v5837_v38 = vpop.f32.mrb[190].mxu1  ;;  %7618 = vrot.lane.b32.xlu0 %v5833_v57, %s10061_s11  ;;  %v6705_v0 = vpop.f32.mrb[177].mxu0 }
 0x609   : > { %v6962_v7 = vadd.f32 %v6939_v59, %v6892_v29  ;;  %7410 = vrot.lane.b32.xlu1 %v12170_v40, %s10067_s23  ;;  %v12280_v17 = vpop.f32.mrb[191].mxu1  ;;  %v6981_v63 = vpop.permute.xlu0 %6980 }
 0x60a   : > { %v7002_v28 = vsel %vm7000_vm3, %v11972_v31, %v6981_v63  ;;  %v6706_v43 = vpop.f32.mrb[178].mxu0 }
 0x60b   : > { %v7023_v1 = vadd.f32 %v7002_v28, %v6953_v34  ;;  %v12284_v42 = vpop.permute.xlu1 %6982  ;;  %v6707_v29 = vpop.f32.mrb[179].mxu0 }
 0x60c   : > { %v7003_v57 = vsel %vm7000_vm3, %v6981_v63, %v12284_v42  ;;  %7626 = vrot.lane.b32.xlu0 %v5837_v38, %s10061_s11 }
 0x60d   : > { %v7024_v59 = vadd.f32 %v7003_v57, %v6954_v23  ;;  %7418 = vrot.lane.b32.xlu1 %v12178_v53, %s10067_s23  ;;  %v6989_v40 = vpop.permute.xlu0 %6988 }
 0x60e   : > { %v7005_v46 = vsel %vm7000_vm3, %v11980_v39, %v6989_v40  ;;  %v5843_v35 = vpop.f32.mrb[192].mxu1  ;;  %v6710_v23 = vpop.f32.mrb[180].mxu0 }
 0x60f   : > { %v7027_v0 = vadd.f32 %v7005_v46, %v6957_v33  ;;  %v12293_v34 = vpop.permute.xlu1 %6990  ;;  %v12295_v28 = vpop.f32.mrb[193].mxu1 }
 0x610   : > { %v7006_v63 = vsel %vm7000_vm3, %v6989_v40, %v12293_v34  ;;  %v5847_v43 = vpop.f32.mrb[194].mxu1  ;;  %7679 = vrot.lane.b32.xlu0 %v5843_v35, %s10070_s26  ;;  %v6711_v29 = vpop.f32.mrb[181].mxu0 }
 0x611   : > { %v7028_v38 = vadd.f32 %v7006_v63, %v6958_v48  ;;  %7472 = vrot.lane.b32.xlu1 %v12182_v5, %s10068_s24  ;;  %v12302_v53 = vpop.f32.mrb[195].mxu1  ;;  %v6997_v57 = vpop.permute.xlu0 %6996 }
 0x612   : > { %v7008_v33 = vsel %vm7000_vm3, %v11987_v50, %v6997_v57  ;;  %v6712_v26 = vpop.f32.mrb[182].mxu0 }
 0x613   : > { %v7031_v46 = vadd.f32 %v7008_v33, %v6961_v13  ;;  %v12306_v39 = vpop.permute.xlu1 %6998  ;;  %v6713_v35 = vpop.f32.mrb[183].mxu0 }
 0x614   : > { %v7009_v40 = vsel %vm7000_vm3, %v6997_v57, %v12306_v39  ;;  %7687 = vrot.lane.b32.xlu0 %v5847_v43, %s10070_s26 }
 0x615   : > { %v7032_v48 = vadd.f32 %v7009_v40, %v6962_v7  ;;  %7480 = vrot.lane.b32.xlu1 %v12196_v55, %s10068_s24  ;;  %v7051_v5 = vpop.permute.xlu0 %7050 }
 0x616   : > { %v7072_v63 = vsel %vm7070_vm4, %v11992_v9, %v7051_v5  ;;  %v5853_v23 = vpop.f32.mrb[196].mxu1  ;;  %v6716_v33 = vpop.f32.mrb[196].mxu0 }
 0x617   : > { %v12315_v13 = vadd.f32 %v7072_v63, %v7023_v1  ;;  %v7053_v26 = vpop.permute.xlu1 %7052  ;;  %v6717_v29 = vpop.f32.mrb[197].mxu0 }
 0x618   : > { %v7073_v57 = vsel %vm7070_vm4, %v7051_v5, %v7053_v26  ;;  %v12318_v50 = vpop.f32.mrb[197].mxu1  ;;  %7695 = vrot.lane.b32.xlu0 %v5853_v23, %s10070_s26  ;;  %v12323_v55 = vpop.f32.mrb[198].mxu0 }
 0x619   : > { %v7094_v7 = vadd.f32 %v7073_v57, %v7024_v59  ;;  %v12321_v43 = vpop.f32.mrb[198].mxu1  ;;  %7488 = vrot.lane.b32.xlu1 %v12207_v30, %s10068_s24  ;;  %v6720_v40 = vpop.f32.mrb[199].mxu0 }
 0x61a   : > { %v5859_v1 = vpop.f32.mrb[199].mxu1  ;;  %v7059_v35 = vpop.permute.xlu0 %7058  ;;  %v6815_v40 = vadd.f32 %v12176_v25, %v12030_v11 }
 0x61b   : > { %v12327_v63 = vpop.permute.xlu1 %7060  ;;  %v7075_v5 = vsel %vm7070_vm4, %v12000_v15, %v7059_v35 }
 0x61c   : > { %v7076_v33 = vsel %vm7070_vm4, %v7059_v35, %v12327_v63  ;;  %7749 = vrot.lane.b32.xlu0 %v5859_v1, %s10071_s27  ;;  %v12334_v59 = vadd.f32 %v7075_v5, %v7027_v0  ;;  %v6885_v5 = vadd.f32 %v12214_v4, %v6815_v40 }
 0x61d   : > { %v7098_v23 = vadd.f32 %v7076_v33, %v7028_v38  ;;  %7542 = vrot.lane.b32.xlu1 %v12229_v10, %s10069_s25 }
 0x61e   : > { %v12338_v30 = vpop.f32.mrb[200].mxu1  ;;  %v7067_v29 = vpop.permute.xlu0 %7066 }
 0x61f   : > { %v12340_v57 = vpop.f32.mrb[200].mxu0  ;;  %v7078_v15 = vsel %vm7070_vm4, %v12008_v51, %v7067_v29  ;;  %v12346_v9 = vpop.permute.xlu1 %7068 }
 0x620   : > { %v6725_v35 = vpop.f32.mrb[201].mxu0  ;;  %v12348_v0 = vadd.f32 %v7078_v15, %v7031_v46  ;;  %v7079_v38 = vsel %vm7070_vm4, %v7067_v29, %v12346_v9  ;;  %v5865_v10 = vpop.f32.mrb[201].mxu1 }
 0x621   : > { %v12352_v1 = vpop.f32.mrb[202].mxu0  ;;  %7550 = vrot.lane.b32.xlu1 %v12236_v36, %s10069_s25  ;;  %v7102_v11 = vadd.f32 %v7079_v38, %v7032_v48  ;;  %v12357_v25 = vpop.f32.mrb[202].mxu1  ;;  %7757 = vrot.lane.b32.xlu0 %v5865_v10, %s10071_s27  ;;  %v6955_v35 = vadd.f32 %v12249_v61, %v6885_v5  ;;  %v6819_v61 = vadd.f32 %v12184_v27, %v12034_v8 }
 0x622   : > { %v6728_v33 = vpop.f32.mrb[203].mxu0  ;;  %v5869_v15 = vpop.f32.mrb[203].mxu1 }
 0x623   : > { %v7121_v46 = vpop.permute.xlu0 %7120  ;;  %v12361_v29 = vpop.permute.xlu1 %7118  ;;  %v7025_v4 = vadd.f32 %v12284_v42, %v6955_v35  ;;  %v6889_v42 = vadd.f32 %v12227_v41, %v6819_v61 }
 0x624   : > { %v7142_v51 = vsel %vm7140_vm5, %v12361_v29, %v7121_v46 }
 0x625   : > { %7558 = vrot.lane.b32.xlu1 %v12251_v52, %s10069_s25  ;;  %v12368_v36 = vadd.f32 %v7142_v51, %v7094_v7  ;;  %7765 = vrot.lane.b32.xlu0 %v5869_v15, %s10071_s27  ;;  %v7095_v10 = vadd.f32 %v7053_v26, %v7025_v4  ;;  %v6959_v15 = vadd.f32 %v12262_v2, %v6889_v42 }
 0x626   : > { %v12371_v48 = vpop.f32.mrb[204].mxu1  ;;  %v12373_v40 = vpop.f32.mrb[204].mxu0  ;;  %v6823_v2 = vadd.f32 %v12194_v24, %v12042_v37 }
 0x627   : > { %v7129_v38 = vpop.permute.xlu0 %7128  ;;  %v6733_v5 = vpop.f32.mrb[205].mxu0 }
 0x628   : > { %v7123_v33 = vpop.permute.xlu1 %7122  ;;  %v5875_v52 = vpop.f32.mrb[205].mxu1 }
 0x629   : > { %v7143_v31 = vsel %vm7140_vm5, %v7121_v46, %v7123_v33  ;;  %v12378_v18 = vpop.f32.mrb[206].mxu0  ;;  %7612 = vrot.lane.b32.xlu1 %v12258_v12, %s10061_s11  ;;  %v12385_v7 = vpop.f32.mrb[206].mxu1  ;;  %7819 = vrot.lane.b32.xlu0 %v5875_v52, %s10072_s28  ;;  %v7029_v12 = vadd.f32 %v12293_v34, %v6959_v15 }
 0x62a   : > { %v12383_v51 = vadd.f32 %v7143_v31, %v7095_v10  ;;  %v6736_v8 = vpop.f32.mrb[207].mxu0  ;;  %v5879_v27 = vpop.f32.mrb[207].mxu1 }
 0x62b   : > { %v7137_v26 = vpop.permute.xlu0 %7136  ;;  %v7099_v10 = vadd.f32 %v12327_v63, %v7029_v12 }
 0x62c   : > { %v7127_v46 = vpop.permute.xlu1 %7126 }
 0x62d   : > { %v7145_v35 = vsel %vm7140_vm5, %v7127_v46, %v7129_v38  ;;  %7620 = vrot.lane.b32.xlu1 %v12273_v44, %s10061_s11  ;;  %7827 = vrot.lane.b32.xlu0 %v5879_v27, %s10072_s28 }
 0x62e   : > { %v12393_v41 = vadd.f32 %v7145_v35, %v7098_v23  ;;  %v12396_v31 = vpop.f32.mrb[208].mxu1  ;;  %v12398_v4 = vpop.f32.mrb[208].mxu0  ;;  %v6893_v23 = vadd.f32 %v12240_v20, %v6823_v2 }
 0x62f   : > { %v7191_v61 = vpop.permute.xlu0 %7190  ;;  %v6741_v5 = vpop.f32.mrb[209].mxu0 }
 0x630   : > { %v7131_v33 = vpop.permute.xlu1 %7130  ;;  %v5885_v52 = vpop.f32.mrb[209].mxu1  ;;  %v6963_v27 = vadd.f32 %v12271_v22, %v6893_v23 }
 0x631   : > { %v7146_v44 = vsel %vm7140_vm5, %v7129_v38, %v7131_v33  ;;  %v12404_v34 = vpop.f32.mrb[210].mxu0  ;;  %7628 = vrot.lane.b32.xlu1 %v12280_v17, %s10061_s11  ;;  %v12409_v8 = vpop.f32.mrb[210].mxu1  ;;  %7835 = vrot.lane.b32.xlu0 %v5885_v52, %s10072_s28  ;;  %v7141_v33 = vsel %vm7140_vm5, %v11897_v16, %v12361_v29 }
 0x632   : > { %v7169_v42 = vadd.f32 %v7146_v44, %v7099_v10  ;;  %v6744_v37 = vpop.f32.mrb[211].mxu0  ;;  %v5889_v24 = vpop.f32.mrb[211].mxu1  ;;  %v7033_v17 = vadd.f32 %v12306_v39, %v6963_v27 }
 0x633   : > { %v7199_v63 = vpop.permute.xlu0 %7198 }
 0x634   : > { %v7135_v15 = vpop.permute.xlu1 %7134  ;;  %v7103_v10 = vadd.f32 %v12346_v9, %v7033_v17 }
 0x635   : > { %v7148_v38 = vsel %vm7140_vm5, %v7135_v15, %v7137_v26  ;;  %7681 = vrot.lane.b32.xlu1 %v12295_v28, %s10070_s26  ;;  %7889 = vrot.lane.b32.xlu0 %v5889_v24, %s10073_s29  ;;  %v7163_v24 = vadd.f32 %v7141_v33, %v12315_v13  ;;  %v7144_v13 = vsel %vm7140_vm5, %v11902_v21, %v7127_v46 }
 0x636   : > { %v7172_v35 = vadd.f32 %v7148_v38, %v7102_v11  ;;  %v12418_v20 = vpop.f32.mrb[212].mxu1  ;;  %v12420_v12 = vpop.f32.mrb[212].mxu0 }
 0x637   : > { %v7207_v2 = vpop.permute.xlu0 %7206  ;;  %v6749_v5 = vpop.f32.mrb[213].mxu0 }
 0x638   : > { %v7139_v22 = vpop.permute.xlu1 %7138  ;;  %v5895_v44 = vpop.f32.mrb[213].mxu1 }
 0x639   : > { %v7149_v28 = vsel %vm7140_vm5, %v7137_v26, %v7139_v22  ;;  %v12427_v39 = vpop.f32.mrb[214].mxu0  ;;  %7689 = vrot.lane.b32.xlu1 %v12302_v53, %s10070_s26  ;;  %v12431_v52 = vpop.f32.mrb[214].mxu1  ;;  %7897 = vrot.lane.b32.xlu0 %v5895_v44, %s10073_s29 }
 0x63a   : > { %v7173_v11 = vadd.f32 %v7149_v28, %v7103_v10  ;;  %v6752_v9 = vpop.f32.mrb[215].mxu0  ;;  %v5899_v23 = vpop.f32.mrb[215].mxu1 }
 0x63b   : > { %v7261_v37 = vpop.permute.xlu0 %7260 }
 0x63c   : > { %v7189_v29 = vpop.permute.xlu1 %7188 }
 0x63d   : > { %v7211_v26 = vsel %vm7210_vm6, %v11914_v19, %v7189_v29  ;;  %v7212_v27 = vsel %vm7210_vm6, %v7189_v29, %v7191_v61  ;;  %7697 = vrot.lane.b32.xlu1 %v12318_v50, %s10070_s26  ;;  %7905 = vrot.lane.b32.xlu0 %v5899_v23, %s10073_s29  ;;  %v7167_v50 = vadd.f32 %v7144_v13, %v12334_v59 }
 0x63e   : > { %v7233_v53 = vadd.f32 %v7211_v26, %v7163_v24  ;;  %v7234_v38 = vadd.f32 %v7212_v27, %v12368_v36 }
 0x63f   : > { %v12442_v17 = vpop.permute.xlu0 %7268 }
 0x640   : > { %v7193_v10 = vpop.permute.xlu1 %7192 }
 0x641   : > { %v7213_v5 = vsel %vm7210_vm6, %v7191_v61, %v7193_v10  ;;  %7747 = vrot.lane.b32.xlu1 %v12321_v43, %s10071_s27 }
 0x642   : > { %v7235_v22 = vadd.f32 %v7213_v5, %v12383_v51  ;;  %v7147_v51 = vsel %vm7140_vm5, %v11908_v62, %v7135_v15 }
 0x643   : > { %v12450_v33 = vpop.permute.xlu0 %7276  ;;  %v7171_v29 = vadd.f32 %v7147_v51, %v12348_v0 }
 0x644   : > { %v7197_v36 = vpop.permute.xlu1 %7196 }
 0x645   : > { %v7214_v28 = vsel %vm7210_vm6, %v11919_v47, %v7197_v36  ;;  %v7215_v44 = vsel %vm7210_vm6, %v7197_v36, %v7199_v63  ;;  %7751 = vrot.lane.b32.xlu1 %v12323_v55, %s10071_s27 }
 0x646   : > { %v7237_v46 = vadd.f32 %v7214_v28, %v7167_v50  ;;  %v7238_v61 = vadd.f32 %v7215_v44, %v12393_v41 }
 0x647   : > { %v12459_v9 = vpop.permute.xlu0 %7330 }
 0x648   : > { %v7201_v43 = vpop.permute.xlu1 %7200 }
 0x649   : > { %v7216_v59 = vsel %vm7210_vm6, %v7199_v63, %v7201_v43  ;;  %7755 = vrot.lane.b32.xlu1 %v12338_v30, %s10071_s27 }
 0x64a   : > { %v7239_v23 = vadd.f32 %v7216_v59, %v7169_v42 }
 0x64b   : > { %v12466_v24 = vpop.permute.xlu0 %7338 }
 0x64c   : > { %v7205_v55 = vpop.permute.xlu1 %7204 }
 0x64d   : > { %v7217_v41 = vsel %vm7210_vm6, %v11926_v3, %v7205_v55  ;;  %v7218_v26 = vsel %vm7210_vm6, %v7205_v55, %v7207_v2  ;;  %7759 = vrot.lane.b32.xlu1 %v12340_v57, %s10071_s27 }
 0x64e   : > { %v7241_v15 = vadd.f32 %v7217_v41, %v7171_v29  ;;  %v7242_v27 = vadd.f32 %v7218_v26, %v7172_v35 }
 0x64f   : > { %v12474_v63 = vpop.permute.xlu0 %7346 }
 0x650   : > { %v7209_v10 = vpop.permute.xlu1 %7208 }
 0x651   : > { %v7219_v30 = vsel %vm7210_vm6, %v7207_v2, %v7209_v10  ;;  %7763 = vrot.lane.b32.xlu1 %v12357_v25, %s10071_s27  ;;  %v7352_v25 = vsel %vm7350_vm8, %v12012_v6, %v12459_v9 }
 0x652   : > { %v7243_v0 = vadd.f32 %v7219_v30, %v7173_v11 }
 0x653   : > { %v12479_v42 = vpop.permute.xlu0 %7400 }
 0x654   : > { %v7259_v13 = vpop.permute.xlu1 %7258  ;;  %v7422_v28 = vsel %vm7420_vm9, %v12036_v54, %v12479_v42 }
 0x655   : > { %v7281_v5 = vsel %vm7280_vm7, %v11934_v14, %v7259_v13  ;;  %v7282_v57 = vsel %vm7280_vm7, %v7259_v13, %v7261_v37  ;;  %7767 = vrot.lane.b32.xlu1 %v12352_v1, %s10071_s27 }
 0x656   : > { %v12486_v35 = vadd.f32 %v7281_v5, %v7233_v53  ;;  %v7304_v2 = vadd.f32 %v7282_v57, %v7234_v38 }
 0x657   : > { %v12491_v11 = vpop.permute.xlu0 %7408 }
 0x658   : > { %v7374_v50 = vadd.f32 %v7352_v25, %v7304_v2  ;;  %v7263_v36 = vpop.permute.xlu1 %7262  ;;  %v7425_v10 = vsel %vm7420_vm9, %v12045_v32, %v12491_v11  ;;  %v13777_v25 = vld [vmem:[#allocation87_spill] sm:$0xff] }
 0x659   : > { %v7283_v44 = vsel %vm7280_vm7, %v7261_v37, %v7263_v36  ;;  %7817 = vrot.lane.b32.xlu1 %v12371_v48, %s10072_s28  ;;  %v7355_v48 = vsel %vm7350_vm8, %v12018_v45, %v12466_v24 }
 0x65a   : > { %v7305_v1 = vadd.f32 %v7283_v44, %v7235_v22  ;;  %v7444_v53 = vadd.f32 %v7422_v28, %v7374_v50 }
 0x65b   : > { %v7417_v38 = vpop.permute.xlu0 %7416 }
 0x65c   : > { %v7267_v43 = vpop.permute.xlu1 %7266 }
 0x65d   : > { %v7284_v51 = vsel %vm7280_vm7, %v11942_v49, %v7267_v43  ;;  %v7285_v59 = vsel %vm7280_vm7, %v7267_v43, %v12442_v17  ;;  %7821 = vrot.lane.b32.xlu1 %v12373_v40, %s10072_s28  ;;  %v13779_v43 = vld [vmem:[#allocation137_spill] sm:$0xff] }
 0x65e   : > { %v12505_v29 = vadd.f32 %v7284_v51, %v7237_v46  ;;  %v7308_v55 = vadd.f32 %v7285_v59, %v7238_v61  ;;  %v7428_v51 = vsel %vm7420_vm9, %v13779_v43, %v7417_v38 }
 0x65f   : > { %v7471_v37 = vpop.permute.xlu0 %7470 }
 0x660   : > { %v7378_v22 = vadd.f32 %v7355_v48, %v7308_v55  ;;  %v7492_v41 = vsel %vm7490_vm10, %v12061_v60, %v7471_v37  ;;  %v7271_v26 = vpop.permute.xlu1 %7270 }
 0x661   : > { %v12515_v30 = vadd.f32 %v7492_v41, %v7444_v53  ;;  %v7286_v40 = vsel %vm7280_vm7, %v12442_v17, %v7271_v26  ;;  %7825 = vrot.lane.b32.xlu1 %v12385_v7, %s10072_s28 }
 0x662   : > { %v7309_v46 = vadd.f32 %v7286_v40, %v7239_v23  ;;  %v7448_v61 = vadd.f32 %v7425_v10, %v7378_v22  ;;  %v13778_v23 = vld [vmem:[#allocation129_spill] sm:$0xff] }
 0x663   : > { %v7479_v13 = vpop.permute.xlu0 %7478  ;;  %v7358_v28 = vsel %vm7350_vm8, %v13778_v23, %v12474_v63 }
 0x664   : > { %v7495_v5 = vsel %vm7490_vm10, %v12069_v58, %v7479_v13  ;;  %v7275_v57 = vpop.permute.xlu1 %7274 }
 0x665   : > { %v7518_v2 = vadd.f32 %v7495_v5, %v7448_v61  ;;  %v7287_v50 = vsel %vm7280_vm7, %v13777_v25, %v7275_v57  ;;  %v7288_v36 = vsel %vm7280_vm7, %v7275_v57, %v12450_v33  ;;  %7829 = vrot.lane.b32.xlu1 %v12378_v18, %s10072_s28 }
 0x666   : > { %v12529_v17 = vadd.f32 %v7287_v50, %v7241_v15  ;;  %v7312_v7 = vadd.f32 %v7288_v36, %v7242_v27 }
 0x668   : > { %v7382_v44 = vadd.f32 %v7358_v28, %v7312_v7  ;;  %v7279_v53 = vpop.permute.xlu1 %7278 }
 0x669   : > { %v7289_v59 = vsel %vm7280_vm7, %v12450_v33, %v7279_v53  ;;  %7833 = vrot.lane.b32.xlu1 %v12396_v31, %s10072_s28 }
 0x66a   : > { %v7452_v55 = vadd.f32 %v7428_v51, %v7382_v44  ;;  %v7313_v18 = vadd.f32 %v7289_v59, %v7243_v0  ;;  %v7487_v0 = vpop.permute.xlu0 %7486 }
 0x66c   : > { %v7333_v15 = vpop.permute.xlu1 %7332 }
 0x66d   : > { %v7353_v27 = vsel %vm7350_vm8, %v12459_v9, %v7333_v15  ;;  %7837 = vrot.lane.b32.xlu1 %v12398_v4, %s10072_s28 }
 0x66e   : > { %v7375_v48 = vadd.f32 %v7353_v27, %v7305_v1  ;;  %v13780_v27 = vld [vmem:[#allocation49_spill] sm:$0xff] }
 0x670   : > { %v7341_v22 = vpop.permute.xlu1 %7340 }
 0x671   : > { %v7356_v41 = vsel %vm7350_vm8, %v12466_v24, %v7341_v22  ;;  %7887 = vrot.lane.b32.xlu1 %v12409_v8, %s10073_s29 }
 0x672   : > { %v7379_v33 = vadd.f32 %v7356_v41, %v7309_v46  ;;  %v13782_v41 = vld [vmem:[#allocation145_spill] sm:$0xff] }
 0x674   : > { %v7349_v26 = vpop.permute.xlu1 %7348 }
 0x675   : > { %v7359_v31 = vsel %vm7350_vm8, %v12474_v63, %v7349_v26  ;;  %7891 = vrot.lane.b32.xlu1 %v12404_v34, %s10073_s29  ;;  %v12560_v63 = vpop.permute.xlu0 %7540 }
 0x676   : > { %v7383_v9 = vadd.f32 %v7359_v31, %v7313_v18 }
 0x678   : > { %v7403_v10 = vpop.permute.xlu1 %7402 }
 0x679   : > { %v7423_v4 = vsel %vm7420_vm9, %v12479_v42, %v7403_v10  ;;  %7895 = vrot.lane.b32.xlu1 %v12418_v20, %s10073_s29  ;;  %v12565_v61 = vpop.permute.xlu0 %7548 }
 0x67a   : > { %v7445_v24 = vadd.f32 %v7423_v4, %v7375_v48  ;;  %v13781_v48 = vld [vmem:[#allocation47_spill] sm:$0xff] }
 0x67b   : > { %v6791_v22 = vsel %vm6790_vm0, %v13781_v48, %v13780_v27 }
 0x67c   : > { %v7411_v1 = vpop.permute.xlu1 %7410 }
 0x67d   : > { %v7426_v8 = vsel %vm7420_vm9, %v12491_v11, %v7411_v1  ;;  %7899 = vrot.lane.b32.xlu1 %v12420_v12, %s10073_s29  ;;  %v12571_v50 = vpop.permute.xlu0 %7556 }
 0x67e   : > { %v7449_v34 = vadd.f32 %v7426_v8, %v7379_v33  ;;  %v7498_v33 = vsel %vm7490_vm10, %v13782_v41, %v7487_v0  ;;  %v13785_v8 = vld [vmem:[#allocation89_spill] sm:$0xff] }
 0x67f   : > { %v7522_v26 = vadd.f32 %v7498_v33, %v7452_v55 }
 0x680   : > { %v7419_v40 = vpop.permute.xlu1 %7418 }
 0x681   : > { %v7429_v46 = vsel %vm7420_vm9, %v7417_v38, %v7419_v40  ;;  %7903 = vrot.lane.b32.xlu1 %v12431_v52, %s10073_s29  ;;  %v12574_v28 = vpop.permute.xlu0 %7610 }
 0x682   : > { %v7453_v42 = vadd.f32 %v7429_v46, %v7383_v9  ;;  %v13783_v9 = vld [vmem:[#allocation55_spill] sm:$0xff] }
 0x684   : > { %v7473_v20 = vpop.permute.xlu1 %7472 }
 0x685   : > { %v7493_v5 = vsel %vm7490_vm10, %v7471_v37, %v7473_v20  ;;  %7907 = vrot.lane.b32.xlu1 %v12427_v39, %s10073_s29  ;;  %v12581_v18 = vpop.permute.xlu0 %7618  ;;  %v13788_v20 = vld [vmem:[#allocation67_spill] sm:$0xff] }
 0x686   : > { %v7515_v11 = vadd.f32 %v7493_v5, %v7445_v24  ;;  %v13784_v24 = vld [vmem:[#allocation169_spill] sm:$0xff] }
 0x687   : > { %v6812_v1 = vadd.f32 %v13784_v24, %v6791_v22  ;;  %v13792_v24 = vld [vmem:[#allocation105_spill] sm:$0xff] }
 0x688   : > { %v7481_v12 = vpop.permute.xlu1 %7480 }
 0x689   : > { %v7496_v57 = vsel %vm7490_vm10, %v7479_v13, %v7481_v12 }
 0x68a   : > { %v7519_v36 = vadd.f32 %v7496_v57, %v7449_v34  ;;  %v13786_v34 = vld [vmem:[#allocation61_spill] sm:$0xff] }
 0x68b   : > { %v6931_v40 = vsel %vm6930_vm2, %v13786_v34, %v13785_v8 }
 0x68c   : > { %v7489_v38 = vpop.permute.xlu1 %7488 }
 0x68d   : > { %v7499_v7 = vsel %vm7490_vm10, %v7487_v0, %v7489_v38  ;;  %v13787_v0 = vld [vmem:[#allocation103_spill] sm:$0xff]  ;;  %v13790_v38 = vld [vmem:[#allocation73_spill] sm:$0xff] }
 0x68e   : > { %v7523_v52 = vadd.f32 %v7499_v7, %v7453_v42  ;;  %v12597_v42 = vpop.permute.xlu0 %7626  ;;  %v7001_v5 = vsel %vm7000_vm3, %v13788_v20, %v13787_v0 }
 0x690   : > { %v7543_v44 = vpop.permute.xlu1 %7542 }
 0x691   : > { %v7563_v37 = vsel %vm7560_vm11, %v12560_v63, %v7543_v44  ;;  %v7585_v53 = vadd.f32 %v7543_v44, %v7515_v11 }
 0x692   : > { %v7584_v39 = vadd.f32 %v7563_v37, %v12515_v30  ;;  %v6861_v30 = vsel %vm6860_vm1, %v13783_v9, %v11931_v56  ;;  %v7680_v27 = vpop.permute.xlu0 %7679 }
 0x693   : > { %v6882_v46 = vadd.f32 %v6861_v30, %v6812_v1  ;;  %v7421_v1 = vsel %vm7420_vm9, %v13792_v24, %v12036_v54 }
 0x694   : > { %v7551_v51 = vpop.permute.xlu1 %7550 }
 0x695   : > { %v7566_v13 = vsel %vm7560_vm11, %v12565_v61, %v7551_v51  ;;  %v7589_v59 = vadd.f32 %v7551_v51, %v7519_v36  ;;  %v6952_v12 = vadd.f32 %v6931_v40, %v6882_v46  ;;  %v13789_v36 = vld [vmem:[#allocation115_spill] sm:$0xff]  ;;  %v13794_v46 = vld [vmem:[#allocation149_spill] sm:$0xff] }
 0x696   : > { %v7588_v15 = vadd.f32 %v7566_v13, %v7518_v2  ;;  %v7071_v7 = vsel %vm7070_vm4, %v13790_v38, %v13789_v36  ;;  %v7562_v0 = vsel %vm7560_vm11, %v13794_v46, %v12560_v63  ;;  %v13797_v36 = vld [vmem:[#allocation135_spill] sm:$0xff] }
 0x698   : > { %v7559_v31 = vpop.permute.xlu1 %7558 }
 0x699   : > { %v7569_v10 = vsel %vm7560_vm11, %v12571_v50, %v7559_v31  ;;  %v7593_v4 = vadd.f32 %v7559_v31, %v7523_v52  ;;  %v7022_v52 = vadd.f32 %v7001_v5, %v6952_v12 }
 0x69a   : > { %v7592_v2 = vadd.f32 %v7569_v10, %v7522_v26 }
 0x69b   : > { %v7092_v13 = vadd.f32 %v7071_v7, %v7022_v52 }
 0x69c   : > { %v7613_v55 = vpop.permute.xlu1 %7612 }
 0x69d   : > { %v7632_v56 = vsel %vm7000_vm3, %v12574_v28, %v7613_v55  ;;  %v7654_v11 = vadd.f32 %v7613_v55, %v7585_v53  ;;  %v7162_v22 = vadd.f32 %v11897_v16, %v7092_v13  ;;  %v13791_v53 = vld [vmem:[#allocation92_spill] sm:$0xff]  ;;  %v13795_v55 = vld [vmem:[#allocation127_spill] sm:$0xff] }
 0x69e   : > { %v7653_v57 = vadd.f32 %v7632_v56, %v7584_v39  ;;  %v7351_v39 = vsel %vm7350_vm8, %v13791_v53, %v12012_v6  ;;  %v7561_v54 = vsel %vm7560_vm11, %v13795_v55, %v13794_v46  ;;  %v13803_v55 = vld [vmem:[#allocation81_spill] sm:$0xff] }
 0x69f   : > { %v7232_v9 = vadd.f32 %v11914_v19, %v7162_v22  ;;  %v7373_v30 = vadd.f32 %v7351_v39, %v12486_v35 }
 0x6a0   : > { %v7621_v44 = vpop.permute.xlu1 %7620 }
 0x6a1   : > { %v7635_v37 = vsel %vm7000_vm3, %v12581_v18, %v7621_v44  ;;  %v7658_v51 = vadd.f32 %v7621_v44, %v7589_v59  ;;  %v7302_v59 = vadd.f32 %v11934_v14, %v7232_v9  ;;  %v7443_v19 = vadd.f32 %v7421_v1, %v7373_v30  ;;  %v13793_v14 = vld [vmem:[#allocation117_spill] sm:$0xff] }
 0x6a2   : > { %v7657_v48 = vadd.f32 %v7635_v37, %v7588_v15  ;;  %v12618_v15 = vpop.permute.xlu0 %7687  ;;  %v13798_v37 = vld [vmem:[#allocation5_spill] sm:$0xff] }
 0x6a3   : > { %v7701_v22 = vsel %vm7699_vm12, %v13798_v37, %v7680_v27 }
 0x6a4   : > { %v7629_v33 = vpop.permute.xlu1 %7628 }
 0x6a5   : > { %v7638_v26 = vsel %vm7000_vm3, %v12597_v42, %v7629_v33  ;;  %v7662_v31 = vadd.f32 %v7629_v33, %v7593_v4  ;;  %v7372_v4 = vadd.f32 %v13791_v53, %v7302_v59 }
 0x6a6   : > { %v7661_v10 = vadd.f32 %v7638_v26, %v7592_v2  ;;  %v7491_v2 = vsel %vm7490_vm10, %v13793_v14, %v12061_v60  ;;  %v12644_v12 = vpop.permute.xlu0 %7695 }
 0x6a7   : > { %v7442_v35 = vadd.f32 %v13792_v24, %v7372_v4 }
 0x6a8   : > { %v7682_v16 = vpop.permute.xlu1 %7681 }
 0x6a9   : > { %v7702_v6 = vsel %vm7699_vm12, %v7680_v27, %v7682_v16  ;;  %v12624_v8 = vadd.f32 %v7682_v16, %v7654_v11  ;;  %v7512_v56 = vadd.f32 %v13793_v14, %v7442_v35  ;;  %v7513_v11 = vadd.f32 %v7491_v2, %v7443_v19  ;;  %v13800_v16 = vld [vmem:[#allocation155_spill] sm:$0xff] }
 0x6aa   : > { %v12627_v34 = vadd.f32 %v7702_v6, %v7653_v57  ;;  %v13796_v57 = vld [vmem:[#allocation163_spill] sm:$0xff]  ;;  %v12665_v30 = vpop.permute.xlu0 %7749 }
 0x6ab   : > { %v7630_v38 = vsel %vm7000_vm3, %v13797_v36, %v13796_v57  ;;  %v7631_v63 = vsel %vm7000_vm3, %v13796_v57, %v12574_v28  ;;  %v7582_v7 = vadd.f32 %v7561_v54, %v7512_v56  ;;  %v7583_v52 = vadd.f32 %v7562_v0, %v7513_v11  ;;  %v13801_v14 = vld [vmem:[#allocation79_spill] sm:$0xff]  ;;  %v13804_v54 = vld [vmem:[#allocation53_spill] sm:$0xff]  ;;  %v13807_v57 = vld [vmem:[#allocation170_spill] sm:$0xff] }
 0x6ac   : > { %v7690_v40 = vpop.permute.xlu1 %7689  ;;  %v13802_v2 = vld [vmem:[#allocation51_spill] sm:$0xff]  ;;  %v6797_v0 = vsel %vm6790_vm0, %v13804_v54, %v13803_v55  ;;  %v13806_v56 = vld [vmem:[#allocation57_spill] sm:$0xff] }
 0x6ad   : > { %v7705_v20 = vsel %vm7699_vm12, %v12618_v15, %v7690_v40  ;;  %v12641_v5 = vadd.f32 %v7690_v40, %v7658_v51  ;;  %v13799_v51 = vld [vmem:[#allocation143_spill] sm:$0xff]  ;;  %v7651_v53 = vadd.f32 %v7630_v38, %v7582_v7  ;;  %v7652_v39 = vadd.f32 %v7631_v63, %v7583_v52  ;;  %v13808_v38 = vld [vmem:[#allocation85_spill] sm:$0xff] }
 0x6ae   : > { %v12646_v60 = vadd.f32 %v7705_v20, %v7657_v48  ;;  %v7700_v13 = vsel %vm7699_vm12, %v13799_v51, %v13798_v37  ;;  %v12683_v35 = vpop.permute.xlu0 %7757  ;;  %v6794_v40 = vsel %vm6790_vm0, %v13802_v2, %v13801_v14  ;;  %v13805_v20 = vld [vmem:[#allocation83_spill] sm:$0xff]  ;;  %v13812_v51 = vld [vmem:[#allocation172_spill] sm:$0xff]  ;;  %vm8013_vm0 = vcmask (!%p8749_p7), 474112  }
 0x6af   : > { %v7721_v28 = vadd.f32 %v7700_v13, %v7651_v53  ;;  %v7722_v9 = vadd.f32 %v7701_v22, %v7652_v39  ;;  %v6864_v11 = vsel %vm6860_vm1, %v13806_v56, %v13805_v20  ;;  %v6816_v36 = vadd.f32 %v13807_v57, %v6794_v40  ;;  %v13809_v63 = vld [vmem:[#allocation59_spill] sm:$0xff] }
 0x6b0   : > { %v7698_v44 = vpop.permute.xlu1 %7697  ;;  %v6867_v7 = vsel %vm6860_vm1, %v13809_v63, %v13808_v38  ;;  %v13810_v52 = vld [vmem:[#allocation95_spill] sm:$0xff]  ;;  %v6820_v13 = vadd.f32 %v13812_v51, %v6797_v0  ;;  %v13822_v38 = vld [vmem:[#allocation77_spill] sm:$0xff] }
 0x6b1   : > { %v7708_v48 = vsel %vm7699_vm12, %v12644_v12, %v7698_v44  ;;  %v12661_v33 = vadd.f32 %v7698_v44, %v7662_v31  ;;  %v13811_v44 = vld [vmem:[#allocation63_spill] sm:$0xff]  ;;  %v6886_v22 = vadd.f32 %v6864_v11, %v6816_v36 }
 0x6b2   : > { %v12663_v26 = vadd.f32 %v7708_v48, %v7661_v10  ;;  %v6934_v37 = vsel %vm6930_vm2, %v13811_v44, %v13810_v52  ;;  %v12704_v48 = vpop.permute.xlu0 %7765  ;;  %v13813_v39 = vld [vmem:[#allocation99_spill] sm:$0xff] }
 0x6b3   : > { %v6956_v14 = vadd.f32 %v6934_v37, %v6886_v22  ;;  %v13817_v2 = vld [vmem:[#allocation111_spill] sm:$0xff] }
 0x6b4   : > { %v7748_v59 = vpop.permute.xlu1 %7747  ;;  %v13818_v40 = vld [vmem:[#allocation71_spill] sm:$0xff] }
 0x6b5   : > { %v7770_v24 = vsel %vm7769_vm13, %v13800_v16, %v7748_v59  ;;  %v7771_v27 = vsel %vm7769_vm13, %v7748_v59, %v12665_v30  ;;  %v13815_v59 = vld [vmem:[#allocation107_spill] sm:$0xff]  ;;  %v13816_v16 = vld [vmem:[#allocation69_spill] sm:$0xff]  ;;  %v7007_v55 = vsel %vm7000_vm3, %v13818_v40, %v13817_v2 }
 0x6b6   : > { %v12671_v1 = vadd.f32 %v7770_v24, %v7721_v28  ;;  %v12673_v31 = vadd.f32 %v7771_v27, %v7722_v9  ;;  %v13814_v28 = vld [vmem:[#allocation65_spill] sm:$0xff]  ;;  %v7004_v24 = vsel %vm7000_vm3, %v13816_v16, %v13815_v59  ;;  %v6890_v27 = vadd.f32 %v6867_v7, %v6820_v13  ;;  %v13819_v54 = vld [vmem:[#allocation119_spill] sm:$0xff]  ;;  %v7820_v7 = vpop.permute.xlu0 %7819 }
 0x6b7   : > { %v6937_v9 = vsel %vm6930_vm2, %v13814_v28, %v13813_v39  ;;  %v13820_v0 = vld [vmem:[#allocation75_spill] sm:$0xff]  ;;  %v7026_v11 = vadd.f32 %v7004_v24, %v6956_v14  ;;  %v13823_v24 = vld [vmem:[#allocation97_spill] sm:$0xff] }
 0x6b8   : > { %v12675_v6 = vpop.permute.xlu1 %7751  ;;  %v7074_v20 = vsel %vm7070_vm4, %v13820_v0, %v13819_v54  ;;  %v6960_v56 = vadd.f32 %v6937_v9, %v6890_v27  ;;  %v13821_v36 = vld [vmem:[#allocation123_spill] sm:$0xff]  ;;  %v7354_v27 = vsel %vm7350_vm8, %v13823_v24, %v12018_v45  ;;  %v13824_v2 = vld [vmem:[#allocation101_spill] sm:$0xff] }
 0x6b9   : > { %v7077_v63 = vsel %vm7070_vm4, %v13822_v38, %v13821_v36  ;;  %v7096_v44 = vadd.f32 %v7074_v20, %v7026_v11  ;;  %v13825_v40 = vld [vmem:[#allocation109_spill] sm:$0xff] }
 0x6ba   : > { %v7030_v52 = vadd.f32 %v7007_v55, %v6960_v56  ;;  %v12730_v59 = vpop.permute.xlu0 %7827  ;;  %v7424_v45 = vsel %vm7420_vm9, %v13825_v40, %v12045_v32  ;;  %v13826_v54 = vld [vmem:[#allocation153_spill] sm:$0xff] }
 0x6bb   : > { %v7166_v51 = vadd.f32 %v11902_v21, %v7096_v44  ;;  %v13828_v20 = vld [vmem:[#allocation113_spill] sm:$0xff]  ;;  %v13832_v44 = vld [vmem:[#allocation167_spill] sm:$0xff] }
 0x6bc   : > { %v12677_v10 = vpop.permute.xlu1 %7755  ;;  %v7100_v37 = vadd.f32 %v7077_v63, %v7030_v52  ;;  %v13829_v56 = vld [vmem:[#allocation121_spill] sm:$0xff] }
 0x6bd   : > { %v7236_v39 = vadd.f32 %v11919_v47, %v7166_v51  ;;  %v13830_v63 = vld [vmem:[#allocation157_spill] sm:$0xff] }
 0x6be   : > { %v7170_v22 = vadd.f32 %v11908_v62, %v7100_v37  ;;  %v7377_v62 = vadd.f32 %v7354_v27, %v12505_v29  ;;  %v12755_v38 = vpop.permute.xlu0 %7835  ;;  %v13831_v52 = vld [vmem:[#allocation133_spill] sm:$0xff]  ;;  %v13833_v37 = vld [vmem:[#allocation139_spill] sm:$0xff] }
 0x6bf   : > { %v7306_v9 = vadd.f32 %v11942_v49, %v7236_v39  ;;  %v7357_v49 = vsel %vm7350_vm8, %v13824_v2, %v13778_v23  ;;  %v7567_v23 = vsel %vm7560_vm11, %v13831_v52, %v13830_v63  ;;  %v7633_v32 = vsel %vm7000_vm3, %v13833_v37, %v13832_v44 }
 0x6c0   : > { %v12679_v4 = vpop.permute.xlu1 %7759  ;;  %v7240_v28 = vadd.f32 %v11926_v3, %v7170_v22  ;;  %v7447_v36 = vadd.f32 %v7424_v45, %v7377_v62  ;;  %v7381_v51 = vadd.f32 %v7357_v49, %v12529_v17  ;;  %v7427_v22 = vsel %vm7420_vm9, %v13828_v20, %v13779_v43 }
 0x6c1   : > { %v7376_v14 = vadd.f32 %v13823_v24, %v7306_v9  ;;  %v7494_v39 = vsel %vm7490_vm10, %v13829_v56, %v12069_v58  ;;  %v7565_v17 = vsel %vm7560_vm11, %v13826_v54, %v12565_v61  ;;  %v7772_v61 = vsel %vm7769_vm13, %v12665_v30, %v12675_v6 }
 0x6c2   : > { %v7310_v21 = vadd.f32 %v13777_v25, %v7240_v28  ;;  %v13827_v25 = vld [vmem:[#allocation131_spill] sm:$0xff]  ;;  %v13834_v28 = vld [vmem:[#allocation125_spill] sm:$0xff]  ;;  %v7451_v45 = vadd.f32 %v7427_v22, %v7381_v51 }
 0x6c3   : > { %v7446_v3 = vadd.f32 %v13825_v40, %v7376_v14  ;;  %v7564_v0 = vsel %vm7560_vm11, %v13827_v25, %v13826_v54  ;;  %v13835_v14 = vld [vmem:[#allocation2_spill] sm:$0xff]  ;;  %v13836_v40 = vld [vmem:[#allocation7_spill] sm:$0xff]  ;;  %v7890_v25 = vpop.permute.xlu0 %7889 }
 0x6c4   : > { %v12681_v19 = vpop.permute.xlu1 %7763  ;;  %v7380_v47 = vadd.f32 %v13824_v2, %v7310_v21  ;;  %v7497_v21 = vsel %vm7490_vm10, %v13834_v28, %v13782_v41  ;;  %v7634_v41 = vsel %vm7000_vm3, %v13832_v44, %v12581_v18  ;;  %v13840_v44 = vld [vmem:[#allocation141_spill] sm:$0xff] }
 0x6c5   : > { %v7516_v11 = vadd.f32 %v13829_v56, %v7446_v3  ;;  %v13837_v3 = vld [vmem:[#allocation147_spill] sm:$0xff]  ;;  %v7794_v56 = vadd.f32 %v12675_v6, %v12624_v8 }
 0x6c6   : > { %v7450_v29 = vadd.f32 %v13828_v20, %v7380_v47  ;;  %v7517_v47 = vadd.f32 %v7494_v39, %v7447_v36  ;;  %v7703_v49 = vsel %vm7699_vm12, %v13837_v3, %v13836_v40  ;;  %v13841_v8 = vld [vmem:[#allocation159_spill] sm:$0xff] }
 0x6c7   : > { %v7586_v24 = vadd.f32 %v7564_v0, %v7516_v11  ;;  %v13838_v11 = vld [vmem:[#allocation8_spill] sm:$0xff]  ;;  %v7773_v6 = vsel %vm7769_vm13, %v13841_v8, %v12677_v10 }
 0x6c8   : > { %v12688_v46 = vpop.permute.xlu1 %7767  ;;  %v7520_v9 = vadd.f32 %v13834_v28, %v7450_v29  ;;  %v7587_v54 = vadd.f32 %v7565_v17, %v7517_v47  ;;  %v13844_v47 = vld [vmem:[#allocation151_spill] sm:$0xff] }
 0x6c9   : > { %v7655_v58 = vadd.f32 %v7633_v32, %v7586_v24 }
 0x6ca   : > { %v7590_v2 = vadd.f32 %v7567_v23, %v7520_v9  ;;  %v7656_v52 = vadd.f32 %v7634_v41, %v7587_v54  ;;  %v13842_v9 = vld [vmem:[#allocation4_spill] sm:$0xff]  ;;  %v7798_v54 = vadd.f32 %v12679_v4, %v12641_v5 }
 0x6cb   : > { %v7725_v51 = vadd.f32 %v7703_v49, %v7655_v58 }
 0x6cc   : > { %v7818_v53 = vpop.permute.xlu1 %7817 }
 0x6cd   : > { %v7840_v43 = vsel %vm7839_vm14, %v13835_v14, %v7818_v53  ;;  %v7841_v62 = vsel %vm7839_vm14, %v7818_v53, %v7820_v7  ;;  %v7704_v53 = vsel %vm7699_vm12, %v13836_v40, %v12618_v15  ;;  %v7793_v15 = vadd.f32 %v7772_v61, %v12627_v34 }
 0x6ce   : > { %v7861_v0 = vadd.f32 %v7840_v43, %v12671_v1  ;;  %v7862_v20 = vadd.f32 %v7841_v62, %v12673_v31  ;;  %v13839_v31 = vld [vmem:[#allocation3_spill] sm:$0xff]  ;;  %v7568_v34 = vsel %vm7560_vm11, %v13830_v63, %v12571_v50  ;;  %v7726_v22 = vadd.f32 %v7704_v53, %v7656_v52  ;;  %v13843_v63 = vld [vmem:[#allocation9_spill] sm:$0xff]  ;;  %v13845_v53 = vld [vmem:[#allocation10_spill] sm:$0xff] }
 0x6cf   : > { %v7636_v37 = vsel %vm7000_vm3, %v13840_v44, %v13839_v31  ;;  %v7795_v43 = vadd.f32 %v7773_v6, %v7725_v51  ;;  %v7706_v40 = vsel %vm7699_vm12, %v13844_v47, %v13843_v63  ;;  %v7637_v3 = vsel %vm7000_vm3, %v13839_v31, %v12597_v42 }
 0x6d0   : > { %v12718_v57 = vpop.permute.xlu1 %7821  ;;  %v7659_v50 = vadd.f32 %v7636_v37, %v7590_v2 }
 0x6d1   : > { %v7842_v18 = vsel %vm7839_vm14, %v7820_v7, %v12718_v57  ;;  %v7774_v7 = vsel %vm7769_vm13, %v12677_v10, %v12683_v35  ;;  %v7864_v32 = vadd.f32 %v12718_v57, %v7794_v56  ;;  %v7521_v57 = vadd.f32 %v7497_v21, %v7451_v45  ;;  %v7898_v45 = vpop.permute.xlu0 %7897  ;;  %v13846_v56 = vld [vmem:[#allocation165_spill] sm:$0xff] }
 0x6d2   : > { %v7863_v39 = vadd.f32 %v7842_v18, %v7793_v15  ;;  %v7796_v62 = vadd.f32 %v7774_v7, %v7726_v22  ;;  %v7707_v21 = vsel %vm7699_vm12, %v13843_v63, %v12644_v12  ;;  %v7776_v5 = vsel %vm7769_vm13, %v13846_v56, %v12681_v19  ;;  %v13848_v22 = vld [vmem:[#allocation11_spill] sm:$0xff] }
 0x6d3   : > { %v7591_v49 = vadd.f32 %v7568_v34, %v7521_v57  ;;  %v7729_v18 = vadd.f32 %v7706_v40, %v7659_v50  ;;  %v7802_v34 = vadd.f32 %v12688_v46, %v12661_v33 }
 0x6d4   : > { %v12724_v13 = vpop.permute.xlu1 %7825 }
 0x6d5   : > { %v7843_v24 = vsel %vm7839_vm14, %v13842_v9, %v12724_v13  ;;  %v7844_v17 = vsel %vm7839_vm14, %v12724_v13, %v12730_v59  ;;  %v7775_v13 = vsel %vm7769_vm13, %v12683_v35, %v12679_v4  ;;  %v7777_v4 = vsel %vm7769_vm13, %v12681_v19, %v12704_v48  ;;  %v7906_v6 = vpop.permute.xlu0 %7905 }
 0x6d6   : > { %v7865_v41 = vadd.f32 %v7843_v24, %v7795_v43  ;;  %v7866_v2 = vadd.f32 %v7844_v17, %v7796_v62  ;;  %v7799_v37 = vadd.f32 %v7776_v5, %v7729_v18  ;;  %v7949_v43 = vld [vmem:[%s12994_s2 + $0x10] sm:$0xff] (!%p8749_p7)  ;;  %v7948_v62 = vld [vmem:[%s12994_s2 + $0x8] sm:$0xff] (!%p8749_p7) }
 0x6d8   : > { %v12732_v16 = vpop.permute.xlu1 %7829 }
 0x6d9   : > { %v7845_v42 = vsel %vm7839_vm14, %v12730_v59, %v12732_v16  ;;  %v7868_v59 = vadd.f32 %v12732_v16, %v7798_v54  ;;  %v7778_v16 = vsel %vm7769_vm13, %v12704_v48, %v12688_v46 }
 0x6da   : > { %v7801_v9 = vadd.f32 %v7778_v16, %v12663_v26  ;;  %v7947_v26 = vld [vmem:[%s12994_s2] sm:$0xff] (!%p8749_p7) }
 0x6dc   : > { %v12742_v55 = vpop.permute.xlu1 %7833 }
 0x6dd   : > { %v7847_v15 = vsel %vm7839_vm14, %v12742_v55, %v12755_v38 }
 0x6e0   : > { %v12771_v27 = vpop.permute.xlu1 %7837 }
 0x6e1   : > { %v7872_v17 = vadd.f32 %v12771_v27, %v7802_v34 }
 0x6e4   : > { %v7888_v29 = vpop.permute.xlu1 %7887 }
 0x6e5   : > { %v7910_v30 = vsel %vm7909_vm15, %v13838_v11, %v7888_v29  ;;  %v7911_v36 = vsel %vm7909_vm15, %v7888_v29, %v7890_v25 }
 0x6e6   : > { %v12804_v23 = vadd.f32 %v7910_v30, %v7861_v0  ;;  %v12806_v1 = vadd.f32 %v7911_v36, %v7862_v20  ;;  %v7660_v0 = vadd.f32 %v7637_v3, %v7591_v49  ;;  %v7797_v20 = vadd.f32 %v7775_v13, %v12646_v60  ;;  %v13847_v60 = vld [vmem:[#allocation6_spill] sm:$0xff] }
 0x6e7   : > { %v7846_v52 = vsel %vm7839_vm14, %v13847_v60, %v12742_v55  ;;  %v7848_v55 = vsel %vm7839_vm14, %v12755_v38, %v12771_v27  ;;  %v10074_v27 = vmov (!%p8749_p7), 0  }
 0x6e8   : > { %v7892_v28 = vpop.permute.xlu1 %7891  ;;  %v7730_v11 = vadd.f32 %v7707_v21, %v7660_v0  ;;  %v7867_v30 = vadd.f32 %v7845_v42, %v7797_v20  ;;  %v7869_v7 = vadd.f32 %v7846_v52, %v7799_v37  ;;  %10015 = vset.pattern.permute.xlu0 (!%p8749_p7), %v10074_v27  ;;  %10016 = vset.pattern.permute.xlu1 (!%p8749_p7), %v10074_v27 }
 0x6e9   : > { %v7912_v10 = vsel %vm7909_vm15, %v7890_v25, %v7892_v28  ;;  %v12828_v14 = vadd.f32 %v7892_v28, %v7864_v32  ;;  %7952 = vperm.xlu0 (!%p8749_p7), %10015, %v7947_v26   ;;  %7962 = vperm.xlu1 (!%p8749_p7), %10016, %v7949_v43  }
 0x6ea   : > { %v12830_v58 = vadd.f32 %v7912_v10, %v7863_v39  ;;  %v7800_v19 = vadd.f32 %v7777_v4, %v7730_v11  ;;  %v7871_v10 = vadd.f32 %v7848_v55, %v7801_v9 }
 0x6ec   : > { %v7896_v61 = vpop.permute.xlu1 %7895  ;;  %v7870_v32 = vadd.f32 %v7847_v15, %v7800_v19 }
 0x6ed   : > { %v7913_v25 = vsel %vm7909_vm15, %v13845_v53, %v7896_v61  ;;  %v7914_v35 = vsel %vm7909_vm15, %v7896_v61, %v7898_v45  ;;  %7957 = vperm.xlu0 (!%p8749_p7), %10015, %v7948_v62  }
 0x6ee   : > { %v12853_v12 = vadd.f32 %v7913_v25, %v7865_v41  ;;  %v12855_v29 = vadd.f32 %v7914_v35, %v7866_v2 }
 0x6f0   : > { %v7900_v36 = vpop.permute.xlu1 %7899 }
 0x6f1   : > { %v7915_v31 = vsel %vm7909_vm15, %v7898_v45, %v7900_v36  ;;  %v12871_v44 = vadd.f32 %v7900_v36, %v7868_v59 }
 0x6f2   : > { %v12873_v8 = vadd.f32 %v7915_v31, %v7867_v30 }
 0x6f4   : > { %v7904_v51 = vpop.permute.xlu1 %7903  ;;  %7946 = sbr.rel (%p8749_p7) target bundleno = 2036 (0x7f4), region = 36 }
 0x6f5   : > { %v7916_v39 = vsel %vm7909_vm15, %v13848_v22, %v7904_v51  ;;  %v7917_v28 = vsel %vm7909_vm15, %v7904_v51, %v7906_v6 }
 0x6f6   : > { %v12887_v24 = vadd.f32 %v7916_v39, %v7869_v7  ;;  %v12889_v48 = vadd.f32 %v7917_v28, %v7870_v32 }
 0x6f8   : > { %v7908_v57 = vpop.permute.xlu1 %7907 }
 0x6f9   : > { %v7918_v33 = vsel %vm7909_vm15, %v7906_v6, %v7908_v57  ;;  %v12893_v46 = vadd.f32 %v7908_v57, %v7872_v17 }
 0x6fa   : > { %v12895_v38 = vadd.f32 %v7918_v33, %v7871_v10 }
 0x768   : > { %v7953_v50 = vpop.permute.xlu0 %7952  ;;  %v7963_v45 = vpop.permute.xlu1 %7962 }
 0x769   : > { %v7966_v63 = vadd.f32 %v7953_v50, %v12806_v1  ;;  %v7965_v47 = vadd.f32 %v7953_v50, %v12804_v23  ;;  %v7968_v40 = vadd.f32 %v7953_v50, %v12828_v14  ;;  %v7967_v3 = vadd.f32 %v7953_v50, %v12830_v58 }
 0x76a   : > { %v7974_v61 = vadd.f32 %v7963_v45, %v12889_v48  ;;  %v7973_v54 = vadd.f32 %v7963_v45, %v12887_v24  ;;  %v7976_v42 = vadd.f32 %v7963_v45, %v12893_v46  ;;  %v7975_v53 = vadd.f32 %v7963_v45, %v12895_v38 }
 0x76b   : > { %7991 = vrot.lane.b32.xlu0 %v7966_v63, %s10075_s10  ;;  %7989 = vrot.lane.b32.xlu1 %v7965_v47, %s10075_s10 }
 0x76c   : > { %v7958_v13 = vpop.permute.xlu0 %7957 }
 0x76d   : > { %v7970_v49 = vadd.f32 %v7958_v13, %v12855_v29  ;;  %v7969_v21 = vadd.f32 %v7958_v13, %v12853_v12  ;;  %v7972_v41 = vadd.f32 %v7958_v13, %v12871_v44  ;;  %v7971_v2 = vadd.f32 %v7958_v13, %v12873_v8 }
 0x76f   : > { %7995 = vrot.lane.b32.xlu0 %v7968_v40, %s10075_s10  ;;  %7993 = vrot.lane.b32.xlu1 %v7967_v3, %s10075_s10 }
 0x773   : > { %7999 = vrot.lane.b32.xlu0 %v7970_v49, %s10075_s10  ;;  %7997 = vrot.lane.b32.xlu1 %v7969_v21, %s10075_s10 }
 0x777   : > { %8003 = vrot.lane.b32.xlu0 %v7972_v41, %s10075_s10  ;;  %8001 = vrot.lane.b32.xlu1 %v7971_v2, %s10075_s10 }
 0x77b   : > { %8007 = vrot.lane.b32.xlu0 %v7974_v61, %s10075_s10  ;;  %8005 = vrot.lane.b32.xlu1 %v7973_v54, %s10075_s10 }
 0x77f   : > { %8011 = vrot.lane.b32.xlu0 %v7976_v42, %s10075_s10  ;;  %8009 = vrot.lane.b32.xlu1 %v7975_v53, %s10075_s10 }
 0x7dd   : > { %v7990_v25 = vpop.permute.xlu1 %7989  ;;  %v7992_v35 = vpop.permute.xlu0 %7991 }
 0x7de   : > { %v8014_v0 = vsel %vm8013_vm0, %v7990_v25, %v7992_v35 }
 0x7df   : > { %8032 = vst [vmem:[%s10151_s4] sm:$0xff] %v8014_v0 }
 0x7e1   : > { %v7994_v20 = vpop.permute.xlu1 %7993  ;;  %v7996_v56 = vpop.permute.xlu0 %7995 }
 0x7e2   : > { %v8015_v5 = vsel %vm8013_vm0, %v7992_v35, %v7994_v20  ;;  %v8016_v4 = vsel %vm8013_vm0, %v7994_v20, %v7996_v56 }
 0x7e3   : > { %8033 = vst [vmem:[%s10151_s4 + $0x8] sm:$0xff] %v8015_v5  ;;  %8034 = vst [vmem:[%s10151_s4 + $0x10] sm:$0xff] %v8016_v4 }
 0x7e5   : > { %v7998_v59 = vpop.permute.xlu1 %7997  ;;  %v8000_v18 = vpop.permute.xlu0 %7999 }
 0x7e6   : > { %v8017_v11 = vsel %vm8013_vm0, %v7998_v59, %v8000_v18 }
 0x7e7   : > { %8035 = vst [vmem:[%s10151_s4 + $0x18] sm:$0xff] %v8017_v11 }
 0x7e9   : > { %v8002_v30 = vpop.permute.xlu1 %8001  ;;  %v8004_v36 = vpop.permute.xlu0 %8003 }
 0x7ea   : > { %v8018_v60 = vsel %vm8013_vm0, %v8000_v18, %v8002_v30  ;;  %v8019_v52 = vsel %vm8013_vm0, %v8002_v30, %v8004_v36 }
 0x7eb   : > { %8036 = vst [vmem:[%s10151_s4 + $0x20] sm:$0xff] %v8018_v60  ;;  %8037 = vst [vmem:[%s10151_s4 + $0x28] sm:$0xff] %v8019_v52 }
 0x7ed   : > { %v8006_v15 = vpop.permute.xlu1 %8005  ;;  %v8008_v31 = vpop.permute.xlu0 %8007 }
 0x7ee   : > { %v8020_v37 = vsel %vm8013_vm0, %v8006_v15, %v8008_v31 }
 0x7ef   : > { %8038 = vst [vmem:[%s10151_s4 + $0x30] sm:$0xff] %v8020_v37 }
 0x7f1   : > { %v8010_v19 = vpop.permute.xlu1 %8009  ;;  %v8012_v16 = vpop.permute.xlu0 %8011 }
 0x7f2   : > { %v8021_v6 = vsel %vm8013_vm0, %v8008_v31, %v8010_v19  ;;  %v8022_v7 = vsel %vm8013_vm0, %v8010_v19, %v8012_v16 }
 0x7f3   : > { %8039 = vst [vmem:[%s10151_s4 + $0x38] sm:$0xff] %v8021_v6  ;;  %8040 = vst [vmem:[%s10151_s4 + $0x40] sm:$0xff] %v8022_v7 }
 0x7f4 PF: > { %p8750_p8 = scmp.le.s32.totalorder %s10039_s12, 0 }
 0x7f5   : > { %s10076_s11 = smov (!%p8750_p8), 58   ;;  %vm8090_vm1 = vcmask (!%p8750_p8), 474112   ;;  %v8048_v39 = vld [vmem:[%s10151_s4 + $0x18] sm:$0xff] (!%p8750_p8)  ;;  %v8049_v17 = vld [vmem:[%s10151_s4 + $0x20] sm:$0xff] (!%p8750_p8)  ;;  %v8050_v10 = vld [vmem:[%s10151_s4 + $0x28] sm:$0xff] (!%p8750_p8) }
 0x7f6   : > { %8044 = sbr.rel (%p8750_p8) target bundleno = 2177 (0x881), region = 40  ;;  %8070 = vrot.lane.b32.xlu1 (!%p8750_p8), %v12830_v58, %s10076_s11  ;;  %8066 = vrot.lane.b32.xlu0 (!%p8750_p8), %v12804_v23, %s10076_s11  ;;  %v8045_v58 = vld [vmem:[%s10151_s4] sm:$0xff] (!%p8750_p8)  ;;  %v8051_v27 = vld [vmem:[%s10151_s4 + $0x30] sm:$0xff] (!%p8750_p8) }
 0x7fa   : > { %8072 = vrot.lane.b32.xlu1 (!%p8750_p8), %v12828_v14, %s10076_s11  ;;  %8068 = vrot.lane.b32.xlu0 (!%p8750_p8), %v12806_v1, %s10076_s11  ;;  %v8047_v14 = vld [vmem:[%s10151_s4 + $0x10] sm:$0xff] (!%p8750_p8)  ;;  %v8052_v40 = vld [vmem:[%s10151_s4 + $0x38] sm:$0xff] (!%p8750_p8) }
 0x7fb   : > { %v8053_v3 = vld [vmem:[%s10151_s4 + $0x40] sm:$0xff] (!%p8750_p8) }
 0x7fe   : > { %8076 = vrot.lane.b32.xlu1 %v12855_v29, %s10076_s11  ;;  %8074 = vrot.lane.b32.xlu0 %v12853_v12, %s10076_s11  ;;  %v8046_v12 = vld [vmem:[%s10151_s4 + $0x8] sm:$0xff] }
 0x802   : > { %8080 = vrot.lane.b32.xlu1 %v12871_v44, %s10076_s11  ;;  %8078 = vrot.lane.b32.xlu0 %v12873_v8, %s10076_s11 }
 0x806   : > { %8084 = vrot.lane.b32.xlu1 %v12889_v48, %s10076_s11  ;;  %8082 = vrot.lane.b32.xlu0 %v12887_v24, %s10076_s11 }
 0x80a   : > { %8088 = vrot.lane.b32.xlu1 %v12893_v46, %s10076_s11  ;;  %8086 = vrot.lane.b32.xlu0 %v12895_v38, %s10076_s11 }
 0x868   : > { %v8071_v23 = vpop.permute.xlu1 %8070  ;;  %v8067_v1 = vpop.permute.xlu0 %8066 }
 0x86c   : > { %v8073_v29 = vpop.permute.xlu1 %8072  ;;  %v8069_v44 = vpop.permute.xlu0 %8068 }
 0x86d   : > { %v8093_v8 = vsel %vm8090_vm1, %v8071_v23, %v8073_v29  ;;  %v8091_v32 = vsel %vm8090_vm1, %v8067_v1, %v8069_v44  ;;  %v8092_v51 = vsel %vm8090_vm1, %v8069_v44, %v8071_v23 }
 0x86e   : > { %v8111_v34 = vadd.f32 %v8093_v8, %v8047_v14  ;;  %v8109_v55 = vadd.f32 %v8091_v32, %v8045_v58  ;;  %v8110_v22 = vadd.f32 %v8092_v51, %v8046_v12 }
 0x870   : > { %8120 = vst [vmem:[%s10151_s4 + $0x10] sm:$0xff] %v8111_v34  ;;  %8118 = vst [vmem:[%s10151_s4] sm:$0xff] %v8109_v55  ;;  %v8077_v28 = vpop.permute.xlu1 %8076  ;;  %v8075_v9 = vpop.permute.xlu0 %8074 }
 0x871   : > { %8119 = vst [vmem:[%s10151_s4 + $0x8] sm:$0xff] %v8110_v22  ;;  %v8094_v24 = vsel %vm8090_vm1, %v8075_v9, %v8077_v28 }
 0x872   : > { %v8112_v48 = vadd.f32 %v8094_v24, %v8048_v39 }
 0x874   : > { %8121 = vst [vmem:[%s10151_s4 + $0x18] sm:$0xff] %v8112_v48  ;;  %v8081_v57 = vpop.permute.xlu1 %8080  ;;  %v8079_v33 = vpop.permute.xlu0 %8078 }
 0x875   : > { %v8095_v46 = vsel %vm8090_vm1, %v8077_v28, %v8079_v33  ;;  %v8096_v38 = vsel %vm8090_vm1, %v8079_v33, %v8081_v57 }
 0x876   : > { %v8113_v26 = vadd.f32 %v8095_v46, %v8049_v17  ;;  %v8114_v43 = vadd.f32 %v8096_v38, %v8050_v10 }
 0x878   : > { %8122 = vst [vmem:[%s10151_s4 + $0x20] sm:$0xff] %v8113_v26  ;;  %8123 = vst [vmem:[%s10151_s4 + $0x28] sm:$0xff] %v8114_v43  ;;  %v8085_v62 = vpop.permute.xlu1 %8084  ;;  %v8083_v50 = vpop.permute.xlu0 %8082 }
 0x879   : > { %v8097_v63 = vsel %vm8090_vm1, %v8083_v50, %v8085_v62 }
 0x87a   : > { %v8115_v47 = vadd.f32 %v8097_v63, %v8051_v27 }
 0x87c   : > { %8124 = vst [vmem:[%s10151_s4 + $0x30] sm:$0xff] %v8115_v47  ;;  %v8089_v13 = vpop.permute.xlu1 %8088  ;;  %v8087_v49 = vpop.permute.xlu0 %8086 }
 0x87d   : > { %v8098_v21 = vsel %vm8090_vm1, %v8085_v62, %v8087_v49  ;;  %v8099_v45 = vsel %vm8090_vm1, %v8087_v49, %v8089_v13 }
 0x87e   : > { %v8116_v41 = vadd.f32 %v8098_v21, %v8052_v40  ;;  %v8117_v2 = vadd.f32 %v8099_v45, %v8053_v3 }
 0x880   : > { %8125 = vst [vmem:[%s10151_s4 + $0x38] sm:$0xff] %v8116_v41  ;;  %8126 = vst [vmem:[%s10151_s4 + $0x40] sm:$0xff] %v8117_v2 }
 0x881 PF: > { %s13_s16 = sadd.s32 1, %s10055_s16   ;;  %s13849_s12 = smov %s10047_s14 }
 0x882   : > { %p10_p9 = scmp.ge.s32.totalorder %s13_s16, 6   ;;  %s13850_s13 = smov %s10051_s15 }
 0x883   : > { %s13851_s14 = smov %s13854_s17  ;;  %s13852_s15 = smov %s13858_s18 }
 0x884   :  { %12 = sbr.rel (!%p10_p9) target bundleno = 3 (0x3), region = 71 }

</bundles_post_ra>
